<compile_context>
chip_gen: v7x
topology: tpu7x:2x2x1
jax: 0.10.0
libtpu: 0.0.40
codegen_flags: <defaults>
</compile_context>

<pallas_src>
import jax
import jax.numpy as jnp
from jax.experimental import pallas as pl
from jax.experimental.pallas import tpu as pltpu


def _pointnet_kernel(x_ref, w1_ref, b1_ref, w2_ref, b2_ref,
                     w3_ref, b3_ref, w4_ref, b4_ref, out_ref):
    BB, N, D_in = x_ref.shape
    M = BB * N

    # Flatten (BB, N, D_in) -> (BB*N, D_in).  N is a multiple of 8 in the
    # intended configuration, so this is layout-free.
    x2d = x_ref[...].reshape(M, D_in)

    # ---- point_mlp layer 1:  Linear(D_in -> 64) + ReLU  ------------------
    # K = D_in is tiny (2), so use VPU broadcast FMAs instead of the MXU.
    w1 = w1_ref[...]                                   # (D_in, 64)
    acc = x2d[:, 0:1] * w1[0:1, :]                     # (M, 64)
    for d in range(1, D_in):                           # static unroll
        acc = acc + x2d[:, d:d + 1] * w1[d:d + 1, :]
    h1 = jnp.maximum(acc + b1_ref[...], 0.0)           # (M, 64)

    # ---- point_mlp layer 2:  Linear(64 -> emb) + ReLU  (MXU) -------------
    h2 = jnp.dot(h1, w2_ref[...], preferred_element_type=jnp.float32)
    h2 = jnp.maximum(h2 + b2_ref[...], 0.0)            # (M, emb)

    # ---- torch.max(feat, dim=1)[0]  -> max over the points axis ----------
    emb = h2.shape[-1]
    g = jnp.max(h2.reshape(BB, N, emb), axis=1)        # (BB, emb)

    # ---- regressor layer 1:  Linear(emb -> 64) + ReLU  (MXU, batched) ----
    h3 = jnp.dot(g, w3_ref[...], preferred_element_type=jnp.float32)
    h3 = jnp.maximum(h3 + b3_ref[...], 0.0)            # (BB, 64)

    # ---- regressor layer 2:  Linear(64 -> 1)  as a VPU reduce ------------
    # Transpose once (XLU) so the per-batch scalars land on lanes, then the
    # (1, BB) result is stored in a single lane-dense write.
    h3t = h3.T                                         # (64, BB)
    o_row = jnp.sum(h3t * w4_ref[...], axis=0, keepdims=True)   # (1, BB)
    o_row = o_row + b4_ref[...]                        # (1, BB)
    out_ref[...] = o_row.reshape(1, 1, BB)


def pointnet_regressor(x, params, block_b=128):
    """x: (B, N, input_dim) float32. Returns (B,) float32."""
    B, N, D_in = x.shape
    w1, b1, w2, b2, w3, b3, w4, b4 = params

    BB = block_b                       # batch tile; 128 -> lane-dense output row
    G = pl.cdiv(B, BB)                 # grid steps (>=2 steps feed both v7x TCs)
    B_pad = G * BB
    if B_pad != B:
        # Zero-pad the batch; padded outputs are finite and sliced off below.
        x = jnp.pad(x, ((0, B_pad - B), (0, 0), (0, 0)))

    full2d = lambda g: (0, 0)          # weights/biases: one resident full block

    out = pl.pallas_call(
        _pointnet_kernel,
        out_shape=jax.ShapeDtypeStruct((G, 1, BB), jnp.float32),
        grid_spec=pltpu.PrefetchScalarGridSpec(
            num_scalar_prefetch=0,
            grid=(G,),
            in_specs=[
                pl.BlockSpec((BB, N, D_in), lambda g: (g, 0, 0)),   # x tile
                pl.BlockSpec(w1.shape, full2d),
                pl.BlockSpec(b1.shape, full2d),
                pl.BlockSpec(w2.shape, full2d),
                pl.BlockSpec(b2.shape, full2d),
                pl.BlockSpec(w3.shape, full2d),
                pl.BlockSpec(b3.shape, full2d),
                pl.BlockSpec(w4.shape, full2d),
                pl.BlockSpec(b4.shape, full2d),
            ],
            out_specs=pl.BlockSpec((1, 1, BB), lambda g: (g, 0, 0)),
        ),
        compiler_params=pltpu.CompilerParams(
            dimension_semantics=("parallel",)),
    )(x, w1, b1, w2, b2, w3, b3, w4, b4)

    return out.reshape(B_pad)[:B]      # squeeze(1) -> (B,)


def init_params(key, input_dim=2, emb_dim=64):
    """Deterministic init mimicking nn.Linear defaults (U[-1/sqrt(fan_in), ...]).
    Weights are stored as (in, out) — i.e. already transposed vs. PyTorch."""
    def linear(k, fan_in, fan_out):
        kw, kb = jax.random.split(k)
        bound = 1.0 / jnp.sqrt(fan_in)
        w = jax.random.uniform(kw, (fan_in, fan_out), jnp.float32, -bound, bound)
        b = jax.random.uniform(kb, (1, fan_out), jnp.float32, -bound, bound)
        return w, b

    k1, k2, k3, k4 = jax.random.split(key, 4)
    w1, b1 = linear(k1, input_dim, 64)      # point_mlp[0]
    w2, b2 = linear(k2, 64, emb_dim)        # point_mlp[2]
    w3, b3 = linear(k3, emb_dim, 64)        # regressor[0]
    w4, b4 = linear(k4, 64, 1)              # regressor[2]
    return (w1, b1, w2, b2, w3, b3, w4, b4)


def reference_forward(x, params):
    """Pure-JAX reference of the PyTorch forward (for sanity check)."""
    w1, b1, w2, b2, w3, b3, w4, b4 = params
    feat = jnp.maximum(x @ w1 + b1, 0.0)
    feat = jnp.maximum(feat @ w2 + b2, 0.0)
    g = jnp.max(feat, axis=1)
    h = jnp.maximum(g @ w3 + b3[0], 0.0)
    out = h @ w4 + b4[0]
    return out[:, 0]


if __name__ == "__main__":
    key = jax.random.PRNGKey(0)
    kx, kp = jax.random.split(key)

    B, N, INPUT_DIM, EMB_DIM = 2, 16, 2, 64
    x = jax.random.normal(kx, (B, N, INPUT_DIM), dtype=jnp.float32)
    params = init_params(kp, input_dim=INPUT_DIM, emb_dim=EMB_DIM)

    out = pointnet_regressor(x, params)
    out = jax.block_until_ready(out)

    ref = reference_forward(x, params)
    assert out.shape == (B,)
    assert jnp.allclose(out, ref, atol=1e-5, rtol=1e-5), (out, ref)

    print("KERNEL_OK")
</pallas_src>

<mosaic_0001>
module attributes {stable_mosaic.version = 11 : i64} {
  func.func @_pointnet_kernel(%arg0: i32, %arg1: memref<128x16x2xf32, #tpu.memory_space<vmem>>, %arg2: memref<2x64xf32, #tpu.memory_space<vmem>>, %arg3: memref<1x64xf32, #tpu.memory_space<vmem>>, %arg4: memref<64x64xf32, #tpu.memory_space<vmem>>, %arg5: memref<1x64xf32, #tpu.memory_space<vmem>>, %arg6: memref<64x64xf32, #tpu.memory_space<vmem>>, %arg7: memref<1x64xf32, #tpu.memory_space<vmem>>, %arg8: memref<64x1xf32, #tpu.memory_space<vmem>>, %arg9: memref<1x1xf32, #tpu.memory_space<vmem>>, %arg10: memref<1x1x128xf32, #tpu.memory_space<vmem>>) attributes {dimension_semantics = [#tpu.dimension_semantics<parallel>], iteration_bounds = array<i64: 1>, scalar_prefetch = 0 : i64, scratch_operands = 0 : i64, tpu.core_type = #tpu.core_type<tc>, window_params = [{transform_indices = @transform_0, window_bounds = array<i64: 128, 16, 2>}, {pipeline_mode = #tpu.pipeline_mode<synchronous>, transform_indices = @transform_1, window_bounds = array<i64: 2, 64>}, {pipeline_mode = #tpu.pipeline_mode<synchronous>, transform_indices = @transform_2, window_bounds = array<i64: 1, 64>}, {pipeline_mode = #tpu.pipeline_mode<synchronous>, transform_indices = @transform_3, window_bounds = array<i64: 64, 64>}, {pipeline_mode = #tpu.pipeline_mode<synchronous>, transform_indices = @transform_4, window_bounds = array<i64: 1, 64>}, {pipeline_mode = #tpu.pipeline_mode<synchronous>, transform_indices = @transform_5, window_bounds = array<i64: 64, 64>}, {pipeline_mode = #tpu.pipeline_mode<synchronous>, transform_indices = @transform_6, window_bounds = array<i64: 1, 64>}, {pipeline_mode = #tpu.pipeline_mode<synchronous>, transform_indices = @transform_7, window_bounds = array<i64: 64, 1>}, {pipeline_mode = #tpu.pipeline_mode<synchronous>, transform_indices = @transform_8, window_bounds = array<i64: 1, 1>}, {transform_indices = @transform_9, window_bounds = array<i64: 1, 1, 128>}]} {
    %c0 = arith.constant 0 : index
    %c0_0 = arith.constant 0 : index
    %c0_1 = arith.constant 0 : index
    %0 = vector.load %arg1[%c0, %c0_0, %c0_1] : memref<128x16x2xf32, #tpu.memory_space<vmem>>, vector<128x16x2xf32>
    %1 = vector.shape_cast %0 : vector<128x16x2xf32> to vector<2048x2xf32>
    %c0_2 = arith.constant 0 : index
    %c0_3 = arith.constant 0 : index
    %2 = vector.load %arg2[%c0_2, %c0_3] : memref<2x64xf32, #tpu.memory_space<vmem>>, vector<2x64xf32>
    %3 = vector.extract_strided_slice %1 {offsets = [0, 0], sizes = [2048, 1], strides = [1, 1]} : vector<2048x2xf32> to vector<2048x1xf32>
    %4 = vector.extract_strided_slice %2 {offsets = [0, 0], sizes = [1, 64], strides = [1, 1]} : vector<2x64xf32> to vector<1x64xf32>
    %5 = vector.broadcast %3 : vector<2048x1xf32> to vector<2048x64xf32>
    %6 = vector.broadcast %4 : vector<1x64xf32> to vector<2048x64xf32>
    %7 = arith.mulf %5, %6 : vector<2048x64xf32>
    %8 = vector.extract_strided_slice %1 {offsets = [0, 1], sizes = [2048, 1], strides = [1, 1]} : vector<2048x2xf32> to vector<2048x1xf32>
    %9 = vector.extract_strided_slice %2 {offsets = [1, 0], sizes = [1, 64], strides = [1, 1]} : vector<2x64xf32> to vector<1x64xf32>
    %10 = vector.broadcast %8 : vector<2048x1xf32> to vector<2048x64xf32>
    %11 = vector.broadcast %9 : vector<1x64xf32> to vector<2048x64xf32>
    %12 = arith.mulf %10, %11 : vector<2048x64xf32>
    %13 = arith.addf %7, %12 : vector<2048x64xf32>
    %c0_4 = arith.constant 0 : index
    %c0_5 = arith.constant 0 : index
    %14 = vector.load %arg3[%c0_4, %c0_5] : memref<1x64xf32, #tpu.memory_space<vmem>>, vector<1x64xf32>
    %15 = vector.broadcast %14 : vector<1x64xf32> to vector<2048x64xf32>
    %16 = arith.addf %13, %15 : vector<2048x64xf32>
    %cst = arith.constant 0.000000e+00 : f32
    %17 = vector.broadcast %cst : f32 to vector<2048x64xf32>
    %18 = arith.maximumf %16, %17 : vector<2048x64xf32>
    %c0_6 = arith.constant 0 : index
    %c0_7 = arith.constant 0 : index
    %19 = vector.load %arg4[%c0_6, %c0_7] : memref<64x64xf32, #tpu.memory_space<vmem>>, vector<64x64xf32>
    %cst_8 = arith.constant dense<0.000000e+00> : vector<2048x64xf32>
    %20 = tpu.matmul %18, %19, %cst_8 {dimension_numbers = #tpu.dot_dimension_numbers<[1], [0], [0], [1], [0, 0, 1, 1], [], []>} : vector<2048x64xf32>, vector<64x64xf32>, vector<2048x64xf32> -> vector<2048x64xf32>
    %c0_9 = arith.constant 0 : index
    %c0_10 = arith.constant 0 : index
    %21 = vector.load %arg5[%c0_9, %c0_10] : memref<1x64xf32, #tpu.memory_space<vmem>>, vector<1x64xf32>
    %22 = vector.broadcast %21 : vector<1x64xf32> to vector<2048x64xf32>
    %23 = arith.addf %20, %22 : vector<2048x64xf32>
    %cst_11 = arith.constant 0.000000e+00 : f32
    %24 = vector.broadcast %cst_11 : f32 to vector<2048x64xf32>
    %25 = arith.maximumf %23, %24 : vector<2048x64xf32>
    %26 = vector.shape_cast %25 : vector<2048x64xf32> to vector<128x16x64xf32>
    %cst_12 = arith.constant dense<0xFF800000> : vector<128x64xf32>
    %27 = vector.multi_reduction <maximumf>, %26, %cst_12 [1] : vector<128x16x64xf32> to vector<128x64xf32>
    %c0_13 = arith.constant 0 : index
    %c0_14 = arith.constant 0 : index
    %28 = vector.load %arg6[%c0_13, %c0_14] : memref<64x64xf32, #tpu.memory_space<vmem>>, vector<64x64xf32>
    %cst_15 = arith.constant dense<0.000000e+00> : vector<128x64xf32>
    %29 = tpu.matmul %27, %28, %cst_15 {dimension_numbers = #tpu.dot_dimension_numbers<[1], [0], [0], [1], [0, 0, 1, 1], [], []>} : vector<128x64xf32>, vector<64x64xf32>, vector<128x64xf32> -> vector<128x64xf32>
    %c0_16 = arith.constant 0 : index
    %c0_17 = arith.constant 0 : index
    %30 = vector.load %arg7[%c0_16, %c0_17] : memref<1x64xf32, #tpu.memory_space<vmem>>, vector<1x64xf32>
    %31 = vector.broadcast %30 : vector<1x64xf32> to vector<128x64xf32>
    %32 = arith.addf %29, %31 : vector<128x64xf32>
    %cst_18 = arith.constant 0.000000e+00 : f32
    %33 = vector.broadcast %cst_18 : f32 to vector<128x64xf32>
    %34 = arith.maximumf %32, %33 : vector<128x64xf32>
    %35 = tpu.transpose %34, [1, 0] : vector<128x64xf32> -> vector<64x128xf32>
    %c0_19 = arith.constant 0 : index
    %c0_20 = arith.constant 0 : index
    %36 = vector.load %arg8[%c0_19, %c0_20] : memref<64x1xf32, #tpu.memory_space<vmem>>, vector<64x1xf32>
    %37 = vector.broadcast %36 : vector<64x1xf32> to vector<64x128xf32>
    %38 = arith.mulf %35, %37 : vector<64x128xf32>
    %cst_21 = arith.constant dense<0.000000e+00> : vector<128xf32>
    %39 = vector.multi_reduction <add>, %38, %cst_21 [0] : vector<64x128xf32> to vector<128xf32>
    %40 = vector.shape_cast %39 : vector<128xf32> to vector<1x128xf32>
    %c0_22 = arith.constant 0 : index
    %c0_23 = arith.constant 0 : index
    %41 = vector.load %arg9[%c0_22, %c0_23] : memref<1x1xf32, #tpu.memory_space<vmem>>, vector<1x1xf32>
    %42 = vector.broadcast %41 : vector<1x1xf32> to vector<1x128xf32>
    %43 = arith.addf %40, %42 : vector<1x128xf32>
    %44 = vector.shape_cast %43 : vector<1x128xf32> to vector<1x1x128xf32>
    %c0_24 = arith.constant 0 : index
    %c0_25 = arith.constant 0 : index
    %c0_26 = arith.constant 0 : index
    %45 = vector.load %arg10[%c0_24, %c0_25, %c0_26] : memref<1x1x128xf32, #tpu.memory_space<vmem>>, vector<1x1x128xf32>
    tpu.vector_store %arg10[%c0_24, %c0_25, %c0_26], %44 {strides = array<i32>} : memref<1x1x128xf32, #tpu.memory_space<vmem>>, vector<1x1x128xf32>,
    return
  }
  func.func @transform_0(%arg0: i32) -> (i32, i32, i32) {
    %c0_i32 = arith.constant 0 : i32
    %c0_i32_0 = arith.constant 0 : i32
    %c0_i32_1 = arith.constant 0 : i32
    return %arg0, %c0_i32, %c0_i32_0 : i32, i32, i32
  }
  func.func @transform_1(%arg0: i32) -> (i32, i32) {
    %c0_i32 = arith.constant 0 : i32
    %c0_i32_0 = arith.constant 0 : i32
    %c0_i32_1 = arith.constant 0 : i32
    return %c0_i32, %c0_i32_0 : i32, i32
  }
  func.func @transform_2(%arg0: i32) -> (i32, i32) {
    %c0_i32 = arith.constant 0 : i32
    %c0_i32_0 = arith.constant 0 : i32
    %c0_i32_1 = arith.constant 0 : i32
    return %c0_i32, %c0_i32_0 : i32, i32
  }
  func.func @transform_3(%arg0: i32) -> (i32, i32) {
    %c0_i32 = arith.constant 0 : i32
    %c0_i32_0 = arith.constant 0 : i32
    %c0_i32_1 = arith.constant 0 : i32
    return %c0_i32, %c0_i32_0 : i32, i32
  }
  func.func @transform_4(%arg0: i32) -> (i32, i32) {
    %c0_i32 = arith.constant 0 : i32
    %c0_i32_0 = arith.constant 0 : i32
    %c0_i32_1 = arith.constant 0 : i32
    return %c0_i32, %c0_i32_0 : i32, i32
  }
  func.func @transform_5(%arg0: i32) -> (i32, i32) {
    %c0_i32 = arith.constant 0 : i32
    %c0_i32_0 = arith.constant 0 : i32
    %c0_i32_1 = arith.constant 0 : i32
    return %c0_i32, %c0_i32_0 : i32, i32
  }
  func.func @transform_6(%arg0: i32) -> (i32, i32) {
    %c0_i32 = arith.constant 0 : i32
    %c0_i32_0 = arith.constant 0 : i32
    %c0_i32_1 = arith.constant 0 : i32
    return %c0_i32, %c0_i32_0 : i32, i32
  }
  func.func @transform_7(%arg0: i32) -> (i32, i32) {
    %c0_i32 = arith.constant 0 : i32
    %c0_i32_0 = arith.constant 0 : i32
    %c0_i32_1 = arith.constant 0 : i32
    return %c0_i32, %c0_i32_0 : i32, i32
  }
  func.func @transform_8(%arg0: i32) -> (i32, i32) {
    %c0_i32 = arith.constant 0 : i32
    %c0_i32_0 = arith.constant 0 : i32
    %c0_i32_1 = arith.constant 0 : i32
    return %c0_i32, %c0_i32_0 : i32, i32
  }
  func.func @transform_9(%arg0: i32) -> (i32, i32, i32) {
    %c0_i32 = arith.constant 0 : i32
    %c0_i32_0 = arith.constant 0 : i32
    %c0_i32_1 = arith.constant 0 : i32
    return %arg0, %c0_i32, %c0_i32_0 : i32, i32, i32
  }
}

</mosaic_0001>

<bundles_post_ra>
// kernel: tpu_custom_call.1
= control target key start
LH: loop header
LB: loop body
LE: loop exit
PB: predicated region body
PF: predicated region fallthrough
CT: control target
= control target key end

     0   :  { %s15422_s0 = inlined_call_operand.vmem [shape: f32[128,16,2], index: 0, kind: input, shape index: {}]   ;;  %s15423_s1 = inlined_call_operand.vmem [shape: f32[2,64], index: 1, kind: input, shape index: {}]   ;;  %s15424_s2 = inlined_call_operand.vmem [shape: f32[1,64], index: 2, kind: input, shape index: {}]   ;;  %s15425_s3 = inlined_call_operand.vmem [shape: f32[64,64], index: 3, kind: input, shape index: {}]   ;;  %s15426_s4 = inlined_call_operand.vmem [shape: f32[1,64], index: 4, kind: input, shape index: {}]   ;;  %s15427_s5 = inlined_call_operand.vmem [shape: f32[64,64], index: 5, kind: input, shape index: {}]   ;;  %s15428_s6 = inlined_call_operand.vmem [shape: f32[1,64], index: 6, kind: input, shape index: {}]   ;;  %s15429_s7 = inlined_call_operand.vmem [shape: f32[64,1], index: 7, kind: input, shape index: {}]   ;;  %s15430_s8 = inlined_call_operand.<no memory space> [shape: f32[1,1], index: 8, kind: input, shape index: {}]   ;;  %s15431_s9 = inlined_call_operand.hbm [shape: f32[1,1,128], index: 9, kind: output, shape index: {}]  }
   0x1   :  { %v14_v0 = vstv %s15430_s8 }
   0x2   :  { %15 = vst [vmem:[#allocation2] sm:$0x1] %v14_v0 }
   0x3   :  { %v37_v1 = vld [vmem:[%s15422_s0 + $0x10] sm:$0xff]  ;;  %v35_v2 = vld [vmem:[%s15422_s0] sm:$0xff]  ;;  %v15432_v3 = vmov 0   ;;  %v38_v4 = vld [vmem:[%s15422_s0 + $0x18] sm:$0xff] }
   0x4   :  { %9057 = vset.pattern.permute.xlu1 %v15432_v3  ;;  %9056 = vset.pattern.permute.xlu0 %v15432_v3  ;;  %v36_v5 = vld [vmem:[%s15422_s0 + $0x8] sm:$0xff]  ;;  %v39_v7 = vld [vmem:[%s15422_s0 + $0x20] sm:$0xff]  ;;  %v42_v8 = vld [vmem:[%s15422_s0 + $0x38] sm:$0xff] }
   0x5   :  { %304 = vperm.xlu1 %9057, %v37_v1   ;;  %294 = vperm.xlu0 %9056, %v35_v2   ;;  %v40_v6 = vld [vmem:[%s15422_s0 + $0x28] sm:$0xff]  ;;  %v41_v9 = vld [vmem:[%s15422_s0 + $0x30] sm:$0xff]  ;;  %v43_v11 = vld [vmem:[%s15422_s0 + $0x40] sm:$0xff] }
   0x6   :  { %v44_v10 = vld [vmem:[%s15422_s0 + $0x48] sm:$0xff]  ;;  %v46_v12 = vld [vmem:[%s15422_s0 + $0x58] sm:$0xff]  ;;  %v45_v13 = vld [vmem:[%s15422_s0 + $0x50] sm:$0xff] }
   0x7   :  { %v48_v14 = vld [vmem:[%s15422_s0 + $0x68] sm:$0xff]  ;;  %v47_v15 = vld [vmem:[%s15422_s0 + $0x60] sm:$0xff] }
   0x9   :  { %309 = vperm.xlu1 %9057, %v38_v4   ;;  %299 = vperm.xlu0 %9056, %v36_v5  }
   0xd   :  { %319 = vperm.xlu1 %9057, %v40_v6   ;;  %314 = vperm.xlu0 %9056, %v39_v7  }
  0x11   :  { %329 = vperm.xlu1 %9057, %v42_v8   ;;  %324 = vperm.xlu0 %9056, %v41_v9  }
  0x15   :  { %339 = vperm.xlu1 %9057, %v44_v10   ;;  %334 = vperm.xlu0 %9056, %v43_v11  }
  0x19   :  { %349 = vperm.xlu1 %9057, %v46_v12   ;;  %344 = vperm.xlu0 %9056, %v45_v13  }
  0x1d   :  { %359 = vperm.xlu1 %9057, %v48_v14   ;;  %354 = vperm.xlu0 %9056, %v47_v15  }
  0x1e   :  { %16 = vsyncpa [#allocation4], 0  ;;  %v50_v16 = vld [vmem:[%s15422_s0 + $0x78] sm:$0xff]  ;;  %v49_v17 = vld [vmem:[%s15422_s0 + $0x70] sm:$0xff]  ;;  %vm3906_vm0 = vcmask 523264   ;;  %vm7571_vm1 = vcmask 1041409  }
  0x1f   :  { %v52_v18 = vld [vmem:[%s15422_s0 + $0x88] sm:$0xff]  ;;  %v51_v19 = vld [vmem:[%s15422_s0 + $0x80] sm:$0xff]  ;;  %v54_v20 = vld [vmem:[%s15422_s0 + $0x98] sm:$0xff]  ;;  %vm7573_vm2 = vcmask 1042434   ;;  %vm7575_vm3 = vcmask 1043459   ;;  %vm7577_vm4 = vcmask 1044484  }
  0x20   :  { %v53_v21 = vld [vmem:[%s15422_s0 + $0x90] sm:$0xff]  ;;  %v56_v22 = vld [vmem:[%s15422_s0 + $0xa8] sm:$0xff]  ;;  %v55_v23 = vld [vmem:[%s15422_s0 + $0xa0] sm:$0xff]  ;;  %vm7579_vm5 = vcmask 1045509   ;;  %vm7581_vm6 = vcmask 1046534   ;;  %vm7583_vm7 = vcmask 1047559  }
  0x21   :  { %369 = vperm.xlu1 %9057, %v50_v16   ;;  %364 = vperm.xlu0 %9056, %v49_v17   ;;  %v58_v24 = vld [vmem:[%s15422_s0 + $0xb8] sm:$0xff]  ;;  %v57_v25 = vld [vmem:[%s15422_s0 + $0xb0] sm:$0xff]  ;;  %v60_v26 = vld [vmem:[%s15422_s0 + $0xc8] sm:$0xff] }
  0x22   :  { %v59_v27 = vld [vmem:[%s15422_s0 + $0xc0] sm:$0xff]  ;;  %v62_v28 = vld [vmem:[%s15422_s0 + $0xd8] sm:$0xff]  ;;  %v61_v29 = vld [vmem:[%s15422_s0 + $0xd0] sm:$0xff] }
  0x23   :  { %v64_v30 = vld [vmem:[%s15422_s0 + $0xe8] sm:$0xff]  ;;  %v63_v31 = vld [vmem:[%s15422_s0 + $0xe0] sm:$0xff]  ;;  %v66_v32 = vld [vmem:[%s15422_s0 + $0xf8] sm:$0xff] }
  0x24   :  { %v65_v33 = vld [vmem:[%s15422_s0 + $0xf0] sm:$0xff]  ;;  %v68_v34 = vld [vmem:[%s15422_s0 + $0x108] sm:$0xff]  ;;  %v67_v35 = vld [vmem:[%s15422_s0 + $0x100] sm:$0xff] }
  0x25   :  { %379 = vperm.xlu1 %9057, %v52_v18   ;;  %374 = vperm.xlu0 %9056, %v51_v19   ;;  %v70_v36 = vld [vmem:[%s15422_s0 + $0x118] sm:$0xff]  ;;  %v69_v37 = vld [vmem:[%s15422_s0 + $0x110] sm:$0xff]  ;;  %v72_v38 = vld [vmem:[%s15422_s0 + $0x128] sm:$0xff] }
  0x26   :  { %v71_v39 = vld [vmem:[%s15422_s0 + $0x120] sm:$0xff]  ;;  %v74_v40 = vld [vmem:[%s15422_s0 + $0x138] sm:$0xff]  ;;  %v73_v41 = vld [vmem:[%s15422_s0 + $0x130] sm:$0xff] }
  0x27   :  { %v76_v42 = vld [vmem:[%s15422_s0 + $0x148] sm:$0xff]  ;;  %v75_v43 = vld [vmem:[%s15422_s0 + $0x140] sm:$0xff]  ;;  %v78_v44 = vld [vmem:[%s15422_s0 + $0x158] sm:$0xff] }
  0x28   :  { %v77_v45 = vld [vmem:[%s15422_s0 + $0x150] sm:$0xff]  ;;  %v80_v46 = vld [vmem:[%s15422_s0 + $0x168] sm:$0xff]  ;;  %v79_v47 = vld [vmem:[%s15422_s0 + $0x160] sm:$0xff] }
  0x29   :  { %389 = vperm.xlu1 %9057, %v54_v20   ;;  %384 = vperm.xlu0 %9056, %v53_v21   ;;  %v82_v48 = vld [vmem:[%s15422_s0 + $0x178] sm:$0xff]  ;;  %v81_v49 = vld [vmem:[%s15422_s0 + $0x170] sm:$0xff]  ;;  %v84_v50 = vld [vmem:[%s15422_s0 + $0x188] sm:$0xff] }
  0x2a   :  { %v83_v51 = vld [vmem:[%s15422_s0 + $0x180] sm:$0xff]  ;;  %v86_v52 = vld [vmem:[%s15422_s0 + $0x198] sm:$0xff]  ;;  %v85_v53 = vld [vmem:[%s15422_s0 + $0x190] sm:$0xff] }
  0x2b   :  { %v88_v54 = vld [vmem:[%s15422_s0 + $0x1a8] sm:$0xff]  ;;  %v87_v55 = vld [vmem:[%s15422_s0 + $0x1a0] sm:$0xff]  ;;  %v90_v56 = vld [vmem:[%s15422_s0 + $0x1b8] sm:$0xff] }
  0x2c   :  { %v89_v57 = vld [vmem:[%s15422_s0 + $0x1b0] sm:$0xff]  ;;  %v92_v58 = vld [vmem:[%s15422_s0 + $0x1c8] sm:$0xff]  ;;  %v91_v59 = vld [vmem:[%s15422_s0 + $0x1c0] sm:$0xff] }
  0x2d   :  { %399 = vperm.xlu1 %9057, %v56_v22   ;;  %394 = vperm.xlu0 %9056, %v55_v23   ;;  %v94_v60 = vld [vmem:[%s15422_s0 + $0x1d8] sm:$0xff]  ;;  %v93_v61 = vld [vmem:[%s15422_s0 + $0x1d0] sm:$0xff]  ;;  %v96_v62 = vld [vmem:[%s15422_s0 + $0x1e8] sm:$0xff] }
  0x2e   :  { %v95_v63 = vld [vmem:[%s15422_s0 + $0x1e0] sm:$0xff]  ;;  %v98_v0 = vld [vmem:[%s15422_s0 + $0x1f8] sm:$0xff]  ;;  %v97_v1 = vld [vmem:[%s15422_s0 + $0x1f0] sm:$0xff] }
  0x2f   :  { %v100_v2 = vld [vmem:[%s15422_s0 + $0x208] sm:$0xff]  ;;  %v99_v4 = vld [vmem:[%s15422_s0 + $0x200] sm:$0xff]  ;;  %v102_v7 = vld [vmem:[%s15422_s0 + $0x218] sm:$0xff] }
  0x30   :  { %v101_v8 = vld [vmem:[%s15422_s0 + $0x210] sm:$0xff]  ;;  %v104_v11 = vld [vmem:[%s15422_s0 + $0x228] sm:$0xff]  ;;  %v103_v12 = vld [vmem:[%s15422_s0 + $0x220] sm:$0xff] }
  0x31   :  { %409 = vperm.xlu1 %9057, %v58_v24   ;;  %404 = vperm.xlu0 %9056, %v57_v25   ;;  %v106_v15 = vld [vmem:[%s15422_s0 + $0x238] sm:$0xff]  ;;  %v105_v16 = vld [vmem:[%s15422_s0 + $0x230] sm:$0xff]  ;;  %v108_v19 = vld [vmem:[%s15422_s0 + $0x248] sm:$0xff] }
  0x32   :  { %v107_v20 = vld [vmem:[%s15422_s0 + $0x240] sm:$0xff]  ;;  %v110_v23 = vld [vmem:[%s15422_s0 + $0x258] sm:$0xff]  ;;  %v109_v24 = vld [vmem:[%s15422_s0 + $0x250] sm:$0xff] }
  0x35   :  { %419 = vperm.xlu1 %9057, %v60_v26   ;;  %414 = vperm.xlu0 %9056, %v59_v27   ;;  %v112_v27 = vld [vmem:[%s15422_s0 + $0x268] sm:$0xff] }
  0x39   :  { %429 = vperm.xlu1 %9057, %v62_v28   ;;  %424 = vperm.xlu0 %9056, %v61_v29   ;;  %v111_v28 = vld [vmem:[%s15422_s0 + $0x260] sm:$0xff] }
  0x3d   :  { %439 = vperm.xlu1 %9057, %v64_v30   ;;  %434 = vperm.xlu0 %9056, %v63_v31   ;;  %v114_v31 = vld [vmem:[%s15422_s0 + $0x278] sm:$0xff] }
  0x41   :  { %449 = vperm.xlu1 %9057, %v66_v32   ;;  %444 = vperm.xlu0 %9056, %v65_v33   ;;  %v113_v32 = vld [vmem:[%s15422_s0 + $0x270] sm:$0xff] }
  0x45   :  { %459 = vperm.xlu1 %9057, %v68_v34   ;;  %454 = vperm.xlu0 %9056, %v67_v35   ;;  %v116_v35 = vld [vmem:[%s15422_s0 + $0x288] sm:$0xff] }
  0x49   :  { %469 = vperm.xlu1 %9057, %v70_v36   ;;  %464 = vperm.xlu0 %9056, %v69_v37   ;;  %v115_v36 = vld [vmem:[%s15422_s0 + $0x280] sm:$0xff] }
  0x4d   :  { %479 = vperm.xlu1 %9057, %v72_v38   ;;  %474 = vperm.xlu0 %9056, %v71_v39   ;;  %v118_v39 = vld [vmem:[%s15422_s0 + $0x298] sm:$0xff] }
  0x51   :  { %489 = vperm.xlu1 %9057, %v74_v40   ;;  %484 = vperm.xlu0 %9056, %v73_v41   ;;  %v117_v40 = vld [vmem:[%s15422_s0 + $0x290] sm:$0xff] }
  0x55   :  { %499 = vperm.xlu1 %9057, %v76_v42   ;;  %494 = vperm.xlu0 %9056, %v75_v43   ;;  %v120_v43 = vld [vmem:[%s15422_s0 + $0x2a8] sm:$0xff] }
  0x59   :  { %509 = vperm.xlu1 %9057, %v78_v44   ;;  %504 = vperm.xlu0 %9056, %v77_v45   ;;  %v119_v44 = vld [vmem:[%s15422_s0 + $0x2a0] sm:$0xff] }
  0x5d   :  { %519 = vperm.xlu1 %9057, %v80_v46   ;;  %514 = vperm.xlu0 %9056, %v79_v47   ;;  %v122_v47 = vld [vmem:[%s15422_s0 + $0x2b8] sm:$0xff] }
  0x61   :  { %529 = vperm.xlu1 %9057, %v82_v48   ;;  %524 = vperm.xlu0 %9056, %v81_v49   ;;  %v121_v48 = vld [vmem:[%s15422_s0 + $0x2b0] sm:$0xff] }
  0x65   :  { %539 = vperm.xlu1 %9057, %v84_v50   ;;  %534 = vperm.xlu0 %9056, %v83_v51   ;;  %v124_v51 = vld [vmem:[%s15422_s0 + $0x2c8] sm:$0xff] }
  0x69   :  { %549 = vperm.xlu1 %9057, %v86_v52   ;;  %544 = vperm.xlu0 %9056, %v85_v53   ;;  %v123_v52 = vld [vmem:[%s15422_s0 + $0x2c0] sm:$0xff] }
  0x6d   :  { %559 = vperm.xlu1 %9057, %v88_v54   ;;  %554 = vperm.xlu0 %9056, %v87_v55   ;;  %v126_v55 = vld [vmem:[%s15422_s0 + $0x2d8] sm:$0xff] }
  0x71   :  { %569 = vperm.xlu1 %9057, %v90_v56   ;;  %564 = vperm.xlu0 %9056, %v89_v57   ;;  %v125_v56 = vld [vmem:[%s15422_s0 + $0x2d0] sm:$0xff] }
  0x75   :  { %579 = vperm.xlu1 %9057, %v92_v58   ;;  %574 = vperm.xlu0 %9056, %v91_v59   ;;  %v128_v59 = vld [vmem:[%s15422_s0 + $0x2e8] sm:$0xff] }
  0x79   :  { %589 = vperm.xlu1 %9057, %v94_v60   ;;  %584 = vperm.xlu0 %9056, %v93_v61   ;;  %v127_v60 = vld [vmem:[%s15422_s0 + $0x2e0] sm:$0xff] }
  0x7d   :  { %599 = vperm.xlu1 %9057, %v96_v62   ;;  %594 = vperm.xlu0 %9056, %v95_v63   ;;  %v130_v63 = vld [vmem:[%s15422_s0 + $0x2f8] sm:$0xff] }
  0x81   :  { %609 = vperm.xlu1 %9057, %v98_v0   ;;  %604 = vperm.xlu0 %9056, %v97_v1   ;;  %v129_v0 = vld [vmem:[%s15422_s0 + $0x2f0] sm:$0xff] }
  0x84   :  { %v9607_v5 = vpop.permute.xlu1 %304  ;;  %v9609_v6 = vpop.permute.xlu0 %294 }
  0x85   :  { %619 = vperm.xlu1 %9057, %v100_v2   ;;  %614 = vperm.xlu0 %9056, %v99_v4   ;;  %v132_v4 = vld [vmem:[%s15422_s0 + $0x308] sm:$0xff] }
  0x88   :  { %v9617_v9 = vpop.permute.xlu1 %309  ;;  %v9619_v10 = vpop.permute.xlu0 %299 }
  0x89   :  { %629 = vperm.xlu1 %9057, %v102_v7   ;;  %624 = vperm.xlu0 %9056, %v101_v8   ;;  %v131_v7 = vld [vmem:[%s15422_s0 + $0x300] sm:$0xff] }
  0x8c   :  { %v9627_v13 = vpop.permute.xlu1 %319  ;;  %v9629_v14 = vpop.permute.xlu0 %314 }
  0x8d   :  { %639 = vperm.xlu1 %9057, %v104_v11   ;;  %634 = vperm.xlu0 %9056, %v103_v12   ;;  %v134_v12 = vld [vmem:[%s15422_s0 + $0x318] sm:$0xff] }
  0x90   :  { %v9637_v17 = vpop.permute.xlu1 %329  ;;  %v9639_v18 = vpop.permute.xlu0 %324 }
  0x91   :  { %649 = vperm.xlu1 %9057, %v106_v15   ;;  %644 = vperm.xlu0 %9056, %v105_v16   ;;  %v133_v15 = vld [vmem:[%s15422_s0 + $0x310] sm:$0xff] }
  0x94   :  { %v9647_v21 = vpop.permute.xlu1 %339  ;;  %v9649_v22 = vpop.permute.xlu0 %334 }
  0x95   :  { %659 = vperm.xlu1 %9057, %v108_v19   ;;  %654 = vperm.xlu0 %9056, %v107_v20   ;;  %v136_v20 = vld [vmem:[%s15422_s0 + $0x328] sm:$0xff] }
  0x98   :  { %v9657_v25 = vpop.permute.xlu1 %349  ;;  %v9659_v26 = vpop.permute.xlu0 %344 }
  0x99   :  { %669 = vperm.xlu1 %9057, %v110_v23   ;;  %664 = vperm.xlu0 %9056, %v109_v24   ;;  %v135_v23 = vld [vmem:[%s15422_s0 + $0x320] sm:$0xff] }
  0x9c   :  { %v9667_v29 = vpop.permute.xlu1 %359  ;;  %v9669_v30 = vpop.permute.xlu0 %354 }
  0x9d   :  { %679 = vperm.xlu1 %9057, %v112_v27   ;;  %674 = vperm.xlu0 %9056, %v111_v28   ;;  %v138_v28 = vld [vmem:[%s15422_s0 + $0x338] sm:$0xff] }
  0xa0   :  { %v9677_v33 = vpop.permute.xlu1 %369  ;;  %v9679_v34 = vpop.permute.xlu0 %364 }
  0xa1   :  { %689 = vperm.xlu1 %9057, %v114_v31   ;;  %684 = vperm.xlu0 %9056, %v113_v32   ;;  %v137_v31 = vld [vmem:[%s15422_s0 + $0x330] sm:$0xff] }
  0xa4   :  { %v9687_v37 = vpop.permute.xlu1 %379  ;;  %v9689_v38 = vpop.permute.xlu0 %374 }
  0xa5   :  { %699 = vperm.xlu1 %9057, %v116_v35   ;;  %694 = vperm.xlu0 %9056, %v115_v36   ;;  %v140_v36 = vld [vmem:[%s15422_s0 + $0x348] sm:$0xff] }
  0xa8   :  { %v9697_v41 = vpop.permute.xlu1 %389  ;;  %v9699_v42 = vpop.permute.xlu0 %384 }
  0xa9   :  { %709 = vperm.xlu1 %9057, %v118_v39   ;;  %704 = vperm.xlu0 %9056, %v117_v40   ;;  %v139_v39 = vld [vmem:[%s15422_s0 + $0x340] sm:$0xff] }
  0xac   :  { %v9707_v45 = vpop.permute.xlu1 %399  ;;  %v9709_v46 = vpop.permute.xlu0 %394 }
  0xad   :  { %719 = vperm.xlu1 %9057, %v120_v43   ;;  %714 = vperm.xlu0 %9056, %v119_v44   ;;  %v142_v44 = vld [vmem:[%s15422_s0 + $0x358] sm:$0xff] }
  0xb0   :  { %v9717_v49 = vpop.permute.xlu1 %409  ;;  %v9719_v50 = vpop.permute.xlu0 %404 }
  0xb1   :  { %729 = vperm.xlu1 %9057, %v122_v47   ;;  %724 = vperm.xlu0 %9056, %v121_v48   ;;  %v141_v47 = vld [vmem:[%s15422_s0 + $0x350] sm:$0xff] }
  0xb4   :  { %v9727_v53 = vpop.permute.xlu1 %419  ;;  %v9729_v54 = vpop.permute.xlu0 %414 }
  0xb5   :  { %739 = vperm.xlu1 %9057, %v124_v51   ;;  %734 = vperm.xlu0 %9056, %v123_v52   ;;  %v144_v52 = vld [vmem:[%s15422_s0 + $0x368] sm:$0xff] }
  0xb8   :  { %v9737_v57 = vpop.permute.xlu1 %429  ;;  %v9739_v58 = vpop.permute.xlu0 %424 }
  0xb9   :  { %749 = vperm.xlu1 %9057, %v126_v55   ;;  %744 = vperm.xlu0 %9056, %v125_v56   ;;  %v143_v55 = vld [vmem:[%s15422_s0 + $0x360] sm:$0xff] }
  0xbc   :  { %v9747_v61 = vpop.permute.xlu1 %439  ;;  %v9749_v62 = vpop.permute.xlu0 %434 }
  0xbd   :  { %759 = vperm.xlu1 %9057, %v128_v59   ;;  %754 = vperm.xlu0 %9056, %v127_v60   ;;  %v146_v60 = vld [vmem:[%s15422_s0 + $0x378] sm:$0xff] }
  0xc0   :  { %v9757_v1 = vpop.permute.xlu1 %449  ;;  %v9759_v2 = vpop.permute.xlu0 %444 }
  0xc1   :  { %769 = vperm.xlu1 %9057, %v130_v63   ;;  %764 = vperm.xlu0 %9056, %v129_v0   ;;  %v145_v63 = vld [vmem:[%s15422_s0 + $0x370] sm:$0xff] }
  0xc4   :  { %v9767_v8 = vpop.permute.xlu1 %459  ;;  %v9769_v11 = vpop.permute.xlu0 %454 }
  0xc5   :  { %779 = vperm.xlu1 %9057, %v132_v4   ;;  %774 = vperm.xlu0 %9056, %v131_v7   ;;  %v148_v7 = vld [vmem:[%s15422_s0 + $0x388] sm:$0xff] }
  0xc8   :  { %v9777_v16 = vpop.permute.xlu1 %469  ;;  %v9779_v19 = vpop.permute.xlu0 %464 }
  0xc9   :  { %789 = vperm.xlu1 %9057, %v134_v12   ;;  %784 = vperm.xlu0 %9056, %v133_v15   ;;  %v147_v12 = vld [vmem:[%s15422_s0 + $0x380] sm:$0xff] }
  0xcc   :  { %v9787_v24 = vpop.permute.xlu1 %479  ;;  %v9789_v27 = vpop.permute.xlu0 %474 }
  0xcd   :  { %799 = vperm.xlu1 %9057, %v136_v20   ;;  %794 = vperm.xlu0 %9056, %v135_v23   ;;  %v150_v23 = vld [vmem:[%s15422_s0 + $0x398] sm:$0xff] }
  0xd0   :  { %v9797_v32 = vpop.permute.xlu1 %489  ;;  %v9799_v35 = vpop.permute.xlu0 %484 }
  0xd1   :  { %809 = vperm.xlu1 %9057, %v138_v28   ;;  %804 = vperm.xlu0 %9056, %v137_v31   ;;  %v149_v28 = vld [vmem:[%s15422_s0 + $0x390] sm:$0xff] }
  0xd4   :  { %v9807_v40 = vpop.permute.xlu1 %499  ;;  %v9809_v43 = vpop.permute.xlu0 %494 }
  0xd5   :  { %819 = vperm.xlu1 %9057, %v140_v36   ;;  %814 = vperm.xlu0 %9056, %v139_v39   ;;  %v152_v39 = vld [vmem:[%s15422_s0 + $0x3a8] sm:$0xff] }
  0xd8   :  { %v9817_v48 = vpop.permute.xlu1 %509  ;;  %v9819_v51 = vpop.permute.xlu0 %504 }
  0xd9   :  { %829 = vperm.xlu1 %9057, %v142_v44   ;;  %824 = vperm.xlu0 %9056, %v141_v47   ;;  %v151_v44 = vld [vmem:[%s15422_s0 + $0x3a0] sm:$0xff] }
  0xdc   :  { %v9827_v56 = vpop.permute.xlu1 %519  ;;  %v9829_v59 = vpop.permute.xlu0 %514 }
  0xdd   :  { %839 = vperm.xlu1 %9057, %v144_v52   ;;  %834 = vperm.xlu0 %9056, %v143_v55   ;;  %v154_v55 = vld [vmem:[%s15422_s0 + $0x3b8] sm:$0xff] }
  0xe0   :  { %v9837_v0 = vpop.permute.xlu1 %529  ;;  %v9839_v4 = vpop.permute.xlu0 %524 }
  0xe1   :  { %15442 = vst [vmem:[#allocation6_spill] sm:$0xff] %v9839_v4  ;;  %849 = vperm.xlu1 %9057, %v146_v60   ;;  %844 = vperm.xlu0 %9056, %v145_v63   ;;  %v153_v60 = vld [vmem:[%s15422_s0 + $0x3b0] sm:$0xff] }
  0xe4   :  { %v9847_v15 = vpop.permute.xlu1 %539  ;;  %v9849_v20 = vpop.permute.xlu0 %534 }
  0xe5   :  { %15443 = vst [vmem:[#allocation7_spill] sm:$0xff] %v9847_v15  ;;  %15444 = vst [vmem:[#allocation8_spill] sm:$0xff] %v9849_v20  ;;  %859 = vperm.xlu1 %9057, %v148_v7   ;;  %854 = vperm.xlu0 %9056, %v147_v12   ;;  %v156_v12 = vld [vmem:[%s15422_s0 + $0x3c8] sm:$0xff]  ;;  %v9127_v20 = vld [vmem:[%s15422_s0 + $0x210] sm:$0xff] }
  0xe8   :  { %v9857_v31 = vpop.permute.xlu1 %549  ;;  %v9859_v36 = vpop.permute.xlu0 %544 }
  0xe9   :  { %15445 = vst [vmem:[#allocation9_spill] sm:$0xff] %v9857_v31  ;;  %15446 = vst [vmem:[#allocation10_spill] sm:$0xff] %v9859_v36  ;;  %869 = vperm.xlu1 %9057, %v150_v23   ;;  %864 = vperm.xlu0 %9056, %v149_v28   ;;  %v155_v23 = vld [vmem:[%s15422_s0 + $0x3c0] sm:$0xff] }
  0xec   :  { %v9867_v47 = vpop.permute.xlu1 %559  ;;  %v9869_v52 = vpop.permute.xlu0 %554 }
  0xed   :  { %15447 = vst [vmem:[#allocation11_spill] sm:$0xff] %v9867_v47  ;;  %15448 = vst [vmem:[#allocation12_spill] sm:$0xff] %v9869_v52  ;;  %879 = vperm.xlu1 %9057, %v152_v39   ;;  %874 = vperm.xlu0 %9056, %v151_v44   ;;  %v158_v44 = vld [vmem:[%s15422_s0 + $0x3d8] sm:$0xff] }
  0xf0   :  { %v9877_v63 = vpop.permute.xlu1 %569  ;;  %v9879_v7 = vpop.permute.xlu0 %564 }
  0xf1   :  { %15449 = vst [vmem:[#allocation13_spill] sm:$0xff] %v9877_v63  ;;  %15450 = vst [vmem:[#allocation14_spill] sm:$0xff] %v9879_v7  ;;  %889 = vperm.xlu1 %9057, %v154_v55   ;;  %884 = vperm.xlu0 %9056, %v153_v60   ;;  %v157_v55 = vld [vmem:[%s15422_s0 + $0x3d0] sm:$0xff]  ;;  %v3896_v63 = vld [vmem:[%s15425_s3 + $0x28] sm:$0xff] }
  0xf4   :  { %v9887_v28 = vpop.permute.xlu1 %579  ;;  %v9889_v39 = vpop.permute.xlu0 %574 }
  0xf5   :  { %15451 = vst [vmem:[#allocation15_spill] sm:$0xff] %v9887_v28  ;;  %15452 = vst [vmem:[#allocation16_spill] sm:$0xff] %v9889_v39  ;;  %899 = vperm.xlu1 %9057, %v156_v12   ;;  %894 = vperm.xlu0 %9056, %v155_v23   ;;  %v160_v39 = vld [vmem:[%s15422_s0 + $0x3e8] sm:$0xff]  ;;  %v159_v12 = vld [vmem:[%s15422_s0 + $0x3e0] sm:$0xff] }
  0xf8   :  { %v9897_v60 = vpop.permute.xlu1 %589  ;;  %v9899_v3 = vpop.permute.xlu0 %584 }
  0xf9   :  { %15453 = vst [vmem:[#allocation17_spill] sm:$0xff] %v9897_v60  ;;  %15454 = vst [vmem:[#allocation18_spill] sm:$0xff] %v9899_v3  ;;  %909 = vperm.xlu1 %9057, %v158_v44   ;;  %904 = vperm.xlu0 %9056, %v157_v55   ;;  %v162_v3 = vld [vmem:[%s15422_s0 + $0x3f8] sm:$0xff]  ;;  %v161_v44 = vld [vmem:[%s15422_s0 + $0x3f0] sm:$0xff] }
  0xfc   :  { %v9907_v23 = vpop.permute.xlu1 %599  ;;  %v9909_v28 = vpop.permute.xlu0 %594 }
  0xfd   :  { %15455 = vst [vmem:[#allocation19_spill] sm:$0xff] %v9907_v23  ;;  %15456 = vst [vmem:[#allocation20_spill] sm:$0xff] %v9909_v28  ;;  %919 = vperm.xlu1 %9057, %v160_v39   ;;  %914 = vperm.xlu0 %9056, %v159_v12   ;;  %v164_v28 = vld [vmem:[%s15422_s0 + $0x408] sm:$0xff]  ;;  %v163_v39 = vld [vmem:[%s15422_s0 + $0x400] sm:$0xff] }
 0x100   :  { %v9917_v55 = vpop.permute.xlu1 %609  ;;  %v9919_v60 = vpop.permute.xlu0 %604 }
 0x101   :  { %15457 = vst [vmem:[#allocation21_spill] sm:$0xff] %v9917_v55  ;;  %15458 = vst [vmem:[#allocation22_spill] sm:$0xff] %v9919_v60  ;;  %929 = vperm.xlu1 %9057, %v162_v3   ;;  %924 = vperm.xlu0 %9056, %v161_v44   ;;  %v166_v60 = vld [vmem:[%s15422_s0 + $0x418] sm:$0xff]  ;;  %v165_v3 = vld [vmem:[%s15422_s0 + $0x410] sm:$0xff] }
 0x104   :  { %v9927_v12 = vpop.permute.xlu1 %619  ;;  %v9929_v23 = vpop.permute.xlu0 %614 }
 0x105   :  { %15459 = vst [vmem:[#allocation23_spill] sm:$0xff] %v9927_v12  ;;  %15460 = vst [vmem:[#allocation24_spill] sm:$0xff] %v9929_v23  ;;  %939 = vperm.xlu1 %9057, %v164_v28   ;;  %934 = vperm.xlu0 %9056, %v163_v39   ;;  %v168_v23 = vld [vmem:[%s15422_s0 + $0x428] sm:$0xff]  ;;  %v167_v28 = vld [vmem:[%s15422_s0 + $0x420] sm:$0xff] }
 0x108   :  { %v9937_v44 = vpop.permute.xlu1 %629  ;;  %v9939_v55 = vpop.permute.xlu0 %624 }
 0x109   :  { %15461 = vst [vmem:[#allocation25_spill] sm:$0xff] %v9937_v44  ;;  %15462 = vst [vmem:[#allocation26_spill] sm:$0xff] %v9939_v55  ;;  %949 = vperm.xlu1 %9057, %v166_v60   ;;  %944 = vperm.xlu0 %9056, %v165_v3   ;;  %v170_v55 = vld [vmem:[%s15422_s0 + $0x438] sm:$0xff]  ;;  %v169_v60 = vld [vmem:[%s15422_s0 + $0x430] sm:$0xff] }
 0x10c   :  { %v9947_v39 = vpop.permute.xlu1 %639  ;;  %v9949_v12 = vpop.permute.xlu0 %634 }
 0x10d   :  { %15463 = vst [vmem:[#allocation27_spill] sm:$0xff] %v9947_v39  ;;  %15464 = vst [vmem:[#allocation28_spill] sm:$0xff] %v9949_v12  ;;  %959 = vperm.xlu1 %9057, %v168_v23   ;;  %954 = vperm.xlu0 %9056, %v167_v28   ;;  %v172_v12 = vld [vmem:[%s15422_s0 + $0x448] sm:$0xff]  ;;  %v171_v23 = vld [vmem:[%s15422_s0 + $0x440] sm:$0xff] }
 0x110   :  { %v9957_v3 = vpop.permute.xlu1 %649  ;;  %v9959_v44 = vpop.permute.xlu0 %644 }
 0x111   :  { %15465 = vst [vmem:[#allocation29_spill] sm:$0xff] %v9957_v3  ;;  %15466 = vst [vmem:[#allocation30_spill] sm:$0xff] %v9959_v44  ;;  %969 = vperm.xlu1 %9057, %v170_v55   ;;  %964 = vperm.xlu0 %9056, %v169_v60   ;;  %v174_v44 = vld [vmem:[%s15422_s0 + $0x458] sm:$0xff]  ;;  %v173_v55 = vld [vmem:[%s15422_s0 + $0x450] sm:$0xff] }
 0x114   :  { %v9967_v28 = vpop.permute.xlu1 %659  ;;  %v9969_v39 = vpop.permute.xlu0 %654 }
 0x115   :  { %15467 = vst [vmem:[#allocation31_spill] sm:$0xff] %v9967_v28  ;;  %15468 = vst [vmem:[#allocation32_spill] sm:$0xff] %v9969_v39  ;;  %979 = vperm.xlu1 %9057, %v172_v12   ;;  %974 = vperm.xlu0 %9056, %v171_v23   ;;  %v176_v39 = vld [vmem:[%s15422_s0 + $0x468] sm:$0xff]  ;;  %v175_v12 = vld [vmem:[%s15422_s0 + $0x460] sm:$0xff] }
 0x118   :  { %v9977_v60 = vpop.permute.xlu1 %669  ;;  %v9979_v3 = vpop.permute.xlu0 %664 }
 0x119   :  { %15469 = vst [vmem:[#allocation33_spill] sm:$0xff] %v9977_v60  ;;  %15470 = vst [vmem:[#allocation34_spill] sm:$0xff] %v9979_v3  ;;  %989 = vperm.xlu1 %9057, %v174_v44   ;;  %984 = vperm.xlu0 %9056, %v173_v55   ;;  %v178_v3 = vld [vmem:[%s15422_s0 + $0x478] sm:$0xff]  ;;  %v177_v44 = vld [vmem:[%s15422_s0 + $0x470] sm:$0xff] }
 0x11c   :  { %v9987_v23 = vpop.permute.xlu1 %679  ;;  %v9989_v28 = vpop.permute.xlu0 %674 }
 0x11d   :  { %15471 = vst [vmem:[#allocation35_spill] sm:$0xff] %v9987_v23  ;;  %15472 = vst [vmem:[#allocation36_spill] sm:$0xff] %v9989_v28  ;;  %999 = vperm.xlu1 %9057, %v176_v39   ;;  %994 = vperm.xlu0 %9056, %v175_v12   ;;  %v180_v28 = vld [vmem:[%s15422_s0 + $0x488] sm:$0xff]  ;;  %v179_v39 = vld [vmem:[%s15422_s0 + $0x480] sm:$0xff] }
 0x120   :  { %v9997_v55 = vpop.permute.xlu1 %689  ;;  %v9999_v60 = vpop.permute.xlu0 %684 }
 0x121   :  { %15473 = vst [vmem:[#allocation37_spill] sm:$0xff] %v9997_v55  ;;  %15474 = vst [vmem:[#allocation38_spill] sm:$0xff] %v9999_v60  ;;  %1009 = vperm.xlu1 %9057, %v178_v3   ;;  %1004 = vperm.xlu0 %9056, %v177_v44   ;;  %v182_v60 = vld [vmem:[%s15422_s0 + $0x498] sm:$0xff]  ;;  %v181_v3 = vld [vmem:[%s15422_s0 + $0x490] sm:$0xff] }
 0x124   :  { %v10007_v12 = vpop.permute.xlu1 %699  ;;  %v10009_v23 = vpop.permute.xlu0 %694 }
 0x125   :  { %15475 = vst [vmem:[#allocation39_spill] sm:$0xff] %v10007_v12  ;;  %15476 = vst [vmem:[#allocation40_spill] sm:$0xff] %v10009_v23  ;;  %1019 = vperm.xlu1 %9057, %v180_v28   ;;  %1014 = vperm.xlu0 %9056, %v179_v39   ;;  %v184_v23 = vld [vmem:[%s15422_s0 + $0x4a8] sm:$0xff]  ;;  %v183_v28 = vld [vmem:[%s15422_s0 + $0x4a0] sm:$0xff] }
 0x128   :  { %v10017_v44 = vpop.permute.xlu1 %709  ;;  %v10019_v55 = vpop.permute.xlu0 %704 }
 0x129   :  { %15477 = vst [vmem:[#allocation41_spill] sm:$0xff] %v10017_v44  ;;  %15478 = vst [vmem:[#allocation42_spill] sm:$0xff] %v10019_v55  ;;  %1029 = vperm.xlu1 %9057, %v182_v60   ;;  %1024 = vperm.xlu0 %9056, %v181_v3   ;;  %v186_v55 = vld [vmem:[%s15422_s0 + $0x4b8] sm:$0xff]  ;;  %v185_v60 = vld [vmem:[%s15422_s0 + $0x4b0] sm:$0xff] }
 0x12c   :  { %v10027_v39 = vpop.permute.xlu1 %719  ;;  %v10029_v12 = vpop.permute.xlu0 %714 }
 0x12d   :  { %15479 = vst [vmem:[#allocation43_spill] sm:$0xff] %v10027_v39  ;;  %15480 = vst [vmem:[#allocation44_spill] sm:$0xff] %v10029_v12  ;;  %1039 = vperm.xlu1 %9057, %v184_v23   ;;  %1034 = vperm.xlu0 %9056, %v183_v28   ;;  %v188_v12 = vld [vmem:[%s15422_s0 + $0x4c8] sm:$0xff]  ;;  %v187_v23 = vld [vmem:[%s15422_s0 + $0x4c0] sm:$0xff] }
 0x130   :  { %v10037_v3 = vpop.permute.xlu1 %729  ;;  %v10039_v44 = vpop.permute.xlu0 %724 }
 0x131   :  { %15481 = vst [vmem:[#allocation45_spill] sm:$0xff] %v10037_v3  ;;  %15482 = vst [vmem:[#allocation46_spill] sm:$0xff] %v10039_v44  ;;  %1049 = vperm.xlu1 %9057, %v186_v55   ;;  %1044 = vperm.xlu0 %9056, %v185_v60   ;;  %v190_v44 = vld [vmem:[%s15422_s0 + $0x4d8] sm:$0xff]  ;;  %v189_v55 = vld [vmem:[%s15422_s0 + $0x4d0] sm:$0xff] }
 0x134   :  { %v10047_v28 = vpop.permute.xlu1 %739  ;;  %v10049_v39 = vpop.permute.xlu0 %734 }
 0x135   :  { %15483 = vst [vmem:[#allocation47_spill] sm:$0xff] %v10047_v28  ;;  %15484 = vst [vmem:[#allocation48_spill] sm:$0xff] %v10049_v39  ;;  %1059 = vperm.xlu1 %9057, %v188_v12   ;;  %1054 = vperm.xlu0 %9056, %v187_v23   ;;  %v192_v39 = vld [vmem:[%s15422_s0 + $0x4e8] sm:$0xff]  ;;  %v191_v12 = vld [vmem:[%s15422_s0 + $0x4e0] sm:$0xff] }
 0x138   :  { %v10057_v60 = vpop.permute.xlu1 %749  ;;  %v10059_v3 = vpop.permute.xlu0 %744 }
 0x139   :  { %15485 = vst [vmem:[#allocation49_spill] sm:$0xff] %v10057_v60  ;;  %15486 = vst [vmem:[#allocation50_spill] sm:$0xff] %v10059_v3  ;;  %1069 = vperm.xlu1 %9057, %v190_v44   ;;  %1064 = vperm.xlu0 %9056, %v189_v55   ;;  %v194_v3 = vld [vmem:[%s15422_s0 + $0x4f8] sm:$0xff]  ;;  %v193_v44 = vld [vmem:[%s15422_s0 + $0x4f0] sm:$0xff] }
 0x13c   :  { %v10067_v23 = vpop.permute.xlu1 %759  ;;  %v10069_v28 = vpop.permute.xlu0 %754 }
 0x13d   :  { %15487 = vst [vmem:[#allocation51_spill] sm:$0xff] %v10067_v23  ;;  %15488 = vst [vmem:[#allocation52_spill] sm:$0xff] %v10069_v28  ;;  %1079 = vperm.xlu1 %9057, %v192_v39   ;;  %1074 = vperm.xlu0 %9056, %v191_v12   ;;  %v196_v28 = vld [vmem:[%s15422_s0 + $0x508] sm:$0xff]  ;;  %v195_v39 = vld [vmem:[%s15422_s0 + $0x500] sm:$0xff] }
 0x140   :  { %v10077_v55 = vpop.permute.xlu1 %769  ;;  %v10079_v60 = vpop.permute.xlu0 %764 }
 0x141   :  { %15489 = vst [vmem:[#allocation53_spill] sm:$0xff] %v10077_v55  ;;  %15490 = vst [vmem:[#allocation54_spill] sm:$0xff] %v10079_v60  ;;  %1089 = vperm.xlu1 %9057, %v194_v3   ;;  %1084 = vperm.xlu0 %9056, %v193_v44   ;;  %v198_v60 = vld [vmem:[%s15422_s0 + $0x518] sm:$0xff]  ;;  %v197_v3 = vld [vmem:[%s15422_s0 + $0x510] sm:$0xff] }
 0x144   :  { %v10087_v12 = vpop.permute.xlu1 %779  ;;  %v10089_v23 = vpop.permute.xlu0 %774 }
 0x145   :  { %15491 = vst [vmem:[#allocation55_spill] sm:$0xff] %v10087_v12  ;;  %15492 = vst [vmem:[#allocation56_spill] sm:$0xff] %v10089_v23  ;;  %1099 = vperm.xlu1 %9057, %v196_v28   ;;  %1094 = vperm.xlu0 %9056, %v195_v39   ;;  %v200_v23 = vld [vmem:[%s15422_s0 + $0x528] sm:$0xff]  ;;  %v199_v28 = vld [vmem:[%s15422_s0 + $0x520] sm:$0xff] }
 0x148   :  { %v10097_v44 = vpop.permute.xlu1 %789  ;;  %v10099_v55 = vpop.permute.xlu0 %784 }
 0x149   :  { %15493 = vst [vmem:[#allocation57_spill] sm:$0xff] %v10097_v44  ;;  %15494 = vst [vmem:[#allocation58_spill] sm:$0xff] %v10099_v55  ;;  %1109 = vperm.xlu1 %9057, %v198_v60   ;;  %1104 = vperm.xlu0 %9056, %v197_v3   ;;  %v202_v55 = vld [vmem:[%s15422_s0 + $0x538] sm:$0xff]  ;;  %v201_v60 = vld [vmem:[%s15422_s0 + $0x530] sm:$0xff] }
 0x14c   :  { %v10107_v39 = vpop.permute.xlu1 %799  ;;  %v10109_v12 = vpop.permute.xlu0 %794 }
 0x14d   :  { %15495 = vst [vmem:[#allocation59_spill] sm:$0xff] %v10107_v39  ;;  %15496 = vst [vmem:[#allocation60_spill] sm:$0xff] %v10109_v12  ;;  %1119 = vperm.xlu1 %9057, %v200_v23   ;;  %1114 = vperm.xlu0 %9056, %v199_v28   ;;  %v204_v12 = vld [vmem:[%s15422_s0 + $0x548] sm:$0xff]  ;;  %v203_v23 = vld [vmem:[%s15422_s0 + $0x540] sm:$0xff] }
 0x150   :  { %v10117_v3 = vpop.permute.xlu1 %809  ;;  %v10119_v44 = vpop.permute.xlu0 %804 }
 0x151   :  { %15497 = vst [vmem:[#allocation61_spill] sm:$0xff] %v10117_v3  ;;  %15498 = vst [vmem:[#allocation62_spill] sm:$0xff] %v10119_v44  ;;  %1129 = vperm.xlu1 %9057, %v202_v55   ;;  %1124 = vperm.xlu0 %9056, %v201_v60   ;;  %v206_v44 = vld [vmem:[%s15422_s0 + $0x558] sm:$0xff]  ;;  %v205_v55 = vld [vmem:[%s15422_s0 + $0x550] sm:$0xff] }
 0x154   :  { %v10127_v28 = vpop.permute.xlu1 %819  ;;  %v10129_v39 = vpop.permute.xlu0 %814 }
 0x155   :  { %15499 = vst [vmem:[#allocation63_spill] sm:$0xff] %v10127_v28  ;;  %15500 = vst [vmem:[#allocation64_spill] sm:$0xff] %v10129_v39  ;;  %1139 = vperm.xlu1 %9057, %v204_v12   ;;  %1134 = vperm.xlu0 %9056, %v203_v23   ;;  %v208_v39 = vld [vmem:[%s15422_s0 + $0x568] sm:$0xff]  ;;  %v207_v12 = vld [vmem:[%s15422_s0 + $0x560] sm:$0xff] }
 0x158   :  { %v10137_v60 = vpop.permute.xlu1 %829  ;;  %v10139_v3 = vpop.permute.xlu0 %824 }
 0x159   :  { %15501 = vst [vmem:[#allocation65_spill] sm:$0xff] %v10137_v60  ;;  %15502 = vst [vmem:[#allocation66_spill] sm:$0xff] %v10139_v3  ;;  %1149 = vperm.xlu1 %9057, %v206_v44   ;;  %1144 = vperm.xlu0 %9056, %v205_v55   ;;  %v210_v3 = vld [vmem:[%s15422_s0 + $0x578] sm:$0xff]  ;;  %v209_v44 = vld [vmem:[%s15422_s0 + $0x570] sm:$0xff] }
 0x15c   :  { %v10147_v23 = vpop.permute.xlu1 %839  ;;  %v10149_v28 = vpop.permute.xlu0 %834 }
 0x15d   :  { %15503 = vst [vmem:[#allocation67_spill] sm:$0xff] %v10147_v23  ;;  %15504 = vst [vmem:[#allocation68_spill] sm:$0xff] %v10149_v28  ;;  %1159 = vperm.xlu1 %9057, %v208_v39   ;;  %1154 = vperm.xlu0 %9056, %v207_v12   ;;  %v212_v28 = vld [vmem:[%s15422_s0 + $0x588] sm:$0xff]  ;;  %v211_v39 = vld [vmem:[%s15422_s0 + $0x580] sm:$0xff] }
 0x160   :  { %v10157_v55 = vpop.permute.xlu1 %849  ;;  %v10159_v60 = vpop.permute.xlu0 %844 }
 0x161   :  { %15505 = vst [vmem:[#allocation69_spill] sm:$0xff] %v10157_v55  ;;  %15506 = vst [vmem:[#allocation70_spill] sm:$0xff] %v10159_v60  ;;  %1169 = vperm.xlu1 %9057, %v210_v3   ;;  %1164 = vperm.xlu0 %9056, %v209_v44   ;;  %v214_v60 = vld [vmem:[%s15422_s0 + $0x598] sm:$0xff]  ;;  %v213_v3 = vld [vmem:[%s15422_s0 + $0x590] sm:$0xff] }
 0x164   :  { %v10167_v12 = vpop.permute.xlu1 %859  ;;  %v10169_v23 = vpop.permute.xlu0 %854 }
 0x165   :  { %15507 = vst [vmem:[#allocation71_spill] sm:$0xff] %v10167_v12  ;;  %15508 = vst [vmem:[#allocation72_spill] sm:$0xff] %v10169_v23  ;;  %1179 = vperm.xlu1 %9057, %v212_v28   ;;  %1174 = vperm.xlu0 %9056, %v211_v39   ;;  %v216_v23 = vld [vmem:[%s15422_s0 + $0x5a8] sm:$0xff]  ;;  %v215_v28 = vld [vmem:[%s15422_s0 + $0x5a0] sm:$0xff] }
 0x168   :  { %v10177_v44 = vpop.permute.xlu1 %869  ;;  %v10179_v55 = vpop.permute.xlu0 %864 }
 0x169   :  { %15509 = vst [vmem:[#allocation73_spill] sm:$0xff] %v10177_v44  ;;  %15510 = vst [vmem:[#allocation74_spill] sm:$0xff] %v10179_v55  ;;  %1189 = vperm.xlu1 %9057, %v214_v60   ;;  %1184 = vperm.xlu0 %9056, %v213_v3   ;;  %v218_v55 = vld [vmem:[%s15422_s0 + $0x5b8] sm:$0xff]  ;;  %v217_v60 = vld [vmem:[%s15422_s0 + $0x5b0] sm:$0xff] }
 0x16c   :  { %v10187_v39 = vpop.permute.xlu1 %879  ;;  %v10189_v12 = vpop.permute.xlu0 %874 }
 0x16d   :  { %15511 = vst [vmem:[#allocation75_spill] sm:$0xff] %v10187_v39  ;;  %15512 = vst [vmem:[#allocation76_spill] sm:$0xff] %v10189_v12  ;;  %1199 = vperm.xlu1 %9057, %v216_v23   ;;  %1194 = vperm.xlu0 %9056, %v215_v28   ;;  %v220_v12 = vld [vmem:[%s15422_s0 + $0x5c8] sm:$0xff]  ;;  %v219_v23 = vld [vmem:[%s15422_s0 + $0x5c0] sm:$0xff] }
 0x170   :  { %v10197_v3 = vpop.permute.xlu1 %889  ;;  %v10199_v44 = vpop.permute.xlu0 %884 }
 0x171   :  { %15513 = vst [vmem:[#allocation77_spill] sm:$0xff] %v10197_v3  ;;  %15514 = vst [vmem:[#allocation78_spill] sm:$0xff] %v10199_v44  ;;  %1209 = vperm.xlu1 %9057, %v218_v55   ;;  %1204 = vperm.xlu0 %9056, %v217_v60   ;;  %v222_v44 = vld [vmem:[%s15422_s0 + $0x5d8] sm:$0xff]  ;;  %v221_v55 = vld [vmem:[%s15422_s0 + $0x5d0] sm:$0xff] }
 0x174   :  { %v10207_v28 = vpop.permute.xlu1 %899  ;;  %v10209_v39 = vpop.permute.xlu0 %894 }
 0x175   :  { %15515 = vst [vmem:[#allocation79_spill] sm:$0xff] %v10207_v28  ;;  %15516 = vst [vmem:[#allocation80_spill] sm:$0xff] %v10209_v39  ;;  %1219 = vperm.xlu1 %9057, %v220_v12   ;;  %1214 = vperm.xlu0 %9056, %v219_v23   ;;  %v224_v39 = vld [vmem:[%s15422_s0 + $0x5e8] sm:$0xff]  ;;  %v223_v12 = vld [vmem:[%s15422_s0 + $0x5e0] sm:$0xff] }
 0x178   :  { %v10217_v60 = vpop.permute.xlu1 %909  ;;  %v10219_v3 = vpop.permute.xlu0 %904 }
 0x179   :  { %15517 = vst [vmem:[#allocation81_spill] sm:$0xff] %v10217_v60  ;;  %15518 = vst [vmem:[#allocation82_spill] sm:$0xff] %v10219_v3  ;;  %1229 = vperm.xlu1 %9057, %v222_v44   ;;  %1224 = vperm.xlu0 %9056, %v221_v55   ;;  %v226_v3 = vld [vmem:[%s15422_s0 + $0x5f8] sm:$0xff]  ;;  %v225_v44 = vld [vmem:[%s15422_s0 + $0x5f0] sm:$0xff] }
 0x17c   :  { %v10227_v23 = vpop.permute.xlu1 %919  ;;  %v10229_v28 = vpop.permute.xlu0 %914 }
 0x17d   :  { %15519 = vst [vmem:[#allocation83_spill] sm:$0xff] %v10227_v23  ;;  %15520 = vst [vmem:[#allocation84_spill] sm:$0xff] %v10229_v28  ;;  %1239 = vperm.xlu1 %9057, %v224_v39   ;;  %1234 = vperm.xlu0 %9056, %v223_v12   ;;  %v228_v28 = vld [vmem:[%s15422_s0 + $0x608] sm:$0xff]  ;;  %v227_v39 = vld [vmem:[%s15422_s0 + $0x600] sm:$0xff] }
 0x180   :  { %v10237_v55 = vpop.permute.xlu1 %929  ;;  %v10239_v60 = vpop.permute.xlu0 %924 }
 0x181   :  { %15521 = vst [vmem:[#allocation85_spill] sm:$0xff] %v10237_v55  ;;  %15522 = vst [vmem:[#allocation86_spill] sm:$0xff] %v10239_v60  ;;  %1249 = vperm.xlu1 %9057, %v226_v3   ;;  %1244 = vperm.xlu0 %9056, %v225_v44   ;;  %v230_v60 = vld [vmem:[%s15422_s0 + $0x618] sm:$0xff]  ;;  %v229_v3 = vld [vmem:[%s15422_s0 + $0x610] sm:$0xff] }
 0x184   :  { %v10247_v12 = vpop.permute.xlu1 %939  ;;  %v10249_v23 = vpop.permute.xlu0 %934 }
 0x185   :  { %15523 = vst [vmem:[#allocation87_spill] sm:$0xff] %v10247_v12  ;;  %15524 = vst [vmem:[#allocation88_spill] sm:$0xff] %v10249_v23  ;;  %1259 = vperm.xlu1 %9057, %v228_v28   ;;  %1254 = vperm.xlu0 %9056, %v227_v39   ;;  %v232_v23 = vld [vmem:[%s15422_s0 + $0x628] sm:$0xff]  ;;  %v231_v28 = vld [vmem:[%s15422_s0 + $0x620] sm:$0xff] }
 0x188   :  { %v10257_v44 = vpop.permute.xlu1 %949  ;;  %v10259_v55 = vpop.permute.xlu0 %944 }
 0x189   :  { %15525 = vst [vmem:[#allocation89_spill] sm:$0xff] %v10257_v44  ;;  %15526 = vst [vmem:[#allocation90_spill] sm:$0xff] %v10259_v55  ;;  %1269 = vperm.xlu1 %9057, %v230_v60   ;;  %1264 = vperm.xlu0 %9056, %v229_v3   ;;  %v234_v55 = vld [vmem:[%s15422_s0 + $0x638] sm:$0xff]  ;;  %v233_v60 = vld [vmem:[%s15422_s0 + $0x630] sm:$0xff] }
 0x18c   :  { %v10267_v39 = vpop.permute.xlu1 %959  ;;  %v10269_v12 = vpop.permute.xlu0 %954 }
 0x18d   :  { %15527 = vst [vmem:[#allocation91_spill] sm:$0xff] %v10267_v39  ;;  %15528 = vst [vmem:[#allocation92_spill] sm:$0xff] %v10269_v12  ;;  %1279 = vperm.xlu1 %9057, %v232_v23   ;;  %1274 = vperm.xlu0 %9056, %v231_v28   ;;  %v236_v12 = vld [vmem:[%s15422_s0 + $0x648] sm:$0xff]  ;;  %v235_v23 = vld [vmem:[%s15422_s0 + $0x640] sm:$0xff] }
 0x190   :  { %v10277_v3 = vpop.permute.xlu1 %969  ;;  %v10279_v44 = vpop.permute.xlu0 %964 }
 0x191   :  { %15529 = vst [vmem:[#allocation93_spill] sm:$0xff] %v10277_v3  ;;  %15530 = vst [vmem:[#allocation94_spill] sm:$0xff] %v10279_v44  ;;  %1289 = vperm.xlu1 %9057, %v234_v55   ;;  %1284 = vperm.xlu0 %9056, %v233_v60   ;;  %v238_v44 = vld [vmem:[%s15422_s0 + $0x658] sm:$0xff]  ;;  %v237_v55 = vld [vmem:[%s15422_s0 + $0x650] sm:$0xff] }
 0x194   :  { %v10287_v28 = vpop.permute.xlu1 %979  ;;  %v10289_v39 = vpop.permute.xlu0 %974 }
 0x195   :  { %15531 = vst [vmem:[#allocation95_spill] sm:$0xff] %v10287_v28  ;;  %15532 = vst [vmem:[#allocation96_spill] sm:$0xff] %v10289_v39  ;;  %1299 = vperm.xlu1 %9057, %v236_v12   ;;  %1294 = vperm.xlu0 %9056, %v235_v23   ;;  %v240_v28 = vld [vmem:[%s15422_s0 + $0x668] sm:$0xff]  ;;  %v239_v12 = vld [vmem:[%s15422_s0 + $0x660] sm:$0xff] }
 0x198   :  { %v10297_v60 = vpop.permute.xlu1 %989  ;;  %v10299_v3 = vpop.permute.xlu0 %984 }
 0x199   :  { %15533 = vst [vmem:[#allocation97_spill] sm:$0xff] %v10297_v60  ;;  %15534 = vst [vmem:[#allocation98_spill] sm:$0xff] %v10299_v3  ;;  %1309 = vperm.xlu1 %9057, %v238_v44   ;;  %1304 = vperm.xlu0 %9056, %v237_v55   ;;  %v242_v60 = vld [vmem:[%s15422_s0 + $0x678] sm:$0xff]  ;;  %v241_v44 = vld [vmem:[%s15422_s0 + $0x670] sm:$0xff] }
 0x19c   :  { %v10307_v23 = vpop.permute.xlu1 %999  ;;  %v10309_v39 = vpop.permute.xlu0 %994 }
 0x19d   :  { %15535 = vst [vmem:[#allocation99_spill] sm:$0xff] %v10307_v23  ;;  %15536 = vst [vmem:[#allocation100_spill] sm:$0xff] %v10309_v39  ;;  %1319 = vperm.xlu1 %9057, %v240_v28   ;;  %1314 = vperm.xlu0 %9056, %v239_v12   ;;  %v244_v23 = vld [vmem:[%s15422_s0 + $0x688] sm:$0xff]  ;;  %v243_v28 = vld [vmem:[%s15422_s0 + $0x680] sm:$0xff] }
 0x1a0   :  { %v10317_v55 = vpop.permute.xlu1 %1009  ;;  %v10319_v3 = vpop.permute.xlu0 %1004 }
 0x1a1   :  { %15537 = vst [vmem:[#allocation101_spill] sm:$0xff] %v10317_v55  ;;  %15538 = vst [vmem:[#allocation102_spill] sm:$0xff] %v10319_v3  ;;  %1329 = vperm.xlu1 %9057, %v242_v60   ;;  %1324 = vperm.xlu0 %9056, %v241_v44   ;;  %v246_v55 = vld [vmem:[%s15422_s0 + $0x698] sm:$0xff]  ;;  %v245_v60 = vld [vmem:[%s15422_s0 + $0x690] sm:$0xff] }
 0x1a4   :  { %v10327_v12 = vpop.permute.xlu1 %1019  ;;  %v10329_v39 = vpop.permute.xlu0 %1014 }
 0x1a5   :  { %15539 = vst [vmem:[#allocation103_spill] sm:$0xff] %v10327_v12  ;;  %15540 = vst [vmem:[#allocation104_spill] sm:$0xff] %v10329_v39  ;;  %1339 = vperm.xlu1 %9057, %v244_v23   ;;  %1334 = vperm.xlu0 %9056, %v243_v28   ;;  %v248_v12 = vld [vmem:[%s15422_s0 + $0x6a8] sm:$0xff]  ;;  %v247_v23 = vld [vmem:[%s15422_s0 + $0x6a0] sm:$0xff] }
 0x1a8   :  { %v10337_v44 = vpop.permute.xlu1 %1029  ;;  %v10339_v3 = vpop.permute.xlu0 %1024 }
 0x1a9   :  { %15541 = vst [vmem:[#allocation105_spill] sm:$0xff] %v10337_v44  ;;  %15542 = vst [vmem:[#allocation106_spill] sm:$0xff] %v10339_v3  ;;  %1349 = vperm.xlu1 %9057, %v246_v55   ;;  %1344 = vperm.xlu0 %9056, %v245_v60   ;;  %v250_v44 = vld [vmem:[%s15422_s0 + $0x6b8] sm:$0xff]  ;;  %v249_v55 = vld [vmem:[%s15422_s0 + $0x6b0] sm:$0xff] }
 0x1ac   :  { %v10347_v28 = vpop.permute.xlu1 %1039  ;;  %v10349_v39 = vpop.permute.xlu0 %1034 }
 0x1ad   :  { %15543 = vst [vmem:[#allocation107_spill] sm:$0xff] %v10347_v28  ;;  %15544 = vst [vmem:[#allocation108_spill] sm:$0xff] %v10349_v39  ;;  %1359 = vperm.xlu1 %9057, %v248_v12   ;;  %1354 = vperm.xlu0 %9056, %v247_v23   ;;  %v252_v28 = vld [vmem:[%s15422_s0 + $0x6c8] sm:$0xff]  ;;  %v251_v12 = vld [vmem:[%s15422_s0 + $0x6c0] sm:$0xff] }
 0x1b0   :  { %v10357_v60 = vpop.permute.xlu1 %1049  ;;  %v10359_v3 = vpop.permute.xlu0 %1044 }
 0x1b1   :  { %15545 = vst [vmem:[#allocation109_spill] sm:$0xff] %v10357_v60  ;;  %15546 = vst [vmem:[#allocation110_spill] sm:$0xff] %v10359_v3  ;;  %1369 = vperm.xlu1 %9057, %v250_v44   ;;  %1364 = vperm.xlu0 %9056, %v249_v55   ;;  %v254_v3 = vld [vmem:[%s15422_s0 + $0x6d8] sm:$0xff]  ;;  %v253_v44 = vld [vmem:[%s15422_s0 + $0x6d0] sm:$0xff] }
 0x1b4   :  { %v10367_v23 = vpop.permute.xlu1 %1059  ;;  %v10369_v39 = vpop.permute.xlu0 %1054 }
 0x1b5   :  { %15547 = vst [vmem:[#allocation111_spill] sm:$0xff] %v10367_v23  ;;  %15548 = vst [vmem:[#allocation112_spill] sm:$0xff] %v10369_v39  ;;  %1379 = vperm.xlu1 %9057, %v252_v28   ;;  %1374 = vperm.xlu0 %9056, %v251_v12   ;;  %v256_v39 = vld [vmem:[%s15422_s0 + $0x6e8] sm:$0xff]  ;;  %v255_v28 = vld [vmem:[%s15422_s0 + $0x6e0] sm:$0xff] }
 0x1b8   :  { %v10377_v55 = vpop.permute.xlu1 %1069  ;;  %v10379_v60 = vpop.permute.xlu0 %1064 }
 0x1b9   :  { %15549 = vst [vmem:[#allocation113_spill] sm:$0xff] %v10377_v55  ;;  %15550 = vst [vmem:[#allocation114_spill] sm:$0xff] %v10379_v60  ;;  %1389 = vperm.xlu1 %9057, %v254_v3   ;;  %1384 = vperm.xlu0 %9056, %v253_v44   ;;  %v258_v60 = vld [vmem:[%s15422_s0 + $0x6f8] sm:$0xff]  ;;  %v257_v3 = vld [vmem:[%s15422_s0 + $0x6f0] sm:$0xff] }
 0x1bc   :  { %v10387_v12 = vpop.permute.xlu1 %1079  ;;  %v10389_v23 = vpop.permute.xlu0 %1074 }
 0x1bd   :  { %15551 = vst [vmem:[#allocation115_spill] sm:$0xff] %v10387_v12  ;;  %15552 = vst [vmem:[#allocation116_spill] sm:$0xff] %v10389_v23  ;;  %1399 = vperm.xlu1 %9057, %v256_v39   ;;  %1394 = vperm.xlu0 %9056, %v255_v28   ;;  %v260_v23 = vld [vmem:[%s15422_s0 + $0x708] sm:$0xff]  ;;  %v259_v39 = vld [vmem:[%s15422_s0 + $0x700] sm:$0xff] }
 0x1c0   :  { %v10397_v44 = vpop.permute.xlu1 %1089  ;;  %v10399_v55 = vpop.permute.xlu0 %1084 }
 0x1c1   :  { %15553 = vst [vmem:[#allocation117_spill] sm:$0xff] %v10397_v44  ;;  %15554 = vst [vmem:[#allocation118_spill] sm:$0xff] %v10399_v55  ;;  %1409 = vperm.xlu1 %9057, %v258_v60   ;;  %1404 = vperm.xlu0 %9056, %v257_v3   ;;  %v262_v55 = vld [vmem:[%s15422_s0 + $0x718] sm:$0xff]  ;;  %v261_v60 = vld [vmem:[%s15422_s0 + $0x710] sm:$0xff] }
 0x1c4   :  { %v10407_v28 = vpop.permute.xlu1 %1099  ;;  %v10409_v12 = vpop.permute.xlu0 %1094 }
 0x1c5   :  { %15555 = vst [vmem:[#allocation119_spill] sm:$0xff] %v10407_v28  ;;  %15556 = vst [vmem:[#allocation120_spill] sm:$0xff] %v10409_v12  ;;  %1419 = vperm.xlu1 %9057, %v260_v23   ;;  %1414 = vperm.xlu0 %9056, %v259_v39   ;;  %v264_v12 = vld [vmem:[%s15422_s0 + $0x728] sm:$0xff]  ;;  %v263_v23 = vld [vmem:[%s15422_s0 + $0x720] sm:$0xff] }
 0x1c8   :  { %v10417_v3 = vpop.permute.xlu1 %1109  ;;  %v10419_v44 = vpop.permute.xlu0 %1104 }
 0x1c9   :  { %15557 = vst [vmem:[#allocation121_spill] sm:$0xff] %v10417_v3  ;;  %15558 = vst [vmem:[#allocation122_spill] sm:$0xff] %v10419_v44  ;;  %1429 = vperm.xlu1 %9057, %v262_v55   ;;  %1424 = vperm.xlu0 %9056, %v261_v60   ;;  %v266_v44 = vld [vmem:[%s15422_s0 + $0x738] sm:$0xff]  ;;  %v265_v55 = vld [vmem:[%s15422_s0 + $0x730] sm:$0xff] }
 0x1cc   :  { %v10427_v39 = vpop.permute.xlu1 %1119  ;;  %v10429_v28 = vpop.permute.xlu0 %1114 }
 0x1cd   :  { %15559 = vst [vmem:[#allocation123_spill] sm:$0xff] %v10427_v39  ;;  %15560 = vst [vmem:[#allocation124_spill] sm:$0xff] %v10429_v28  ;;  %1439 = vperm.xlu1 %9057, %v264_v12   ;;  %1434 = vperm.xlu0 %9056, %v263_v23   ;;  %v268_v28 = vld [vmem:[%s15422_s0 + $0x748] sm:$0xff]  ;;  %v267_v12 = vld [vmem:[%s15422_s0 + $0x740] sm:$0xff] }
 0x1d0   :  { %v10437_v60 = vpop.permute.xlu1 %1129  ;;  %v10439_v3 = vpop.permute.xlu0 %1124 }
 0x1d1   :  { %15561 = vst [vmem:[#allocation125_spill] sm:$0xff] %v10437_v60  ;;  %15562 = vst [vmem:[#allocation126_spill] sm:$0xff] %v10439_v3  ;;  %1449 = vperm.xlu1 %9057, %v266_v44   ;;  %1444 = vperm.xlu0 %9056, %v265_v55   ;;  %v270_v3 = vld [vmem:[%s15422_s0 + $0x758] sm:$0xff]  ;;  %v269_v44 = vld [vmem:[%s15422_s0 + $0x750] sm:$0xff] }
 0x1d4   :  { %v10447_v23 = vpop.permute.xlu1 %1139  ;;  %v10449_v39 = vpop.permute.xlu0 %1134 }
 0x1d5   :  { %15563 = vst [vmem:[#allocation127_spill] sm:$0xff] %v10447_v23  ;;  %15564 = vst [vmem:[#allocation128_spill] sm:$0xff] %v10449_v39  ;;  %1459 = vperm.xlu1 %9057, %v268_v28   ;;  %1454 = vperm.xlu0 %9056, %v267_v12   ;;  %v272_v39 = vld [vmem:[%s15422_s0 + $0x768] sm:$0xff]  ;;  %v271_v28 = vld [vmem:[%s15422_s0 + $0x760] sm:$0xff] }
 0x1d8   :  { %v10457_v55 = vpop.permute.xlu1 %1149  ;;  %v10459_v60 = vpop.permute.xlu0 %1144 }
 0x1d9   :  { %15565 = vst [vmem:[#allocation129_spill] sm:$0xff] %v10457_v55  ;;  %15566 = vst [vmem:[#allocation130_spill] sm:$0xff] %v10459_v60  ;;  %1469 = vperm.xlu1 %9057, %v270_v3   ;;  %1464 = vperm.xlu0 %9056, %v269_v44   ;;  %v274_v60 = vld [vmem:[%s15422_s0 + $0x778] sm:$0xff]  ;;  %v273_v3 = vld [vmem:[%s15422_s0 + $0x770] sm:$0xff] }
 0x1dc   :  { %v10467_v12 = vpop.permute.xlu1 %1159  ;;  %v10469_v23 = vpop.permute.xlu0 %1154 }
 0x1dd   :  { %15567 = vst [vmem:[#allocation131_spill] sm:$0xff] %v10467_v12  ;;  %15568 = vst [vmem:[#allocation132_spill] sm:$0xff] %v10469_v23  ;;  %1479 = vperm.xlu1 %9057, %v272_v39   ;;  %1474 = vperm.xlu0 %9056, %v271_v28   ;;  %v276_v23 = vld [vmem:[%s15422_s0 + $0x788] sm:$0xff]  ;;  %v275_v39 = vld [vmem:[%s15422_s0 + $0x780] sm:$0xff] }
 0x1e0   :  { %v10477_v44 = vpop.permute.xlu1 %1169  ;;  %v10479_v55 = vpop.permute.xlu0 %1164 }
 0x1e1   :  { %15569 = vst [vmem:[#allocation133_spill] sm:$0xff] %v10477_v44  ;;  %15570 = vst [vmem:[#allocation134_spill] sm:$0xff] %v10479_v55  ;;  %1489 = vperm.xlu1 %9057, %v274_v60   ;;  %1484 = vperm.xlu0 %9056, %v273_v3   ;;  %v278_v55 = vld [vmem:[%s15422_s0 + $0x798] sm:$0xff]  ;;  %v277_v60 = vld [vmem:[%s15422_s0 + $0x790] sm:$0xff] }
 0x1e4   :  { %v10487_v28 = vpop.permute.xlu1 %1179  ;;  %v10489_v12 = vpop.permute.xlu0 %1174 }
 0x1e5   :  { %15571 = vst [vmem:[#allocation135_spill] sm:$0xff] %v10487_v28  ;;  %15572 = vst [vmem:[#allocation136_spill] sm:$0xff] %v10489_v12  ;;  %1499 = vperm.xlu1 %9057, %v276_v23   ;;  %1494 = vperm.xlu0 %9056, %v275_v39   ;;  %v280_v12 = vld [vmem:[%s15422_s0 + $0x7a8] sm:$0xff]  ;;  %v279_v23 = vld [vmem:[%s15422_s0 + $0x7a0] sm:$0xff] }
 0x1e8   :  { %v10497_v3 = vpop.permute.xlu1 %1189  ;;  %v10499_v44 = vpop.permute.xlu0 %1184 }
 0x1e9   :  { %15573 = vst [vmem:[#allocation137_spill] sm:$0xff] %v10497_v3  ;;  %15574 = vst [vmem:[#allocation138_spill] sm:$0xff] %v10499_v44  ;;  %1509 = vperm.xlu1 %9057, %v278_v55   ;;  %1504 = vperm.xlu0 %9056, %v277_v60   ;;  %v282_v44 = vld [vmem:[%s15422_s0 + $0x7b8] sm:$0xff]  ;;  %v281_v55 = vld [vmem:[%s15422_s0 + $0x7b0] sm:$0xff] }
 0x1ec   :  { %v10507_v39 = vpop.permute.xlu1 %1199  ;;  %v10509_v28 = vpop.permute.xlu0 %1194 }
 0x1ed   :  { %15575 = vst [vmem:[#allocation139_spill] sm:$0xff] %v10507_v39  ;;  %15576 = vst [vmem:[#allocation140_spill] sm:$0xff] %v10509_v28  ;;  %1519 = vperm.xlu1 %9057, %v280_v12   ;;  %1514 = vperm.xlu0 %9056, %v279_v23   ;;  %v284_v28 = vld [vmem:[%s15422_s0 + $0x7c8] sm:$0xff]  ;;  %v283_v12 = vld [vmem:[%s15422_s0 + $0x7c0] sm:$0xff] }
 0x1f0   :  { %v10517_v60 = vpop.permute.xlu1 %1209  ;;  %v10519_v3 = vpop.permute.xlu0 %1204 }
 0x1f1   :  { %15577 = vst [vmem:[#allocation141_spill] sm:$0xff] %v10517_v60  ;;  %15578 = vst [vmem:[#allocation142_spill] sm:$0xff] %v10519_v3  ;;  %1529 = vperm.xlu1 %9057, %v282_v44   ;;  %1524 = vperm.xlu0 %9056, %v281_v55   ;;  %v286_v3 = vld [vmem:[%s15422_s0 + $0x7d8] sm:$0xff]  ;;  %v285_v44 = vld [vmem:[%s15422_s0 + $0x7d0] sm:$0xff] }
 0x1f4   :  { %v10527_v23 = vpop.permute.xlu1 %1219  ;;  %v10529_v39 = vpop.permute.xlu0 %1214 }
 0x1f5   :  { %15579 = vst [vmem:[#allocation143_spill] sm:$0xff] %v10527_v23  ;;  %15580 = vst [vmem:[#allocation144_spill] sm:$0xff] %v10529_v39  ;;  %1539 = vperm.xlu1 %9057, %v284_v28   ;;  %1534 = vperm.xlu0 %9056, %v283_v12   ;;  %v288_v39 = vld [vmem:[%s15422_s0 + $0x7e8] sm:$0xff]  ;;  %v287_v28 = vld [vmem:[%s15422_s0 + $0x7e0] sm:$0xff] }
 0x1f8   :  { %v10537_v55 = vpop.permute.xlu1 %1229  ;;  %v10539_v60 = vpop.permute.xlu0 %1224 }
 0x1f9   :  { %15581 = vst [vmem:[#allocation145_spill] sm:$0xff] %v10537_v55  ;;  %15582 = vst [vmem:[#allocation146_spill] sm:$0xff] %v10539_v60  ;;  %1549 = vperm.xlu1 %9057, %v286_v3   ;;  %1544 = vperm.xlu0 %9056, %v285_v44   ;;  %v3891_v55 = vld [vmem:[%s15425_s3] sm:$0xff]  ;;  %v3892_v3 = vld [vmem:[%s15425_s3 + $0x8] sm:$0xff] }
 0x1fa   :  { %v9013_v44 = vpack.c.bf16 %v3892_v3, %v3891_v55  ;;  %v290_v60 = vld [vmem:[%s15422_s0 + $0x7f8] sm:$0xff] }
 0x1fb   :  { %v3894_v55 = vld [vmem:[%s15425_s3 + $0x18] sm:$0xff] }
 0x1fc   :  { %v10547_v12 = vpop.permute.xlu1 %1239  ;;  %v10549_v23 = vpop.permute.xlu0 %1234  ;;  %9014 = vmatprep.subr.bf16.mxu0 %v9013_v44  ;;  %9045 = vmatprep.subr.bf16.mxu1 %v9013_v44 }
 0x1fd   :  { %15583 = vst [vmem:[#allocation147_spill] sm:$0xff] %v10547_v12  ;;  %15584 = vst [vmem:[#allocation148_spill] sm:$0xff] %v10549_v23  ;;  %1559 = vperm.xlu1 %9057, %v288_v39   ;;  %1554 = vperm.xlu0 %9056, %v287_v28   ;;  %v289_v12 = vld [vmem:[%s15422_s0 + $0x7f0] sm:$0xff] }
 0x1fe   :  { %9016 = vmatpush3.bf16.msra.mxu0 %v9013_v44  ;;  %v3893_v39 = vld [vmem:[%s15425_s3 + $0x10] sm:$0xff]  ;;  %9049 = vmatpush3.bf16.msra.mxu1 %v9013_v44  ;;  %v9352_v44 = vmov 1  }
 0x1ff   :  { %v9017_v28 = vpack.c.bf16 %v3894_v55, %v3893_v39  ;;  %v9062_v39 = vld [vmem:[%s15422_s0] sm:$0xff] }
 0x200   :  { %v10563_v23 = vpop.permute.xlu1 %1249  ;;  %v10565_v7 = vpop.permute.xlu0 %1244 }
 0x201   :  { %15585 = vst [vmem:[#allocation149_spill] sm:$0xff] %v10563_v23  ;;  %15586 = vst [vmem:[#allocation150_spill] sm:$0xff] %v10565_v7  ;;  %1569 = vperm.xlu1 %9057, %v290_v60   ;;  %1564 = vperm.xlu0 %9056, %v289_v12   ;;  %v3895_v7 = vld [vmem:[%s15425_s3 + $0x20] sm:$0xff]  ;;  %v9061_v12 = vld [vmem:[%s15422_s0 + $0x8] sm:$0xff] }
 0x202   :  { %9018 = vmatprep.subr.bf16.mxu0 %v9017_v28  ;;  %9046 = vmatprep.subr.bf16.mxu1 %v9017_v28  ;;  %v9021_v60 = vpack.c.bf16 %v3896_v63, %v3895_v7  ;;  %v3897_v63 = vld [vmem:[%s15425_s3 + $0x30] sm:$0xff]  ;;  %v3898_v7 = vld [vmem:[%s15425_s3 + $0x38] sm:$0xff] }
 0x203   :  { %9020 = vmatpush3.bf16.msra.mxu0 %v9017_v28  ;;  %9050 = vmatpush3.bf16.msra.mxu1 %v9017_v28  ;;  %v9025_v28 = vpack.c.bf16 %v3898_v7, %v3897_v63  ;;  %v9066_v63 = vld [vmem:[%s15422_s0 + $0x28] sm:$0xff] }
 0x204   :  { %v10573_v3 = vpop.permute.xlu1 %1259  ;;  %v10575_v23 = vpop.permute.xlu0 %1254  ;;  %9022 = vmatprep.subr.bf16.mxu0 %v9021_v60  ;;  %9047 = vmatprep.subr.bf16.mxu1 %v9021_v60 }
 0x205   :  { %15587 = vst [vmem:[#allocation151_spill] sm:$0xff] %v10573_v3  ;;  %15588 = vst [vmem:[#allocation152_spill] sm:$0xff] %v10575_v23  ;;  %9059 = vset.pattern.permute.xlu1 %v9352_v44  ;;  %9058 = vset.pattern.permute.xlu0 %v9352_v44  ;;  %v9063_v44 = vld [vmem:[%s15422_s0 + $0x10] sm:$0xff] }
 0x206   :  { %1837 = vperm.xlu1 %9059, %v9061_v12   ;;  %1833 = vperm.xlu0 %9058, %v9062_v39   ;;  %v9064_v12 = vld [vmem:[%s15422_s0 + $0x18] sm:$0xff]  ;;  %v9123_v3 = vld [vmem:[%s15422_s0 + $0x1f0] sm:$0xff] }
 0x207   :  { %9024 = vmatpush3.bf16.msra.mxu0 %v9021_v60  ;;  %9051 = vmatpush3.bf16.msra.mxu1 %v9021_v60  ;;  %v9065_v60 = vld [vmem:[%s15422_s0 + $0x20] sm:$0xff] }
 0x208   :  { %v10589_v55 = vpop.permute.xlu1 %1269  ;;  %v10591_v23 = vpop.permute.xlu0 %1264  ;;  %9026 = vmatprep.subr.bf16.mxu0 %v9025_v28  ;;  %9048 = vmatprep.subr.bf16.mxu1 %v9025_v28 }
 0x209   :  { %15589 = vst [vmem:[#allocation153_spill] sm:$0xff] %v10589_v55  ;;  %15590 = vst [vmem:[#allocation154_spill] sm:$0xff] %v10591_v23 }
 0x20a   :  { %1841 = vperm.xlu1 %9059, %v9063_v44   ;;  %1845 = vperm.xlu0 %9058, %v9064_v12   ;;  %v9067_v12 = vld [vmem:[%s15422_s0 + $0x30] sm:$0xff] }
 0x20b   :  { %9028 = vmatpush3.bf16.msra.mxu0 %v9025_v28  ;;  %9052 = vmatpush3.bf16.msra.mxu1 %v9025_v28  ;;  %v9068_v28 = vld [vmem:[%s15422_s0 + $0x38] sm:$0xff] }
 0x20c   :  { %v10605_v39 = vpop.permute.xlu1 %1279  ;;  %v10607_v23 = vpop.permute.xlu0 %1274 }
 0x20d   :  { %15591 = vst [vmem:[#allocation155_spill] sm:$0xff] %v10605_v39  ;;  %15592 = vst [vmem:[#allocation156_spill] sm:$0xff] %v10607_v23  ;;  %v1572_v39 = vlaneseq }
 0x20e   :  { %1849 = vperm.xlu1 %9059, %v9065_v60   ;;  %1853 = vperm.xlu0 %9058, %v9066_v63   ;;  %v9069_v63 = vld [vmem:[%s15422_s0 + $0x40] sm:$0xff] }
 0x210   :  { %v10615_v7 = vpop.permute.xlu1 %1289  ;;  %v10617_v44 = vpop.permute.xlu0 %1284 }
 0x211   :  { %15593 = vst [vmem:[#allocation157_spill] sm:$0xff] %v10615_v7  ;;  %15594 = vst [vmem:[#allocation158_spill] sm:$0xff] %v10617_v44  ;;  %v9070_v44 = vld [vmem:[%s15422_s0 + $0x48] sm:$0xff] }
 0x212   :  { %1857 = vperm.xlu1 %9059, %v9067_v12   ;;  %1861 = vperm.xlu0 %9058, %v9068_v28   ;;  %v9071_v28 = vld [vmem:[%s15422_s0 + $0x50] sm:$0xff] }
 0x214   :  { %v10625_v60 = vpop.permute.xlu1 %1299  ;;  %v10627_v23 = vpop.permute.xlu0 %1294 }
 0x215   :  { %15595 = vst [vmem:[#allocation159_spill] sm:$0xff] %v10625_v60  ;;  %15596 = vst [vmem:[#allocation160_spill] sm:$0xff] %v10627_v23  ;;  %v9072_v23 = vld [vmem:[%s15422_s0 + $0x58] sm:$0xff] }
 0x216   :  { %1865 = vperm.xlu1 %9059, %v9069_v63   ;;  %1869 = vperm.xlu0 %9058, %v9070_v44   ;;  %v9073_v44 = vld [vmem:[%s15422_s0 + $0x60] sm:$0xff] }
 0x218   :  { %v10635_v12 = vpop.permute.xlu1 %1309  ;;  %v10637_v7 = vpop.permute.xlu0 %1304 }
 0x219   :  { %15597 = vst [vmem:[#allocation161_spill] sm:$0xff] %v10635_v12  ;;  %15598 = vst [vmem:[#allocation162_spill] sm:$0xff] %v10637_v7  ;;  %v9074_v7 = vld [vmem:[%s15422_s0 + $0x68] sm:$0xff] }
 0x21a   :  { %1873 = vperm.xlu1 %9059, %v9071_v28   ;;  %1877 = vperm.xlu0 %9058, %v9072_v23   ;;  %v9075_v23 = vld [vmem:[%s15422_s0 + $0x70] sm:$0xff] }
 0x21c   :  { %v10645_v63 = vpop.permute.xlu1 %1319  ;;  %v10647_v60 = vpop.permute.xlu0 %1314 }
 0x21d   :  { %15599 = vst [vmem:[#allocation163_spill] sm:$0xff] %v10645_v63  ;;  %15600 = vst [vmem:[#allocation164_spill] sm:$0xff] %v10647_v60  ;;  %v9076_v60 = vld [vmem:[%s15422_s0 + $0x78] sm:$0xff] }
 0x21e   :  { %1881 = vperm.xlu1 %9059, %v9073_v44   ;;  %1885 = vperm.xlu0 %9058, %v9074_v7   ;;  %v9077_v7 = vld [vmem:[%s15422_s0 + $0x80] sm:$0xff] }
 0x220   :  { %v10655_v28 = vpop.permute.xlu1 %1329  ;;  %v10657_v12 = vpop.permute.xlu0 %1324 }
 0x221   :  { %15601 = vst [vmem:[#allocation165_spill] sm:$0xff] %v10655_v28  ;;  %15602 = vst [vmem:[#allocation166_spill] sm:$0xff] %v10657_v12  ;;  %v9078_v12 = vld [vmem:[%s15422_s0 + $0x88] sm:$0xff] }
 0x222   :  { %1889 = vperm.xlu1 %9059, %v9075_v23   ;;  %1893 = vperm.xlu0 %9058, %v9076_v60   ;;  %v9079_v60 = vld [vmem:[%s15422_s0 + $0x90] sm:$0xff] }
 0x224   :  { %v10665_v44 = vpop.permute.xlu1 %1339  ;;  %v10667_v63 = vpop.permute.xlu0 %1334 }
 0x225   :  { %15603 = vst [vmem:[#allocation167_spill] sm:$0xff] %v10665_v44  ;;  %15604 = vst [vmem:[#allocation168_spill] sm:$0xff] %v10667_v63  ;;  %v9080_v63 = vld [vmem:[%s15422_s0 + $0x98] sm:$0xff] }
 0x226   :  { %1897 = vperm.xlu1 %9059, %v9077_v7   ;;  %1901 = vperm.xlu0 %9058, %v9078_v12   ;;  %v9081_v12 = vld [vmem:[%s15422_s0 + $0xa0] sm:$0xff] }
 0x228   :  { %v10675_v23 = vpop.permute.xlu1 %1349  ;;  %v10677_v28 = vpop.permute.xlu0 %1344 }
 0x229   :  { %15605 = vst [vmem:[#allocation169_spill] sm:$0xff] %v10675_v23  ;;  %15606 = vst [vmem:[#allocation170_spill] sm:$0xff] %v10677_v28  ;;  %v9082_v28 = vld [vmem:[%s15422_s0 + $0xa8] sm:$0xff] }
 0x22a   :  { %1905 = vperm.xlu1 %9059, %v9079_v60   ;;  %1909 = vperm.xlu0 %9058, %v9080_v63   ;;  %v9083_v63 = vld [vmem:[%s15422_s0 + $0xb0] sm:$0xff] }
 0x22c   :  { %v10685_v7 = vpop.permute.xlu1 %1359  ;;  %v10687_v44 = vpop.permute.xlu0 %1354 }
 0x22d   :  { %15607 = vst [vmem:[#allocation171_spill] sm:$0xff] %v10685_v7  ;;  %15608 = vst [vmem:[#allocation172_spill] sm:$0xff] %v10687_v44  ;;  %v9084_v44 = vld [vmem:[%s15422_s0 + $0xb8] sm:$0xff] }
 0x22e   :  { %1913 = vperm.xlu1 %9059, %v9081_v12   ;;  %1917 = vperm.xlu0 %9058, %v9082_v28   ;;  %v9085_v28 = vld [vmem:[%s15422_s0 + $0xc0] sm:$0xff] }
 0x230   :  { %v10695_v60 = vpop.permute.xlu1 %1369  ;;  %v10697_v23 = vpop.permute.xlu0 %1364 }
 0x231   :  { %15609 = vst [vmem:[#allocation173_spill] sm:$0xff] %v10695_v60  ;;  %15610 = vst [vmem:[#allocation174_spill] sm:$0xff] %v10697_v23  ;;  %v9086_v23 = vld [vmem:[%s15422_s0 + $0xc8] sm:$0xff] }
 0x232   :  { %1921 = vperm.xlu1 %9059, %v9083_v63   ;;  %1925 = vperm.xlu0 %9058, %v9084_v44   ;;  %v9087_v44 = vld [vmem:[%s15422_s0 + $0xd0] sm:$0xff] }
 0x234   :  { %v10705_v12 = vpop.permute.xlu1 %1379  ;;  %v10707_v7 = vpop.permute.xlu0 %1374 }
 0x235   :  { %15611 = vst [vmem:[#allocation175_spill] sm:$0xff] %v10705_v12  ;;  %15612 = vst [vmem:[#allocation176_spill] sm:$0xff] %v10707_v7  ;;  %v9088_v7 = vld [vmem:[%s15422_s0 + $0xd8] sm:$0xff] }
 0x236   :  { %1929 = vperm.xlu1 %9059, %v9085_v28   ;;  %1933 = vperm.xlu0 %9058, %v9086_v23   ;;  %v9089_v23 = vld [vmem:[%s15422_s0 + $0xe0] sm:$0xff] }
 0x238   :  { %v10715_v63 = vpop.permute.xlu1 %1389  ;;  %v10717_v60 = vpop.permute.xlu0 %1384 }
 0x239   :  { %15613 = vst [vmem:[#allocation177_spill] sm:$0xff] %v10715_v63  ;;  %15614 = vst [vmem:[#allocation178_spill] sm:$0xff] %v10717_v60  ;;  %v9090_v60 = vld [vmem:[%s15422_s0 + $0xe8] sm:$0xff] }
 0x23a   :  { %1937 = vperm.xlu1 %9059, %v9087_v44   ;;  %1941 = vperm.xlu0 %9058, %v9088_v7   ;;  %v9091_v7 = vld [vmem:[%s15422_s0 + $0xf0] sm:$0xff] }
 0x23c   :  { %v10725_v28 = vpop.permute.xlu1 %1399  ;;  %v10727_v12 = vpop.permute.xlu0 %1394 }
 0x23d   :  { %15615 = vst [vmem:[#allocation179_spill] sm:$0xff] %v10725_v28  ;;  %15616 = vst [vmem:[#allocation180_spill] sm:$0xff] %v10727_v12  ;;  %v9092_v12 = vld [vmem:[%s15422_s0 + $0xf8] sm:$0xff] }
 0x23e   :  { %1945 = vperm.xlu1 %9059, %v9089_v23   ;;  %1949 = vperm.xlu0 %9058, %v9090_v60   ;;  %v9093_v60 = vld [vmem:[%s15422_s0 + $0x100] sm:$0xff] }
 0x240   :  { %v10735_v44 = vpop.permute.xlu1 %1409  ;;  %v10737_v63 = vpop.permute.xlu0 %1404 }
 0x241   :  { %15617 = vst [vmem:[#allocation181_spill] sm:$0xff] %v10735_v44  ;;  %15618 = vst [vmem:[#allocation182_spill] sm:$0xff] %v10737_v63  ;;  %v9094_v63 = vld [vmem:[%s15422_s0 + $0x108] sm:$0xff] }
 0x242   :  { %1953 = vperm.xlu1 %9059, %v9091_v7   ;;  %1957 = vperm.xlu0 %9058, %v9092_v12   ;;  %v9095_v12 = vld [vmem:[%s15422_s0 + $0x110] sm:$0xff] }
 0x244   :  { %v10745_v23 = vpop.permute.xlu1 %1419  ;;  %v10747_v28 = vpop.permute.xlu0 %1414 }
 0x245   :  { %15619 = vst [vmem:[#allocation183_spill] sm:$0xff] %v10745_v23  ;;  %15620 = vst [vmem:[#allocation184_spill] sm:$0xff] %v10747_v28  ;;  %v9096_v28 = vld [vmem:[%s15422_s0 + $0x118] sm:$0xff] }
 0x246   :  { %1961 = vperm.xlu1 %9059, %v9093_v60   ;;  %1965 = vperm.xlu0 %9058, %v9094_v63   ;;  %v9097_v63 = vld [vmem:[%s15422_s0 + $0x120] sm:$0xff] }
 0x248   :  { %v10755_v7 = vpop.permute.xlu1 %1429  ;;  %v10757_v44 = vpop.permute.xlu0 %1424 }
 0x249   :  { %15621 = vst [vmem:[#allocation185_spill] sm:$0xff] %v10755_v7  ;;  %15622 = vst [vmem:[#allocation186_spill] sm:$0xff] %v10757_v44  ;;  %v9098_v44 = vld [vmem:[%s15422_s0 + $0x128] sm:$0xff] }
 0x24a   :  { %1969 = vperm.xlu1 %9059, %v9095_v12   ;;  %1973 = vperm.xlu0 %9058, %v9096_v28   ;;  %v9099_v28 = vld [vmem:[%s15422_s0 + $0x130] sm:$0xff] }
 0x24c   :  { %v10765_v60 = vpop.permute.xlu1 %1439  ;;  %v10767_v23 = vpop.permute.xlu0 %1434 }
 0x24d   :  { %15623 = vst [vmem:[#allocation187_spill] sm:$0xff] %v10765_v60  ;;  %15624 = vst [vmem:[#allocation188_spill] sm:$0xff] %v10767_v23  ;;  %v9100_v23 = vld [vmem:[%s15422_s0 + $0x138] sm:$0xff] }
 0x24e   :  { %1977 = vperm.xlu1 %9059, %v9097_v63   ;;  %1981 = vperm.xlu0 %9058, %v9098_v44   ;;  %v9101_v44 = vld [vmem:[%s15422_s0 + $0x140] sm:$0xff] }
 0x250   :  { %v10775_v12 = vpop.permute.xlu1 %1449  ;;  %v10777_v7 = vpop.permute.xlu0 %1444 }
 0x251   :  { %15625 = vst [vmem:[#allocation189_spill] sm:$0xff] %v10775_v12  ;;  %15626 = vst [vmem:[#allocation190_spill] sm:$0xff] %v10777_v7  ;;  %v9102_v7 = vld [vmem:[%s15422_s0 + $0x148] sm:$0xff] }
 0x252   :  { %1985 = vperm.xlu1 %9059, %v9099_v28   ;;  %1989 = vperm.xlu0 %9058, %v9100_v23   ;;  %v9103_v23 = vld [vmem:[%s15422_s0 + $0x150] sm:$0xff] }
 0x254   :  { %v10785_v63 = vpop.permute.xlu1 %1459  ;;  %v10787_v60 = vpop.permute.xlu0 %1454 }
 0x255   :  { %15627 = vst [vmem:[#allocation191_spill] sm:$0xff] %v10785_v63  ;;  %15628 = vst [vmem:[#allocation192_spill] sm:$0xff] %v10787_v60  ;;  %v9104_v60 = vld [vmem:[%s15422_s0 + $0x158] sm:$0xff] }
 0x256   :  { %1993 = vperm.xlu1 %9059, %v9101_v44   ;;  %1997 = vperm.xlu0 %9058, %v9102_v7   ;;  %v9105_v7 = vld [vmem:[%s15422_s0 + $0x160] sm:$0xff] }
 0x258   :  { %v10795_v28 = vpop.permute.xlu1 %1469  ;;  %v10797_v12 = vpop.permute.xlu0 %1464 }
 0x259   :  { %15629 = vst [vmem:[#allocation193_spill] sm:$0xff] %v10795_v28  ;;  %15630 = vst [vmem:[#allocation194_spill] sm:$0xff] %v10797_v12  ;;  %v9106_v12 = vld [vmem:[%s15422_s0 + $0x168] sm:$0xff] }
 0x25a   :  { %2001 = vperm.xlu1 %9059, %v9103_v23   ;;  %2005 = vperm.xlu0 %9058, %v9104_v60   ;;  %v9107_v60 = vld [vmem:[%s15422_s0 + $0x170] sm:$0xff] }
 0x25c   :  { %v10805_v44 = vpop.permute.xlu1 %1479  ;;  %v10807_v63 = vpop.permute.xlu0 %1474 }
 0x25d   :  { %15631 = vst [vmem:[#allocation195_spill] sm:$0xff] %v10805_v44  ;;  %15632 = vst [vmem:[#allocation196_spill] sm:$0xff] %v10807_v63  ;;  %v9108_v63 = vld [vmem:[%s15422_s0 + $0x178] sm:$0xff] }
 0x25e   :  { %2009 = vperm.xlu1 %9059, %v9105_v7   ;;  %2013 = vperm.xlu0 %9058, %v9106_v12   ;;  %v9109_v12 = vld [vmem:[%s15422_s0 + $0x180] sm:$0xff] }
 0x260   :  { %v10815_v23 = vpop.permute.xlu1 %1489  ;;  %v10817_v28 = vpop.permute.xlu0 %1484 }
 0x261   :  { %15633 = vst [vmem:[#allocation197_spill] sm:$0xff] %v10815_v23  ;;  %15634 = vst [vmem:[#allocation198_spill] sm:$0xff] %v10817_v28  ;;  %v9110_v28 = vld [vmem:[%s15422_s0 + $0x188] sm:$0xff] }
 0x262   :  { %2017 = vperm.xlu1 %9059, %v9107_v60   ;;  %2021 = vperm.xlu0 %9058, %v9108_v63   ;;  %v9111_v63 = vld [vmem:[%s15422_s0 + $0x190] sm:$0xff] }
 0x264   :  { %v10825_v7 = vpop.permute.xlu1 %1499  ;;  %v10827_v44 = vpop.permute.xlu0 %1494 }
 0x265   :  { %15635 = vst [vmem:[#allocation199_spill] sm:$0xff] %v10825_v7  ;;  %15636 = vst [vmem:[#allocation200_spill] sm:$0xff] %v10827_v44  ;;  %v9112_v44 = vld [vmem:[%s15422_s0 + $0x198] sm:$0xff] }
 0x266   :  { %2025 = vperm.xlu1 %9059, %v9109_v12   ;;  %2029 = vperm.xlu0 %9058, %v9110_v28   ;;  %v9113_v28 = vld [vmem:[%s15422_s0 + $0x1a0] sm:$0xff] }
 0x268   :  { %v10835_v60 = vpop.permute.xlu1 %1509  ;;  %v10837_v23 = vpop.permute.xlu0 %1504 }
 0x269   :  { %15637 = vst [vmem:[#allocation201_spill] sm:$0xff] %v10835_v60  ;;  %15638 = vst [vmem:[#allocation202_spill] sm:$0xff] %v10837_v23  ;;  %v9114_v23 = vld [vmem:[%s15422_s0 + $0x1a8] sm:$0xff] }
 0x26a   :  { %2033 = vperm.xlu1 %9059, %v9111_v63   ;;  %2037 = vperm.xlu0 %9058, %v9112_v44   ;;  %v9115_v44 = vld [vmem:[%s15422_s0 + $0x1b0] sm:$0xff] }
 0x26c   :  { %v10845_v12 = vpop.permute.xlu1 %1519  ;;  %v10847_v7 = vpop.permute.xlu0 %1514 }
 0x26d   :  { %15639 = vst [vmem:[#allocation203_spill] sm:$0xff] %v10845_v12  ;;  %15640 = vst [vmem:[#allocation204_spill] sm:$0xff] %v10847_v7  ;;  %v9116_v7 = vld [vmem:[%s15422_s0 + $0x1b8] sm:$0xff] }
 0x26e   :  { %2041 = vperm.xlu1 %9059, %v9113_v28   ;;  %2045 = vperm.xlu0 %9058, %v9114_v23   ;;  %v9117_v23 = vld [vmem:[%s15422_s0 + $0x1c0] sm:$0xff] }
 0x270   :  { %v10855_v63 = vpop.permute.xlu1 %1529  ;;  %v10857_v60 = vpop.permute.xlu0 %1524 }
 0x271   :  { %15641 = vst [vmem:[#allocation205_spill] sm:$0xff] %v10855_v63  ;;  %15642 = vst [vmem:[#allocation206_spill] sm:$0xff] %v10857_v60  ;;  %v9118_v60 = vld [vmem:[%s15422_s0 + $0x1c8] sm:$0xff] }
 0x272   :  { %2049 = vperm.xlu1 %9059, %v9115_v44   ;;  %2053 = vperm.xlu0 %9058, %v9116_v7   ;;  %v10879_v7 = vshrl.u32 %v1572_v39, 7  ;;  %v291_v39 = vld [vmem:[%s15423_s1] sm:$0x3] }
 0x274   :  { %v10865_v28 = vpop.permute.xlu1 %1539  ;;  %v10867_v12 = vpop.permute.xlu0 %1534  ;;  %15647 = vst [vmem:[#allocation211_spill] sm:$0xff] %v10879_v7 }
 0x275   :  { %15643 = vst [vmem:[#allocation207_spill] sm:$0xff] %v10865_v28  ;;  %15644 = vst [vmem:[#allocation208_spill] sm:$0xff] %v10867_v12  ;;  %v9119_v12 = vld [vmem:[%s15422_s0 + $0x1d0] sm:$0xff] }
 0x276   :  { %2057 = vperm.xlu1 %9059, %v9117_v23   ;;  %2061 = vperm.xlu0 %9058, %v9118_v60   ;;  %v9120_v23 = vld [vmem:[%s15422_s0 + $0x1d8] sm:$0xff]  ;;  %v15433_v60 = vsub.s32 0, %v10879_v7 }
 0x278   :  { %v10875_v44 = vpop.permute.xlu1 %1549  ;;  %v10877_v63 = vpop.permute.xlu0 %1544 }
 0x279   :  { %15645 = vst [vmem:[#allocation209_spill] sm:$0xff] %v10875_v44  ;;  %15646 = vst [vmem:[#allocation210_spill] sm:$0xff] %v10877_v63  ;;  %v9121_v63 = vld [vmem:[%s15422_s0 + $0x1e0] sm:$0xff]  ;;  %v10908_v44 = vrot.slane %v291_v39, %v15433_v60 }
 0x27a   :  { %2065 = vperm.xlu1 %9059, %v9119_v12   ;;  %2069 = vperm.xlu0 %9058, %v9120_v23   ;;  %v9122_v12 = vld [vmem:[%s15422_s0 + $0x1e8] sm:$0xff]  ;;  %v2858_v23 = vsub.s32 1, %v10879_v7 }
 0x27b   :  { %v1577_v60 = vmul.f32 %v10908_v44, %v9619_v10 }
 0x27c   :  { %v10887_v28 = vpop.permute.xlu1 %1559  ;;  %v10889_v55 = vpop.permute.xlu0 %1554 }
 0x27d   :  { %15648 = vst [vmem:[#allocation212_spill] sm:$0xff] %v10887_v28  ;;  %15649 = vst [vmem:[#allocation213_spill] sm:$0xff] %v10889_v55 }
 0x27e   :  { %2073 = vperm.xlu1 %9059, %v9121_v63   ;;  %2077 = vperm.xlu0 %9058, %v9122_v12   ;;  %v9124_v63 = vld [vmem:[%s15422_s0 + $0x1f8] sm:$0xff]  ;;  %v10916_v12 = vrot.slane %v291_v39, %v2858_v23  ;;  %v9126_v39 = vld [vmem:[%s15422_s0 + $0x208] sm:$0xff] }
 0x280   :  { %v10902_v28 = vpop.permute.xlu1 %1569  ;;  %v10904_v55 = vpop.permute.xlu0 %1564 }
 0x281   :  { %15650 = vst [vmem:[#allocation214_spill] sm:$0xff] %v10902_v28  ;;  %15651 = vst [vmem:[#allocation215_spill] sm:$0xff] %v10904_v55  ;;  %v1576_v28 = vmul.f32 %v10908_v44, %v9609_v6  ;;  %v10933_v6 = vld [vmem:[%s15424_s2] ss:$0 sm:$0xff] }
 0x282   :  { %2081 = vperm.xlu1 %9059, %v9123_v3   ;;  %2085 = vperm.xlu0 %9058, %v9124_v63   ;;  %v9125_v3 = vld [vmem:[%s15422_s0 + $0x200] sm:$0xff] }
 0x285   :  { %v1838_v55 = vpop.permute.xlu1 %1837  ;;  %v1834_v52 = vpop.permute.xlu0 %1833 }
 0x286   :  { %v2861_v7 = vmul.f32 %v10916_v12, %v1838_v55  ;;  %v2860_v47 = vmul.f32 %v10916_v12, %v1834_v52  ;;  %2089 = vperm.xlu1 %9059, %v9125_v3   ;;  %2093 = vperm.xlu0 %9058, %v9126_v39   ;;  %v1578_v52 = vmul.f32 %v10908_v44, %v9607_v5  ;;  %v9128_v5 = vld [vmem:[%s15422_s0 + $0x218] sm:$0xff] }
 0x287   :  { %v1579_v55 = vmul.f32 %v10908_v44, %v9617_v9 }
 0x288   :  { %v3117_v10 = vadd.f32 %v2861_v7, %v1577_v60  ;;  %v3116_v23 = vadd.f32 %v2860_v47, %v1576_v28  ;;  %v1581_v60 = vmul.f32 %v10908_v44, %v9627_v13  ;;  %v9130_v13 = vld [vmem:[%s15422_s0 + $0x228] sm:$0xff] }
 0x289   :  { %v1842_v63 = vpop.permute.xlu1 %1841  ;;  %v1846_v3 = vpop.permute.xlu0 %1845 }
 0x28a   :  { %v3380_v36 = vadd.f32 %v10933_v6, %v3117_v10  ;;  %v2862_v31 = vmul.f32 %v10916_v12, %v1842_v63  ;;  %v2863_v39 = vmul.f32 %v10916_v12, %v1846_v3  ;;  %2097 = vperm.xlu1 %9059, %v9127_v20   ;;  %2101 = vperm.xlu0 %9058, %v9128_v5  }
 0x28b   :  { %v3379_v9 = vadd.f32 %v10933_v6, %v3116_v23  ;;  %v1580_v10 = vmul.f32 %v10908_v44, %v9629_v14 }
 0x28c   :  { %v3636_v47 = vmax.f32 %v3380_v36, 0.0  ;;  %v3118_v28 = vadd.f32 %v2862_v31, %v1578_v52  ;;  %v3119_v7 = vadd.f32 %v2863_v39, %v1579_v55  ;;  %v9129_v31 = vld [vmem:[%s15422_s0 + $0x220] sm:$0xff]  ;;  %v1583_v39 = vmul.f32 %v10908_v44, %v9637_v17  ;;  %v9132_v17 = vld [vmem:[%s15422_s0 + $0x238] sm:$0xff] }
 0x28d   :  { %v1850_v63 = vpop.permute.xlu1 %1849  ;;  %v1854_v3 = vpop.permute.xlu0 %1853  ;;  %v3635_v20 = vmax.f32 %v3379_v9, 0.0  ;;  %v1582_v9 = vmul.f32 %v10908_v44, %v9639_v18 }
 0x28e   :  { %v3381_v15 = vadd.f32 %v10933_v6, %v3118_v28  ;;  %v3382_v4 = vadd.f32 %v10933_v6, %v3119_v7  ;;  %v2864_v5 = vmul.f32 %v10916_v12, %v1850_v63  ;;  %v2865_v36 = vmul.f32 %v10916_v12, %v1854_v3  ;;  %2105 = vperm.xlu1 %9059, %v9129_v31  }
 0x28f   :  { %2109 = vperm.xlu0 %9058, %v9130_v13   ;;  %8589 = vmatprep.mubr.msk.f32.mxu0 %vm3906_vm0, %v3635_v20 }
 0x290   :  { %v3637_v14 = vmax.f32 %v3381_v15, 0.0  ;;  %v3638_v23 = vmax.f32 %v3382_v4, 0.0  ;;  %v3120_v52 = vadd.f32 %v2864_v5, %v1580_v10  ;;  %v3121_v55 = vadd.f32 %v2865_v36, %v1581_v60  ;;  %8590 = vmatmul.mubr.msk.f32.vlgmr.msra.gmra.mrb[0].mxu0 %vm3906_vm0, %v3636_v47  ;;  %v9131_v15 = vld [vmem:[%s15422_s0 + $0x230] sm:$0xff] }
 0x291   :  { %v1858_v28 = vpop.permute.xlu1 %1857  ;;  %v1862_v7 = vpop.permute.xlu0 %1861  ;;  %v1585_v5 = vmul.f32 %v10908_v44, %v9647_v21  ;;  %v1584_v36 = vmul.f32 %v10908_v44, %v9649_v22  ;;  %v9134_v21 = vld [vmem:[%s15422_s0 + $0x440] sm:$0xff] }
 0x292   :  { %v3383_v63 = vadd.f32 %v10933_v6, %v3120_v52  ;;  %v3384_v3 = vadd.f32 %v10933_v6, %v3121_v55  ;;  %v2866_v20 = vmul.f32 %v10916_v12, %v1858_v28  ;;  %v2867_v4 = vmul.f32 %v10916_v12, %v1862_v7  ;;  %2113 = vperm.xlu1 %9059, %v9131_v15  }
 0x293   :  { %2117 = vperm.xlu0 %9058, %v9132_v17   ;;  %8592 = vmatprep.mubr.msk.f32.mxu0 %vm3906_vm0, %v3637_v14 }
 0x294   :  { %v3639_v18 = vmax.f32 %v3383_v63, 0.0  ;;  %v3640_v47 = vmax.f32 %v3384_v3, 0.0  ;;  %v3122_v60 = vadd.f32 %v2866_v20, %v1582_v9  ;;  %v3123_v10 = vadd.f32 %v2867_v4, %v1583_v39  ;;  %8593 = vmatmul.mubr.msk.f32.gmra.mrb[2].mxu0 %vm3906_vm0, %v3638_v23  ;;  %v9133_v23 = vld [vmem:[%s15422_s0 + $0x240] sm:$0xff] }
 0x295   :  { %v1866_v31 = vpop.permute.xlu1 %1865  ;;  %v1870_v13 = vpop.permute.xlu0 %1869  ;;  %v1587_v63 = vmul.f32 %v10908_v44, %v9657_v25  ;;  %v1586_v3 = vmul.f32 %v10908_v44, %v9659_v26  ;;  %v9136_v25 = vld [vmem:[%s15422_s0 + $0x450] sm:$0xff] }
 0x296   :  { %v3385_v52 = vadd.f32 %v10933_v6, %v3122_v60  ;;  %v3386_v55 = vadd.f32 %v10933_v6, %v3123_v10  ;;  %v2868_v14 = vmul.f32 %v10916_v12, %v1866_v31  ;;  %v2869_v28 = vmul.f32 %v10916_v12, %v1870_v13  ;;  %2121 = vperm.xlu1 %9059, %v9133_v23  }
 0x297   :  { %2377 = vperm.xlu0 %9058, %v9134_v21   ;;  %8595 = vmatprep.mubr.msk.f32.mxu0 %vm3906_vm0, %v3639_v18  ;;  %v1589_v31 = vmul.f32 %v10908_v44, %v9667_v29  ;;  %v1588_v13 = vmul.f32 %v10908_v44, %v9669_v30  ;;  %v9138_v29 = vld [vmem:[%s15422_s0 + $0x460] sm:$0xff] }
 0x298   :  { %v3641_v22 = vmax.f32 %v3385_v52, 0.0  ;;  %v3642_v39 = vmax.f32 %v3386_v55, 0.0  ;;  %v3124_v9 = vadd.f32 %v2868_v14, %v1584_v36  ;;  %v3125_v7 = vadd.f32 %v2869_v28, %v1585_v5  ;;  %8596 = vmatmul.mubr.msk.f32.gmra.mrb[4].mxu0 %vm3906_vm0, %v3640_v47  ;;  %v9135_v47 = vld [vmem:[%s15422_s0 + $0x448] sm:$0xff] }
 0x299   :  { %v1874_v20 = vpop.permute.xlu1 %1873  ;;  %v1878_v4 = vpop.permute.xlu0 %1877 }
 0x29a   :  { %v3387_v15 = vadd.f32 %v10933_v6, %v3124_v9  ;;  %v3388_v17 = vadd.f32 %v10933_v6, %v3125_v7  ;;  %v2870_v18 = vmul.f32 %v10916_v12, %v1874_v20  ;;  %v2871_v60 = vmul.f32 %v10916_v12, %v1878_v4  ;;  %2381 = vperm.xlu1 %9059, %v9135_v47   ;;  %v9139_v47 = vld [vmem:[%s15422_s0 + $0x468] sm:$0xff] }
 0x29b   :  { %2385 = vperm.xlu0 %9058, %v9136_v25   ;;  %8598 = vmatprep.mubr.msk.f32.mxu0 %vm3906_vm0, %v3641_v22  ;;  %v9137_v22 = vld [vmem:[%s15422_s0 + $0x458] sm:$0xff] }
 0x29c   :  { %v3643_v26 = vmax.f32 %v3387_v15, 0.0  ;;  %v3644_v10 = vmax.f32 %v3388_v17, 0.0  ;;  %v3126_v5 = vadd.f32 %v2870_v18, %v1586_v3  ;;  %v3127_v36 = vadd.f32 %v2871_v60, %v1587_v63  ;;  %8599 = vmatmul.mubr.msk.f32.gmra.mrb[6].mxu0 %vm3906_vm0, %v3642_v39 }
 0x29d   :  { %v1882_v52 = vpop.permute.xlu1 %1881  ;;  %v1886_v55 = vpop.permute.xlu0 %1885  ;;  %v1591_v63 = vmul.f32 %v10908_v44, %v9677_v33  ;;  %v1590_v3 = vmul.f32 %v10908_v44, %v9679_v34  ;;  %v9140_v33 = vld [vmem:[%s15422_s0 + $0x470] sm:$0xff] }
 0x29e   :  { %v3389_v14 = vadd.f32 %v10933_v6, %v3126_v5  ;;  %v3390_v28 = vadd.f32 %v10933_v6, %v3127_v36  ;;  %v2872_v23 = vmul.f32 %v10916_v12, %v1882_v52  ;;  %v2873_v21 = vmul.f32 %v10916_v12, %v1886_v55  ;;  %2389 = vperm.xlu1 %9059, %v9137_v22  }
 0x29f   :  { %2393 = vperm.xlu0 %9058, %v9138_v29   ;;  %8601 = vmatprep.mubr.msk.f32.mxu0 %vm3906_vm0, %v3643_v26  ;;  %v1593_v5 = vmul.f32 %v10908_v44, %v9687_v37  ;;  %v1592_v36 = vmul.f32 %v10908_v44, %v9689_v38  ;;  %v9142_v37 = vld [vmem:[%s15422_s0 + $0x480] sm:$0xff] }
 0x2a0   :  { %v3645_v30 = vmax.f32 %v3389_v14, 0.0  ;;  %v3646_v39 = vmax.f32 %v3390_v28, 0.0  ;;  %v3128_v9 = vadd.f32 %v2872_v23, %v1588_v13  ;;  %v3129_v7 = vadd.f32 %v2873_v21, %v1589_v31  ;;  %8602 = vmatmul.mubr.msk.f32.gmra.mrb[8].mxu0 %vm3906_vm0, %v3644_v10  ;;  %v9141_v23 = vld [vmem:[%s15422_s0 + $0x478] sm:$0xff] }
 0x2a1   :  { %v1890_v20 = vpop.permute.xlu1 %1889  ;;  %v1894_v4 = vpop.permute.xlu0 %1893 }
 0x2a2   :  { %v3391_v15 = vadd.f32 %v10933_v6, %v3128_v9  ;;  %v3392_v17 = vadd.f32 %v10933_v6, %v3129_v7  ;;  %v2874_v18 = vmul.f32 %v10916_v12, %v1890_v20  ;;  %v2875_v60 = vmul.f32 %v10916_v12, %v1894_v4  ;;  %2397 = vperm.xlu1 %9059, %v9139_v47  }
 0x2a3   :  { %2401 = vperm.xlu0 %9058, %v9140_v33   ;;  %8604 = vmatprep.mubr.msk.f32.mxu0 %vm3906_vm0, %v3645_v30  ;;  %v1595_v30 = vmul.f32 %v10908_v44, %v9697_v41  ;;  %v9144_v41 = vld [vmem:[%s15422_s0 + $0x490] sm:$0xff]  ;;  %v1597_v47 = vmul.f32 %v10908_v44, %v9707_v45  ;;  %v1596_v33 = vmul.f32 %v10908_v44, %v9709_v46  ;;  %v9146_v45 = vld [vmem:[%s15422_s0 + $0x4a0] sm:$0xff] }
 0x2a4   :  { %v3647_v34 = vmax.f32 %v3391_v15, 0.0  ;;  %v3648_v25 = vmax.f32 %v3392_v17, 0.0  ;;  %v3130_v26 = vadd.f32 %v2874_v18, %v1590_v3  ;;  %v3131_v10 = vadd.f32 %v2875_v60, %v1591_v63  ;;  %8605 = vmatmul.mubr.msk.f32.gmra.mrb[10].mxu0 %vm3906_vm0, %v3646_v39  ;;  %v9143_v15 = vld [vmem:[%s15422_s0 + $0x488] sm:$0xff] }
 0x2a5   :  { %v1898_v31 = vpop.permute.xlu1 %1897  ;;  %v1902_v13 = vpop.permute.xlu0 %1901  ;;  %v1594_v39 = vmul.f32 %v10908_v44, %v9699_v42 }
 0x2a6   :  { %v3393_v52 = vadd.f32 %v10933_v6, %v3130_v26  ;;  %v3394_v55 = vadd.f32 %v10933_v6, %v3131_v10  ;;  %v2876_v14 = vmul.f32 %v10916_v12, %v1898_v31  ;;  %v2877_v28 = vmul.f32 %v10916_v12, %v1902_v13  ;;  %2405 = vperm.xlu1 %9059, %v9141_v23   ;;  %v9145_v31 = vld [vmem:[%s15422_s0 + $0x498] sm:$0xff] }
 0x2a7   :  { %2409 = vperm.xlu0 %9058, %v9142_v37   ;;  %8607 = vmatprep.mubr.msk.f32.mxu0 %vm3906_vm0, %v3647_v34 }
 0x2a8   :  { %v3649_v38 = vmax.f32 %v3393_v52, 0.0  ;;  %v3650_v21 = vmax.f32 %v3394_v55, 0.0  ;;  %v3132_v22 = vadd.f32 %v2876_v14, %v1592_v36  ;;  %v3133_v29 = vadd.f32 %v2877_v28, %v1593_v5  ;;  %8608 = vmatmul.mubr.msk.f32.gmra.mrb[12].mxu0 %vm3906_vm0, %v3648_v25 }
 0x2a9   :  { %v1906_v9 = vpop.permute.xlu1 %1905  ;;  %v1910_v7 = vpop.permute.xlu0 %1909  ;;  %v1599_v14 = vmul.f32 %v10908_v44, %v9717_v49  ;;  %v1598_v28 = vmul.f32 %v10908_v44, %v9719_v50  ;;  %v9148_v49 = vld [vmem:[%s15422_s0 + $0x4b0] sm:$0xff] }
 0x2aa   :  { %v3395_v63 = vadd.f32 %v10933_v6, %v3132_v22  ;;  %v3396_v3 = vadd.f32 %v10933_v6, %v3133_v29  ;;  %v2878_v20 = vmul.f32 %v10916_v12, %v1906_v9  ;;  %v2879_v4 = vmul.f32 %v10916_v12, %v1910_v7  ;;  %2413 = vperm.xlu1 %9059, %v9143_v15  }
 0x2ab   :  { %2417 = vperm.xlu0 %9058, %v9144_v41   ;;  %8610 = vmatprep.mubr.msk.f32.mxu0 %vm3906_vm0, %v3649_v38 }
 0x2ac   :  { %v3651_v42 = vmax.f32 %v3395_v63, 0.0  ;;  %v3652_v17 = vmax.f32 %v3396_v3, 0.0  ;;  %v3134_v18 = vadd.f32 %v2878_v20, %v1594_v39  ;;  %v3135_v60 = vadd.f32 %v2879_v4, %v1595_v30  ;;  %8611 = vmatmul.mubr.msk.f32.gmra.mrb[14].mxu0 %vm3906_vm0, %v3650_v21  ;;  %v9147_v30 = vld [vmem:[%s15422_s0 + $0x4a8] sm:$0xff] }
 0x2ad   :  { %v1914_v34 = vpop.permute.xlu1 %1913  ;;  %v1918_v25 = vpop.permute.xlu0 %1917  ;;  %v1601_v63 = vmul.f32 %v10908_v44, %v9727_v53  ;;  %v1600_v3 = vmul.f32 %v10908_v44, %v9729_v54  ;;  %v9150_v53 = vld [vmem:[%s15422_s0 + $0x4c0] sm:$0xff] }
 0x2ae   :  { %v3397_v26 = vadd.f32 %v10933_v6, %v3134_v18  ;;  %v3398_v10 = vadd.f32 %v10933_v6, %v3135_v60  ;;  %v2880_v5 = vmul.f32 %v10916_v12, %v1914_v34  ;;  %v2881_v36 = vmul.f32 %v10916_v12, %v1918_v25  ;;  %2421 = vperm.xlu1 %9059, %v9145_v31   ;;  %v9149_v18 = vld [vmem:[%s15422_s0 + $0x4b8] sm:$0xff] }
 0x2af   :  { %2425 = vperm.xlu0 %9058, %v9146_v45   ;;  %8613 = vmatprep.mubr.msk.f32.mxu0 %vm3906_vm0, %v3651_v42  ;;  %v1603_v34 = vmul.f32 %v10908_v44, %v9737_v57  ;;  %v1602_v25 = vmul.f32 %v10908_v44, %v9739_v58  ;;  %v9152_v57 = vld [vmem:[%s15422_s0 + $0x4d0] sm:$0xff] }
 0x2b0   :  { %v3653_v46 = vmax.f32 %v3397_v26, 0.0  ;;  %v3654_v13 = vmax.f32 %v3398_v10, 0.0  ;;  %v3136_v52 = vadd.f32 %v2880_v5, %v1596_v33  ;;  %v3137_v55 = vadd.f32 %v2881_v36, %v1597_v47  ;;  %8614 = vmatmul.mubr.msk.f32.gmra.mrb[16].mxu0 %vm3906_vm0, %v3652_v17 }
 0x2b1   :  { %v1922_v23 = vpop.permute.xlu1 %1921  ;;  %v1926_v37 = vpop.permute.xlu0 %1925 }
 0x2b2   :  { %v3399_v38 = vadd.f32 %v10933_v6, %v3136_v52  ;;  %v3400_v21 = vadd.f32 %v10933_v6, %v3137_v55  ;;  %v2882_v22 = vmul.f32 %v10916_v12, %v1922_v23  ;;  %v2883_v29 = vmul.f32 %v10916_v12, %v1926_v37  ;;  %2429 = vperm.xlu1 %9059, %v9147_v30   ;;  %v9153_v30 = vld [vmem:[%s15422_s0 + $0x4d8] sm:$0xff] }
 0x2b3   :  { %2433 = vperm.xlu0 %9058, %v9148_v49   ;;  %8616 = vmatprep.mubr.msk.f32.mxu0 %vm3906_vm0, %v3653_v46  ;;  %v9151_v46 = vld [vmem:[%s15422_s0 + $0x4c8] sm:$0xff] }
 0x2b4   :  { %v3655_v50 = vmax.f32 %v3399_v38, 0.0  ;;  %v3656_v39 = vmax.f32 %v3400_v21, 0.0  ;;  %v3138_v9 = vadd.f32 %v2882_v22, %v1598_v28  ;;  %v3139_v7 = vadd.f32 %v2883_v29, %v1599_v14  ;;  %8617 = vmatmul.mubr.msk.f32.gmra.mrb[18].mxu0 %vm3906_vm0, %v3654_v13 }
 0x2b5   :  { %v1930_v20 = vpop.permute.xlu1 %1929  ;;  %v1934_v4 = vpop.permute.xlu0 %1933  ;;  %v1605_v14 = vmul.f32 %v10908_v44, %v9747_v61  ;;  %v1604_v28 = vmul.f32 %v10908_v44, %v9749_v62  ;;  %v9154_v61 = vld [vmem:[%s15422_s0 + $0x4e0] sm:$0xff] }
 0x2b6   :  { %v3401_v15 = vadd.f32 %v10933_v6, %v3138_v9  ;;  %v3402_v41 = vadd.f32 %v10933_v6, %v3139_v7  ;;  %v2884_v42 = vmul.f32 %v10916_v12, %v1930_v20  ;;  %v2885_v17 = vmul.f32 %v10916_v12, %v1934_v4  ;;  %2437 = vperm.xlu1 %9059, %v9149_v18  }
 0x2b7   :  { %2441 = vperm.xlu0 %9058, %v9150_v53   ;;  %8619 = vmatprep.mubr.msk.f32.mxu0 %vm3906_vm0, %v3655_v50  ;;  %v1607_v9 = vmul.f32 %v10908_v44, %v9757_v1  ;;  %v1606_v7 = vmul.f32 %v10908_v44, %v9759_v2  ;;  %v9156_v1 = vld [vmem:[%s15422_s0 + $0x4f0] sm:$0xff] }
 0x2b8   :  { %v3657_v54 = vmax.f32 %v3401_v15, 0.0  ;;  %v3658_v60 = vmax.f32 %v3402_v41, 0.0  ;;  %v3140_v47 = vadd.f32 %v2884_v42, %v1600_v3  ;;  %v3141_v33 = vadd.f32 %v2885_v17, %v1601_v63  ;;  %8620 = vmatmul.mubr.msk.f32.gmra.mrb[20].mxu0 %vm3906_vm0, %v3656_v39  ;;  %v9155_v42 = vld [vmem:[%s15422_s0 + $0x4e8] sm:$0xff] }
 0x2b9   :  { %v1938_v26 = vpop.permute.xlu1 %1937  ;;  %v1942_v10 = vpop.permute.xlu0 %1941 }
 0x2ba   :  { %v3403_v5 = vadd.f32 %v10933_v6, %v3140_v47  ;;  %v3404_v36 = vadd.f32 %v10933_v6, %v3141_v33  ;;  %v2886_v31 = vmul.f32 %v10916_v12, %v1938_v26  ;;  %v2887_v45 = vmul.f32 %v10916_v12, %v1942_v10  ;;  %2445 = vperm.xlu1 %9059, %v9151_v46  }
 0x2bb   :  { %2449 = vperm.xlu0 %9058, %v9152_v57   ;;  %8622 = vmatprep.mubr.msk.f32.mxu0 %vm3906_vm0, %v3657_v54  ;;  %v1609_v54 = vmul.f32 %v10908_v44, %v9767_v8  ;;  %v9158_v8 = vld [vmem:[%s15422_s0 + $0x500] sm:$0xff]  ;;  %v1611_v46 = vmul.f32 %v10908_v44, %v9777_v16  ;;  %v1610_v57 = vmul.f32 %v10908_v44, %v9779_v19  ;;  %v9160_v16 = vld [vmem:[%s15422_s0 + $0x510] sm:$0xff] }
 0x2bc   :  { %v3659_v58 = vmax.f32 %v3403_v5, 0.0  ;;  %v3660_v13 = vmax.f32 %v3404_v36, 0.0  ;;  %v3142_v52 = vadd.f32 %v2886_v31, %v1602_v25  ;;  %v3143_v55 = vadd.f32 %v2887_v45, %v1603_v34  ;;  %8623 = vmatmul.mubr.msk.f32.gmra.mrb[22].mxu0 %vm3906_vm0, %v3658_v60  ;;  %v9157_v5 = vld [vmem:[%s15422_s0 + $0x4f8] sm:$0xff] }
 0x2bd   :  { %v1946_v23 = vpop.permute.xlu1 %1945  ;;  %v1950_v37 = vpop.permute.xlu0 %1949  ;;  %v1608_v60 = vmul.f32 %v10908_v44, %v9769_v11 }
 0x2be   :  { %v3405_v38 = vadd.f32 %v10933_v6, %v3142_v52  ;;  %v3406_v21 = vadd.f32 %v10933_v6, %v3143_v55  ;;  %v2888_v22 = vmul.f32 %v10916_v12, %v1946_v23  ;;  %v2889_v29 = vmul.f32 %v10916_v12, %v1950_v37  ;;  %2453 = vperm.xlu1 %9059, %v9153_v30   ;;  %v9159_v23 = vld [vmem:[%s15422_s0 + $0x508] sm:$0xff] }
 0x2bf   :  { %2457 = vperm.xlu0 %9058, %v9154_v61   ;;  %8625 = vmatprep.mubr.msk.f32.mxu0 %vm3906_vm0, %v3659_v58 }
 0x2c0   :  { %v3661_v62 = vmax.f32 %v3405_v38, 0.0  ;;  %v3662_v49 = vmax.f32 %v3406_v21, 0.0  ;;  %v3144_v50 = vadd.f32 %v2888_v22, %v1604_v28  ;;  %v3145_v39 = vadd.f32 %v2889_v29, %v1605_v14  ;;  %8626 = vmatmul.mubr.msk.f32.gmra.mrb[24].mxu0 %vm3906_vm0, %v3660_v13 }
 0x2c1   :  { %v1954_v63 = vpop.permute.xlu1 %1953  ;;  %v1958_v3 = vpop.permute.xlu0 %1957  ;;  %v1613_v22 = vmul.f32 %v10908_v44, %v9787_v24  ;;  %v1612_v29 = vmul.f32 %v10908_v44, %v9789_v27  ;;  %v9162_v24 = vld [vmem:[%s15422_s0 + $0x520] sm:$0xff] }
 0x2c2   :  { %v3407_v20 = vadd.f32 %v10933_v6, %v3144_v50  ;;  %v3408_v4 = vadd.f32 %v10933_v6, %v3145_v39  ;;  %v2890_v15 = vmul.f32 %v10916_v12, %v1954_v63  ;;  %v2891_v41 = vmul.f32 %v10916_v12, %v1958_v3  ;;  %2461 = vperm.xlu1 %9059, %v9155_v42  }
 0x2c3   :  { %2465 = vperm.xlu0 %9058, %v9156_v1   ;;  %8628 = vmatprep.mubr.msk.f32.mxu0 %vm3906_vm0, %v3661_v62 }
 0x2c4   :  { %v3663_v2 = vmax.f32 %v3407_v20, 0.0  ;;  %v3664_v17 = vmax.f32 %v3408_v4, 0.0  ;;  %v3146_v18 = vadd.f32 %v2890_v15, %v1606_v7  ;;  %v3147_v53 = vadd.f32 %v2891_v41, %v1607_v9  ;;  %8629 = vmatmul.mubr.msk.f32.gmra.mrb[26].mxu0 %vm3906_vm0, %v3662_v49  ;;  %v9161_v9 = vld [vmem:[%s15422_s0 + $0x518] sm:$0xff] }
 0x2c5   :  { %v1962_v47 = vpop.permute.xlu1 %1961  ;;  %v1966_v33 = vpop.permute.xlu0 %1965  ;;  %v1615_v20 = vmul.f32 %v10908_v44, %v9797_v32  ;;  %v1614_v4 = vmul.f32 %v10908_v44, %v9799_v35  ;;  %v9164_v32 = vld [vmem:[%s15422_s0 + $0x530] sm:$0xff] }
 0x2c6   :  { %v3409_v34 = vadd.f32 %v10933_v6, %v3146_v18  ;;  %v3410_v25 = vadd.f32 %v10933_v6, %v3147_v53  ;;  %v2892_v26 = vmul.f32 %v10916_v12, %v1962_v47  ;;  %v2893_v10 = vmul.f32 %v10916_v12, %v1966_v33  ;;  %2469 = vperm.xlu1 %9059, %v9157_v5   ;;  %v9163_v18 = vld [vmem:[%s15422_s0 + $0x528] sm:$0xff] }
 0x2c7   :  { %2473 = vperm.xlu0 %9058, %v9158_v8   ;;  %8631 = vmatprep.mubr.msk.f32.mxu0 %vm3906_vm0, %v3663_v2  ;;  %v1617_v47 = vmul.f32 %v10908_v44, %v9807_v40  ;;  %v1616_v33 = vmul.f32 %v10908_v44, %v9809_v43  ;;  %v9166_v40 = vld [vmem:[%s15422_s0 + $0x540] sm:$0xff] }
 0x2c8   :  { %v3665_v11 = vmax.f32 %v3409_v34, 0.0  ;;  %v3666_v36 = vmax.f32 %v3410_v25, 0.0  ;;  %v3148_v31 = vadd.f32 %v2892_v26, %v1608_v60  ;;  %v3149_v45 = vadd.f32 %v2893_v10, %v1609_v54  ;;  %8632 = vmatmul.mubr.msk.f32.gmra.mrb[28].mxu0 %vm3906_vm0, %v3664_v17 }
 0x2c9   :  { %v1970_v58 = vpop.permute.xlu1 %1969  ;;  %v1974_v13 = vpop.permute.xlu0 %1973 }
 0x2ca   :  { %v3411_v52 = vadd.f32 %v10933_v6, %v3148_v31  ;;  %v3412_v55 = vadd.f32 %v10933_v6, %v3149_v45  ;;  %v2894_v14 = vmul.f32 %v10916_v12, %v1970_v58  ;;  %v2895_v28 = vmul.f32 %v10916_v12, %v1974_v13  ;;  %2477 = vperm.xlu1 %9059, %v9159_v23   ;;  %v9167_v23 = vld [vmem:[%s15422_s0 + $0x548] sm:$0xff] }
 0x2cb   :  { %2481 = vperm.xlu0 %9058, %v9160_v16   ;;  %8634 = vmatprep.mubr.msk.f32.mxu0 %vm3906_vm0, %v3665_v11  ;;  %v9165_v11 = vld [vmem:[%s15422_s0 + $0x538] sm:$0xff] }
 0x2cc   :  { %v3667_v19 = vmax.f32 %v3411_v52, 0.0  ;;  %v3668_v37 = vmax.f32 %v3412_v55, 0.0  ;;  %v3150_v38 = vadd.f32 %v2894_v14, %v1610_v57  ;;  %v3151_v21 = vadd.f32 %v2895_v28, %v1611_v46  ;;  %8635 = vmatmul.mubr.msk.f32.gmra.mrb[30].mxu0 %vm3906_vm0, %v3666_v36 }
 0x2cd   :  { %v1978_v30 = vpop.permute.xlu1 %1977  ;;  %v1982_v61 = vpop.permute.xlu0 %1981  ;;  %v1619_v46 = vmul.f32 %v10908_v44, %v9817_v48  ;;  %v1618_v57 = vmul.f32 %v10908_v44, %v9819_v51  ;;  %v9168_v48 = vld [vmem:[%s15422_s0 + $0x550] sm:$0xff] }
 0x2ce   :  { %v3413_v62 = vadd.f32 %v10933_v6, %v3150_v38  ;;  %v3414_v49 = vadd.f32 %v10933_v6, %v3151_v21  ;;  %v2896_v50 = vmul.f32 %v10916_v12, %v1978_v30  ;;  %v2897_v39 = vmul.f32 %v10916_v12, %v1982_v61  ;;  %2485 = vperm.xlu1 %9059, %v9161_v9  }
 0x2cf   :  { %2489 = vperm.xlu0 %9058, %v9162_v24   ;;  %8637 = vmatprep.mubr.msk.f32.mxu0 %vm3906_vm0, %v3667_v19  ;;  %v1621_v38 = vmul.f32 %v10908_v44, %v9827_v56  ;;  %v1620_v21 = vmul.f32 %v10908_v44, %v9829_v59  ;;  %v9170_v56 = vld [vmem:[%s15422_s0 + $0x560] sm:$0xff] }
 0x2d0   :  { %v3669_v27 = vmax.f32 %v3413_v62, 0.0  ;;  %v3670_v7 = vmax.f32 %v3414_v49, 0.0  ;;  %v3152_v63 = vadd.f32 %v2896_v50, %v1612_v29  ;;  %v3153_v3 = vadd.f32 %v2897_v39, %v1613_v22  ;;  %8638 = vmatmul.mubr.msk.f32.gmra.mrb[32].mxu0 %vm3906_vm0, %v3668_v37  ;;  %v9169_v50 = vld [vmem:[%s15422_s0 + $0x558] sm:$0xff] }
 0x2d1   :  { %v1986_v15 = vpop.permute.xlu1 %1985  ;;  %v1990_v41 = vpop.permute.xlu0 %1989 }
 0x2d2   :  { %v3415_v42 = vadd.f32 %v10933_v6, %v3152_v63  ;;  %v3416_v1 = vadd.f32 %v10933_v6, %v3153_v3  ;;  %v2898_v2 = vmul.f32 %v10916_v12, %v1986_v15  ;;  %v2899_v17 = vmul.f32 %v10916_v12, %v1990_v41  ;;  %2493 = vperm.xlu1 %9059, %v9163_v18  }
 0x2d3   :  { %2497 = vperm.xlu0 %9058, %v9164_v32   ;;  %8640 = vmatprep.mubr.msk.f32.mxu0 %vm3906_vm0, %v3669_v27  ;;  %v1623_v27 = vmul.f32 %v10908_v44, %v9837_v0  ;;  %v9172_v0 = vld [vmem:[%s15422_s0 + $0x570] sm:$0xff] }
 0x2d4   :  { %v3671_v35 = vmax.f32 %v3415_v42, 0.0  ;;  %v3672_v53 = vmax.f32 %v3416_v1, 0.0  ;;  %v3154_v54 = vadd.f32 %v2898_v2, %v1614_v4  ;;  %v3155_v60 = vadd.f32 %v2899_v17, %v1615_v20  ;;  %8641 = vmatmul.mubr.msk.f32.gmra.mrb[34].mxu0 %vm3906_vm0, %v3670_v7  ;;  %v15652_v7 = vld [vmem:[#allocation6_spill] sm:$0xff] }
 0x2d5   :  { %v1994_v34 = vpop.permute.xlu1 %1993  ;;  %v1998_v25 = vpop.permute.xlu0 %1997  ;;  %v1622_v63 = vmul.f32 %v10908_v44, %v15652_v7  ;;  %v9171_v1 = vld [vmem:[%s15422_s0 + $0x568] sm:$0xff] }
 0x2d6   :  { %v3417_v26 = vadd.f32 %v10933_v6, %v3154_v54  ;;  %v3418_v10 = vadd.f32 %v10933_v6, %v3155_v60  ;;  %v2900_v5 = vmul.f32 %v10916_v12, %v1994_v34  ;;  %v2901_v8 = vmul.f32 %v10916_v12, %v1998_v25  ;;  %2501 = vperm.xlu1 %9059, %v9165_v11   ;;  %v15654_v54 = vld [vmem:[#allocation8_spill] sm:$0xff] }
 0x2d7   :  { %2505 = vperm.xlu0 %9058, %v9166_v40   ;;  %8643 = vmatprep.mubr.msk.f32.mxu0 %vm3906_vm0, %v3671_v35  ;;  %v15653_v35 = vld [vmem:[#allocation7_spill] sm:$0xff]  ;;  %v1624_v60 = vmul.f32 %v10908_v44, %v15654_v54 }
 0x2d8   :  { %v3673_v43 = vmax.f32 %v3417_v26, 0.0  ;;  %v3674_v36 = vmax.f32 %v3418_v10, 0.0  ;;  %v3156_v31 = vadd.f32 %v2900_v5, %v1616_v33  ;;  %v3157_v45 = vadd.f32 %v2901_v8, %v1617_v47  ;;  %8644 = vmatmul.mubr.msk.f32.gmra.mrb[36].mxu0 %vm3906_vm0, %v3672_v53  ;;  %v9173_v5 = vld [vmem:[%s15422_s0 + $0x578] sm:$0xff]  ;;  %v9174_v8 = vld [vmem:[%s15422_s0 + $0x580] sm:$0xff] }
 0x2d9   :  { %v2002_v58 = vpop.permute.xlu1 %2001  ;;  %v2006_v13 = vpop.permute.xlu0 %2005  ;;  %v1625_v53 = vmul.f32 %v10908_v44, %v15653_v35 }
 0x2da   :  { %v3419_v52 = vadd.f32 %v10933_v6, %v3156_v31  ;;  %v3420_v55 = vadd.f32 %v10933_v6, %v3157_v45  ;;  %v2902_v14 = vmul.f32 %v10916_v12, %v2002_v58  ;;  %v2903_v28 = vmul.f32 %v10916_v12, %v2006_v13  ;;  %2509 = vperm.xlu1 %9059, %v9167_v23   ;;  %v15655_v31 = vld [vmem:[#allocation9_spill] sm:$0xff]  ;;  %v9175_v23 = vld [vmem:[%s15422_s0 + $0x588] sm:$0xff] }
 0x2db   :  { %2513 = vperm.xlu0 %9058, %v9168_v48   ;;  %8646 = vmatprep.mubr.msk.f32.mxu0 %vm3906_vm0, %v3673_v43  ;;  %v1627_v45 = vmul.f32 %v10908_v44, %v15655_v31  ;;  %v9176_v48 = vld [vmem:[%s15422_s0 + $0x590] sm:$0xff] }
 0x2dc   :  { %v3675_v51 = vmax.f32 %v3419_v52, 0.0  ;;  %v3676_v16 = vmax.f32 %v3420_v55, 0.0  ;;  %v3158_v19 = vadd.f32 %v2902_v14, %v1618_v57  ;;  %v3159_v37 = vadd.f32 %v2903_v28, %v1619_v46  ;;  %8647 = vmatmul.mubr.msk.f32.gmra.mrb[38].mxu0 %vm3906_vm0, %v3674_v36  ;;  %v15656_v46 = vld [vmem:[#allocation10_spill] sm:$0xff] }
 0x2dd   :  { %v2010_v22 = vpop.permute.xlu1 %2009  ;;  %v2014_v29 = vpop.permute.xlu0 %2013  ;;  %v1626_v57 = vmul.f32 %v10908_v44, %v15656_v46 }
 0x2de   :  { %v3421_v30 = vadd.f32 %v10933_v6, %v3158_v19  ;;  %v3422_v61 = vadd.f32 %v10933_v6, %v3159_v37  ;;  %v2904_v62 = vmul.f32 %v10916_v12, %v2010_v22  ;;  %v2905_v49 = vmul.f32 %v10916_v12, %v2014_v29  ;;  %2517 = vperm.xlu1 %9059, %v9169_v50   ;;  %v15658_v22 = vld [vmem:[#allocation12_spill] sm:$0xff] }
 0x2df   :  { %2521 = vperm.xlu0 %9058, %v9170_v56   ;;  %8649 = vmatprep.mubr.msk.f32.mxu0 %vm3906_vm0, %v3675_v51  ;;  %v1628_v29 = vmul.f32 %v10908_v44, %v15658_v22  ;;  %v9184_v22 = vld [vmem:[%s15422_s0 + $0x5c8] sm:$0xff] }
 0x2e0   :  { %v3677_v59 = vmax.f32 %v3421_v30, 0.0  ;;  %v3678_v39 = vmax.f32 %v3422_v61, 0.0  ;;  %v3160_v9 = vadd.f32 %v2904_v62, %v1620_v21  ;;  %v3161_v24 = vadd.f32 %v2905_v49, %v1621_v38  ;;  %8650 = vmatmul.mubr.msk.f32.gmra.mrb[40].mxu0 %vm3906_vm0, %v3676_v16  ;;  %v15657_v38 = vld [vmem:[#allocation11_spill] sm:$0xff] }
 0x2e1   :  { %v2018_v3 = vpop.permute.xlu1 %2017  ;;  %v2022_v20 = vpop.permute.xlu0 %2021  ;;  %v1629_v21 = vmul.f32 %v10908_v44, %v15657_v38  ;;  %v15666_v38 = vld [vmem:[#allocation20_spill] sm:$0xff] }
 0x2e2   :  { %v3423_v4 = vadd.f32 %v10933_v6, %v3160_v9  ;;  %v3424_v15 = vadd.f32 %v10933_v6, %v3161_v24  ;;  %v2906_v41 = vmul.f32 %v10916_v12, %v2018_v3  ;;  %v2907_v42 = vmul.f32 %v10916_v12, %v2022_v20  ;;  %2525 = vperm.xlu1 %9059, %v9171_v1   ;;  %v15660_v20 = vld [vmem:[#allocation14_spill] sm:$0xff] }
 0x2e3   :  { %2529 = vperm.xlu0 %9058, %v9172_v0   ;;  %8652 = vmatprep.mubr.msk.f32.mxu0 %vm3906_vm0, %v3677_v59  ;;  %v9177_v59 = vld [vmem:[%s15422_s0 + $0x598] sm:$0xff] }
 0x2e4   :  { %v3679_v2 = vmax.f32 %v3423_v4, 0.0  ;;  %v3680_v17 = vmax.f32 %v3424_v15, 0.0  ;;  %v3162_v18 = vadd.f32 %v2906_v41, %v1622_v63  ;;  %v3163_v32 = vadd.f32 %v2907_v42, %v1623_v27  ;;  %8653 = vmatmul.mubr.msk.f32.gmra.mrb[42].mxu0 %vm3906_vm0, %v3678_v39  ;;  %v9178_v39 = vld [vmem:[%s15422_s0 + $0x5a0] sm:$0xff] }
 0x2e5   :  { %v2026_v47 = vpop.permute.xlu1 %2025  ;;  %v2030_v33 = vpop.permute.xlu0 %2029  ;;  %v15659_v63 = vld [vmem:[#allocation13_spill] sm:$0xff]  ;;  %v1630_v4 = vmul.f32 %v10908_v44, %v15660_v20 }
 0x2e6   :  { %v3425_v34 = vadd.f32 %v10933_v6, %v3162_v18  ;;  %v3426_v25 = vadd.f32 %v10933_v6, %v3163_v32  ;;  %v2908_v26 = vmul.f32 %v10916_v12, %v2026_v47  ;;  %v2909_v10 = vmul.f32 %v10916_v12, %v2030_v33  ;;  %2533 = vperm.xlu1 %9059, %v9173_v5   ;;  %v9180_v18 = vld [vmem:[%s15422_s0 + $0x5b0] sm:$0xff] }
 0x2e7   :  { %2537 = vperm.xlu0 %9058, %v9174_v8   ;;  %8655 = vmatprep.mubr.msk.f32.mxu0 %vm3906_vm0, %v3679_v2  ;;  %v1631_v3 = vmul.f32 %v10908_v44, %v15659_v63  ;;  %v15662_v33 = vld [vmem:[#allocation16_spill] sm:$0xff] }
 0x2e8   :  { %v3681_v11 = vmax.f32 %v3425_v34, 0.0  ;;  %v3682_v40 = vmax.f32 %v3426_v25, 0.0  ;;  %v3164_v43 = vadd.f32 %v2908_v26, %v1624_v60  ;;  %v3165_v36 = vadd.f32 %v2909_v10, %v1625_v53  ;;  %8656 = vmatmul.mubr.msk.f32.gmra.mrb[44].mxu0 %vm3906_vm0, %v3680_v17  ;;  %v9179_v17 = vld [vmem:[%s15422_s0 + $0x5a8] sm:$0xff] }
 0x2e9   :  { %v2034_v58 = vpop.permute.xlu1 %2033  ;;  %v2038_v13 = vpop.permute.xlu0 %2037  ;;  %v15661_v60 = vld [vmem:[#allocation15_spill] sm:$0xff]  ;;  %v1632_v34 = vmul.f32 %v10908_v44, %v15662_v33 }
 0x2ea   :  { %v3427_v52 = vadd.f32 %v10933_v6, %v3164_v43  ;;  %v3428_v55 = vadd.f32 %v10933_v6, %v3165_v36  ;;  %v2910_v14 = vmul.f32 %v10916_v12, %v2034_v58  ;;  %v2911_v28 = vmul.f32 %v10916_v12, %v2038_v13  ;;  %2541 = vperm.xlu1 %9059, %v9175_v23   ;;  %v9182_v43 = vld [vmem:[%s15422_s0 + $0x248] sm:$0xff] }
 0x2eb   :  { %2545 = vperm.xlu0 %9058, %v9176_v48   ;;  %8658 = vmatprep.mubr.msk.f32.mxu0 %vm3906_vm0, %v3681_v11  ;;  %v1633_v47 = vmul.f32 %v10908_v44, %v15661_v60  ;;  %v15664_v13 = vld [vmem:[#allocation18_spill] sm:$0xff] }
 0x2ec   :  { %v3683_v51 = vmax.f32 %v3427_v52, 0.0  ;;  %v3684_v16 = vmax.f32 %v3428_v55, 0.0  ;;  %v3166_v19 = vadd.f32 %v2910_v14, %v1626_v57  ;;  %v3167_v37 = vadd.f32 %v2911_v28, %v1627_v45  ;;  %8659 = vmatmul.mubr.msk.f32.gmra.mrb[46].mxu0 %vm3906_vm0, %v3682_v40  ;;  %v9181_v40 = vld [vmem:[%s15422_s0 + $0x5b8] sm:$0xff] }
 0x2ed   :  { %v2042_v30 = vpop.permute.xlu1 %2041  ;;  %v2046_v61 = vpop.permute.xlu0 %2045  ;;  %v15663_v57 = vld [vmem:[#allocation17_spill] sm:$0xff]  ;;  %v1634_v52 = vmul.f32 %v10908_v44, %v15664_v13 }
 0x2ee   :  { %v3429_v62 = vadd.f32 %v10933_v6, %v3166_v19  ;;  %v3430_v49 = vadd.f32 %v10933_v6, %v3167_v37  ;;  %v2912_v50 = vmul.f32 %v10916_v12, %v2042_v30  ;;  %v2913_v56 = vmul.f32 %v10916_v12, %v2046_v61  ;;  %2549 = vperm.xlu1 %9059, %v9177_v59   ;;  %v15665_v19 = vld [vmem:[#allocation19_spill] sm:$0xff]  ;;  %v15679_v13 = vld [vmem:[#allocation33_spill] sm:$0xff] }
 0x2ef   :  { %2553 = vperm.xlu0 %9058, %v9178_v39   ;;  %8661 = vmatprep.mubr.msk.f32.mxu0 %vm3906_vm0, %v3683_v51  ;;  %v1635_v58 = vmul.f32 %v10908_v44, %v15663_v57  ;;  %v1637_v37 = vmul.f32 %v10908_v44, %v15665_v19  ;;  %v15669_v39 = vld [vmem:[#allocation23_spill] sm:$0xff]  ;;  %v15678_v57 = vld [vmem:[#allocation32_spill] sm:$0xff] }
 0x2f0   :  { %v3685_v9 = vmax.f32 %v3429_v62, 0.0  ;;  %v3686_v24 = vmax.f32 %v3430_v49, 0.0  ;;  %v3168_v27 = vadd.f32 %v2912_v50, %v1628_v29  ;;  %v3169_v7 = vadd.f32 %v2913_v56, %v1629_v21  ;;  %8662 = vmatmul.mubr.msk.f32.gmra.mrb[48].mxu0 %vm3906_vm0, %v3684_v16  ;;  %v9183_v16 = vld [vmem:[%s15422_s0 + $0x5c0] sm:$0xff] }
 0x2f1   :  { %v2050_v15 = vpop.permute.xlu1 %2049  ;;  %v2054_v41 = vpop.permute.xlu0 %2053  ;;  %v1636_v21 = vmul.f32 %v10908_v44, %v15666_v38  ;;  %v15667_v49 = vld [vmem:[#allocation21_spill] sm:$0xff]  ;;  %v15668_v56 = vld [vmem:[#allocation22_spill] sm:$0xff] }
 0x2f2   :  { %v3431_v42 = vadd.f32 %v10933_v6, %v3168_v27  ;;  %v3432_v1 = vadd.f32 %v10933_v6, %v3169_v7  ;;  %v2914_v0 = vmul.f32 %v10916_v12, %v2050_v15  ;;  %v2915_v2 = vmul.f32 %v10916_v12, %v2054_v41  ;;  %2557 = vperm.xlu1 %9059, %v9179_v17   ;;  %v9185_v41 = vld [vmem:[%s15422_s0 + $0x250] sm:$0xff] }
 0x2f3   :  { %2561 = vperm.xlu0 %9058, %v9180_v18   ;;  %8664 = vmatprep.mubr.msk.f32.mxu0 %vm3906_vm0, %v3685_v9  ;;  %v1639_v50 = vmul.f32 %v10908_v44, %v15667_v49  ;;  %v1638_v59 = vmul.f32 %v10908_v44, %v15668_v56  ;;  %v11407_v9 = vmul.f32 %v10908_v44, %v15669_v39  ;;  %v15673_v17 = vld [vmem:[#allocation27_spill] sm:$0xff]  ;;  %v11496_v49 = vld [vmem:[%s15424_s2] ss:$0 sm:$0xff] }
 0x2f4   :  { %v3687_v32 = vmax.f32 %v3431_v42, 0.0  ;;  %v3688_v35 = vmax.f32 %v3432_v1, 0.0  ;;  %v3170_v53 = vadd.f32 %v2914_v0, %v1630_v4  ;;  %v3171_v54 = vadd.f32 %v2915_v2, %v1631_v3  ;;  %8665 = vmatmul.mubr.msk.f32.gmra.mrb[50].mxu0 %vm3906_vm0, %v3686_v24  ;;  %v15670_v24 = vld [vmem:[#allocation24_spill] sm:$0xff]  ;;  %v15671_v42 = vld [vmem:[#allocation25_spill] sm:$0xff]  ;;  %v15672_v0 = vld [vmem:[#allocation26_spill] sm:$0xff] }
 0x2f5   :  { %v2058_v25 = vpop.permute.xlu1 %2057  ;;  %v2062_v26 = vpop.permute.xlu0 %2061  ;;  %v11411_v27 = vmul.f32 %v10908_v44, %v15670_v24  ;;  %v11422_v1 = vmul.f32 %v10908_v44, %v15671_v42  ;;  %v11426_v2 = vmul.f32 %v10908_v44, %v15672_v0  ;;  %v11430_v18 = vmul.f32 %v10908_v44, %v15673_v17  ;;  %v9190_v24 = vld [vmem:[%s15422_s0 + $0x260] sm:$0xff] }
 0x2f6   :  { %v3433_v10 = vadd.f32 %v10933_v6, %v3170_v53  ;;  %v3434_v5 = vadd.f32 %v10933_v6, %v3171_v54  ;;  %v2916_v8 = vmul.f32 %v10916_v12, %v2058_v25  ;;  %v2917_v11 = vmul.f32 %v10916_v12, %v2062_v26  ;;  %2565 = vperm.xlu1 %9059, %v9181_v40   ;;  %v15676_v26 = vld [vmem:[#allocation30_spill] sm:$0xff] }
 0x2f7   :  { %2125 = vperm.xlu0 %9058, %v9182_v43   ;;  %8667 = vmatprep.mubr.msk.f32.mxu0 %vm3906_vm0, %v3687_v32  ;;  %v9186_v32 = vld [vmem:[%s15422_s0 + $0x258] sm:$0xff] }
 0x2f8   :  { %v3689_v36 = vmax.f32 %v3433_v10, 0.0  ;;  %v3690_v31 = vmax.f32 %v3434_v5, 0.0  ;;  %v3172_v45 = vadd.f32 %v2916_v8, %v1632_v34  ;;  %v3173_v46 = vadd.f32 %v2917_v11, %v1633_v47  ;;  %8668 = vmatmul.mubr.msk.f32.gmra.mrb[52].mxu0 %vm3906_vm0, %v3688_v35  ;;  %v15674_v47 = vld [vmem:[#allocation28_spill] sm:$0xff]  ;;  %v15675_v34 = vld [vmem:[#allocation29_spill] sm:$0xff]  ;;  %v15677_v5 = vld [vmem:[#allocation31_spill] sm:$0xff] }
 0x2f9   :  { %v2066_v55 = vpop.permute.xlu1 %2065  ;;  %v2070_v14 = vpop.permute.xlu0 %2069  ;;  %v11439_v33 = vmul.f32 %v10908_v44, %v15674_v47  ;;  %v11443_v25 = vmul.f32 %v10908_v44, %v15675_v34  ;;  %v11447_v10 = vmul.f32 %v10908_v44, %v15676_v26  ;;  %v11451_v8 = vmul.f32 %v10908_v44, %v15677_v5  ;;  %v15691_v47 = vld [vmem:[#allocation44_spill] sm:$0xff]  ;;  %v15693_v26 = vld [vmem:[#allocation45_spill] sm:$0xff] }
 0x2fa   :  { %v3435_v28 = vadd.f32 %v10933_v6, %v3172_v45  ;;  %v3436_v23 = vadd.f32 %v10933_v6, %v3173_v46  ;;  %v2918_v48 = vmul.f32 %v10916_v12, %v2066_v55  ;;  %v2919_v51 = vmul.f32 %v10916_v12, %v2070_v14  ;;  %2569 = vperm.xlu1 %9059, %v9183_v16   ;;  %v9187_v46 = vld [vmem:[%s15422_s0 + $0x5d0] sm:$0xff]  ;;  %v15680_v55 = vld [vmem:[#allocation34_spill] sm:$0xff]  ;;  %v9188_v14 = vld [vmem:[%s15422_s0 + $0x5d8] sm:$0xff] }
 0x2fb   :  { %2573 = vperm.xlu0 %9058, %v9184_v22   ;;  %8670 = vmatprep.mubr.msk.f32.mxu0 %vm3906_vm0, %v3689_v36  ;;  %v15681_v16 = vld [vmem:[#allocation35_spill] sm:$0xff]  ;;  %v11534_v34 = vmul.f32 %v10908_v44, %v15691_v47  ;;  %v11538_v5 = vmul.f32 %v10908_v44, %v15693_v26  ;;  %v15715_v47 = vld [vmem:[#allocation56_spill] sm:$0xff] }
 0x2fc   :  { %v3691_v29 = vmax.f32 %v3435_v28, 0.0  ;;  %v3692_v30 = vmax.f32 %v3436_v23, 0.0  ;;  %v3174_v61 = vadd.f32 %v2918_v48, %v1634_v52  ;;  %v3175_v62 = vadd.f32 %v2919_v51, %v1635_v58  ;;  %8671 = vmatmul.mubr.msk.f32.gmra.mrb[54].mxu0 %vm3906_vm0, %v3690_v31 }
 0x2fd   :  { %v2074_v7 = vpop.permute.xlu1 %2073  ;;  %v2078_v63 = vpop.permute.xlu0 %2077  ;;  %v11462_v58 = vmul.f32 %v10908_v44, %v15678_v57  ;;  %v11466_v52 = vmul.f32 %v10908_v44, %v15679_v13  ;;  %v11479_v19 = vmul.f32 %v10908_v44, %v15681_v16  ;;  %15692 = vst [vmem:[#allocation7_spill] sm:$0xff] %v11534_v34  ;;  %15694 = vst [vmem:[#allocation8_spill] sm:$0xff] %v11538_v5  ;;  %v15697_v57 = vld [vmem:[#allocation47_spill] sm:$0xff] }
 0x2fe   :  { %v3437_v3 = vadd.f32 %v10933_v6, %v3174_v61  ;;  %v3438_v20 = vadd.f32 %v10933_v6, %v3175_v62  ;;  %v2920_v4 = vmul.f32 %v10916_v12, %v2074_v7  ;;  %v2921_v15 = vmul.f32 %v10916_v12, %v2078_v63  ;;  %2129 = vperm.xlu1 %9059, %v9185_v41   ;;  %v15685_v7 = vld [vmem:[#allocation39_spill] sm:$0xff] }
 0x2ff   :  { %2133 = vperm.xlu0 %9058, %v9186_v32   ;;  %8673 = vmatprep.mubr.msk.f32.mxu0 %vm3906_vm0, %v3691_v29  ;;  %v15684_v29 = vld [vmem:[#allocation38_spill] sm:$0xff]  ;;  %v11507_v63 = vmul.f32 %v10908_v44, %v15685_v7  ;;  %v11553_v13 = vmul.f32 %v10908_v44, %v15697_v57  ;;  %v11607_v26 = vmul.f32 %v10908_v44, %v15715_v47 }
 0x300   :  { %v3693_v35 = vmax.f32 %v3437_v3, 0.0  ;;  %v3694_v53 = vmax.f32 %v3438_v20, 0.0  ;;  %v3176_v54 = vadd.f32 %v2920_v4, %v1636_v21  ;;  %v3177_v60 = vadd.f32 %v2921_v15, %v1637_v37  ;;  %8674 = vmatmul.mubr.msk.f32.gmra.mrb[56].mxu0 %vm3906_vm0, %v3692_v30  ;;  %v15682_v37 = vld [vmem:[#allocation36_spill] sm:$0xff]  ;;  %v15683_v21 = vld [vmem:[#allocation37_spill] sm:$0xff]  ;;  %v9191_v41 = vld [vmem:[%s15422_s0 + $0x268] sm:$0xff] }
 0x301   :  { %v2082_v11 = vpop.permute.xlu1 %2081  ;;  %v2086_v40 = vpop.permute.xlu0 %2085  ;;  %v11483_v38 = vmul.f32 %v10908_v44, %v15682_v37  ;;  %v11487_v22 = vmul.f32 %v10908_v44, %v15683_v21  ;;  %v11491_v30 = vmul.f32 %v10908_v44, %v15684_v29  ;;  %v15686_v3 = vld [vmem:[#allocation40_spill] sm:$0xff]  ;;  %v15687_v4 = vld [vmem:[#allocation41_spill] sm:$0xff]  ;;  %15698 = vst [vmem:[#allocation10_spill] sm:$0xff] %v11553_v13  ;;  %v15703_v29 = vld [vmem:[#allocation50_spill] sm:$0xff] }
 0x302   :  { %v3439_v43 = vadd.f32 %v10933_v6, %v3176_v54  ;;  %v3440_v36 = vadd.f32 %v10933_v6, %v3177_v60  ;;  %v2922_v31 = vmul.f32 %v10916_v12, %v2082_v11  ;;  %v2923_v45 = vmul.f32 %v10916_v12, %v2086_v40  ;;  %2577 = vperm.xlu1 %9059, %v9187_v46   ;;  %v15689_v54 = vld [vmem:[#allocation43_spill] sm:$0xff]  ;;  %v15701_v37 = vld [vmem:[#allocation49_spill] sm:$0xff]  ;;  %v15735_v47 = vld [vmem:[#allocation66_spill] sm:$0xff] }
 0x303   :  { %v11470_v6 = vmul.f32 %v10908_v44, %v15680_v55  ;;  %2581 = vperm.xlu0 %9058, %v9188_v14   ;;  %8676 = vmatprep.mubr.msk.f32.mxu0 %vm3906_vm0, %v3693_v35  ;;  %v11511_v20 = vmul.f32 %v10908_v44, %v15686_v3  ;;  %v11515_v15 = vmul.f32 %v10908_v44, %v15687_v4  ;;  %v15688_v35 = vld [vmem:[#allocation42_spill] sm:$0xff]  ;;  %v15699_v55 = vld [vmem:[#allocation48_spill] sm:$0xff]  ;;  %v15709_v4 = vld [vmem:[#allocation53_spill] sm:$0xff] }
 0x304   :  { %v3695_v28 = vmax.f32 %v3439_v43, 0.0  ;;  %v3696_v23 = vmax.f32 %v3440_v36, 0.0  ;;  %v3178_v48 = vadd.f32 %v2922_v31, %v1638_v59  ;;  %v3179_v51 = vadd.f32 %v2923_v45, %v1639_v50  ;;  %8677 = vmatmul.mubr.msk.f32.gmra.mrb[58].mxu0 %vm3906_vm0, %v3694_v53  ;;  %v9192_v31 = vld [vmem:[%s15422_s0 + $0x5e0] sm:$0xff]  ;;  %v9194_v3 = vld [vmem:[%s15422_s0 + $0x270] sm:$0xff]  ;;  %15716 = vst [vmem:[#allocation19_spill] sm:$0xff] %v11607_v26 }
 0x305   :  { %v2090_v61 = vpop.permute.xlu1 %2089  ;;  %v2094_v62 = vpop.permute.xlu0 %2093  ;;  %v11526_v53 = vmul.f32 %v10908_v44, %v15688_v35  ;;  %v11530_v60 = vmul.f32 %v10908_v44, %v15689_v54  ;;  %v15695_v45 = vld [vmem:[#allocation46_spill] sm:$0xff]  ;;  %v11557_v14 = vmul.f32 %v10908_v44, %v15699_v55  ;;  %v11568_v21 = vmul.f32 %v10908_v44, %v15701_v37  ;;  %v9195_v54 = vld [vmem:[%s15422_s0 + $0x278] sm:$0xff]  ;;  %v9196_v37 = vld [vmem:[%s15422_s0 + $0x5f0] sm:$0xff] }
 0x306   :  { %v3441_v50 = vadd.f32 %v11496_v49, %v3178_v48  ;;  %v3442_v56 = vadd.f32 %v11496_v49, %v3179_v51  ;;  %v2924_v59 = vmul.f32 %v10916_v12, %v2090_v61  ;;  %v2925_v39 = vmul.f32 %v10916_v12, %v2094_v62  ;;  %2137 = vperm.xlu1 %9059, %v9190_v24   ;;  %v15705_v62 = vld [vmem:[#allocation51_spill] sm:$0xff]  ;;  %v15839_v26 = vld [vmem:[#allocation141_spill] sm:$0xff] }
 0x307   :  { %2141 = vperm.xlu0 %9058, %v9191_v41   ;;  %8679 = vmatprep.mubr.msk.f32.mxu0 %vm3906_vm0, %v3695_v28  ;;  %15690 = vst [vmem:[#allocation6_spill] sm:$0xff] %v11530_v60  ;;  %v11549_v46 = vmul.f32 %v10908_v44, %v15695_v45  ;;  %15700 = vst [vmem:[#allocation11_spill] sm:$0xff] %v11557_v14  ;;  %v9193_v28 = vld [vmem:[%s15422_s0 + $0x5e8] sm:$0xff]  ;;  %v11572_v61 = vmul.f32 %v10908_v44, %v15703_v29  ;;  %v15725_v29 = vld [vmem:[#allocation61_spill] sm:$0xff] }
 0x308   :  { %v3697_v42 = vmax.f32 %v3441_v50, 0.0  ;;  %v3698_v0 = vmax.f32 %v3442_v56, 0.0  ;;  %v3180_v17 = vadd.f32 %v2924_v59, %v11411_v27  ;;  %v3181_v32 = vadd.f32 %v2925_v39, %v11407_v9  ;;  %8680 = vmatmul.mubr.msk.f32.gmra.mrb[60].mxu0 %vm3906_vm0, %v3696_v23  ;;  %15702 = vst [vmem:[#allocation12_spill] sm:$0xff] %v11568_v21  ;;  %v15707_v56 = vld [vmem:[#allocation52_spill] sm:$0xff]  ;;  %v15721_v45 = vld [vmem:[#allocation59_spill] sm:$0xff]  ;;  %v15851_v14 = vld [vmem:[#allocation153_spill] sm:$0xff] }
 0x309   :  { %v2098_v27 = vpop.permute.xlu1 %2097  ;;  %v2102_v9 = vpop.permute.xlu0 %2101  ;;  %15696 = vst [vmem:[#allocation9_spill] sm:$0xff] %v11549_v46  ;;  %15704 = vst [vmem:[#allocation13_spill] sm:$0xff] %v11572_v61  ;;  %v11576_v50 = vmul.f32 %v10908_v44, %v15705_v62  ;;  %v11580_v59 = vmul.f32 %v10908_v44, %v15707_v56  ;;  %v11591_v41 = vmul.f32 %v10908_v44, %v15709_v4  ;;  %v15727_v62 = vld [vmem:[#allocation62_spill] sm:$0xff]  ;;  %v15850_v61 = vld [vmem:[#allocation152_spill] sm:$0xff] }
 0x30a   :  { %v3443_v11 = vadd.f32 %v11496_v49, %v3180_v17  ;;  %v3444_v40 = vadd.f32 %v11496_v49, %v3181_v32  ;;  %v2926_v43 = vmul.f32 %v10916_v12, %v2098_v27  ;;  %v2927_v36 = vmul.f32 %v10916_v12, %v2102_v9  ;;  %2585 = vperm.xlu1 %9059, %v9192_v31   ;;  %v15713_v17 = vld [vmem:[#allocation55_spill] sm:$0xff]  ;;  %v15858_v46 = vld [vmem:[#allocation158_spill] sm:$0xff] }
 0x30b   :  { %2589 = vperm.xlu0 %9058, %v9193_v28   ;;  %8682 = vmatprep.mubr.msk.f32.mxu0 %vm3906_vm0, %v3697_v42  ;;  %15706 = vst [vmem:[#allocation14_spill] sm:$0xff] %v11576_v50  ;;  %15708 = vst [vmem:[#allocation15_spill] sm:$0xff] %v11580_v59  ;;  %v15711_v42 = vld [vmem:[#allocation54_spill] sm:$0xff]  ;;  %v11599_v32 = vmul.f32 %v10908_v44, %v15713_v17  ;;  %v11621_v57 = vmul.f32 %v10908_v44, %v15721_v45  ;;  %v15737_v45 = vld [vmem:[#allocation67_spill] sm:$0xff] }
 0x30c   :  { %v3699_v23 = vmax.f32 %v3443_v11, 0.0  ;;  %v3700_v48 = vmax.f32 %v3444_v40, 0.0  ;;  %v3182_v51 = vadd.f32 %v2926_v43, %v11426_v2  ;;  %v3183_v16 = vadd.f32 %v2927_v36, %v11422_v1  ;;  %8683 = vmatmul.mubr.msk.f32.gmra.mrb[62].mxu0 %vm3906_vm0, %v3698_v0  ;;  %15710 = vst [vmem:[#allocation16_spill] sm:$0xff] %v11591_v41  ;;  %v15717_v40 = vld [vmem:[#allocation57_spill] sm:$0xff]  ;;  %v15719_v36 = vld [vmem:[#allocation58_spill] sm:$0xff]  ;;  %v15845_v59 = vld [vmem:[#allocation147_spill] sm:$0xff] }
 0x30d   :  { %v2106_v2 = vpop.permute.xlu1 %2105  ;;  %v11595_v0 = vmul.f32 %v10908_v44, %v15711_v42  ;;  %15714 = vst [vmem:[#allocation18_spill] sm:$0xff] %v11599_v32  ;;  %v11613_v43 = vmul.f32 %v10908_v44, %v15717_v40  ;;  %v11617_v31 = vmul.f32 %v10908_v44, %v15719_v36  ;;  %15722 = vst [vmem:[#allocation22_spill] sm:$0xff] %v11621_v57 }
 0x30e   :  { %v3445_v1 = vadd.f32 %v11496_v49, %v3182_v51  ;;  %v3446_v39 = vadd.f32 %v11496_v49, %v3183_v16  ;;  %v2928_v24 = vmul.f32 %v10916_v12, %v2106_v2  ;;  %v2110_v7 = vpop.permute.xlu0 %2109  ;;  %2145 = vperm.xlu1 %9059, %v9194_v3   ;;  %8685 = vmatprep.mubr.msk.f32.mxu0 %vm3906_vm0, %v3699_v23  ;;  %v15723_v23 = vld [vmem:[#allocation60_spill] sm:$0xff] }
 0x30f   :  { %15712 = vst [vmem:[#allocation17_spill] sm:$0xff] %v11595_v0  ;;  %v2929_v35 = vmul.f32 %v10916_v12, %v2110_v7  ;;  %2149 = vperm.xlu0 %9058, %v9195_v54   ;;  %15718 = vst [vmem:[#allocation20_spill] sm:$0xff] %v11613_v43  ;;  %v11640_v56 = vmul.f32 %v10908_v44, %v15727_v62  ;;  %v15731_v3 = vld [vmem:[#allocation64_spill] sm:$0xff]  ;;  %v9199_v62 = vld [vmem:[%s15422_s0 + $0x288] sm:$0xff]  ;;  %v12075_v41 = vmul.f32 %v10908_v44, %v15839_v26 }
 0x310   :  { %v3701_v27 = vmax.f32 %v3445_v1, 0.0  ;;  %v3702_v9 = vmax.f32 %v3446_v39, 0.0  ;;  %v3184_v11 = vadd.f32 %v2928_v24, %v11439_v33  ;;  %8686 = vmatmul.mubr.msk.f32.gmra.mrb[64].mxu0 %vm3906_vm0, %v3700_v48  ;;  %15720 = vst [vmem:[#allocation21_spill] sm:$0xff] %v11617_v31  ;;  %v11626_v33 = vmul.f32 %v10908_v44, %v15723_v23  ;;  %v9197_v39 = vld [vmem:[%s15422_s0 + $0x5f8] sm:$0xff]  ;;  %v15729_v24 = vld [vmem:[#allocation63_spill] sm:$0xff]  ;;  %v9198_v23 = vld [vmem:[%s15422_s0 + $0x280] sm:$0xff] }
 0x311   :  { %v3185_v55 = vadd.f32 %v2929_v35, %v11430_v18  ;;  %v2114_v28 = vpop.permute.xlu1 %2113  ;;  %v11636_v18 = vmul.f32 %v10908_v44, %v15725_v29  ;;  %15728 = vst [vmem:[#allocation25_spill] sm:$0xff] %v11640_v56  ;;  %v11649_v7 = vmul.f32 %v10908_v44, %v15729_v24  ;;  %v11653_v4 = vmul.f32 %v10908_v44, %v15731_v3  ;;  %v15733_v35 = vld [vmem:[#allocation65_spill] sm:$0xff]  ;;  %v15832_v56 = vld [vmem:[#allocation134_spill] sm:$0xff]  ;;  %v15838_v31 = vld [vmem:[#allocation140_spill] sm:$0xff] }
 0x312   :  { %15724 = vst [vmem:[#allocation23_spill] sm:$0xff] %v11626_v33  ;;  %v3447_v48 = vadd.f32 %v11496_v49, %v3184_v11  ;;  %v2930_v51 = vmul.f32 %v10916_v12, %v2114_v28  ;;  %v2118_v16 = vpop.permute.xlu0 %2117  ;;  %2593 = vperm.xlu1 %9059, %v9196_v37   ;;  %8688 = vmatprep.mubr.msk.f32.mxu0 %vm3906_vm0, %v3701_v27  ;;  %v15833_v33 = vld [vmem:[#allocation135_spill] sm:$0xff]  ;;  %v15844_v0 = vld [vmem:[#allocation146_spill] sm:$0xff] }
 0x313   :  { %15726 = vst [vmem:[#allocation24_spill] sm:$0xff] %v11636_v18  ;;  %v3448_v2 = vadd.f32 %v11496_v49, %v3185_v55  ;;  %v2931_v1 = vmul.f32 %v10916_v12, %v2118_v16  ;;  %2597 = vperm.xlu0 %9058, %v9197_v39   ;;  %15730 = vst [vmem:[#allocation26_spill] sm:$0xff] %v11649_v7  ;;  %v11659_v54 = vmul.f32 %v10908_v44, %v15733_v35  ;;  %v15744_v39 = vld [vmem:[#allocation70_spill] sm:$0xff]  ;;  %v15827_v18 = vld [vmem:[#allocation129_spill] sm:$0xff] }
 0x314   :  { %15732 = vst [vmem:[#allocation27_spill] sm:$0xff] %v11653_v4  ;;  %v3703_v42 = vmax.f32 %v3447_v48, 0.0  ;;  %v3186_v17 = vadd.f32 %v2930_v51, %v11447_v10  ;;  %8689 = vmatmul.mubr.msk.f32.gmra.mrb[66].mxu0 %vm3906_vm0, %v3702_v9  ;;  %v11663_v27 = vmul.f32 %v10908_v44, %v15735_v47  ;;  %v11668_v55 = vmul.f32 %v10908_v44, %v15737_v45  ;;  %v15739_v48 = vld [vmem:[#allocation68_spill] sm:$0xff] }
 0x315   :  { %15734 = vst [vmem:[#allocation28_spill] sm:$0xff] %v11659_v54  ;;  %v3704_v11 = vmax.f32 %v3448_v2, 0.0  ;;  %v3187_v40 = vadd.f32 %v2931_v1, %v11443_v25  ;;  %v2122_v36 = vpop.permute.xlu1 %2121  ;;  %v11678_v25 = vmul.f32 %v10908_v44, %v15739_v48  ;;  %v15741_v51 = vld [vmem:[#allocation96_spill] sm:$0xff]  ;;  %v15742_v2 = vld [vmem:[#allocation69_spill] sm:$0xff]  ;;  %v11693_v24 = vmul.f32 %v10908_v44, %v15744_v39  ;;  %v15821_v54 = vld [vmem:[#allocation123_spill] sm:$0xff] }
 0x316   :  { %15736 = vst [vmem:[#allocation29_spill] sm:$0xff] %v11663_v27  ;;  %15738 = vst [vmem:[#allocation30_spill] sm:$0xff] %v11668_v55  ;;  %v3449_v10 = vadd.f32 %v11496_v49, %v3186_v17  ;;  %v2932_v9 = vmul.f32 %v10916_v12, %v2122_v36  ;;  %v2378_v28 = vpop.permute.xlu0 %2377  ;;  %2153 = vperm.xlu1 %9059, %v9198_v23   ;;  %8691 = vmatprep.mubr.msk.f32.mxu0 %vm3906_vm0, %v3703_v42  ;;  %v15746_v17 = vld [vmem:[#allocation71_spill] sm:$0xff]  ;;  %v15748_v47 = vld [vmem:[#allocation72_spill] sm:$0xff] }
 0x317   :  { %15740 = vst [vmem:[#allocation31_spill] sm:$0xff] %v11678_v25  ;;  %v1712_v16 = vmul.f32 %v10908_v44, %v15741_v51  ;;  %v3450_v37 = vadd.f32 %v11496_v49, %v3187_v40  ;;  %v2996_v29 = vmul.f32 %v10916_v12, %v2378_v28  ;;  %2157 = vperm.xlu0 %9058, %v9199_v62   ;;  %15745 = vst [vmem:[#allocation33_spill] sm:$0xff] %v11693_v24  ;;  %v15750_v23 = vld [vmem:[#allocation95_spill] sm:$0xff]  ;;  %v15751_v51 = vld [vmem:[#allocation73_spill] sm:$0xff] }
 0x318   :  { %v11689_v1 = vmul.f32 %v10908_v44, %v15742_v2  ;;  %v3705_v3 = vmax.f32 %v3449_v10, 0.0  ;;  %v3188_v42 = vadd.f32 %v2932_v9, %v11462_v58  ;;  %8692 = vmatmul.mubr.msk.f32.gmra.mrb[68].mxu0 %vm3906_vm0, %v3704_v11  ;;  %v11699_v35 = vmul.f32 %v10908_v44, %v15746_v17  ;;  %v9200_v11 = vld [vmem:[%s15422_s0 + $0x600] sm:$0xff]  ;;  %v9201_v2 = vld [vmem:[%s15422_s0 + $0x608] sm:$0xff]  ;;  %v15826_v27 = vld [vmem:[#allocation128_spill] sm:$0xff] }
 0x319   :  { %v11703_v40 = vmul.f32 %v10908_v44, %v15748_v47  ;;  %v3706_v36 = vmax.f32 %v3450_v37, 0.0  ;;  %v3252_v45 = vadd.f32 %v2996_v29, %v1712_v16  ;;  %v2382_v28 = vpop.permute.xlu1 %2381  ;;  %v1713_v48 = vmul.f32 %v10908_v44, %v15750_v23  ;;  %v15753_v16 = vld [vmem:[#allocation98_spill] sm:$0xff] }
 0x31a   :  { %15743 = vst [vmem:[#allocation32_spill] sm:$0xff] %v11689_v1  ;;  %15747 = vst [vmem:[#allocation34_spill] sm:$0xff] %v11699_v35  ;;  %v3451_v10 = vadd.f32 %v11496_v49, %v3188_v42  ;;  %v2997_v58 = vmul.f32 %v10916_v12, %v2382_v28  ;;  %v2386_v9 = vpop.permute.xlu0 %2385  ;;  %2601 = vperm.xlu1 %9059, %v9200_v11   ;;  %8694 = vmatprep.mubr.msk.f32.mxu0 %vm3906_vm0, %v3705_v3  ;;  %v15754_v42 = vld [vmem:[#allocation74_spill] sm:$0xff]  ;;  %v15756_v3 = vld [vmem:[#allocation75_spill] sm:$0xff] }
 0x31b   :  { %15749 = vst [vmem:[#allocation35_spill] sm:$0xff] %v11703_v40  ;;  %v11715_v37 = vmul.f32 %v10908_v44, %v15751_v51  ;;  %v1714_v29 = vmul.f32 %v10908_v44, %v15753_v16  ;;  %v2998_v62 = vmul.f32 %v10916_v12, %v2386_v9  ;;  %2605 = vperm.xlu0 %9058, %v9201_v2   ;;  %v15758_v9 = vld [vmem:[#allocation76_spill] sm:$0xff]  ;;  %v15760_v51 = vld [vmem:[#allocation77_spill] sm:$0xff]  ;;  %v15809_v35 = vld [vmem:[#allocation111_spill] sm:$0xff] }
 0x31c   :  { %v3515_v39 = vadd.f32 %v11496_v49, %v3252_v45  ;;  %v11726_v17 = vmul.f32 %v10908_v44, %v15754_v42  ;;  %v11730_v47 = vmul.f32 %v10908_v44, %v15756_v3  ;;  %v3707_v28 = vmax.f32 %v3451_v10, 0.0  ;;  %8695 = vmatmul.mubr.msk.f32.gmra.mrb[70].mxu0 %vm3906_vm0, %v3706_v36  ;;  %v9202_v36 = vld [vmem:[%s15422_s0 + $0x290] sm:$0xff]  ;;  %v15815_v1 = vld [vmem:[#allocation117_spill] sm:$0xff] }
 0x31d   :  { %15752 = vst [vmem:[#allocation36_spill] sm:$0xff] %v11715_v37  ;;  %v3253_v23 = vadd.f32 %v2997_v58, %v1713_v48  ;;  %v11735_v11 = vmul.f32 %v10908_v44, %v15758_v9  ;;  %v11739_v16 = vmul.f32 %v10908_v44, %v15760_v51  ;;  %v3254_v45 = vadd.f32 %v2998_v62, %v1714_v29  ;;  %v2390_v2 = vpop.permute.xlu1 %2389  ;;  %v15762_v37 = vld [vmem:[#allocation97_spill] sm:$0xff]  ;;  %v15763_v58 = vld [vmem:[#allocation100_spill] sm:$0xff]  ;;  %v15766_v51 = vld [vmem:[#allocation79_spill] sm:$0xff] }
 0x31e   :  { %15755 = vst [vmem:[#allocation37_spill] sm:$0xff] %v11726_v17  ;;  %15757 = vst [vmem:[#allocation38_spill] sm:$0xff] %v11730_v47  ;;  %v3771_v42 = vmax.f32 %v3515_v39, 0.0  ;;  %v1715_v17 = vmul.f32 %v10908_v44, %v15762_v37  ;;  %v2999_v48 = vmul.f32 %v10916_v12, %v2390_v2  ;;  %v2394_v10 = vpop.permute.xlu0 %2393  ;;  %2161 = vperm.xlu1 %9059, %v9202_v36   ;;  %8697 = vmatprep.mubr.msk.f32.mxu0 %vm3906_vm0, %v3707_v28  ;;  %v9203_v37 = vld [vmem:[%s15422_s0 + $0x298] sm:$0xff] }
 0x31f   :  { %15759 = vst [vmem:[#allocation39_spill] sm:$0xff] %v11735_v11  ;;  %15761 = vst [vmem:[#allocation40_spill] sm:$0xff] %v11739_v16  ;;  %v3516_v3 = vadd.f32 %v11496_v49, %v3253_v23  ;;  %v1716_v29 = vmul.f32 %v10908_v44, %v15763_v58  ;;  %v3517_v62 = vadd.f32 %v11496_v49, %v3254_v45  ;;  %2165 = vperm.xlu0 %9058, %v9203_v37   ;;  %v15764_v23 = vld [vmem:[#allocation78_spill] sm:$0xff]  ;;  %v15768_v45 = vld [vmem:[#allocation80_spill] sm:$0xff] }
 0x320   :  { %v3000_v39 = vmul.f32 %v10916_v12, %v2394_v10  ;;  %8793 = vmatprep.mubr.msk.f32.mxu1 %vm3906_vm0, %v3771_v42  ;;  %v11759_v9 = vmul.f32 %v10908_v44, %v15764_v23  ;;  %v11763_v28 = vmul.f32 %v10908_v44, %v15766_v51  ;;  %v3255_v36 = vadd.f32 %v2999_v48, %v1715_v17  ;;  %v15770_v58 = vld [vmem:[#allocation81_spill] sm:$0xff]  ;;  %v15772_v11 = vld [vmem:[#allocation99_spill] sm:$0xff]  ;;  %v15773_v48 = vld [vmem:[#allocation102_spill] sm:$0xff] }
 0x321   :  { %v3772_v2 = vmax.f32 %v3516_v3, 0.0  ;;  %v11767_v10 = vmul.f32 %v10908_v44, %v15768_v45  ;;  %v11771_v16 = vmul.f32 %v10908_v44, %v15770_v58  ;;  %v3773_v37 = vmax.f32 %v3517_v62, 0.0  ;;  %v2398_v47 = vpop.permute.xlu1 %2397  ;;  %v9204_v17 = vld [vmem:[%s15422_s0 + $0x610] sm:$0xff] }
 0x322   :  { %15765 = vst [vmem:[#allocation41_spill] sm:$0xff] %v11759_v9  ;;  %15767 = vst [vmem:[#allocation42_spill] sm:$0xff] %v11763_v28  ;;  %v3256_v42 = vadd.f32 %v3000_v39, %v1716_v29  ;;  %v1717_v23 = vmul.f32 %v10908_v44, %v15772_v11  ;;  %v3518_v9 = vadd.f32 %v11496_v49, %v3255_v36  ;;  %v2402_v3 = vpop.permute.xlu0 %2401  ;;  %2609 = vperm.xlu1 %9059, %v9204_v17   ;;  %v9205_v11 = vld [vmem:[%s15422_s0 + $0x618] sm:$0xff]  ;;  %v15776_v45 = vld [vmem:[#allocation83_spill] sm:$0xff] }
 0x323   :  { %15769 = vst [vmem:[#allocation43_spill] sm:$0xff] %v11767_v10  ;;  %15771 = vst [vmem:[#allocation44_spill] sm:$0xff] %v11771_v16  ;;  %v3001_v51 = vmul.f32 %v10916_v12, %v2398_v47  ;;  %8794 = vmatmul.mubr.msk.f32.vlgmr.msra.gmra.mrb[0].mxu1 %vm3906_vm0, %v3772_v2  ;;  %v1718_v62 = vmul.f32 %v10908_v44, %v15773_v48  ;;  %v3002_v39 = vmul.f32 %v10916_v12, %v2402_v3  ;;  %v15774_v47 = vld [vmem:[#allocation82_spill] sm:$0xff]  ;;  %v15780_v48 = vld [vmem:[#allocation85_spill] sm:$0xff] }
 0x324   :  { %v3519_v29 = vadd.f32 %v11496_v49, %v3256_v42  ;;  %2613 = vperm.xlu0 %9058, %v9205_v11   ;;  %8796 = vmatprep.mubr.msk.f32.mxu1 %vm3906_vm0, %v3773_v37  ;;  %v11791_v36 = vmul.f32 %v10908_v44, %v15774_v47  ;;  %v11795_v2 = vmul.f32 %v10908_v44, %v15776_v45  ;;  %v3774_v58 = vmax.f32 %v3518_v9, 0.0  ;;  %v15778_v42 = vld [vmem:[#allocation84_spill] sm:$0xff]  ;;  %v15782_v10 = vld [vmem:[#allocation101_spill] sm:$0xff] }
 0x325   :  { %v3257_v17 = vadd.f32 %v3001_v51, %v1717_v23  ;;  %v11799_v3 = vmul.f32 %v10908_v44, %v15778_v42  ;;  %v11803_v16 = vmul.f32 %v10908_v44, %v15780_v48  ;;  %v3258_v37 = vadd.f32 %v3002_v39, %v1718_v62  ;;  %v2406_v28 = vpop.permute.xlu1 %2405  ;;  %v9206_v23 = vld [vmem:[%s15422_s0 + $0x2a0] sm:$0xff]  ;;  %v15783_v51 = vld [vmem:[#allocation104_spill] sm:$0xff]  ;;  %v15786_v42 = vld [vmem:[#allocation87_spill] sm:$0xff] }
 0x326   :  { %15775 = vst [vmem:[#allocation45_spill] sm:$0xff] %v11791_v36  ;;  %15777 = vst [vmem:[#allocation46_spill] sm:$0xff] %v11795_v2  ;;  %v3775_v11 = vmax.f32 %v3519_v29, 0.0  ;;  %v1719_v47 = vmul.f32 %v10908_v44, %v15782_v10  ;;  %v3003_v45 = vmul.f32 %v10916_v12, %v2406_v28  ;;  %v2410_v9 = vpop.permute.xlu0 %2409  ;;  %2169 = vperm.xlu1 %9059, %v9206_v23   ;;  %v9207_v10 = vld [vmem:[%s15422_s0 + $0x2a8] sm:$0xff] }
 0x327   :  { %15779 = vst [vmem:[#allocation47_spill] sm:$0xff] %v11799_v3  ;;  %15781 = vst [vmem:[#allocation48_spill] sm:$0xff] %v11803_v16  ;;  %v3520_v36 = vadd.f32 %v11496_v49, %v3257_v17  ;;  %8797 = vmatmul.mubr.msk.f32.gmra.mrb[2].mxu1 %vm3906_vm0, %v3774_v58  ;;  %v1720_v29 = vmul.f32 %v10908_v44, %v15783_v51  ;;  %v3521_v62 = vadd.f32 %v11496_v49, %v3258_v37  ;;  %v15784_v28 = vld [vmem:[#allocation86_spill] sm:$0xff]  ;;  %v15788_v37 = vld [vmem:[#allocation88_spill] sm:$0xff] }
 0x328   :  { %v3004_v39 = vmul.f32 %v10916_v12, %v2410_v9  ;;  %2173 = vperm.xlu0 %9058, %v9207_v10   ;;  %8799 = vmatprep.mubr.msk.f32.mxu1 %vm3906_vm0, %v3775_v11  ;;  %v11823_v17 = vmul.f32 %v10908_v44, %v15784_v28  ;;  %v11827_v58 = vmul.f32 %v10908_v44, %v15786_v42  ;;  %v15790_v51 = vld [vmem:[#allocation89_spill] sm:$0xff]  ;;  %v15792_v3 = vld [vmem:[#allocation103_spill] sm:$0xff] }
 0x329   :  { %v3776_v48 = vmax.f32 %v3520_v36, 0.0  ;;  %v3259_v23 = vadd.f32 %v3003_v45, %v1719_v47  ;;  %v11831_v9 = vmul.f32 %v10908_v44, %v15788_v37  ;;  %v11835_v16 = vmul.f32 %v10908_v44, %v15790_v51  ;;  %v2414_v2 = vpop.permute.xlu1 %2413  ;;  %v9208_v47 = vld [vmem:[%s15422_s0 + $0x620] sm:$0xff]  ;;  %v15796_v37 = vld [vmem:[#allocation91_spill] sm:$0xff] }
 0x32a   :  { %15785 = vst [vmem:[#allocation49_spill] sm:$0xff] %v11823_v17  ;;  %15787 = vst [vmem:[#allocation50_spill] sm:$0xff] %v11827_v58  ;;  %v3777_v10 = vmax.f32 %v3521_v62, 0.0  ;;  %v3260_v11 = vadd.f32 %v3004_v39, %v1720_v29  ;;  %v1721_v28 = vmul.f32 %v10908_v44, %v15792_v3  ;;  %v3005_v42 = vmul.f32 %v10916_v12, %v2414_v2  ;;  %v2418_v36 = vpop.permute.xlu0 %2417  ;;  %v15793_v45 = vld [vmem:[#allocation106_spill] sm:$0xff] }
 0x32b   :  { %15789 = vst [vmem:[#allocation51_spill] sm:$0xff] %v11831_v9  ;;  %15791 = vst [vmem:[#allocation52_spill] sm:$0xff] %v11835_v16  ;;  %v3522_v17 = vadd.f32 %v11496_v49, %v3259_v23  ;;  %2617 = vperm.xlu1 %9059, %v9208_v47   ;;  %8800 = vmatmul.mubr.msk.f32.gmra.mrb[4].mxu1 %vm3906_vm0, %v3776_v48  ;;  %v1722_v62 = vmul.f32 %v10908_v44, %v15793_v45  ;;  %v9209_v3 = vld [vmem:[%s15422_s0 + $0x628] sm:$0xff]  ;;  %v15800_v45 = vld [vmem:[#allocation93_spill] sm:$0xff] }
 0x32c   :  { %v3523_v29 = vadd.f32 %v11496_v49, %v3260_v11  ;;  %v3006_v39 = vmul.f32 %v10916_v12, %v2418_v36  ;;  %2621 = vperm.xlu0 %9058, %v9209_v3   ;;  %8802 = vmatprep.mubr.msk.f32.mxu1 %vm3906_vm0, %v3777_v10  ;;  %v15794_v2 = vld [vmem:[#allocation90_spill] sm:$0xff]  ;;  %v11859_v48 = vmul.f32 %v10908_v44, %v15796_v37  ;;  %v15798_v11 = vld [vmem:[#allocation92_spill] sm:$0xff]  ;;  %v15802_v9 = vld [vmem:[#allocation105_spill] sm:$0xff] }
 0x32d   :  { %v11855_v23 = vmul.f32 %v10908_v44, %v15794_v2  ;;  %v3778_v51 = vmax.f32 %v3522_v17, 0.0  ;;  %v3261_v47 = vadd.f32 %v3005_v42, %v1721_v28  ;;  %v11863_v36 = vmul.f32 %v10908_v44, %v15798_v11  ;;  %v2422_v58 = vpop.permute.xlu1 %2421  ;;  %v9210_v28 = vld [vmem:[%s15422_s0 + $0x2b0] sm:$0xff] }
 0x32e   :  { %15797 = vst [vmem:[#allocation54_spill] sm:$0xff] %v11859_v48  ;;  %v11867_v16 = vmul.f32 %v10908_v44, %v15800_v45  ;;  %v3779_v3 = vmax.f32 %v3523_v29, 0.0  ;;  %v3262_v10 = vadd.f32 %v3006_v39, %v1722_v62  ;;  %v1723_v2 = vmul.f32 %v10908_v44, %v15802_v9  ;;  %v2426_v17 = vpop.permute.xlu0 %2425  ;;  %v15803_v42 = vld [vmem:[#allocation108_spill] sm:$0xff]  ;;  %v15806_v11 = vld [vmem:[#allocation107_spill] sm:$0xff] }
 0x32f   :  { %15795 = vst [vmem:[#allocation53_spill] sm:$0xff] %v11855_v23  ;;  %15799 = vst [vmem:[#allocation55_spill] sm:$0xff] %v11863_v36  ;;  %v3524_v23 = vadd.f32 %v11496_v49, %v3261_v47  ;;  %v3007_v37 = vmul.f32 %v10916_v12, %v2422_v58  ;;  %2177 = vperm.xlu1 %9059, %v9210_v28   ;;  %8803 = vmatmul.mubr.msk.f32.gmra.mrb[6].mxu1 %vm3906_vm0, %v3778_v51  ;;  %v9211_v9 = vld [vmem:[%s15422_s0 + $0x2b8] sm:$0xff]  ;;  %v15804_v58 = vld [vmem:[#allocation94_spill] sm:$0xff] }
 0x330   :  { %15801 = vst [vmem:[#allocation56_spill] sm:$0xff] %v11867_v16  ;;  %v1724_v29 = vmul.f32 %v10908_v44, %v15803_v42  ;;  %v3525_v62 = vadd.f32 %v11496_v49, %v3262_v10  ;;  %v3008_v39 = vmul.f32 %v10916_v12, %v2426_v17  ;;  %2181 = vperm.xlu0 %9058, %v9211_v9   ;;  %v15807_v42 = vld [vmem:[#allocation109_spill] sm:$0xff]  ;;  %v15808_v17 = vld [vmem:[#allocation110_spill] sm:$0xff] }
 0x331   :  { %8805 = vmatprep.mubr.msk.f32.mxu1 %vm3906_vm0, %v3779_v3  ;;  %v11887_v47 = vmul.f32 %v10908_v44, %v15804_v58  ;;  %v1725_v51 = vmul.f32 %v10908_v44, %v15806_v11  ;;  %v3780_v45 = vmax.f32 %v3524_v23, 0.0  ;;  %v3263_v28 = vadd.f32 %v3007_v37, %v1723_v2  ;;  %v2430_v9 = vpop.permute.xlu1 %2429  ;;  %v9212_v23 = vld [vmem:[%s15422_s0 + $0x630] sm:$0xff] }
 0x332   :  { %v1727_v10 = vmul.f32 %v10908_v44, %v15807_v42  ;;  %v1726_v16 = vmul.f32 %v10908_v44, %v15808_v17  ;;  %v3781_v48 = vmax.f32 %v3525_v62, 0.0  ;;  %v3264_v36 = vadd.f32 %v3008_v39, %v1724_v29  ;;  %v2434_v40 = vpop.permute.xlu0 %2433  ;;  %v15810_v2 = vld [vmem:[#allocation112_spill] sm:$0xff]  ;;  %v15811_v39 = vld [vmem:[#allocation113_spill] sm:$0xff] }
 0x333   :  { %15805 = vst [vmem:[#allocation57_spill] sm:$0xff] %v11887_v47  ;;  %v1729_v3 = vmul.f32 %v10908_v44, %v15809_v35  ;;  %v3526_v58 = vadd.f32 %v11496_v49, %v3263_v28  ;;  %v3009_v47 = vmul.f32 %v10916_v12, %v2430_v9  ;;  %2625 = vperm.xlu1 %9059, %v9212_v23   ;;  %v9213_v35 = vld [vmem:[%s15422_s0 + $0x638] sm:$0xff]  ;;  %v15812_v28 = vld [vmem:[#allocation114_spill] sm:$0xff]  ;;  %v15813_v9 = vld [vmem:[#allocation115_spill] sm:$0xff] }
 0x334   :  { %8806 = vmatmul.mubr.msk.f32.gmra.mrb[8].mxu1 %vm3906_vm0, %v3780_v45  ;;  %v1728_v37 = vmul.f32 %v10908_v44, %v15810_v2  ;;  %v3527_v29 = vadd.f32 %v11496_v49, %v3264_v36  ;;  %v3010_v62 = vmul.f32 %v10916_v12, %v2434_v40  ;;  %2629 = vperm.xlu0 %9058, %v9213_v35   ;;  %v15814_v40 = vld [vmem:[#allocation116_spill] sm:$0xff] }
 0x335   :  { %8808 = vmatprep.mubr.msk.f32.mxu1 %vm3906_vm0, %v3781_v48  ;;  %v11913_v11 = vmul.f32 %v10908_v44, %v15811_v39  ;;  %v1730_v45 = vmul.f32 %v10908_v44, %v15812_v28  ;;  %v3782_v42 = vmax.f32 %v3526_v58, 0.0  ;;  %v3265_v17 = vadd.f32 %v3009_v47, %v1725_v51  ;;  %v2438_v48 = vpop.permute.xlu1 %2437  ;;  %v9214_v51 = vld [vmem:[%s15422_s0 + $0x2c0] sm:$0xff] }
 0x336   :  { %v11919_v36 = vmul.f32 %v10908_v44, %v15813_v9  ;;  %v11923_v23 = vmul.f32 %v10908_v44, %v15814_v40  ;;  %v3783_v2 = vmax.f32 %v3527_v29, 0.0  ;;  %v3266_v35 = vadd.f32 %v3010_v62, %v1726_v16  ;;  %v2442_v47 = vpop.permute.xlu0 %2441  ;;  %v15816_v28 = vld [vmem:[#allocation118_spill] sm:$0xff] }
 0x337   :  { %v11927_v39 = vmul.f32 %v10908_v44, %v15815_v1  ;;  %v3528_v24 = vadd.f32 %v11496_v49, %v3265_v17  ;;  %v3011_v58 = vmul.f32 %v10916_v12, %v2438_v48  ;;  %2185 = vperm.xlu1 %9059, %v9214_v51   ;;  %v11937_v16 = vmul.f32 %v10908_v44, %v15816_v28  ;;  %v9215_v62 = vld [vmem:[%s15422_s0 + $0x2c8] sm:$0xff] }
 0x338   :  { %8809 = vmatmul.mubr.msk.f32.gmra.mrb[10].mxu1 %vm3906_vm0, %v3782_v42  ;;  %v3529_v29 = vadd.f32 %v11496_v49, %v3266_v35  ;;  %v3012_v1 = vmul.f32 %v10916_v12, %v2442_v47  ;;  %2189 = vperm.xlu0 %9058, %v9215_v62   ;;  %v15817_v17 = vld [vmem:[#allocation119_spill] sm:$0xff]  ;;  %v15818_v42 = vld [vmem:[#allocation120_spill] sm:$0xff]  ;;  %v15819_v35 = vld [vmem:[#allocation121_spill] sm:$0xff]  ;;  %v11995_v7 = vmul.f32 %v10908_v44, %v15826_v27 }
 0x339   :  { %8811 = vmatprep.mubr.msk.f32.mxu1 %vm3906_vm0, %v3783_v2  ;;  %v11947_v9 = vmul.f32 %v10908_v44, %v15817_v17  ;;  %v11951_v40 = vmul.f32 %v10908_v44, %v15818_v42  ;;  %v3784_v48 = vmax.f32 %v3528_v24, 0.0  ;;  %v3267_v51 = vadd.f32 %v3011_v58, %v1727_v10  ;;  %v15820_v28 = vld [vmem:[#allocation122_spill] sm:$0xff]  ;;  %v2446_v25 = vpop.permute.xlu1 %2445 }
 0x33a   :  { %v11955_v47 = vmul.f32 %v10908_v44, %v15819_v35  ;;  %v11959_v55 = vmul.f32 %v10908_v44, %v15820_v28  ;;  %v3785_v62 = vmax.f32 %v3529_v29, 0.0  ;;  %v3268_v2 = vadd.f32 %v3012_v1, %v1728_v37  ;;  %v2450_v10 = vpop.permute.xlu0 %2449  ;;  %v9216_v58 = vld [vmem:[%s15422_s0 + $0x640] sm:$0xff]  ;;  %v15822_v35 = vld [vmem:[#allocation124_spill] sm:$0xff] }
 0x33b   :  { %v11963_v17 = vmul.f32 %v10908_v44, %v15821_v54  ;;  %v3530_v42 = vadd.f32 %v11496_v49, %v3267_v51  ;;  %v3013_v24 = vmul.f32 %v10916_v12, %v2446_v25  ;;  %2633 = vperm.xlu1 %9059, %v9216_v58   ;;  %v11973_v37 = vmul.f32 %v10908_v44, %v15822_v35  ;;  %v9217_v25 = vld [vmem:[%s15422_s0 + $0x648] sm:$0xff]  ;;  %v15823_v1 = vld [vmem:[#allocation125_spill] sm:$0xff] }
 0x33c   :  { %8812 = vmatmul.mubr.msk.f32.gmra.mrb[12].mxu1 %vm3906_vm0, %v3784_v48  ;;  %v3531_v29 = vadd.f32 %v11496_v49, %v3268_v2  ;;  %v3014_v54 = vmul.f32 %v10916_v12, %v2450_v10  ;;  %2637 = vperm.xlu0 %9058, %v9217_v25   ;;  %v11983_v51 = vmul.f32 %v10908_v44, %v15823_v1  ;;  %v15824_v48 = vld [vmem:[#allocation126_spill] sm:$0xff]  ;;  %v15825_v2 = vld [vmem:[#allocation127_spill] sm:$0xff] }
 0x33d   :  { %8814 = vmatprep.mubr.msk.f32.mxu1 %vm3906_vm0, %v3785_v62  ;;  %v11987_v28 = vmul.f32 %v10908_v44, %v15824_v48  ;;  %v3786_v58 = vmax.f32 %v3530_v42, 0.0  ;;  %v3269_v35 = vadd.f32 %v3013_v24, %v1729_v3  ;;  %v11991_v10 = vmul.f32 %v10908_v44, %v15825_v2  ;;  %v2454_v4 = vpop.permute.xlu1 %2453  ;;  %v9218_v24 = vld [vmem:[%s15422_s0 + $0x2d0] sm:$0xff]  ;;  %v15828_v27 = vld [vmem:[#allocation130_spill] sm:$0xff] }
 0x33e   :  { %v3787_v25 = vmax.f32 %v3531_v29, 0.0  ;;  %v3270_v62 = vadd.f32 %v3014_v54, %v1730_v45  ;;  %v11999_v1 = vmul.f32 %v10908_v44, %v15827_v18  ;;  %v3015_v42 = vmul.f32 %v10916_v12, %v2454_v4  ;;  %v2458_v3 = vpop.permute.xlu0 %2457  ;;  %v9219_v4 = vld [vmem:[%s15422_s0 + $0x2d8] sm:$0xff]  ;;  %v15829_v54 = vld [vmem:[#allocation131_spill] sm:$0xff] }
 0x33f   :  { %v3532_v48 = vadd.f32 %v11496_v49, %v3269_v35  ;;  %2193 = vperm.xlu1 %9059, %v9218_v24   ;;  %v12009_v45 = vmul.f32 %v10908_v44, %v15828_v27  ;;  %v3016_v18 = vmul.f32 %v10916_v12, %v2458_v3  ;;  %v12019_v35 = vmul.f32 %v10908_v44, %v15829_v54  ;;  %v15831_v27 = vld [vmem:[#allocation133_spill] sm:$0xff] }
 0x340   :  { %8815 = vmatmul.mubr.msk.f32.gmra.mrb[14].mxu1 %vm3906_vm0, %v3786_v58  ;;  %v3533_v29 = vadd.f32 %v11496_v49, %v3270_v62  ;;  %2197 = vperm.xlu0 %9058, %v9219_v4   ;;  %v15830_v58 = vld [vmem:[#allocation132_spill] sm:$0xff]  ;;  %v3271_v62 = vadd.f32 %v3015_v42, %v11913_v11  ;;  %v12028_v3 = vmul.f32 %v10908_v44, %v15831_v27 }
 0x341   :  { %8817 = vmatprep.mubr.msk.f32.mxu1 %vm3906_vm0, %v3787_v25  ;;  %v12023_v2 = vmul.f32 %v10908_v44, %v15830_v58  ;;  %v3788_v24 = vmax.f32 %v3532_v48, 0.0  ;;  %v12032_v4 = vmul.f32 %v10908_v44, %v15832_v56  ;;  %v3272_v57 = vadd.f32 %v3016_v18, %v11923_v23  ;;  %v2462_v54 = vpop.permute.xlu1 %2461  ;;  %v9220_v58 = vld [vmem:[%s15422_s0 + $0x650] sm:$0xff]  ;;  %v9221_v18 = vld [vmem:[%s15422_s0 + $0x658] sm:$0xff] }
 0x342   :  { %v3789_v25 = vmax.f32 %v3533_v29, 0.0  ;;  %v12037_v43 = vmul.f32 %v10908_v44, %v15833_v33  ;;  %v3534_v48 = vadd.f32 %v11496_v49, %v3271_v62  ;;  %v3017_v11 = vmul.f32 %v10916_v12, %v2462_v54  ;;  %v2466_v42 = vpop.permute.xlu0 %2465  ;;  %v15834_v56 = vld [vmem:[#allocation136_spill] sm:$0xff]  ;;  %v15835_v62 = vld [vmem:[#allocation137_spill] sm:$0xff] }
 0x343   :  { %2641 = vperm.xlu1 %9059, %v9220_v58   ;;  %v12047_v23 = vmul.f32 %v10908_v44, %v15834_v56  ;;  %v3535_v29 = vadd.f32 %v11496_v49, %v3272_v57  ;;  %v3018_v33 = vmul.f32 %v10916_v12, %v2466_v42  ;;  %v12057_v27 = vmul.f32 %v10908_v44, %v15835_v62  ;;  %v15837_v56 = vld [vmem:[#allocation139_spill] sm:$0xff] }
 0x344   :  { %8818 = vmatmul.mubr.msk.f32.gmra.mrb[16].mxu1 %vm3906_vm0, %v3788_v24  ;;  %2645 = vperm.xlu0 %9058, %v9221_v18   ;;  %v15836_v24 = vld [vmem:[#allocation138_spill] sm:$0xff]  ;;  %v3790_v58 = vmax.f32 %v3534_v48, 0.0  ;;  %v3273_v57 = vadd.f32 %v3017_v11, %v11919_v36  ;;  %v12066_v42 = vmul.f32 %v10908_v44, %v15837_v56  ;;  %v12070_v18 = vmul.f32 %v10908_v44, %v15838_v31 }
 0x345   :  { %8820 = vmatprep.mubr.msk.f32.mxu1 %vm3906_vm0, %v3789_v25  ;;  %v12061_v54 = vmul.f32 %v10908_v44, %v15836_v24  ;;  %v3791_v25 = vmax.f32 %v3535_v29, 0.0  ;;  %v3274_v32 = vadd.f32 %v3018_v33, %v11937_v16  ;;  %v2470_v62 = vpop.permute.xlu1 %2469  ;;  %v9222_v24 = vld [vmem:[%s15422_s0 + $0x2e0] sm:$0xff]  ;;  %v9223_v33 = vld [vmem:[%s15422_s0 + $0x2e8] sm:$0xff]  ;;  %v12113_v21 = vmul.f32 %v10908_v44, %v15845_v59 }
 0x346   :  { %v3536_v48 = vadd.f32 %v11496_v49, %v3273_v57  ;;  %v3019_v36 = vmul.f32 %v10916_v12, %v2470_v62  ;;  %v2474_v11 = vpop.permute.xlu0 %2473  ;;  %v15840_v31 = vld [vmem:[#allocation142_spill] sm:$0xff]  ;;  %v15841_v57 = vld [vmem:[#allocation143_spill] sm:$0xff]  ;;  %v12151_v5 = vmul.f32 %v10908_v44, %v15851_v14 }
 0x347   :  { %2201 = vperm.xlu1 %9059, %v9222_v24   ;;  %v12085_v16 = vmul.f32 %v10908_v44, %v15840_v31  ;;  %v3537_v29 = vadd.f32 %v11496_v49, %v3274_v32  ;;  %v3020_v26 = vmul.f32 %v10916_v12, %v2474_v11  ;;  %v12095_v56 = vmul.f32 %v10908_v44, %v15841_v57  ;;  %v15843_v31 = vld [vmem:[#allocation145_spill] sm:$0xff] }
 0x348   :  { %8821 = vmatmul.mubr.msk.f32.gmra.mrb[18].mxu1 %vm3906_vm0, %v3790_v58  ;;  %2205 = vperm.xlu0 %9058, %v9223_v33   ;;  %v15842_v58 = vld [vmem:[#allocation144_spill] sm:$0xff]  ;;  %v3792_v24 = vmax.f32 %v3536_v48, 0.0  ;;  %v3275_v32 = vadd.f32 %v3019_v36, %v11927_v39  ;;  %v12104_v11 = vmul.f32 %v10908_v44, %v15843_v31  ;;  %v12108_v33 = vmul.f32 %v10908_v44, %v15844_v0 }
 0x349   :  { %8823 = vmatprep.mubr.msk.f32.mxu1 %vm3906_vm0, %v3791_v25  ;;  %v12099_v62 = vmul.f32 %v10908_v44, %v15842_v58  ;;  %v3793_v25 = vmax.f32 %v3537_v29, 0.0  ;;  %v3276_v50 = vadd.f32 %v3020_v26, %v11951_v40  ;;  %v2478_v57 = vpop.permute.xlu1 %2477  ;;  %v9224_v58 = vld [vmem:[%s15422_s0 + $0x660] sm:$0xff]  ;;  %v15846_v0 = vld [vmem:[#allocation148_spill] sm:$0xff]  ;;  %v9225_v26 = vld [vmem:[%s15422_s0 + $0x668] sm:$0xff] }
 0x34a   :  { %v3538_v48 = vadd.f32 %v11496_v49, %v3275_v32  ;;  %v3021_v39 = vmul.f32 %v10916_v12, %v2478_v57  ;;  %v2482_v36 = vpop.permute.xlu0 %2481  ;;  %v12123_v40 = vmul.f32 %v10908_v44, %v15846_v0  ;;  %v15847_v32 = vld [vmem:[#allocation149_spill] sm:$0xff]  ;;  %v15849_v0 = vld [vmem:[#allocation151_spill] sm:$0xff] }
 0x34b   :  { %2649 = vperm.xlu1 %9059, %v9224_v58   ;;  %v3539_v29 = vadd.f32 %v11496_v49, %v3276_v50  ;;  %v3022_v59 = vmul.f32 %v10916_v12, %v2482_v36  ;;  %v12133_v31 = vmul.f32 %v10908_v44, %v15847_v32  ;;  %v12142_v36 = vmul.f32 %v10908_v44, %v15849_v0 }
 0x34c   :  { %8824 = vmatmul.mubr.msk.f32.gmra.mrb[20].mxu1 %vm3906_vm0, %v3792_v24  ;;  %2653 = vperm.xlu0 %9058, %v9225_v26   ;;  %v15848_v24 = vld [vmem:[#allocation150_spill] sm:$0xff]  ;;  %v3794_v58 = vmax.f32 %v3538_v48, 0.0  ;;  %v3277_v50 = vadd.f32 %v3021_v39, %v11947_v9  ;;  %v12146_v26 = vmul.f32 %v10908_v44, %v15850_v61 }
 0x34d   :  { %8826 = vmatprep.mubr.msk.f32.mxu1 %vm3906_vm0, %v3793_v25  ;;  %v12137_v57 = vmul.f32 %v10908_v44, %v15848_v24  ;;  %v3795_v25 = vmax.f32 %v3539_v29, 0.0  ;;  %v3278_v13 = vadd.f32 %v3022_v59, %v11959_v55  ;;  %v2486_v32 = vpop.permute.xlu1 %2485  ;;  %v9226_v24 = vld [vmem:[%s15422_s0 + $0x2f0] sm:$0xff]  ;;  %v15852_v61 = vld [vmem:[#allocation154_spill] sm:$0xff]  ;;  %v9227_v59 = vld [vmem:[%s15422_s0 + $0x2f8] sm:$0xff] }
 0x34e   :  { %v3540_v48 = vadd.f32 %v11496_v49, %v3277_v50  ;;  %v3023_v9 = vmul.f32 %v10916_v12, %v2486_v32  ;;  %v2490_v39 = vpop.permute.xlu0 %2489  ;;  %v12161_v55 = vmul.f32 %v10908_v44, %v15852_v61  ;;  %v15853_v50 = vld [vmem:[#allocation155_spill] sm:$0xff]  ;;  %v15856_v61 = vld [vmem:[#allocation157_spill] sm:$0xff] }
 0x34f   :  { %2209 = vperm.xlu1 %9059, %v9226_v24   ;;  %v3541_v29 = vadd.f32 %v11496_v49, %v3278_v13  ;;  %v3024_v14 = vmul.f32 %v10916_v12, %v2490_v39  ;;  %v12171_v0 = vmul.f32 %v10908_v44, %v15853_v50  ;;  %v12180_v39 = vmul.f32 %v10908_v44, %v15856_v61 }
 0x350   :  { %8827 = vmatmul.mubr.msk.f32.gmra.mrb[22].mxu1 %vm3906_vm0, %v3794_v58  ;;  %2213 = vperm.xlu0 %9058, %v9227_v59   ;;  %v15855_v58 = vld [vmem:[#allocation156_spill] sm:$0xff]  ;;  %v3796_v24 = vmax.f32 %v3540_v48, 0.0  ;;  %v3279_v13 = vadd.f32 %v3023_v9, %v11955_v47  ;;  %v12184_v59 = vmul.f32 %v10908_v44, %v15858_v46 }
 0x351   :  { %8829 = vmatprep.mubr.msk.f32.mxu1 %vm3906_vm0, %v3795_v25  ;;  %15854 = vst [vmem:[#allocation58_spill] sm:$0xff] %v12171_v0  ;;  %v12175_v32 = vmul.f32 %v10908_v44, %v15855_v58  ;;  %15857 = vst [vmem:[#allocation59_spill] sm:$0xff] %v12180_v39  ;;  %v3797_v25 = vmax.f32 %v3541_v29, 0.0  ;;  %v3280_v60 = vadd.f32 %v3024_v14, %v11973_v37  ;;  %v2494_v50 = vpop.permute.xlu1 %2493  ;;  %v15859_v0 = vld [vmem:[#allocation159_spill] sm:$0xff]  ;;  %v15861_v46 = vld [vmem:[#allocation160_spill] sm:$0xff] }
 0x352   :  { %v12189_v34 = vmul.f32 %v10908_v44, %v15859_v0  ;;  %v3542_v48 = vadd.f32 %v11496_v49, %v3279_v13  ;;  %v3025_v47 = vmul.f32 %v10916_v12, %v2494_v50  ;;  %v2498_v9 = vpop.permute.xlu0 %2497  ;;  %v9228_v58 = vld [vmem:[%s15422_s0 + $0x670] sm:$0xff]  ;;  %v12199_v37 = vmul.f32 %v10908_v44, %v15861_v46  ;;  %v9229_v0 = vld [vmem:[%s15422_s0 + $0x678] sm:$0xff] }
 0x353   :  { %2657 = vperm.xlu1 %9059, %v9228_v58   ;;  %v3543_v29 = vadd.f32 %v11496_v49, %v3280_v60  ;;  %v3026_v14 = vmul.f32 %v10916_v12, %v2498_v9  ;;  %v15863_v13 = vld [vmem:[#allocation161_spill] sm:$0xff]  ;;  %v15866_v46 = vld [vmem:[#allocation163_spill] sm:$0xff] }
 0x354   :  { %15860 = vst [vmem:[#allocation60_spill] sm:$0xff] %v12189_v34  ;;  %8830 = vmatmul.mubr.msk.f32.gmra.mrb[24].mxu1 %vm3906_vm0, %v3796_v24  ;;  %15862 = vst [vmem:[#allocation61_spill] sm:$0xff] %v12199_v37  ;;  %2661 = vperm.xlu0 %9058, %v9229_v0   ;;  %v12209_v61 = vmul.f32 %v10908_v44, %v15863_v13  ;;  %v15865_v24 = vld [vmem:[#allocation162_spill] sm:$0xff]  ;;  %v3798_v58 = vmax.f32 %v3542_v48, 0.0  ;;  %v3281_v60 = vadd.f32 %v3025_v47, %v11963_v17  ;;  %v15868_v34 = vld [vmem:[#allocation164_spill] sm:$0xff] }
 0x355   :  { %8832 = vmatprep.mubr.msk.f32.mxu1 %vm3906_vm0, %v3797_v25  ;;  %v12213_v50 = vmul.f32 %v10908_v44, %v15865_v24  ;;  %v12218_v9 = vmul.f32 %v10908_v44, %v15866_v46  ;;  %v12222_v0 = vmul.f32 %v10908_v44, %v15868_v34  ;;  %v3799_v25 = vmax.f32 %v3543_v29, 0.0  ;;  %v2502_v13 = vpop.permute.xlu1 %2501  ;;  %v9230_v24 = vld [vmem:[%s15422_s0 + $0x300] sm:$0xff] }
 0x356   :  { %15864 = vst [vmem:[#allocation62_spill] sm:$0xff] %v12209_v61  ;;  %v3282_v37 = vadd.f32 %v3026_v14, %v11987_v28  ;;  %v15869_v61 = vld [vmem:[#allocation165_spill] sm:$0xff]  ;;  %v3544_v48 = vadd.f32 %v11496_v49, %v3281_v60  ;;  %v3027_v17 = vmul.f32 %v10916_v12, %v2502_v13  ;;  %v2506_v47 = vpop.permute.xlu0 %2505  ;;  %v15871_v34 = vld [vmem:[#allocation166_spill] sm:$0xff]  ;;  %v15873_v60 = vld [vmem:[#allocation167_spill] sm:$0xff] }
 0x357   :  { %15867 = vst [vmem:[#allocation63_spill] sm:$0xff] %v12218_v9  ;;  %v12227_v39 = vmul.f32 %v10908_v44, %v15869_v61  ;;  %2217 = vperm.xlu1 %9059, %v9230_v24   ;;  %v12237_v28 = vmul.f32 %v10908_v44, %v15871_v34  ;;  %v3028_v14 = vmul.f32 %v10916_v12, %v2506_v47  ;;  %v9231_v61 = vld [vmem:[%s15422_s0 + $0x308] sm:$0xff]  ;;  %v15876_v34 = vld [vmem:[#allocation169_spill] sm:$0xff] }
 0x358   :  { %8833 = vmatmul.mubr.msk.f32.gmra.mrb[26].mxu1 %vm3906_vm0, %v3798_v58  ;;  %v3545_v29 = vadd.f32 %v11496_v49, %v3282_v37  ;;  %2221 = vperm.xlu0 %9058, %v9231_v61   ;;  %v12247_v46 = vmul.f32 %v10908_v44, %v15873_v60  ;;  %v15875_v58 = vld [vmem:[#allocation168_spill] sm:$0xff]  ;;  %v3800_v24 = vmax.f32 %v3544_v48, 0.0  ;;  %v3283_v37 = vadd.f32 %v3027_v17, %v11983_v51 }
 0x359   :  { %15870 = vst [vmem:[#allocation64_spill] sm:$0xff] %v12227_v39  ;;  %15872 = vst [vmem:[#allocation65_spill] sm:$0xff] %v12237_v28  ;;  %8835 = vmatprep.mubr.msk.f32.mxu1 %vm3906_vm0, %v3799_v25  ;;  %v12251_v13 = vmul.f32 %v10908_v44, %v15875_v58  ;;  %v12256_v47 = vmul.f32 %v10908_v44, %v15876_v34  ;;  %v15878_v39 = vld [vmem:[#allocation170_spill] sm:$0xff]  ;;  %v3284_v28 = vadd.f32 %v3028_v14, %v11995_v7  ;;  %v2510_v60 = vpop.permute.xlu1 %2509 }
 0x35a   :  { %15874 = vst [vmem:[#allocation66_spill] sm:$0xff] %v12247_v46  ;;  %v12260_v61 = vmul.f32 %v10908_v44, %v15878_v39  ;;  %v3801_v25 = vmax.f32 %v3545_v29, 0.0  ;;  %v15879_v46 = vld [vmem:[#allocation171_spill] sm:$0xff]  ;;  %v3546_v48 = vadd.f32 %v11496_v49, %v3283_v37  ;;  %v3029_v51 = vmul.f32 %v10916_v12, %v2510_v60  ;;  %v2514_v17 = vpop.permute.xlu0 %2513  ;;  %v9232_v58 = vld [vmem:[%s15422_s0 + $0x680] sm:$0xff]  ;;  %v15881_v39 = vld [vmem:[#allocation172_spill] sm:$0xff] }
 0x35b   :  { %15877 = vst [vmem:[#allocation67_spill] sm:$0xff] %v12256_v47  ;;  %v12265_v9 = vmul.f32 %v10908_v44, %v15879_v46  ;;  %2665 = vperm.xlu1 %9059, %v9232_v58   ;;  %v12275_v7 = vmul.f32 %v10908_v44, %v15881_v39  ;;  %v3547_v29 = vadd.f32 %v11496_v49, %v3284_v28  ;;  %v9233_v46 = vld [vmem:[%s15422_s0 + $0x688] sm:$0xff]  ;;  %v15883_v37 = vld [vmem:[#allocation173_spill] sm:$0xff] }
 0x35c   :  { %8836 = vmatmul.mubr.msk.f32.gmra.mrb[28].mxu1 %vm3906_vm0, %v3800_v24  ;;  %v3030_v14 = vmul.f32 %v10916_v12, %v2514_v17  ;;  %2669 = vperm.xlu0 %9058, %v9233_v46   ;;  %v12285_v34 = vmul.f32 %v10908_v44, %v15883_v37  ;;  %v15885_v24 = vld [vmem:[#allocation174_spill] sm:$0xff]  ;;  %v3802_v58 = vmax.f32 %v3546_v48, 0.0  ;;  %v3285_v28 = vadd.f32 %v3029_v51, %v11991_v10  ;;  %v15886_v39 = vld [vmem:[#allocation175_spill] sm:$0xff] }
 0x35d   :  { %15880 = vst [vmem:[#allocation68_spill] sm:$0xff] %v12265_v9  ;;  %15882 = vst [vmem:[#allocation96_spill] sm:$0xff] %v12275_v7  ;;  %8838 = vmatprep.mubr.msk.f32.mxu1 %vm3906_vm0, %v3801_v25  ;;  %v12289_v60 = vmul.f32 %v10908_v44, %v15885_v24  ;;  %v12294_v17 = vmul.f32 %v10908_v44, %v15886_v39  ;;  %v15888_v9 = vld [vmem:[#allocation176_spill] sm:$0xff]  ;;  %v3803_v25 = vmax.f32 %v3547_v29, 0.0  ;;  %v2518_v37 = vpop.permute.xlu1 %2517 }
 0x35e   :  { %15884 = vst [vmem:[#allocation69_spill] sm:$0xff] %v12285_v34  ;;  %v12298_v46 = vmul.f32 %v10908_v44, %v15888_v9  ;;  %v3286_v7 = vadd.f32 %v3030_v14, %v12009_v45  ;;  %v15890_v34 = vld [vmem:[#allocation177_spill] sm:$0xff]  ;;  %v3548_v48 = vadd.f32 %v11496_v49, %v3285_v28  ;;  %v3031_v10 = vmul.f32 %v10916_v12, %v2518_v37  ;;  %v2522_v51 = vpop.permute.xlu0 %2521  ;;  %v9234_v24 = vld [vmem:[%s15422_s0 + $0x310] sm:$0xff]  ;;  %v15892_v9 = vld [vmem:[#allocation178_spill] sm:$0xff] }
 0x35f   :  { %15887 = vst [vmem:[#allocation70_spill] sm:$0xff] %v12294_v17  ;;  %v12303_v47 = vmul.f32 %v10908_v44, %v15890_v34  ;;  %2225 = vperm.xlu1 %9059, %v9234_v24   ;;  %v12313_v45 = vmul.f32 %v10908_v44, %v15892_v9  ;;  %v3032_v14 = vmul.f32 %v10916_v12, %v2522_v51  ;;  %v9235_v34 = vld [vmem:[%s15422_s0 + $0x318] sm:$0xff]  ;;  %v15894_v28 = vld [vmem:[#allocation179_spill] sm:$0xff] }
 0x360   :  { %15889 = vst [vmem:[#allocation71_spill] sm:$0xff] %v12298_v46  ;;  %8839 = vmatmul.mubr.msk.f32.gmra.mrb[30].mxu1 %vm3906_vm0, %v3802_v58  ;;  %v3549_v29 = vadd.f32 %v11496_v49, %v3286_v7  ;;  %2229 = vperm.xlu0 %9058, %v9235_v34   ;;  %v12323_v39 = vmul.f32 %v10908_v44, %v15894_v28  ;;  %v15896_v58 = vld [vmem:[#allocation180_spill] sm:$0xff]  ;;  %v3804_v24 = vmax.f32 %v3548_v48, 0.0  ;;  %v15898_v9 = vld [vmem:[#allocation181_spill] sm:$0xff]  ;;  %v15902_v48 = vld [vmem:[#allocation183_spill] sm:$0xff] }
 0x361   :  { %15891 = vst [vmem:[#allocation72_spill] sm:$0xff] %v12303_v47  ;;  %15893 = vst [vmem:[#allocation95_spill] sm:$0xff] %v12313_v45  ;;  %8841 = vmatprep.mubr.msk.f32.mxu1 %vm3906_vm0, %v3803_v25  ;;  %v12327_v37 = vmul.f32 %v10908_v44, %v15896_v58  ;;  %v3287_v7 = vadd.f32 %v3031_v10, %v11999_v1  ;;  %v12332_v51 = vmul.f32 %v10908_v44, %v15898_v9  ;;  %v15900_v47 = vld [vmem:[#allocation182_spill] sm:$0xff]  ;;  %v2526_v28 = vpop.permute.xlu1 %2525  ;;  %v12342_v58 = vld [vmem:[%s15426_s4] ss:$0 sm:$0xff] }
 0x362   :  { %15895 = vst [vmem:[#allocation73_spill] sm:$0xff] %v12323_v39  ;;  %v12336_v34 = vmul.f32 %v10908_v44, %v15900_v47  ;;  %v3805_v25 = vmax.f32 %v3549_v29, 0.0  ;;  %v3288_v45 = vadd.f32 %v3032_v14, %v12023_v2  ;;  %v12346_v1 = vmul.f32 %v10908_v44, %v15902_v48  ;;  %v9236_v47 = vld [vmem:[%s15422_s0 + $0x690] sm:$0xff] }
 0x363   :  { %15897 = vst [vmem:[#allocation98_spill] sm:$0xff] %v12327_v37  ;;  %15899 = vst [vmem:[#allocation74_spill] sm:$0xff] %v12332_v51  ;;  %v3550_v10 = vadd.f32 %v11496_v49, %v3287_v7  ;;  %v3033_v9 = vmul.f32 %v10916_v12, %v2526_v28  ;;  %v2530_v51 = vpop.permute.xlu0 %2529  ;;  %2673 = vperm.xlu1 %9059, %v9236_v47   ;;  %v15904_v2 = vld [vmem:[#allocation184_spill] sm:$0xff]  ;;  %v15906_v28 = vld [vmem:[#allocation185_spill] sm:$0xff] }
 0x364   :  { %15901 = vst [vmem:[#allocation75_spill] sm:$0xff] %v12336_v34  ;;  %15903 = vst [vmem:[#allocation76_spill] sm:$0xff] %v12346_v1  ;;  %8842 = vmatmul.mubr.msk.f32.gmra.mrb[32].mxu1 %vm3906_vm0, %v3804_v24  ;;  %v12356_v29 = vmul.f32 %v10908_v44, %v15904_v2  ;;  %v3551_v14 = vadd.f32 %v11496_v49, %v3288_v45  ;;  %v3034_v48 = vmul.f32 %v10916_v12, %v2530_v51  ;;  %v8591_v1 = vpop.f32.mrb[0].mxu0  ;;  %v9237_v7 = vld [vmem:[%s15422_s0 + $0x698] sm:$0xff]  ;;  %v15908_v34 = vld [vmem:[#allocation186_spill] sm:$0xff] }
 0x365   :  { %2677 = vperm.xlu0 %9058, %v9237_v7   ;;  %8844 = vmatprep.mubr.msk.f32.mxu1 %vm3906_vm0, %v3805_v25  ;;  %v12366_v47 = vmul.f32 %v10908_v44, %v15906_v28  ;;  %v3806_v24 = vmax.f32 %v3550_v10, 0.0  ;;  %v3289_v2 = vadd.f32 %v3033_v9, %v12019_v35  ;;  %v4741_v45 = vpop.f32.mrb[1].mxu0  ;;  %v12372_v51 = vmul.f32 %v10908_v44, %v15908_v34  ;;  %v2534_v25 = vpop.permute.xlu1 %2533  ;;  %v15910_v17 = vld [vmem:[#allocation187_spill] sm:$0xff]  ;;  %v9238_v34 = vld [vmem:[%s15422_s0 + $0x320] sm:$0xff] }
 0x366   :  { %15905 = vst [vmem:[#allocation77_spill] sm:$0xff] %v12356_v29  ;;  %v4747_v29 = vadd.f32 %v8591_v1, %v12342_v58  ;;  %v3807_v39 = vmax.f32 %v3551_v14, 0.0  ;;  %v3290_v37 = vadd.f32 %v3034_v48, %v12032_v4  ;;  %v4742_v7 = vadd.f32 %v12342_v58, %v4741_v45  ;;  %v15912_v4 = vld [vmem:[#allocation188_spill] sm:$0xff]  ;;  %v9239_v45 = vld [vmem:[%s15422_s0 + $0x328] sm:$0xff] }
 0x367   :  { %15907 = vst [vmem:[#allocation97_spill] sm:$0xff] %v12366_v47  ;;  %15909 = vst [vmem:[#allocation100_spill] sm:$0xff] %v12372_v51  ;;  %v12378_v28 = vmul.f32 %v10908_v44, %v15910_v17  ;;  %v3552_v10 = vadd.f32 %v11496_v49, %v3289_v2  ;;  %v3035_v1 = vmul.f32 %v10916_v12, %v2534_v25  ;;  %v2538_v9 = vpop.permute.xlu0 %2537  ;;  %2233 = vperm.xlu1 %9059, %v9238_v34  }
 0x368   :  { %v6021_v35 = vmax.f32 %v4747_v29, 0.0  ;;  %8845 = vmatmul.mubr.msk.f32.gmra.mrb[34].mxu1 %vm3906_vm0, %v3806_v24  ;;  %v12388_v14 = vmul.f32 %v10908_v44, %v15912_v4  ;;  %v3553_v17 = vadd.f32 %v11496_v49, %v3290_v37  ;;  %v6020_v48 = vmax.f32 %v4742_v7, 0.0  ;;  %v8594_v29 = vpop.f32.mrb[2].mxu0 }
 0x369   :  { %15911 = vst [vmem:[#allocation78_spill] sm:$0xff] %v12378_v28  ;;  %v3036_v2 = vmul.f32 %v10916_v12, %v2538_v9  ;;  %2237 = vperm.xlu0 %9058, %v9239_v45   ;;  %8847 = vmatprep.mubr.msk.f32.mxu1 %vm3906_vm0, %v3807_v39  ;;  %v3808_v25 = vmax.f32 %v3552_v10, 0.0  ;;  %v3291_v34 = vadd.f32 %v3035_v1, %v12028_v3  ;;  %v4751_v28 = vpop.f32.mrb[3].mxu0  ;;  %v12405_v39 = vld [vmem:[%s15424_s2] ss:$0 sm:$0xff] }
 0x36a   :  { %15913 = vst [vmem:[#allocation79_spill] sm:$0xff] %v12388_v14  ;;  %v6277_v24 = vsel %vm3906_vm0, %v6021_v35, -inf  ;;  %v4757_v4 = vadd.f32 %v8594_v29, %v12342_v58  ;;  %v3809_v49 = vmax.f32 %v3553_v17, 0.0  ;;  %v6276_v37 = vsel %vm3906_vm0, %v6020_v48, -inf  ;;  %v2542_v14 = vpop.permute.xlu1 %2541  ;;  %v9241_v17 = vld [vmem:[%s15422_s0 + $0x6a0] sm:$0xff] }
 0x36b   :  { %v3292_v7 = vadd.f32 %v3036_v2, %v12047_v23  ;;  %v4752_v9 = vadd.f32 %v12342_v58, %v4751_v28  ;;  %v6278_v47 = vmax.f32 %v6276_v37, %v6277_v24  ;;  %v3554_v10 = vadd.f32 %v12405_v39, %v3291_v34  ;;  %v2546_v1 = vpop.permute.xlu0 %2545  ;;  %2681 = vperm.xlu1 %9059, %v9241_v17   ;;  %v15914_v23 = vld [vmem:[#allocation189_spill] sm:$0xff]  ;;  %v8597_v45 = vpop.f32.mrb[4].mxu0 }
 0x36c   :  { %v6023_v3 = vmax.f32 %v4757_v4, 0.0  ;;  %v3037_v35 = vmul.f32 %v10916_v12, %v2542_v14  ;;  %8848 = vmatmul.mubr.msk.f32.gmra.mrb[36].mxu1 %vm3906_vm0, %v3808_v25  ;;  %v12415_v28 = vmul.f32 %v10908_v44, %v15914_v23  ;;  %v3038_v29 = vmul.f32 %v10916_v12, %v2546_v1  ;;  %v9242_v14 = vld [vmem:[%s15422_s0 + $0x6a8] sm:$0xff]  ;;  %v4761_v37 = vpop.f32.mrb[5].mxu0 }
 0x36d   :  { %v3555_v48 = vadd.f32 %v12405_v39, %v3292_v7  ;;  %v6022_v2 = vmax.f32 %v4752_v9, 0.0  ;;  %2685 = vperm.xlu0 %9058, %v9242_v14   ;;  %8850 = vmatprep.mubr.msk.f32.mxu1 %vm3906_vm0, %v3809_v49  ;;  %v6279_v24 = vrot.slane %v6278_v47, 4  ;;  %v3810_v34 = vmax.f32 %v3554_v10, 0.0 }
 0x36e   :  { %15915 = vst [vmem:[#allocation80_spill] sm:$0xff] %v12415_v28  ;;  %v6286_v25 = vsel %vm3906_vm0, %v6023_v3, -inf  ;;  %v3293_v4 = vadd.f32 %v3037_v35, %v12037_v43  ;;  %v3294_v9 = vadd.f32 %v3038_v29, %v12061_v54  ;;  %v4767_v1 = vadd.f32 %v8597_v45, %v12342_v58  ;;  %v2550_v23 = vpop.permute.xlu1 %2549  ;;  %v9243_v43 = vld [vmem:[%s15422_s0 + $0x330] sm:$0xff] }
 0x36f   :  { %v3811_v17 = vmax.f32 %v3555_v48, 0.0  ;;  %v6285_v7 = vsel %vm3906_vm0, %v6022_v2, -inf  ;;  %v6280_v28 = vmax.f32 %v6278_v47, %v6279_v24  ;;  %v4762_v49 = vadd.f32 %v12342_v58, %v4761_v37  ;;  %v2554_v10 = vpop.permute.xlu0 %2553  ;;  %2241 = vperm.xlu1 %9059, %v9243_v43   ;;  %v8600_v2 = vpop.f32.mrb[6].mxu0  ;;  %v9244_v47 = vld [vmem:[%s15422_s0 + $0x338] sm:$0xff] }
 0x370   :  { %v6287_v51 = vmax.f32 %v6285_v7, %v6286_v25  ;;  %v3556_v14 = vadd.f32 %v12405_v39, %v3293_v4  ;;  %v3557_v3 = vadd.f32 %v12405_v39, %v3294_v9  ;;  %v6025_v35 = vmax.f32 %v4767_v1, 0.0  ;;  %8851 = vmatmul.mubr.msk.f32.gmra.mrb[38].mxu1 %vm3906_vm0, %v3810_v34  ;;  %v4771_v4 = vpop.f32.mrb[7].mxu0 }
 0x371   :  { %v3039_v54 = vmul.f32 %v10916_v12, %v2550_v23  ;;  %v3040_v48 = vmul.f32 %v10916_v12, %v2554_v10  ;;  %2245 = vperm.xlu0 %9058, %v9244_v47   ;;  %v6281_v29 = vrot.slane %v6280_v28, 2  ;;  %v6024_v25 = vmax.f32 %v4762_v49, 0.0  ;;  %8853 = vmatprep.mubr.msk.f32.mxu1 %vm3906_vm0, %v3811_v17 }
 0x372   :  { %v6288_v45 = vrot.slane %v6287_v51, 4  ;;  %v3812_v24 = vmax.f32 %v3556_v14, 0.0  ;;  %v3813_v37 = vmax.f32 %v3557_v3, 0.0  ;;  %v6295_v7 = vsel %vm3906_vm0, %v6025_v35, -inf  ;;  %v2558_v23 = vpop.permute.xlu1 %2557  ;;  %v9245_v14 = vld [vmem:[%s15422_s0 + $0x6b0] sm:$0xff] }
 0x373   :  { %v3295_v9 = vadd.f32 %v3039_v54, %v12057_v27  ;;  %v3296_v1 = vadd.f32 %v3040_v48, %v12070_v18  ;;  %v6282_v10 = vmax.f32 %v6280_v28, %v6281_v29  ;;  %v6294_v47 = vsel %vm3906_vm0, %v6024_v25, -inf  ;;  %v2562_v46 = vpop.permute.xlu0 %2561  ;;  %2689 = vperm.xlu1 %9059, %v9245_v14   ;;  %v8603_v3 = vpop.f32.mrb[8].mxu0 }
 0x374   :  { %v6289_v43 = vmax.f32 %v6287_v51, %v6288_v45  ;;  %v4777_v34 = vadd.f32 %v8600_v2, %v12342_v58  ;;  %v6296_v17 = vmax.f32 %v6294_v47, %v6295_v7  ;;  %v4772_v18 = vadd.f32 %v12342_v58, %v4771_v4  ;;  %v9246_v51 = vld [vmem:[%s15422_s0 + $0x6b8] sm:$0xff]  ;;  %8854 = vmatmul.mubr.msk.f32.gmra.mrb[40].mxu1 %vm3906_vm0, %v3812_v24  ;;  %v4781_v48 = vpop.f32.mrb[9].mxu0 }
 0x375   :  { %v3558_v49 = vadd.f32 %v12405_v39, %v3295_v9  ;;  %v3559_v27 = vadd.f32 %v12405_v39, %v3296_v1  ;;  %2693 = vperm.xlu0 %9058, %v9246_v51   ;;  %v3041_v54 = vmul.f32 %v10916_v12, %v2558_v23  ;;  %8856 = vmatprep.mubr.msk.f32.mxu1 %vm3906_vm0, %v3813_v37  ;;  %v6283_v7 = vrot.slane %v6282_v10, 1  ;;  %v9247_v23 = vld [vmem:[%s15422_s0 + $0x340] sm:$0xff] }
 0x376   :  { %v6290_v28 = vrot.slane %v6289_v43, 2  ;;  %v6027_v35 = vmax.f32 %v4777_v34, 0.0  ;;  %v6297_v2 = vrot.slane %v6296_v17, 4  ;;  %v6026_v25 = vmax.f32 %v4772_v18, 0.0  ;;  %v2566_v4 = vpop.permute.xlu1 %2565 }
 0x377   :  { %v3814_v29 = vmax.f32 %v3558_v49, 0.0  ;;  %v3815_v45 = vmax.f32 %v3559_v27, 0.0  ;;  %v3297_v47 = vadd.f32 %v3041_v54, %v12066_v42  ;;  %v2126_v14 = vpop.permute.xlu0 %2125  ;;  %2249 = vperm.xlu1 %9059, %v9247_v23   ;;  %v3042_v49 = vmul.f32 %v10916_v12, %v2562_v46  ;;  %v8606_v27 = vpop.f32.mrb[10].mxu0 }
 0x378   :  { %v6291_v9 = vmax.f32 %v6289_v43, %v6290_v28  ;;  %v6304_v1 = vsel %vm3906_vm0, %v6027_v35, -inf  ;;  %v6298_v24 = vmax.f32 %v6296_v17, %v6297_v2  ;;  %v6303_v34 = vsel %vm3906_vm0, %v6026_v25, -inf  ;;  %v9248_v43 = vld [vmem:[%s15422_s0 + $0x348] sm:$0xff]  ;;  %v4791_v17 = vpop.f32.mrb[11].mxu0 }
 0x379   :  { %v4787_v37 = vadd.f32 %v8603_v3, %v12342_v58  ;;  %2253 = vperm.xlu0 %9058, %v9248_v43   ;;  %v12469_v18 = vmax.f32 %v6303_v34, %v6304_v1  ;;  %v3560_v51 = vadd.f32 %v12405_v39, %v3297_v47  ;;  %v4782_v28 = vadd.f32 %v12342_v58, %v4781_v48  ;;  %v9249_v48 = vld [vmem:[%s15422_s0 + $0x6c0] sm:$0xff] }
 0x37a   :  { %v6292_v42 = vrot.slane %v6291_v9, 1  ;;  %8857 = vmatmul.mubr.msk.f32.gmra.mrb[42].mxu1 %vm3906_vm0, %v3814_v29  ;;  %v6299_v35 = vrot.slane %v6298_v24, 2  ;;  %v3298_v46 = vadd.f32 %v3042_v49, %v12085_v16  ;;  %v3043_v54 = vmul.f32 %v10916_v12, %v2566_v4  ;;  %v2570_v2 = vpop.permute.xlu1 %2569 }
 0x37b   :  { %v6029_v3 = vmax.f32 %v4787_v37, 0.0  ;;  %8859 = vmatprep.mubr.msk.f32.mxu1 %vm3906_vm0, %v3815_v45  ;;  %v6284_v25 = vmax.f32 %v6282_v10, %v6283_v7  ;;  %v3816_v1 = vmax.f32 %v3560_v51, 0.0  ;;  %v6028_v34 = vmax.f32 %v4782_v28, 0.0  ;;  %v2574_v43 = vpop.permute.xlu0 %2573  ;;  %2697 = vperm.xlu1 %9059, %v9249_v48   ;;  %v8609_v49 = vpop.f32.mrb[12].mxu0  ;;  %v9250_v10 = vld [vmem:[%s15422_s0 + $0x6c8] sm:$0xff] }
 0x37c   :  { %v6293_v23 = vmax.f32 %v6291_v9, %v6292_v42  ;;  %v6300_v29 = vmax.f32 %v6298_v24, %v6299_v35  ;;  %v3561_v47 = vadd.f32 %v12405_v39, %v3298_v46  ;;  %v3299_v4 = vadd.f32 %v3043_v54, %v12075_v41  ;;  %v15916_v45 = vld [vmem:[#allocation190_spill] sm:$0xff]  ;;  %v4801_v42 = vpop.f32.mrb[13].mxu0 }
 0x37d   :  { %v6313_v16 = vsel %vm3906_vm0, %v6029_v3, -inf  ;;  %2701 = vperm.xlu0 %9058, %v9250_v10   ;;  %v12488_v7 = vmul.f32 %v10908_v44, %v15916_v45  ;;  %v6312_v24 = vsel %vm3906_vm0, %v6028_v34, -inf  ;;  %v2933_v37 = vmul.f32 %v10916_v12, %v2126_v14  ;;  %v9251_v14 = vld [vmem:[%s15422_s0 + $0x350] sm:$0xff] }
 0x37e   :  { %v7572_v9 = vsel %vm7571_vm1, %v6293_v23, %v6284_v25  ;;  %8860 = vmatmul.mubr.msk.f32.gmra.mrb[44].mxu1 %vm3906_vm0, %v3816_v1  ;;  %v6301_v41 = vrot.slane %v6300_v29, 1  ;;  %v3817_v51 = vmax.f32 %v3561_v47, 0.0  ;;  %v12494_v28 = vmax.f32 %v6312_v24, %v6313_v16  ;;  %v2130_v46 = vpop.permute.xlu1 %2129  ;;  %v15918_v1 = vld [vmem:[#allocation191_spill] sm:$0xff] }
 0x37f   :  { %15917 = vst [vmem:[#allocation81_spill] sm:$0xff] %v12488_v7  ;;  %v3562_v35 = vadd.f32 %v12405_v39, %v3299_v4  ;;  %v3189_v3 = vadd.f32 %v2933_v37, %v11451_v8  ;;  %v4797_v54 = vadd.f32 %v8606_v27, %v12342_v58  ;;  %v4792_v25 = vadd.f32 %v12342_v58, %v4791_v17  ;;  %v2134_v23 = vpop.permute.xlu0 %2133  ;;  %v8612_v8 = vpop.f32.mrb[14].mxu0  ;;  %v9252_v27 = vld [vmem:[%s15422_s0 + $0x358] sm:$0xff] }
 0x380   :  { %2257 = vperm.xlu1 %9059, %v9251_v14   ;;  %v12505_v34 = vmul.f32 %v10908_v44, %v15918_v1  ;;  %v6302_v48 = vmax.f32 %v6300_v29, %v6301_v41  ;;  %v3044_v16 = vmul.f32 %v10916_v12, %v2570_v2  ;;  %8862 = vmatprep.mubr.msk.f32.mxu1 %vm3906_vm0, %v3817_v51  ;;  %v15920_v17 = vld [vmem:[#allocation192_spill] sm:$0xff]  ;;  %v4811_v29 = vpop.f32.mrb[15].mxu0  ;;  %v15922_v37 = vld [vmem:[#allocation193_spill] sm:$0xff]  ;;  %v15925_v1 = vld [vmem:[#allocation194_spill] sm:$0xff] }
 0x381   :  { %v3818_v47 = vmax.f32 %v3562_v35, 0.0  ;;  %2261 = vperm.xlu0 %9058, %v9252_v27   ;;  %v12514_v4 = vmul.f32 %v10908_v44, %v15920_v17  ;;  %v3452_v10 = vadd.f32 %v12405_v39, %v3189_v3  ;;  %v6031_v45 = vmax.f32 %v4797_v54, 0.0 }
 0x382   :  { %15919 = vst [vmem:[#allocation99_spill] sm:$0xff] %v12505_v34  ;;  %v6030_v24 = vmax.f32 %v4792_v25, 0.0  ;;  %v12519_v2 = vmul.f32 %v10908_v44, %v15922_v37  ;;  %v12522_v41 = vsel %vm7573_vm2, %v6302_v48, %v7572_v9  ;;  %v3300_v51 = vadd.f32 %v3044_v16, %v12099_v62  ;;  %v2578_v14 = vpop.permute.xlu1 %2577  ;;  %v9253_v9 = vld [vmem:[%s15422_s0 + $0x6d0] sm:$0xff] }
 0x383   :  { %15921 = vst [vmem:[#allocation102_spill] sm:$0xff] %v12514_v4  ;;  %15924 = vst [vmem:[#allocation83_spill] sm:$0xff] %v12522_v41  ;;  %v3045_v35 = vmul.f32 %v10916_v12, %v2574_v43  ;;  %8863 = vmatmul.mubr.msk.f32.gmra.mrb[46].mxu1 %vm3906_vm0, %v3818_v47  ;;  %v12529_v3 = vmul.f32 %v10908_v44, %v15925_v1  ;;  %v3708_v54 = vmax.f32 %v3452_v10, 0.0  ;;  %v6322_v25 = vsel %vm3906_vm0, %v6031_v45, -inf  ;;  %v2582_v17 = vpop.permute.xlu0 %2581  ;;  %v15927_v62 = vld [vmem:[#allocation195_spill] sm:$0xff]  ;;  %v8615_v10 = vpop.f32.mrb[16].mxu0 }
 0x384   :  { %15923 = vst [vmem:[#allocation82_spill] sm:$0xff] %v12519_v2  ;;  %v6321_v27 = vsel %vm3906_vm0, %v6030_v24, -inf  ;;  %2705 = vperm.xlu1 %9059, %v9253_v9   ;;  %v12538_v43 = vmul.f32 %v10908_v44, %v15927_v62  ;;  %v3563_v47 = vadd.f32 %v12405_v39, %v3300_v51  ;;  %v9254_v45 = vld [vmem:[%s15422_s0 + $0x6d8] sm:$0xff]  ;;  %v4807_v1 = vadd.f32 %v8609_v49, %v12342_v58  ;;  %v4821_v51 = vpop.f32.mrb[17].mxu0 }
 0x385   :  { %15926 = vst [vmem:[#allocation84_spill] sm:$0xff] %v12529_v3  ;;  %v12540_v48 = vmax.f32 %v6321_v27, %v6322_v25  ;;  %v3301_v16 = vadd.f32 %v3045_v35, %v12095_v56  ;;  %2709 = vperm.xlu0 %9058, %v9254_v45   ;;  %v15929_v24 = vld [vmem:[#allocation196_spill] sm:$0xff]  ;;  %v4802_v9 = vadd.f32 %v12342_v58, %v4801_v42  ;;  %v15931_v56 = vld [vmem:[#allocation197_spill] sm:$0xff]  ;;  %v15933_v27 = vld [vmem:[#allocation198_spill] sm:$0xff] }
 0x386   :  { %15928 = vst [vmem:[#allocation85_spill] sm:$0xff] %v12538_v43  ;;  %v12549_v37 = vmul.f32 %v10908_v44, %v15929_v24  ;;  %v2934_v25 = vmul.f32 %v10916_v12, %v2130_v46  ;;  %8698 = vmatmul.mubr.msk.f32.gmra.mrb[72].mxu0 %vm3906_vm0, %v3708_v54  ;;  %v12557_v35 = vmul.f32 %v10908_v44, %v15931_v56  ;;  %v3819_v45 = vmax.f32 %v3563_v47, 0.0  ;;  %v2138_v41 = vpop.permute.xlu1 %2137  ;;  %v9255_v56 = vld [vmem:[%s15422_s0 + $0x360] sm:$0xff]  ;;  %v15937_v47 = vld [vmem:[#allocation200_spill] sm:$0xff] }
 0x387   :  { %v12561_v62 = vmul.f32 %v10908_v44, %v15933_v27  ;;  %v3564_v24 = vadd.f32 %v12405_v39, %v3301_v16  ;;  %v6033_v49 = vmax.f32 %v4807_v1, 0.0  ;;  %v6032_v43 = vmax.f32 %v4802_v9, 0.0  ;;  %v12566_v54 = vpop.permute.xlu0 %2141  ;;  %v9256_v9 = vld [vmem:[%s15422_s0 + $0x368] sm:$0xff] }
 0x388   :  { %15930 = vst [vmem:[#allocation101_spill] sm:$0xff] %v12549_v37  ;;  %15932 = vst [vmem:[#allocation104_spill] sm:$0xff] %v12557_v35  ;;  %v3190_v42 = vadd.f32 %v2934_v25, %v11470_v6  ;;  %v2935_v46 = vmul.f32 %v10916_v12, %v2134_v23  ;;  %2265 = vperm.xlu1 %9059, %v9255_v56   ;;  %v15935_v35 = vld [vmem:[#allocation199_spill] sm:$0xff]  ;;  %v12577_v16 = vmul.f32 %v10908_v44, %v15937_v47  ;;  %v12581_v23 = vpop.f32.mrb[18].mxu0 }
 0x389   :  { %15934 = vst [vmem:[#allocation86_spill] sm:$0xff] %v12561_v62  ;;  %v12573_v27 = vmul.f32 %v10908_v44, %v15935_v35  ;;  %v3820_v1 = vmax.f32 %v3564_v24, 0.0  ;;  %v4817_v6 = vadd.f32 %v8612_v8, %v12342_v58  ;;  %8865 = vmatprep.mubr.msk.f32.mxu1 %vm3906_vm0, %v3819_v45  ;;  %2269 = vperm.xlu0 %9058, %v9256_v9   ;;  %v6331_v25 = vsel %vm3906_vm0, %v6033_v49, -inf  ;;  %v4831_v24 = vpop.f32.mrb[19].mxu0  ;;  %v15941_v45 = vld [vmem:[#allocation202_spill] sm:$0xff] }
 0x38a   :  { %15938 = vst [vmem:[#allocation88_spill] sm:$0xff] %v12577_v16  ;;  %v6330_v35 = vsel %vm3906_vm0, %v6032_v43, -inf  ;;  %v3453_v56 = vadd.f32 %v12405_v39, %v3190_v42  ;;  %v3191_v47 = vadd.f32 %v2935_v46, %v11466_v52  ;;  %v12596_v16 = vmul.f32 %v10908_v44, %v15941_v45  ;;  %v12601_v49 = vpop.permute.xlu1 %2585  ;;  %v9257_v45 = vld [vmem:[%s15422_s0 + $0x6e0] sm:$0xff] }
 0x38b   :  { %15936 = vst [vmem:[#allocation87_spill] sm:$0xff] %v12573_v27  ;;  %v15939_v27 = vld [vmem:[#allocation201_spill] sm:$0xff]  ;;  %v12598_v62 = vmax.f32 %v6330_v35, %v6331_v25  ;;  %v6035_v9 = vmax.f32 %v4817_v6, 0.0  ;;  %8866 = vmatmul.mubr.msk.f32.gmra.mrb[48].mxu1 %vm3906_vm0, %v3820_v1  ;;  %v4812_v52 = vadd.f32 %v12342_v58, %v4811_v29  ;;  %v3046_v46 = vmul.f32 %v10916_v12, %v2578_v14  ;;  %v15943_v25 = vld [vmem:[#allocation203_spill] sm:$0xff]  ;;  %v15945_v1 = vld [vmem:[#allocation204_spill] sm:$0xff]  ;;  %v12621_v14 = vpop.f32.mrb[20].mxu0 }
 0x38c   :  { %v12592_v8 = vmul.f32 %v10908_v44, %v15939_v27  ;;  %15942 = vst [vmem:[#allocation103_spill] sm:$0xff] %v12596_v16  ;;  %v3709_v43 = vmax.f32 %v3453_v56, 0.0  ;;  %v3454_v42 = vadd.f32 %v12405_v39, %v3191_v47  ;;  %v12606_v27 = vpop.permute.xlu0 %2589  ;;  %2713 = vperm.xlu1 %9059, %v9257_v45   ;;  %v12613_v6 = vmul.f32 %v10908_v44, %v15943_v25  ;;  %v9258_v47 = vld [vmem:[%s15422_s0 + $0x6e8] sm:$0xff] }
 0x38d   :  { %v12617_v35 = vmul.f32 %v10908_v44, %v15945_v1  ;;  %v6340_v56 = vsel %vm3906_vm0, %v6035_v9, -inf  ;;  %v3047_v29 = vmul.f32 %v10916_v12, %v2582_v17  ;;  %2717 = vperm.xlu0 %9058, %v9258_v47   ;;  %v3302_v25 = vadd.f32 %v3046_v46, %v12108_v33  ;;  %v12629_v1 = vpop.f32.mrb[21].mxu0  ;;  %v15947_v9 = vld [vmem:[#allocation205_spill] sm:$0xff] }
 0x38e   :  { %15940 = vst [vmem:[#allocation89_spill] sm:$0xff] %v12592_v8  ;;  %15944 = vst [vmem:[#allocation106_spill] sm:$0xff] %v12613_v6  ;;  %v3710_v45 = vmax.f32 %v3454_v42, 0.0  ;;  %v6034_v8 = vmax.f32 %v4812_v52, 0.0  ;;  %v4827_v6 = vadd.f32 %v8615_v10, %v12342_v58  ;;  %8700 = vmatprep.mubr.msk.f32.mxu0 %vm3906_vm0, %v3709_v43  ;;  %v12633_v17 = vmul.f32 %v10908_v44, %v15947_v9  ;;  %v12641_v52 = vpop.permute.xlu1 %2145 }
 0x38f   :  { %15946 = vst [vmem:[#allocation90_spill] sm:$0xff] %v12617_v35  ;;  %v15949_v35 = vld [vmem:[#allocation206_spill] sm:$0xff]  ;;  %v3303_v47 = vadd.f32 %v3047_v29, %v12104_v11  ;;  %v4822_v42 = vadd.f32 %v12342_v58, %v4821_v51  ;;  %v3565_v10 = vadd.f32 %v12405_v39, %v3302_v25  ;;  %v2936_v46 = vmul.f32 %v10916_v12, %v2138_v41  ;;  %v15951_v11 = vld [vmem:[#allocation207_spill] sm:$0xff]  ;;  %v15953_v29 = vld [vmem:[#allocation208_spill] sm:$0xff] }
 0x390   :  { %15948 = vst [vmem:[#allocation91_spill] sm:$0xff] %v12633_v17  ;;  %v12637_v16 = vmul.f32 %v10908_v44, %v15949_v35  ;;  %v6339_v33 = vsel %vm3906_vm0, %v6034_v8, -inf  ;;  %v6037_v43 = vmax.f32 %v4827_v6, 0.0  ;;  %8701 = vmatmul.mubr.msk.f32.gmra.mrb[74].mxu0 %vm3906_vm0, %v3710_v45  ;;  %v12647_v9 = vpop.permute.xlu0 %2149  ;;  %v9259_v35 = vld [vmem:[%s15422_s0 + $0x370] sm:$0xff]  ;;  %v12654_v51 = vmul.f32 %v10908_v44, %v15951_v11  ;;  %v12663_v45 = vpop.f32.mrb[22].mxu0  ;;  %v9260_v25 = vld [vmem:[%s15422_s0 + $0x378] sm:$0xff] }
 0x391   :  { %2273 = vperm.xlu1 %9059, %v9259_v35   ;;  %v12658_v8 = vmul.f32 %v10908_v44, %v15953_v29  ;;  %v12660_v6 = vmax.f32 %v6339_v33, %v6340_v56  ;;  %v3566_v41 = vadd.f32 %v12405_v39, %v3303_v47  ;;  %2277 = vperm.xlu0 %9058, %v9260_v25   ;;  %v3821_v35 = vmax.f32 %v3565_v10, 0.0  ;;  %v15955_v29 = vld [vmem:[#allocation209_spill] sm:$0xff] }
 0x392   :  { %15950 = vst [vmem:[#allocation92_spill] sm:$0xff] %v12637_v16  ;;  %15952 = vst [vmem:[#allocation93_spill] sm:$0xff] %v12654_v51  ;;  %v6349_v17 = vsel %vm3906_vm0, %v6037_v43, -inf  ;;  %v6036_v11 = vmax.f32 %v4822_v42, 0.0  ;;  %v3192_v51 = vadd.f32 %v2936_v46, %v11483_v38  ;;  %v12670_v16 = vpop.f32.mrb[23].mxu0  ;;  %v12674_v56 = vmul.f32 %v10908_v44, %v15955_v29  ;;  %v12679_v37 = vpop.permute.xlu1 %2593 }
 0x393   :  { %15954 = vst [vmem:[#allocation105_spill] sm:$0xff] %v12658_v8  ;;  %v6306_v47 = vrot.slane %v12469_v18, 4  ;;  %v3822_v33 = vmax.f32 %v3566_v41, 0.0  ;;  %v2937_v8 = vmul.f32 %v10916_v12, %v12566_v54  ;;  %v4837_v38 = vadd.f32 %v12581_v23, %v12342_v58  ;;  %8868 = vmatprep.mubr.msk.f32.mxu1 %vm3906_vm0, %v3821_v35  ;;  %v9261_v41 = vld [vmem:[%s15422_s0 + $0x6f0] sm:$0xff]  ;;  %v15957_v54 = vld [vmem:[#allocation210_spill] sm:$0xff]  ;;  %v12698_v23 = vpop.f32.mrb[24].mxu0 }
 0x394   :  { %15956 = vst [vmem:[#allocation108_spill] sm:$0xff] %v12674_v56  ;;  %v6348_v10 = vsel %vm3906_vm0, %v6036_v11, -inf  ;;  %v3455_v42 = vadd.f32 %v12405_v39, %v3192_v51  ;;  %v4832_v43 = vadd.f32 %v12342_v58, %v4831_v24  ;;  %v12687_v46 = vpop.permute.xlu0 %2597  ;;  %v12694_v25 = vmul.f32 %v10908_v44, %v15957_v54  ;;  %v9262_v24 = vld [vmem:[%s15422_s0 + $0x6f8] sm:$0xff]  ;;  %v12705_v54 = vpop.f32.mrb[25].mxu0 }
 0x395   :  { %2721 = vperm.xlu1 %9059, %v9261_v41   ;;  %v6350_v11 = vmax.f32 %v6348_v10, %v6349_v17  ;;  %v3193_v51 = vadd.f32 %v2937_v8, %v11479_v19  ;;  %8869 = vmatmul.mubr.msk.f32.gmra.mrb[50].mxu1 %vm3906_vm0, %v3822_v33  ;;  %v6039_v29 = vmax.f32 %v4837_v38, 0.0  ;;  %v3048_v41 = vmul.f32 %v10916_v12, %v12601_v49  ;;  %v15959_v17 = vld [vmem:[#allocation212_spill] sm:$0xff] }
 0x396   :  { %15958 = vst [vmem:[#allocation94_spill] sm:$0xff] %v12694_v25  ;;  %2725 = vperm.xlu0 %9058, %v9262_v24   ;;  %v3711_v35 = vmax.f32 %v3455_v42, 0.0  ;;  %v6038_v56 = vmax.f32 %v4832_v43, 0.0  ;;  %v12709_v19 = vmul.f32 %v10908_v44, %v15959_v17  ;;  %v12712_v8 = vmax.f32 %v12469_v18, %v6306_v47  ;;  %v12715_v25 = vpop.permute.xlu1 %2153  ;;  %v9263_v18 = vld [vmem:[%s15422_s0 + $0x380] sm:$0xff] }
 0x397   :  { %v6351_v33 = vrot.slane %v6350_v11, 4  ;;  %v3456_v10 = vadd.f32 %v12405_v39, %v3193_v51  ;;  %v6358_v42 = vsel %vm3906_vm0, %v6039_v29, -inf  ;;  %v3304_v49 = vadd.f32 %v3048_v41, %v12123_v40  ;;  %v9264_v40 = vld [vmem:[%s15422_s0 + $0x388] sm:$0xff]  ;;  %v9265_v47 = vld [vmem:[%s15422_s0 + $0x700] sm:$0xff] }
 0x398   :  { %15960 = vst [vmem:[#allocation107_spill] sm:$0xff] %v12709_v19  ;;  %v6357_v38 = vsel %vm3906_vm0, %v6038_v56, -inf  ;;  %v3049_v43 = vmul.f32 %v10916_v12, %v12606_v27  ;;  %8703 = vmatprep.mubr.msk.f32.mxu0 %vm3906_vm0, %v3711_v35  ;;  %v12723_v24 = vpop.permute.xlu0 %2157  ;;  %v12729_v56 = vpop.f32.mrb[26].mxu0  ;;  %v4847_v41 = vadd.f32 %v12621_v14, %v12342_v58 }
 0x399   :  { %2281 = vperm.xlu1 %9059, %v9263_v18   ;;  %v6352_v51 = vmax.f32 %v6350_v11, %v6351_v33  ;;  %v3712_v29 = vmax.f32 %v3456_v10, 0.0  ;;  %v6359_v17 = vmax.f32 %v6357_v38, %v6358_v42  ;;  %v3567_v27 = vadd.f32 %v12405_v39, %v3304_v49  ;;  %v12740_v11 = vpop.f32.mrb[27].mxu0 }
 0x39a   :  { %2285 = vperm.xlu0 %9058, %v9264_v40   ;;  %v3305_v35 = vadd.f32 %v3049_v43, %v12113_v21  ;;  %v4842_v18 = vadd.f32 %v12342_v58, %v12629_v1  ;;  %v2938_v42 = vmul.f32 %v10916_v12, %v12641_v52  ;;  %v2939_v38 = vmul.f32 %v10916_v12, %v12647_v9  ;;  %v12747_v49 = vpop.permute.xlu1 %2601 }
 0x39b   :  { %v6353_v33 = vrot.slane %v6352_v51, 2  ;;  %v6360_v10 = vrot.slane %v6359_v17, 4  ;;  %8704 = vmatmul.mubr.msk.f32.gmra.mrb[76].mxu0 %vm3906_vm0, %v3712_v29  ;;  %v3823_v21 = vmax.f32 %v3567_v27, 0.0  ;;  %v6041_v43 = vmax.f32 %v4847_v41, 0.0  ;;  %v12757_v2 = vpop.f32.mrb[28].mxu0  ;;  %v9266_v27 = vld [vmem:[%s15422_s0 + $0x708] sm:$0xff] }
 0x39c   :  { %v3568_v14 = vadd.f32 %v12405_v39, %v3305_v35  ;;  %v6040_v40 = vmax.f32 %v4842_v18, 0.0  ;;  %v12750_v1 = vpop.permute.xlu0 %2605  ;;  %v3194_v9 = vadd.f32 %v2938_v42, %v11491_v30  ;;  %v3195_v29 = vadd.f32 %v2939_v38, %v11487_v22  ;;  %v12767_v30 = vpop.f32.mrb[29].mxu0 }
 0x39d   :  { %2729 = vperm.xlu1 %9059, %v9265_v47   ;;  %v6354_v52 = vmax.f32 %v6352_v51, %v6353_v33  ;;  %v6361_v19 = vmax.f32 %v6359_v17, %v6360_v10  ;;  %v6367_v41 = vsel %vm3906_vm0, %v6041_v43, -inf  ;;  %v4857_v47 = vadd.f32 %v12663_v45, %v12342_v58  ;;  %8871 = vmatprep.mubr.msk.f32.mxu1 %vm3906_vm0, %v3823_v21  ;;  %v9267_v43 = vld [vmem:[%s15422_s0 + $0x390] sm:$0xff] }
 0x39e   :  { %2733 = vperm.xlu0 %9058, %v9266_v27   ;;  %v3824_v35 = vmax.f32 %v3568_v14, 0.0  ;;  %v6366_v18 = vsel %vm3906_vm0, %v6040_v40, -inf  ;;  %v3457_v33 = vadd.f32 %v12405_v39, %v3194_v9  ;;  %v12770_v10 = vpop.permute.xlu1 %2161  ;;  %v3458_v42 = vadd.f32 %v12405_v39, %v3195_v29 }
 0x39f   :  { %v6355_v22 = vrot.slane %v6354_v52, 1  ;;  %v6362_v51 = vrot.slane %v6361_v19, 2  ;;  %v6368_v17 = vmax.f32 %v6366_v18, %v6367_v41  ;;  %v6043_v38 = vmax.f32 %v4857_v47, 0.0  ;;  %v12783_v41 = vpop.f32.mrb[30].mxu0 }
 0x3a0   :  { %v4852_v14 = vadd.f32 %v12342_v58, %v12670_v16  ;;  %v3050_v45 = vmul.f32 %v10916_v12, %v12679_v37  ;;  %8872 = vmatmul.mubr.msk.f32.gmra.mrb[52].mxu1 %vm3906_vm0, %v3824_v35  ;;  %v12778_v21 = vpop.permute.xlu0 %2165  ;;  %v3713_v29 = vmax.f32 %v3457_v33, 0.0  ;;  %v9268_v16 = vld [vmem:[%s15422_s0 + $0x398] sm:$0xff]  ;;  %v3714_v37 = vmax.f32 %v3458_v42, 0.0  ;;  %v12790_v3 = vpop.f32.mrb[31].mxu0 }
 0x3a1   :  { %2289 = vperm.xlu1 %9059, %v9267_v43   ;;  %v6356_v40 = vmax.f32 %v6354_v52, %v6355_v22  ;;  %v6363_v9 = vmax.f32 %v6361_v19, %v6362_v51  ;;  %v6369_v27 = vrot.slane %v6368_v17, 4  ;;  %v6376_v35 = vsel %vm3906_vm0, %v6043_v38, -inf }
 0x3a2   :  { %2293 = vperm.xlu0 %9058, %v9268_v16   ;;  %v6042_v18 = vmax.f32 %v4852_v14, 0.0  ;;  %v3306_v47 = vadd.f32 %v3050_v45, %v12137_v57  ;;  %v3051_v19 = vmul.f32 %v10916_v12, %v12687_v46  ;;  %v4867_v22 = vadd.f32 %v12698_v23, %v12342_v58  ;;  %8706 = vmatprep.mubr.msk.f32.mxu0 %vm3906_vm0, %v3713_v29  ;;  %v12797_v51 = vpop.permute.xlu1 %2609  ;;  %v9269_v23 = vld [vmem:[%s15422_s0 + $0x710] sm:$0xff] }
 0x3a3   :  { %v6364_v43 = vrot.slane %v6363_v9, 1  ;;  %v6370_v52 = vmax.f32 %v6368_v17, %v6369_v27  ;;  %v4862_v57 = vadd.f32 %v12342_v58, %v12705_v54  ;;  %v2940_v17 = vmul.f32 %v10916_v12, %v12715_v25  ;;  %8707 = vmatmul.mubr.msk.f32.gmra.mrb[78].mxu0 %vm3906_vm0, %v3714_v37  ;;  %v12812_v29 = vpop.f32.mrb[32].mxu0  ;;  %v9270_v25 = vld [vmem:[%s15422_s0 + $0x718] sm:$0xff] }
 0x3a4   :  { %v6375_v33 = vsel %vm3906_vm0, %v6042_v18, -inf  ;;  %v3569_v42 = vadd.f32 %v12405_v39, %v3306_v47  ;;  %v12806_v46 = vpop.permute.xlu0 %2613  ;;  %v3307_v27 = vadd.f32 %v3051_v19, %v12133_v31  ;;  %v6045_v16 = vmax.f32 %v4867_v22, 0.0  ;;  %v12818_v47 = vpop.f32.mrb[33].mxu0 }
 0x3a5   :  { %2737 = vperm.xlu1 %9059, %v9269_v23   ;;  %v6365_v38 = vmax.f32 %v6363_v9, %v6364_v43  ;;  %v6371_v14 = vrot.slane %v6370_v52, 2  ;;  %v6377_v45 = vmax.f32 %v6375_v33, %v6376_v35  ;;  %v6044_v37 = vmax.f32 %v4862_v57, 0.0 }
 0x3a6   :  { %2741 = vperm.xlu0 %9058, %v9270_v25   ;;  %v3825_v54 = vmax.f32 %v3569_v42, 0.0  ;;  %v3196_v18 = vadd.f32 %v2940_v17, %v11511_v20  ;;  %v3570_v31 = vadd.f32 %v12405_v39, %v3307_v27  ;;  %v12822_v19 = vpop.permute.xlu1 %2169  ;;  %v6385_v33 = vsel %vm3906_vm0, %v6045_v16, -inf  ;;  %v9272_v27 = vld [vmem:[%s15422_s0 + $0x3a8] sm:$0xff] }
 0x3a7   :  { %v7585_v9 = vsel %vm7571_vm1, %v6365_v38, %v6356_v40  ;;  %v6372_v43 = vmax.f32 %v6370_v52, %v6371_v14  ;;  %v6378_v35 = vrot.slane %v6377_v45, 4  ;;  %v6384_v23 = vsel %vm3906_vm0, %v6044_v37, -inf  ;;  %v9271_v40 = vld [vmem:[%s15422_s0 + $0x3a0] sm:$0xff]  ;;  %v12835_v14 = vpop.f32.mrb[34].mxu0 }
 0x3a8   :  { %v3459_v42 = vadd.f32 %v12405_v39, %v3196_v18  ;;  %v2941_v22 = vmul.f32 %v10916_v12, %v12723_v24  ;;  %8874 = vmatprep.mubr.msk.f32.mxu1 %vm3906_vm0, %v3825_v54  ;;  %v12830_v20 = vpop.permute.xlu0 %2173  ;;  %v3826_v17 = vmax.f32 %v3570_v31, 0.0  ;;  %v6386_v38 = vmax.f32 %v6384_v23, %v6385_v33 }
 0x3a9   :  { %2297 = vperm.xlu1 %9059, %v9271_v40   ;;  %v6373_v52 = vrot.slane %v6372_v43, 1  ;;  %v6379_v57 = vmax.f32 %v6377_v45, %v6378_v35  ;;  %v4877_v54 = vadd.f32 %v12729_v56, %v12342_v58  ;;  %v4872_v16 = vadd.f32 %v12342_v58, %v12740_v11  ;;  %v12845_v45 = vpop.f32.mrb[35].mxu0 }
 0x3aa   :  { %2301 = vperm.xlu0 %9058, %v9272_v27   ;;  %v3715_v24 = vmax.f32 %v3459_v42, 0.0  ;;  %v3197_v25 = vadd.f32 %v2941_v22, %v11507_v63  ;;  %v6387_v35 = vrot.slane %v6386_v38, 4  ;;  %v3052_v31 = vmul.f32 %v10916_v12, %v12747_v49  ;;  %8875 = vmatmul.mubr.msk.f32.gmra.mrb[54].mxu1 %vm3906_vm0, %v3826_v17  ;;  %v12850_v33 = vpop.permute.xlu1 %2617 }
 0x3ab   :  { %v6374_v37 = vmax.f32 %v6372_v43, %v6373_v52  ;;  %v6380_v18 = vrot.slane %v6379_v57, 2  ;;  %v6047_v23 = vmax.f32 %v4877_v54, 0.0  ;;  %v6046_v42 = vmax.f32 %v4872_v16, 0.0  ;;  %v9273_v43 = vld [vmem:[%s15422_s0 + $0x720] sm:$0xff]  ;;  %v12863_v17 = vpop.f32.mrb[36].mxu0 }
 0x3ac   :  { %v3460_v63 = vadd.f32 %v12405_v39, %v3197_v25  ;;  %v3053_v56 = vmul.f32 %v10916_v12, %v12750_v1  ;;  %8709 = vmatprep.mubr.msk.f32.mxu0 %vm3906_vm0, %v3715_v24  ;;  %v12856_v11 = vpop.permute.xlu0 %2621  ;;  %v6388_v40 = vmax.f32 %v6386_v38, %v6387_v35  ;;  %v3308_v52 = vadd.f32 %v3052_v31, %v12146_v26  ;;  %v9274_v1 = vld [vmem:[%s15422_s0 + $0x728] sm:$0xff] }
 0x3ad   :  { %2745 = vperm.xlu1 %9059, %v9273_v43   ;;  %v7586_v49 = vsel %vm7573_vm2, %v6374_v37, %v7585_v9  ;;  %v6381_v22 = vmax.f32 %v6379_v57, %v6380_v18  ;;  %v6394_v24 = vsel %vm3906_vm0, %v6047_v23, -inf  ;;  %v6393_v25 = vsel %vm3906_vm0, %v6046_v42, -inf  ;;  %v12871_v9 = vpop.f32.mrb[37].mxu0 }
 0x3ae   :  { %2749 = vperm.xlu0 %9058, %v9274_v1   ;;  %v3716_v27 = vmax.f32 %v3460_v63, 0.0  ;;  %v3309_v54 = vadd.f32 %v3053_v56, %v12142_v36  ;;  %v6389_v38 = vrot.slane %v6388_v40, 2  ;;  %v12873_v26 = vmax.f32 %v6393_v25, %v6394_v24  ;;  %v12876_v37 = vpop.permute.xlu1 %2177 }
 0x3af   :  { %v6382_v57 = vrot.slane %v6381_v22, 1  ;;  %v3571_v16 = vadd.f32 %v12405_v39, %v3308_v52  ;;  %v4887_v35 = vadd.f32 %v12757_v2, %v12342_v58  ;;  %v4882_v31 = vadd.f32 %v12342_v58, %v12767_v30  ;;  %v9275_v2 = vld [vmem:[%s15422_s0 + $0x3b0] sm:$0xff]  ;;  %v12894_v30 = vpop.f32.mrb[38].mxu0 }
 0x3b0   :  { %v3572_v18 = vadd.f32 %v12405_v39, %v3309_v54  ;;  %v2942_v36 = vmul.f32 %v10916_v12, %v12770_v10  ;;  %8710 = vmatmul.mubr.msk.f32.gmra.mrb[80].mxu0 %vm3906_vm0, %v3716_v27  ;;  %v12886_v63 = vpop.permute.xlu0 %2181  ;;  %v15961_v23 = vrot.slane %v12494_v28, 4  ;;  %v6390_v43 = vmax.f32 %v6388_v40, %v6389_v38  ;;  %v9276_v10 = vld [vmem:[%s15422_s0 + $0x3b8] sm:$0xff] }
 0x3b1   :  { %v6383_v56 = vmax.f32 %v6381_v22, %v6382_v57  ;;  %v3827_v52 = vmax.f32 %v3571_v16, 0.0  ;;  %2305 = vperm.xlu1 %9059, %v9275_v2   ;;  %v6049_v27 = vmax.f32 %v4887_v35, 0.0  ;;  %v6048_v24 = vmax.f32 %v4882_v31, 0.0  ;;  %v12900_v22 = vpop.f32.mrb[39].mxu0 }
 0x3b2   :  { %v6316_v42 = vmax.f32 %v12494_v28, %v15961_v23  ;;  %2309 = vperm.xlu0 %9058, %v9276_v10   ;;  %v3828_v1 = vmax.f32 %v3572_v18, 0.0  ;;  %v3198_v28 = vadd.f32 %v2942_v36, %v11526_v53  ;;  %v6308_v40 = vrot.slane %v12712_v8, 2  ;;  %v12907_v38 = vpop.permute.xlu1 %2625 }
 0x3b3   :  { %v7587_v25 = vsel %vm7575_vm3, %v6383_v56, %v7586_v49  ;;  %v6391_v54 = vrot.slane %v6390_v43, 1  ;;  %v2943_v57 = vmul.f32 %v10916_v12, %v12778_v21  ;;  %8877 = vmatprep.mubr.msk.f32.mxu1 %vm3906_vm0, %v3827_v52  ;;  %v6403_v16 = vsel %vm3906_vm0, %v6049_v27, -inf  ;;  %v9277_v56 = vld [vmem:[%s15422_s0 + $0x730] sm:$0xff]  ;;  %v12923_v52 = vpop.f32.mrb[40].mxu0  ;;  %v15962_v27 = vld [vmem:[#allocation213_spill] sm:$0xff] }
 0x3b4   :  { %v6402_v18 = vsel %vm3906_vm0, %v6048_v24, -inf  ;;  %v3461_v53 = vadd.f32 %v12405_v39, %v3198_v28  ;;  %v4897_v35 = vadd.f32 %v12783_v41, %v12342_v58  ;;  %8878 = vmatmul.mubr.msk.f32.gmra.mrb[56].mxu1 %vm3906_vm0, %v3828_v1  ;;  %v12915_v49 = vpop.permute.xlu0 %2629  ;;  %v6317_v31 = vrot.slane %v6316_v42, 2  ;;  %v9278_v41 = vld [vmem:[%s15422_s0 + $0x738] sm:$0xff]  ;;  %v12932_v1 = vpop.f32.mrb[41].mxu0 }
 0x3b5   :  { %v6392_v36 = vmax.f32 %v6390_v43, %v6391_v54  ;;  %v12917_v21 = vmax.f32 %v6402_v18, %v6403_v16  ;;  %v3199_v23 = vadd.f32 %v2943_v57, %v11515_v15  ;;  %2753 = vperm.xlu1 %9059, %v9277_v56   ;;  %v4892_v43 = vadd.f32 %v12342_v58, %v12790_v3 }
 0x3b6   :  { %2757 = vperm.xlu0 %9058, %v9278_v41   ;;  %v3717_v2 = vmax.f32 %v3461_v53, 0.0  ;;  %v6051_v10 = vmax.f32 %v4897_v35, 0.0  ;;  %v3054_v15 = vmul.f32 %v10916_v12, %v12797_v51  ;;  %v12936_v24 = vmul.f32 %v10908_v44, %v15962_v27  ;;  %v12943_v16 = vpop.permute.xlu1 %2185  ;;  %v9279_v41 = vld [vmem:[%s15422_s0 + $0x3c0] sm:$0xff] }
 0x3b7   :  { %v6324_v28 = vrot.slane %v12540_v48, 4  ;;  %v12940_v54 = vsel %vm7577_vm4, %v6392_v36, %v7587_v25  ;;  %v3462_v57 = vadd.f32 %v12405_v39, %v3199_v23  ;;  %v6050_v18 = vmax.f32 %v4892_v43, 0.0 }
 0x3b8   :  { %15963 = vst [vmem:[#allocation109_spill] sm:$0xff] %v12936_v24  ;;  %15964 = vst [vmem:[#allocation110_spill] sm:$0xff] %v12940_v54  ;;  %v6412_v3 = vsel %vm3906_vm0, %v6051_v10, -inf  ;;  %v3310_v51 = vadd.f32 %v3054_v15, %v12161_v55  ;;  %v3055_v53 = vmul.f32 %v10916_v12, %v12806_v46  ;;  %8712 = vmatprep.mubr.msk.f32.mxu0 %vm3906_vm0, %v3717_v2  ;;  %v12950_v35 = vpop.permute.xlu0 %2189  ;;  %v12958_v55 = vpop.f32.mrb[42].mxu0  ;;  %v9280_v46 = vld [vmem:[%s15422_s0 + $0x3c8] sm:$0xff] }
 0x3b9   :  { %v6309_v56 = vmax.f32 %v12712_v8, %v6308_v40  ;;  %v6318_v25 = vmax.f32 %v6316_v42, %v6317_v31  ;;  %v3718_v36 = vmax.f32 %v3462_v57, 0.0  ;;  %v4907_v23 = vadd.f32 %v12812_v29, %v12342_v58  ;;  %2313 = vperm.xlu1 %9059, %v9279_v41   ;;  %v12969_v58 = vld [vmem:[%s15426_s4] ss:$0 sm:$0xff]  ;;  %v12973_v40 = vpop.f32.mrb[43].mxu0  ;;  %v15965_v31 = vld [vmem:[#allocation214_spill] sm:$0xff] }
 0x3ba   :  { %2317 = vperm.xlu0 %9058, %v9280_v46   ;;  %v6411_v2 = vsel %vm3906_vm0, %v6050_v18, -inf  ;;  %v3573_v8 = vadd.f32 %v12405_v39, %v3310_v51  ;;  %v3311_v42 = vadd.f32 %v3055_v53, %v12151_v5  ;;  %v4902_v29 = vadd.f32 %v12969_v58, %v12818_v47  ;;  %v12983_v5 = vpop.permute.xlu1 %2633 }
 0x3bb   :  { %v12977_v10 = vmul.f32 %v10908_v44, %v15965_v31  ;;  %v6325_v43 = vmax.f32 %v12540_v48, %v6324_v28  ;;  %v12980_v15 = vmax.f32 %v6411_v2, %v6412_v3  ;;  %v6053_v27 = vmax.f32 %v4907_v23, 0.0  ;;  %8713 = vmatmul.mubr.msk.f32.gmra.mrb[82].mxu0 %vm3906_vm0, %v3718_v36  ;;  %v9282_v3 = vld [vmem:[%s15422_s0 + $0x740] sm:$0xff]  ;;  %v12996_v36 = vpop.f32.mrb[44].mxu0  ;;  %v15968_v31 = vld [vmem:[#allocation215_spill] sm:$0xff] }
 0x3bc   :  { %v3829_v57 = vmax.f32 %v3573_v8, 0.0  ;;  %v3574_v18 = vadd.f32 %v12405_v39, %v3311_v42  ;;  %v6052_v51 = vmax.f32 %v4902_v29, 0.0  ;;  %v2944_v47 = vmul.f32 %v10916_v12, %v12822_v19  ;;  %v12988_v53 = vpop.permute.xlu0 %2637  ;;  %v9283_v19 = vld [vmem:[%s15422_s0 + $0x748] sm:$0xff]  ;;  %v13006_v29 = vpop.f32.mrb[45].mxu0 }
 0x3bd   :  { %15966 = vst [vmem:[#allocation111_spill] sm:$0xff] %v12977_v10  ;;  %v6310_v41 = vrot.slane %v6309_v56, 1  ;;  %v6319_v46 = vrot.slane %v6318_v25, 1  ;;  %v6421_v48 = vsel %vm3906_vm0, %v6053_v27, -inf  ;;  %v2945_v28 = vmul.f32 %v10916_v12, %v12830_v20  ;;  %2761 = vperm.xlu1 %9059, %v9282_v3   ;;  %v15967_v8 = vld [vmem:[#allocation7_spill] sm:$0xff]  ;;  %v15970_v10 = vld [vmem:[#allocation6_spill] sm:$0xff] }
 0x3be   :  { %2765 = vperm.xlu0 %9058, %v9283_v19   ;;  %v3830_v23 = vmax.f32 %v3574_v18, 0.0  ;;  %v6420_v2 = vsel %vm3906_vm0, %v6052_v51, -inf  ;;  %v3200_v42 = vadd.f32 %v2944_v47, %v15967_v8  ;;  %v4917_v20 = vadd.f32 %v12969_v58, %v12835_v14  ;;  %8880 = vmatprep.mubr.msk.f32.mxu1 %vm3906_vm0, %v3829_v57  ;;  %v13013_v18 = vpop.permute.xlu1 %2193 }
 0x3bf   :  { %v13010_v27 = vmul.f32 %v10908_v44, %v15968_v31  ;;  %v6326_v3 = vrot.slane %v6325_v43, 2  ;;  %v6422_v54 = vmax.f32 %v6420_v2, %v6421_v48  ;;  %v3201_v19 = vadd.f32 %v2945_v28, %v15970_v10  ;;  %v9284_v2 = vld [vmem:[%s15422_s0 + $0x3d0] sm:$0xff] }
 0x3c0   :  { %v3463_v51 = vadd.f32 %v12405_v39, %v3200_v42  ;;  %v6055_v47 = vmax.f32 %v4917_v20, 0.0  ;;  %v4912_v14 = vadd.f32 %v12969_v58, %v12845_v45  ;;  %v3056_v57 = vmul.f32 %v10916_v12, %v12850_v33  ;;  %8881 = vmatmul.mubr.msk.f32.gmra.mrb[58].mxu1 %vm3906_vm0, %v3830_v23  ;;  %v13021_v8 = vpop.permute.xlu0 %2197  ;;  %v13031_v45 = vpop.f32.mrb[46].mxu0  ;;  %v9285_v33 = vld [vmem:[%s15422_s0 + $0x3d8] sm:$0xff] }
 0x3c1   :  { %15969 = vst [vmem:[#allocation112_spill] sm:$0xff] %v13010_v27  ;;  %v13023_v44 = vmax.f32 %v6309_v56, %v6310_v41  ;;  %v13025_v48 = vmax.f32 %v6318_v25, %v6319_v46  ;;  %v6423_v10 = vrot.slane %v6422_v54, 4  ;;  %v3464_v28 = vadd.f32 %v12405_v39, %v3201_v19  ;;  %2321 = vperm.xlu1 %9059, %v9284_v2   ;;  %v13038_v46 = vpop.f32.mrb[47].mxu0 }
 0x3c2   :  { %2325 = vperm.xlu0 %9058, %v9285_v33   ;;  %v3719_v23 = vmax.f32 %v3463_v51, 0.0  ;;  %v6430_v56 = vsel %vm3906_vm0, %v6055_v47, -inf  ;;  %v6054_v25 = vmax.f32 %v4912_v14, 0.0  ;;  %v3312_v41 = vadd.f32 %v3056_v57, %v12175_v32  ;;  %v13044_v19 = vpop.permute.xlu1 %2641  ;;  %v13050_v51 = vld [vmem:[%s15424_s2] ss:$0 sm:$0xff]  ;;  %v15973_v57 = vld [vmem:[#allocation58_spill] sm:$0xff] }
 0x3c3   :  { %15971 = vst [vmem:[#allocation113_spill] sm:$0xff] %v13023_v44  ;;  %15972 = vst [vmem:[#allocation114_spill] sm:$0xff] %v13025_v48  ;;  %v13040_v39 = vmax.f32 %v6325_v43, %v6326_v3  ;;  %v6424_v42 = vmax.f32 %v6422_v54, %v6423_v10  ;;  %v3720_v20 = vmax.f32 %v3464_v28, 0.0  ;;  %v3057_v31 = vmul.f32 %v10916_v12, %v12856_v11  ;;  %v9287_v28 = vld [vmem:[%s15422_s0 + $0x750] sm:$0xff] }
 0x3c4   :  { %v6429_v2 = vsel %vm3906_vm0, %v6054_v25, -inf  ;;  %v3575_v32 = vadd.f32 %v13050_v51, %v3312_v41  ;;  %v4927_v43 = vadd.f32 %v12969_v58, %v12863_v17  ;;  %v4922_v54 = vadd.f32 %v12969_v58, %v12871_v9  ;;  %8715 = vmatprep.mubr.msk.f32.mxu0 %vm3906_vm0, %v3719_v23  ;;  %v13058_v11 = vpop.permute.xlu0 %2645  ;;  %v13066_v17 = vpop.f32.mrb[48].mxu0 }
 0x3c5   :  { %v6333_v3 = vrot.slane %v12598_v62, 4  ;;  %v6425_v47 = vrot.slane %v6424_v42, 2  ;;  %v6431_v14 = vmax.f32 %v6429_v2, %v6430_v56  ;;  %v3313_v10 = vadd.f32 %v3057_v31, %v15973_v57  ;;  %8716 = vmatmul.mubr.msk.f32.gmra.mrb[84].mxu0 %vm3906_vm0, %v3720_v20  ;;  %2769 = vperm.xlu1 %9059, %v9287_v28   ;;  %v9288_v56 = vld [vmem:[%s15422_s0 + $0x758] sm:$0xff]  ;;  %v13073_v41 = vpop.f32.mrb[49].mxu0 }
 0x3c6   :  { %v3831_v9 = vmax.f32 %v3575_v32, 0.0  ;;  %v6057_v33 = vmax.f32 %v4927_v43, 0.0  ;;  %v6056_v23 = vmax.f32 %v4922_v54, 0.0  ;;  %v2946_v25 = vmul.f32 %v10916_v12, %v12876_v37  ;;  %2773 = vperm.xlu0 %9058, %v9288_v56   ;;  %v13077_v28 = vpop.permute.xlu1 %2201  ;;  %v15974_v37 = vld [vmem:[#allocation9_spill] sm:$0xff] }
 0x3c7   :  { %v6426_v31 = vmax.f32 %v6424_v42, %v6425_v47  ;;  %v6432_v2 = vrot.slane %v6431_v14, 4  ;;  %v3576_v57 = vadd.f32 %v13050_v51, %v3313_v10  ;;  %v2947_v48 = vmul.f32 %v10916_v12, %v12886_v63  ;;  %v15975_v63 = vld [vmem:[#allocation8_spill] sm:$0xff] }
 0x3c8   :  { %v6439_v32 = vsel %vm3906_vm0, %v6057_v33, -inf  ;;  %v6438_v43 = vsel %vm3906_vm0, %v6056_v23, -inf  ;;  %v3202_v54 = vadd.f32 %v2946_v25, %v15974_v37  ;;  %8883 = vmatprep.mubr.msk.f32.mxu1 %vm3906_vm0, %v3831_v9  ;;  %v13085_v56 = vpop.permute.xlu0 %2205  ;;  %v13088_v42 = vmax.f32 %v12598_v62, %v6333_v3  ;;  %v9289_v33 = vld [vmem:[%s15422_s0 + $0x3e0] sm:$0xff]  ;;  %v13093_v23 = vpop.f32.mrb[50].mxu0  ;;  %v9290_v3 = vld [vmem:[%s15422_s0 + $0x3e8] sm:$0xff] }
 0x3c9   :  { %v6433_v47 = vmax.f32 %v6431_v14, %v6432_v2  ;;  %v3832_v10 = vmax.f32 %v3576_v57, 0.0  ;;  %v6440_v20 = vmax.f32 %v6438_v43, %v6439_v32  ;;  %2329 = vperm.xlu1 %9059, %v9289_v33   ;;  %v3203_v37 = vadd.f32 %v2947_v48, %v15975_v63  ;;  %v13104_v14 = vpop.f32.mrb[51].mxu0 }
 0x3ca   :  { %v3465_v25 = vadd.f32 %v13050_v51, %v3202_v54  ;;  %v4937_v9 = vadd.f32 %v12969_v58, %v12894_v30  ;;  %v4932_v62 = vadd.f32 %v12969_v58, %v12900_v22  ;;  %2333 = vperm.xlu0 %9058, %v9290_v3   ;;  %v6427_v2 = vrot.slane %v6426_v31, 1  ;;  %v13109_v48 = vpop.permute.xlu1 %2649 }
 0x3cb   :  { %v6434_v57 = vrot.slane %v6433_v47, 2  ;;  %v6441_v32 = vrot.slane %v6440_v20, 4  ;;  %v3058_v43 = vmul.f32 %v10916_v12, %v12907_v38  ;;  %8884 = vmatmul.mubr.msk.f32.gmra.mrb[60].mxu1 %vm3906_vm0, %v3832_v10  ;;  %v3466_v22 = vadd.f32 %v13050_v51, %v3203_v37  ;;  %v9291_v38 = vld [vmem:[%s15422_s0 + $0x760] sm:$0xff]  ;;  %v13120_v10 = vpop.f32.mrb[52].mxu0 }
 0x3cc   :  { %v3721_v30 = vmax.f32 %v3465_v25, 0.0  ;;  %v6059_v54 = vmax.f32 %v4937_v9, 0.0  ;;  %v6058_v33 = vmax.f32 %v4932_v62, 0.0  ;;  %v13112_v63 = vpop.permute.xlu0 %2653  ;;  %v3059_v24 = vmul.f32 %v10916_v12, %v12915_v49  ;;  %v13130_v49 = vpop.f32.mrb[53].mxu0 }
 0x3cd   :  { %v6435_v3 = vmax.f32 %v6433_v47, %v6434_v57  ;;  %v6442_v44 = vmax.f32 %v6440_v20, %v6441_v32  ;;  %v3314_v27 = vadd.f32 %v3058_v43, %v12184_v59  ;;  %2777 = vperm.xlu1 %9059, %v9291_v38   ;;  %v3722_v25 = vmax.f32 %v3466_v22, 0.0  ;;  %v9292_v59 = vld [vmem:[%s15422_s0 + $0x768] sm:$0xff] }
 0x3ce   :  { %v6448_v37 = vsel %vm3906_vm0, %v6059_v54, -inf  ;;  %v6447_v9 = vsel %vm3906_vm0, %v6058_v33, -inf  ;;  %v4947_v20 = vadd.f32 %v12969_v58, %v12923_v52  ;;  %8718 = vmatprep.mubr.msk.f32.mxu0 %vm3906_vm0, %v3721_v30  ;;  %2781 = vperm.xlu0 %9058, %v9292_v59   ;;  %v13135_v43 = vpop.permute.xlu1 %2209  ;;  %v15976_v22 = vld [vmem:[#allocation59_spill] sm:$0xff]  ;;  %v4942_v30 = vadd.f32 %v12969_v58, %v12932_v1 }
 0x3cf   :  { %v6436_v47 = vrot.slane %v6435_v3, 1  ;;  %v6443_v62 = vrot.slane %v6442_v44, 2  ;;  %v13132_v57 = vmax.f32 %v6447_v9, %v6448_v37  ;;  %v3577_v32 = vadd.f32 %v13050_v51, %v3314_v27  ;;  %8719 = vmatmul.mubr.msk.f32.gmra.mrb[86].mxu0 %vm3906_vm0, %v3722_v25  ;;  %v9293_v27 = vld [vmem:[%s15422_s0 + $0x3f0] sm:$0xff] }
 0x3d0   :  { %v3315_v54 = vadd.f32 %v3059_v24, %v15976_v22  ;;  %v6061_v52 = vmax.f32 %v4947_v20, 0.0  ;;  %v2948_v33 = vmul.f32 %v10916_v12, %v12943_v16  ;;  %v13143_v38 = vpop.permute.xlu0 %2213  ;;  %v6428_v59 = vmax.f32 %v6426_v31, %v6427_v2  ;;  %v13148_v24 = vpop.f32.mrb[54].mxu0  ;;  %v15977_v22 = vld [vmem:[#allocation11_spill] sm:$0xff]  ;;  %v9294_v31 = vld [vmem:[%s15422_s0 + $0x3f8] sm:$0xff] }
 0x3d1   :  { %v6437_v37 = vmax.f32 %v6435_v3, %v6436_v47  ;;  %v6444_v9 = vmax.f32 %v6442_v44, %v6443_v62  ;;  %v3833_v34 = vmax.f32 %v3577_v32, 0.0  ;;  %2337 = vperm.xlu1 %9059, %v9293_v27   ;;  %v6060_v16 = vmax.f32 %v4942_v30, 0.0  ;;  %v13156_v44 = vpop.f32.mrb[55].mxu0 }
 0x3d2   :  { %v3578_v1 = vadd.f32 %v13050_v51, %v3315_v54  ;;  %v6457_v20 = vsel %vm3906_vm0, %v6061_v52, -inf  ;;  %v3204_v25 = vadd.f32 %v2948_v33, %v15977_v22  ;;  %2341 = vperm.xlu0 %9058, %v9294_v31   ;;  %v15978_v2 = vrot.slane %v13040_v39, 1  ;;  %v13167_v54 = vpop.permute.xlu1 %2657 }
 0x3d3   :  { %v7592_v47 = vsel %vm7571_vm1, %v6437_v37, %v6428_v59  ;;  %v6445_v62 = vrot.slane %v6444_v9, 1  ;;  %v2949_v32 = vmul.f32 %v10916_v12, %v12950_v35  ;;  %8886 = vmatprep.mubr.msk.f32.mxu1 %vm3906_vm0, %v3833_v34  ;;  %v6456_v30 = vsel %vm3906_vm0, %v6060_v16, -inf  ;;  %v15980_v35 = vld [vmem:[#allocation10_spill] sm:$0xff]  ;;  %v9295_v34 = vld [vmem:[%s15422_s0 + $0x770] sm:$0xff] }
 0x3d4   :  { %v13161_v3 = vmax.f32 %v13040_v39, %v15978_v2  ;;  %v3834_v52 = vmax.f32 %v3578_v1, 0.0  ;;  %v3467_v33 = vadd.f32 %v13050_v51, %v3204_v25  ;;  %v4957_v27 = vadd.f32 %v12969_v58, %v12958_v55  ;;  %v13173_v39 = vpop.permute.xlu0 %2661  ;;  %v13182_v1 = vpop.f32.mrb[56].mxu0 }
 0x3d5   :  { %v6396_v59 = vrot.slane %v12873_v26, 4  ;;  %v6446_v37 = vmax.f32 %v6444_v9, %v6445_v62  ;;  %v13176_v22 = vmax.f32 %v6456_v30, %v6457_v20  ;;  %v3205_v31 = vadd.f32 %v2949_v32, %v15980_v35  ;;  %2785 = vperm.xlu1 %9059, %v9295_v34   ;;  %v9296_v9 = vld [vmem:[%s15422_s0 + $0x778] sm:$0xff]  ;;  %v13192_v20 = vpop.f32.mrb[57].mxu0 }
 0x3d6   :  { %15979 = vst [vmem:[#allocation115_spill] sm:$0xff] %v13161_v3  ;;  %v3723_v16 = vmax.f32 %v3467_v33, 0.0  ;;  %v6063_v25 = vmax.f32 %v4957_v27, 0.0  ;;  %v4952_v55 = vadd.f32 %v12969_v58, %v12973_v40  ;;  %v3060_v2 = vmul.f32 %v10916_v12, %v12983_v5  ;;  %8887 = vmatmul.mubr.msk.f32.gmra.mrb[62].mxu1 %vm3906_vm0, %v3834_v52  ;;  %2789 = vperm.xlu0 %9058, %v9296_v9   ;;  %v13200_v33 = vpop.permute.xlu1 %2217  ;;  %v15982_v27 = vld [vmem:[#allocation61_spill] sm:$0xff] }
 0x3d7   :  { %v6335_v62 = vrot.slane %v13088_v42, 2  ;;  %v6405_v32 = vrot.slane %v12917_v21, 4  ;;  %v13197_v30 = vsel %vm7573_vm2, %v6446_v37, %v7592_v47  ;;  %v3468_v40 = vadd.f32 %v13050_v51, %v3205_v31 }
 0x3d8   :  { %15981 = vst [vmem:[#allocation116_spill] sm:$0xff] %v13197_v30  ;;  %v6466_v5 = vsel %vm3906_vm0, %v6063_v25, -inf  ;;  %v6062_v52 = vmax.f32 %v4952_v55, 0.0  ;;  %v3316_v35 = vadd.f32 %v3060_v2, %v15982_v27  ;;  %v3061_v34 = vmul.f32 %v10916_v12, %v12988_v53  ;;  %8721 = vmatprep.mubr.msk.f32.mxu0 %vm3906_vm0, %v3723_v16  ;;  %v13207_v9 = vpop.permute.xlu0 %2221  ;;  %v9297_v25 = vld [vmem:[%s15422_s0 + $0x400] sm:$0xff]  ;;  %v13216_v55 = vpop.f32.mrb[58].mxu0  ;;  %v15983_v2 = vld [vmem:[#allocation60_spill] sm:$0xff] }
 0x3d9   :  { %v6342_v3 = vrot.slane %v12660_v6, 4  ;;  %v6397_v47 = vmax.f32 %v12873_v26, %v6396_v59  ;;  %v3724_v37 = vmax.f32 %v3468_v40, 0.0  ;;  %v4967_v31 = vadd.f32 %v12969_v58, %v12996_v36  ;;  %2345 = vperm.xlu1 %9059, %v9297_v25   ;;  %v9298_v36 = vld [vmem:[%s15422_s0 + $0x408] sm:$0xff]  ;;  %v13226_v59 = vpop.f32.mrb[59].mxu0 }
 0x3da   :  { %v6465_v53 = vsel %vm3906_vm0, %v6062_v52, -inf  ;;  %v3579_v16 = vadd.f32 %v13050_v51, %v3316_v35  ;;  %v3317_v27 = vadd.f32 %v3061_v34, %v15983_v2  ;;  %v4962_v26 = vadd.f32 %v12969_v58, %v13006_v29  ;;  %2349 = vperm.xlu0 %9058, %v9298_v36  }
 0x3db   :  { %v6336_v40 = vmax.f32 %v13088_v42, %v6335_v62  ;;  %v6406_v25 = vmax.f32 %v12917_v21, %v6405_v32  ;;  %v13230_v30 = vmax.f32 %v6465_v53, %v6466_v5  ;;  %v6065_v52 = vmax.f32 %v4967_v31, 0.0  ;;  %8722 = vmatmul.mubr.msk.f32.gmra.mrb[88].mxu0 %vm3906_vm0, %v3724_v37  ;;  %v13242_v62 = vpop.permute.xlu1 %2665  ;;  %v9299_v32 = vld [vmem:[%s15422_s0 + $0x780] sm:$0xff]  ;;  %v13247_v5 = vpop.f32.mrb[60].mxu0  ;;  %v9300_v53 = vld [vmem:[%s15422_s0 + $0x788] sm:$0xff] }
 0x3dc   :  { %v3835_v35 = vmax.f32 %v3579_v16, 0.0  ;;  %v3580_v34 = vadd.f32 %v13050_v51, %v3317_v27  ;;  %v6064_v29 = vmax.f32 %v4962_v26, 0.0  ;;  %v2950_v2 = vmul.f32 %v10916_v12, %v13013_v18  ;;  %v13259_v16 = vpop.f32.mrb[61].mxu0 }
 0x3dd   :  { %v13237_v36 = vmax.f32 %v12660_v6, %v6342_v3  ;;  %v6398_v4 = vrot.slane %v6397_v47, 2  ;;  %v6475_v42 = vsel %vm3906_vm0, %v6065_v52, -inf  ;;  %v2951_v21 = vmul.f32 %v10916_v12, %v13021_v8  ;;  %2793 = vperm.xlu1 %9059, %v9299_v32   ;;  %v15984_v6 = vld [vmem:[#allocation13_spill] sm:$0xff]  ;;  %v13254_v8 = vpop.permute.xlu0 %2669 }
 0x3de   :  { %v3836_v37 = vmax.f32 %v3580_v34, 0.0  ;;  %v6474_v18 = vsel %vm3906_vm0, %v6064_v29, -inf  ;;  %v3206_v3 = vadd.f32 %v2950_v2, %v15984_v6  ;;  %v4977_v31 = vadd.f32 %v12969_v58, %v13031_v45  ;;  %8889 = vmatprep.mubr.msk.f32.mxu1 %vm3906_vm0, %v3835_v35  ;;  %2797 = vperm.xlu0 %9058, %v9300_v53   ;;  %v15985_v34 = vld [vmem:[#allocation12_spill] sm:$0xff] }
 0x3df   :  { %v6407_v27 = vrot.slane %v6406_v25, 2  ;;  %v6414_v26 = vrot.slane %v12980_v15, 4  ;;  %v13262_v52 = vmax.f32 %v6474_v18, %v6475_v42  ;;  %v3207_v29 = vadd.f32 %v2951_v21, %v15985_v34  ;;  %v9301_v21 = vld [vmem:[%s15422_s0 + $0x410] sm:$0xff]  ;;  %v13276_v18 = vpop.f32.mrb[62].mxu0 }
 0x3e0   :  { %v3469_v45 = vadd.f32 %v13050_v51, %v3206_v3  ;;  %v6067_v2 = vmax.f32 %v4977_v31, 0.0  ;;  %v4972_v35 = vadd.f32 %v12969_v58, %v13038_v46  ;;  %v3062_v32 = vmul.f32 %v10916_v12, %v13044_v19  ;;  %8890 = vmatmul.mubr.msk.f32.gmra.mrb[64].mxu1 %vm3906_vm0, %v3836_v37  ;;  %v9302_v37 = vld [vmem:[%s15422_s0 + $0x418] sm:$0xff] }
 0x3e1   :  { %v6337_v6 = vrot.slane %v6336_v40, 1  ;;  %v6344_v53 = vrot.slane %v13237_v36, 2  ;;  %v6399_v7 = vmax.f32 %v6397_v47, %v6398_v4  ;;  %v3470_v42 = vadd.f32 %v13050_v51, %v3207_v29  ;;  %2353 = vperm.xlu1 %9059, %v9301_v21   ;;  %v13283_v4 = vpop.f32.mrb[63].mxu0 }
 0x3e2   :  { %v3725_v3 = vmax.f32 %v3469_v45, 0.0  ;;  %v6484_v46 = vsel %vm3906_vm0, %v6067_v2, -inf  ;;  %v6066_v31 = vmax.f32 %v4972_v35, 0.0  ;;  %v3318_v19 = vadd.f32 %v3062_v32, %v12213_v50  ;;  %2357 = vperm.xlu0 %9058, %v9302_v37   ;;  %v13288_v45 = vpop.permute.xlu1 %2225 }
 0x3e3   :  { %v6408_v47 = vmax.f32 %v6406_v25, %v6407_v27  ;;  %v6415_v34 = vmax.f32 %v12980_v15, %v6414_v26  ;;  %v3726_v29 = vmax.f32 %v3470_v42, 0.0  ;;  %v3063_v21 = vmul.f32 %v10916_v12, %v13058_v11  ;;  %v13297_v25 = vpop.permute.xlu0 %2229  ;;  %v15987_v26 = vld [vmem:[#allocation62_spill] sm:$0xff] }
 0x3e4   :  { %v6483_v2 = vsel %vm3906_vm0, %v6066_v31, -inf  ;;  %v3581_v50 = vadd.f32 %v13050_v51, %v3318_v19  ;;  %v4987_v35 = vadd.f32 %v12969_v58, %v13066_v17  ;;  %v4982_v32 = vadd.f32 %v12969_v58, %v13073_v41  ;;  %8724 = vmatprep.mubr.msk.f32.mxu0 %vm3906_vm0, %v3725_v3  ;;  %v9303_v17 = vld [vmem:[%s15422_s0 + $0x790] sm:$0xff]  ;;  %v13308_v31 = vpop.f32.mrb[64].mxu0 }
 0x3e5   :  { %v13299_v15 = vmax.f32 %v6336_v40, %v6337_v6  ;;  %v6400_v27 = vrot.slane %v6399_v7, 1  ;;  %v13301_v11 = vmax.f32 %v6483_v2, %v6484_v46  ;;  %v3319_v42 = vadd.f32 %v3063_v21, %v15987_v26  ;;  %8725 = vmatmul.mubr.msk.f32.gmra.mrb[90].mxu0 %vm3906_vm0, %v3726_v29  ;;  %2801 = vperm.xlu1 %9059, %v9303_v17   ;;  %v9304_v6 = vld [vmem:[%s15422_s0 + $0x798] sm:$0xff]  ;;  %v13315_v46 = vpop.f32.mrb[65].mxu0 }
 0x3e6   :  { %v3837_v41 = vmax.f32 %v3581_v50, 0.0  ;;  %v6069_v3 = vmax.f32 %v4987_v35, 0.0  ;;  %v6068_v19 = vmax.f32 %v4982_v32, 0.0  ;;  %v2952_v40 = vmul.f32 %v10916_v12, %v13077_v28  ;;  %2805 = vperm.xlu0 %9058, %v9304_v6   ;;  %v15989_v32 = vld [vmem:[#allocation15_spill] sm:$0xff] }
 0x3e7   :  { %15986 = vst [vmem:[#allocation117_spill] sm:$0xff] %v13299_v15  ;;  %v13318_v37 = vmax.f32 %v13237_v36, %v6344_v53  ;;  %v6409_v29 = vrot.slane %v6408_v47, 1  ;;  %v6416_v21 = vrot.slane %v6415_v34, 2  ;;  %v3582_v2 = vadd.f32 %v13050_v51, %v3319_v42  ;;  %v13330_v15 = vpop.permute.xlu1 %2673  ;;  %v9305_v42 = vld [vmem:[%s15422_s0 + $0x420] sm:$0xff] }
 0x3e8   :  { %v6493_v50 = vsel %vm3906_vm0, %v6069_v3, -inf  ;;  %v6492_v35 = vsel %vm3906_vm0, %v6068_v19, -inf  ;;  %v3208_v28 = vadd.f32 %v2952_v40, %v15989_v32  ;;  %v2953_v26 = vmul.f32 %v10916_v12, %v13085_v56  ;;  %8892 = vmatprep.mubr.msk.f32.mxu1 %vm3906_vm0, %v3837_v41  ;;  %v13335_v3 = vpop.f32.mrb[66].mxu0  ;;  %v15991_v56 = vld [vmem:[#allocation14_spill] sm:$0xff]  ;;  %v13343_v41 = vpop.permute.xlu0 %2677 }
 0x3e9   :  { %15988 = vst [vmem:[#allocation118_spill] sm:$0xff] %v13318_v37  ;;  %v13327_v17 = vmax.f32 %v6399_v7, %v6400_v27  ;;  %v6450_v36 = vrot.slane %v13132_v57, 4  ;;  %v3838_v53 = vmax.f32 %v3582_v2, 0.0  ;;  %v6494_v6 = vmax.f32 %v6492_v35, %v6493_v50  ;;  %2361 = vperm.xlu1 %9059, %v9305_v42   ;;  %v9306_v2 = vld [vmem:[%s15422_s0 + $0x428] sm:$0xff]  ;;  %v13348_v50 = vpop.f32.mrb[67].mxu0 }
 0x3ea   :  { %v3471_v19 = vadd.f32 %v13050_v51, %v3208_v28  ;;  %v3209_v40 = vadd.f32 %v2953_v26, %v15991_v56  ;;  %v4997_v7 = vadd.f32 %v12969_v58, %v13093_v23  ;;  %v4992_v27 = vadd.f32 %v12969_v58, %v13104_v14  ;;  %2365 = vperm.xlu0 %9058, %v9306_v2  }
 0x3eb   :  { %15990 = vst [vmem:[#allocation119_spill] sm:$0xff] %v13327_v17  ;;  %v13350_v35 = vmax.f32 %v6408_v47, %v6409_v29  ;;  %v13352_v32 = vmax.f32 %v6415_v34, %v6416_v21  ;;  %v6495_v28 = vrot.slane %v6494_v6, 4  ;;  %v3064_v23 = vmul.f32 %v10916_v12, %v13109_v48  ;;  %8893 = vmatmul.mubr.msk.f32.gmra.mrb[66].mxu1 %vm3906_vm0, %v3838_v53  ;;  %v9307_v48 = vld [vmem:[%s15422_s0 + $0x7a0] sm:$0xff]  ;;  %v13367_v29 = vpop.f32.mrb[68].mxu0 }
 0x3ec   :  { %v3727_v14 = vmax.f32 %v3471_v19, 0.0  ;;  %v3472_v26 = vadd.f32 %v13050_v51, %v3209_v40  ;;  %v6071_v42 = vmax.f32 %v4997_v7, 0.0  ;;  %v6070_v56 = vmax.f32 %v4992_v27, 0.0  ;;  %v15993_v7 = vld [vmem:[#allocation63_spill] sm:$0xff] }
 0x3ed   :  { %15992 = vst [vmem:[#allocation120_spill] sm:$0xff] %v13350_v35  ;;  %v13359_v17 = vmax.f32 %v13132_v57, %v6450_v36  ;;  %v6496_v2 = vmax.f32 %v6494_v6, %v6495_v28  ;;  %v3320_v47 = vadd.f32 %v3064_v23, %v12222_v0  ;;  %v3065_v34 = vmul.f32 %v10916_v12, %v13112_v63  ;;  %v9308_v0 = vld [vmem:[%s15422_s0 + $0x7a8] sm:$0xff]  ;;  %v13377_v63 = vpop.f32.mrb[69].mxu0  ;;  %v13381_v28 = vpop.permute.xlu1 %2233 }
 0x3ee   :  { %2809 = vperm.xlu1 %9059, %v9307_v48   ;;  %v3728_v21 = vmax.f32 %v3472_v26, 0.0  ;;  %v6502_v53 = vsel %vm3906_vm0, %v6071_v42, -inf  ;;  %v6501_v19 = vsel %vm3906_vm0, %v6070_v56, -inf  ;;  %v5007_v57 = vadd.f32 %v12969_v58, %v13120_v10  ;;  %8727 = vmatprep.mubr.msk.f32.mxu0 %vm3906_vm0, %v3727_v14  ;;  %v13390_v42 = vpop.permute.xlu0 %2237 }
 0x3ef   :  { %2813 = vperm.xlu0 %9058, %v9308_v0   ;;  %v6497_v36 = vrot.slane %v6496_v2, 2  ;;  %v6503_v6 = vmax.f32 %v6501_v19, %v6502_v53  ;;  %v3583_v40 = vadd.f32 %v13050_v51, %v3320_v47  ;;  %v3321_v27 = vadd.f32 %v3065_v34, %v15993_v7  ;;  %v9309_v53 = vld [vmem:[%s15422_s0 + $0x430] sm:$0xff] }
 0x3f0   :  { %v6073_v23 = vmax.f32 %v5007_v57, 0.0  ;;  %v5002_v10 = vadd.f32 %v12969_v58, %v13130_v49  ;;  %v2954_v14 = vmul.f32 %v10916_v12, %v13135_v43  ;;  %v2955_v26 = vmul.f32 %v10916_v12, %v13143_v38  ;;  %8728 = vmatmul.mubr.msk.f32.gmra.mrb[92].mxu0 %vm3906_vm0, %v3728_v21  ;;  %v13396_v49 = vpop.f32.mrb[70].mxu0  ;;  %v15994_v38 = vld [vmem:[#allocation17_spill] sm:$0xff]  ;;  %v15995_v21 = vld [vmem:[#allocation16_spill] sm:$0xff] }
 0x3f1   :  { %v6498_v56 = vmax.f32 %v6496_v2, %v6497_v36  ;;  %v6504_v47 = vrot.slane %v6503_v6, 4  ;;  %v3839_v48 = vmax.f32 %v3583_v40, 0.0  ;;  %v3584_v34 = vadd.f32 %v13050_v51, %v3321_v27  ;;  %v9310_v2 = vld [vmem:[%s15422_s0 + $0x438] sm:$0xff]  ;;  %v13404_v36 = vpop.f32.mrb[71].mxu0 }
 0x3f2   :  { %2369 = vperm.xlu1 %9059, %v9309_v53   ;;  %v6511_v43 = vsel %vm3906_vm0, %v6073_v23, -inf  ;;  %v6072_v19 = vmax.f32 %v5002_v10, 0.0  ;;  %v3210_v57 = vadd.f32 %v2954_v14, %v15994_v38  ;;  %v3211_v0 = vadd.f32 %v2955_v26, %v15995_v21 }
 0x3f3   :  { %2373 = vperm.xlu0 %9058, %v9310_v2   ;;  %v6505_v7 = vmax.f32 %v6503_v6, %v6504_v47  ;;  %v3840_v27 = vmax.f32 %v3584_v34, 0.0  ;;  %v5017_v53 = vadd.f32 %v12969_v58, %v13148_v24  ;;  %8895 = vmatprep.mubr.msk.f32.mxu1 %vm3906_vm0, %v3839_v48  ;;  %v5012_v26 = vadd.f32 %v12969_v58, %v13156_v44  ;;  %v13416_v6 = vpop.permute.xlu1 %2681  ;;  %v9311_v24 = vld [vmem:[%s15422_s0 + $0x7b0] sm:$0xff]  ;;  %v13423_v44 = vpop.permute.xlu0 %2685 }
 0x3f4   :  { %v6510_v23 = vsel %vm3906_vm0, %v6072_v19, -inf  ;;  %v3473_v10 = vadd.f32 %v13050_v51, %v3210_v57  ;;  %v3474_v14 = vadd.f32 %v13050_v51, %v3211_v0  ;;  %v6499_v38 = vrot.slane %v6498_v56, 1 }
 0x3f5   :  { %v6506_v21 = vrot.slane %v6505_v7, 2  ;;  %v6512_v2 = vmax.f32 %v6510_v23, %v6511_v43  ;;  %v6075_v40 = vmax.f32 %v5017_v53, 0.0  ;;  %8896 = vmatmul.mubr.msk.f32.gmra.mrb[68].mxu1 %vm3906_vm0, %v3840_v27  ;;  %v6074_v34 = vmax.f32 %v5012_v26, 0.0  ;;  %v9312_v43 = vld [vmem:[%s15422_s0 + $0x7b8] sm:$0xff] }
 0x3f6   :  { %2817 = vperm.xlu1 %9059, %v9311_v24   ;;  %v3729_v47 = vmax.f32 %v3473_v10, 0.0  ;;  %v3730_v48 = vmax.f32 %v3474_v14, 0.0  ;;  %v3066_v19 = vmul.f32 %v10916_v12, %v13167_v54  ;;  %v3067_v53 = vmul.f32 %v10916_v12, %v13173_v39  ;;  %v13431_v23 = vpop.f32.mrb[0].mxu1  ;;  %v15996_v14 = vld [vmem:[#allocation65_spill] sm:$0xff]  ;;  %v15997_v39 = vld [vmem:[#allocation64_spill] sm:$0xff] }
 0x3f7   :  { %2821 = vperm.xlu0 %9058, %v9312_v43   ;;  %v6507_v57 = vmax.f32 %v6505_v7, %v6506_v21  ;;  %v6513_v0 = vrot.slane %v6512_v2, 4  ;;  %v6520_v27 = vsel %vm3906_vm0, %v6075_v40, -inf  ;;  %v6519_v10 = vsel %vm3906_vm0, %v6074_v34, -inf  ;;  %v13440_v7 = vpop.f32.mrb[1].mxu1  ;;  %v9313_v34 = vld [vmem:[%s15422_s0 + $0x7c0] sm:$0xff] }
 0x3f8   :  { %v3322_v54 = vadd.f32 %v3066_v19, %v15996_v14  ;;  %v5027_v26 = vadd.f32 %v12969_v58, %v13182_v1  ;;  %v5022_v24 = vadd.f32 %v12969_v58, %v13192_v20  ;;  %8730 = vmatprep.mubr.msk.f32.mxu0 %vm3906_vm0, %v3729_v47  ;;  %v13442_v43 = vmax.f32 %v6519_v10, %v6520_v27  ;;  %v13456_v10 = vpop.permute.xlu1 %2241 }
 0x3f9   :  { %v6508_v40 = vrot.slane %v6507_v57, 1  ;;  %v6514_v21 = vmax.f32 %v6512_v2, %v6513_v0  ;;  %v3323_v35 = vadd.f32 %v3067_v53, %v15997_v39  ;;  %8731 = vmatmul.mubr.msk.f32.gmra.mrb[94].mxu0 %vm3906_vm0, %v3730_v48  ;;  %v2956_v47 = vmul.f32 %v10916_v12, %v13200_v33  ;;  %v9314_v2 = vld [vmem:[%s15422_s0 + $0x7c8] sm:$0xff] }
 0x3fa   :  { %2825 = vperm.xlu1 %9059, %v9313_v34   ;;  %v3585_v1 = vadd.f32 %v13050_v51, %v3322_v54  ;;  %v6077_v20 = vmax.f32 %v5027_v26, 0.0  ;;  %v6076_v19 = vmax.f32 %v5022_v24, 0.0  ;;  %v6500_v0 = vmax.f32 %v6498_v56, %v6499_v38  ;;  %v13458_v14 = vpop.f32.mrb[2].mxu1  ;;  %v15998_v33 = vld [vmem:[#allocation19_spill] sm:$0xff]  ;;  %v13463_v34 = vpop.permute.xlu0 %2245 }
 0x3fb   :  { %2829 = vperm.xlu0 %9058, %v9314_v2   ;;  %v6509_v27 = vmax.f32 %v6507_v57, %v6508_v40  ;;  %v6515_v48 = vrot.slane %v6514_v21, 2  ;;  %v3586_v53 = vadd.f32 %v13050_v51, %v3323_v35  ;;  %v3212_v39 = vadd.f32 %v2956_v47, %v15998_v33  ;;  %v13465_v37 = vpop.f32.mrb[3].mxu1  ;;  %v9315_v40 = vld [vmem:[%s15422_s0 + $0x7d0] sm:$0xff] }
 0x3fc   :  { %v3841_v54 = vmax.f32 %v3585_v1, 0.0  ;;  %v6529_v26 = vsel %vm3906_vm0, %v6077_v20, -inf  ;;  %v6528_v24 = vsel %vm3906_vm0, %v6076_v19, -inf  ;;  %v6459_v56 = vrot.slane %v13176_v22, 4 }
 0x3fd   :  { %v7599_v38 = vsel %vm7571_vm1, %v6509_v27, %v6500_v0  ;;  %v6516_v35 = vmax.f32 %v6514_v21, %v6515_v48  ;;  %v3842_v57 = vmax.f32 %v3586_v53, 0.0  ;;  %v13472_v1 = vmax.f32 %v6528_v24, %v6529_v26 }
 0x3fe   :  { %2833 = vperm.xlu1 %9059, %v9315_v40   ;;  %v3475_v20 = vadd.f32 %v13050_v51, %v3212_v39  ;;  %v2957_v19 = vmul.f32 %v10916_v12, %v13207_v9  ;;  %v5037_v47 = vadd.f32 %v12969_v58, %v13216_v55  ;;  %8898 = vmatprep.mubr.msk.f32.mxu1 %vm3906_vm0, %v3841_v54  ;;  %v15999_v21 = vrot.slane %v13359_v17, 2  ;;  %v9316_v9 = vld [vmem:[%s15422_s0 + $0x7d8] sm:$0xff]  ;;  %v13493_v55 = vpop.f32.mrb[4].mxu1  ;;  %v16000_v54 = vld [vmem:[#allocation18_spill] sm:$0xff]  ;;  %v13501_v40 = vpop.permute.xlu1 %2689 }
 0x3ff   :  { %v6517_v0 = vrot.slane %v6516_v35, 1  ;;  %v5032_v27 = vadd.f32 %v12969_v58, %v13226_v59  ;;  %v3068_v48 = vmul.f32 %v10916_v12, %v13242_v62  ;;  %8899 = vmatmul.mubr.msk.f32.gmra.mrb[70].mxu1 %vm3906_vm0, %v3842_v57  ;;  %2837 = vperm.xlu0 %9058, %v9316_v9   ;;  %v6468_v53 = vrot.slane %v13230_v30, 4  ;;  %v13497_v33 = vpop.f32.mrb[5].mxu1 }
 0x400   :  { %v13483_v2 = vmax.f32 %v13359_v17, %v15999_v21  ;;  %v3731_v17 = vmax.f32 %v3475_v20, 0.0  ;;  %v3213_v26 = vadd.f32 %v2957_v19, %v16000_v54  ;;  %v6079_v24 = vmax.f32 %v5037_v47, 0.0  ;;  %v9317_v21 = vld [vmem:[%s15422_s0 + $0x7e0] sm:$0xff] }
 0x401   :  { %v6460_v59 = vmax.f32 %v13176_v22, %v6459_v56  ;;  %v6518_v62 = vmax.f32 %v6516_v35, %v6517_v0  ;;  %v6078_v39 = vmax.f32 %v5032_v27, 0.0  ;;  %v3324_v57 = vadd.f32 %v3068_v48, %v12251_v13  ;;  %v13512_v56 = vpop.permute.xlu0 %2693  ;;  %v9318_v48 = vld [vmem:[%s15422_s0 + $0x7e8] sm:$0xff] }
 0x402   :  { %2841 = vperm.xlu1 %9059, %v9317_v21   ;;  %v6477_v20 = vrot.slane %v13262_v52, 4  ;;  %v3476_v19 = vadd.f32 %v13050_v51, %v3213_v26  ;;  %v6538_v47 = vsel %vm3906_vm0, %v6079_v24, -inf  ;;  %v3069_v22 = vmul.f32 %v10916_v12, %v13254_v8  ;;  %8733 = vmatprep.mubr.msk.f32.mxu0 %vm3906_vm0, %v3731_v17  ;;  %v13523_v9 = vpop.f32.mrb[6].mxu1  ;;  %v16002_v26 = vld [vmem:[#allocation66_spill] sm:$0xff] }
 0x403   :  { %v6418_v13 = vrot.slane %v13352_v32, 1  ;;  %v13516_v35 = vsel %vm7573_vm2, %v6518_v62, %v7599_v38  ;;  %v6537_v0 = vsel %vm3906_vm0, %v6078_v39, -inf  ;;  %v3587_v27 = vadd.f32 %v13050_v51, %v3324_v57  ;;  %2845 = vperm.xlu0 %9058, %v9318_v48   ;;  %v13529_v38 = vpop.f32.mrb[7].mxu1  ;;  %v13549_v48 = vpop.permute.xlu1 %2249 }
 0x404   :  { %16001 = vst [vmem:[#allocation121_spill] sm:$0xff] %v13516_v35  ;;  %v6469_v8 = vmax.f32 %v13230_v30, %v6468_v53  ;;  %v3732_v17 = vmax.f32 %v3476_v19, 0.0  ;;  %v13526_v54 = vmax.f32 %v6537_v0, %v6538_v47  ;;  %v3325_v24 = vadd.f32 %v3069_v22, %v16002_v26  ;;  %v9319_v30 = vld [vmem:[%s15422_s0 + $0x7f0] sm:$0xff] }
 0x405   :  { %v6454_v62 = vrot.slane %v13483_v2, 1  ;;  %v3843_v39 = vmax.f32 %v3587_v27, 0.0  ;;  %v5047_v57 = vadd.f32 %v12969_v58, %v13247_v5  ;;  %v5042_v21 = vadd.f32 %v12969_v58, %v13259_v16 }
 0x406   :  { %2849 = vperm.xlu1 %9059, %v9319_v30   ;;  %v6461_v53 = vrot.slane %v6460_v59, 2  ;;  %v6478_v19 = vmax.f32 %v13262_v52, %v6477_v20  ;;  %v3588_v47 = vadd.f32 %v13050_v51, %v3325_v24  ;;  %v2958_v22 = vmul.f32 %v10916_v12, %v13288_v45  ;;  %8734 = vmatmul.mubr.msk.f32.gmra.mrb[96].mxu0 %vm3906_vm0, %v3732_v17  ;;  %v9320_v52 = vld [vmem:[%s15422_s0 + $0x7f8] sm:$0xff] }
 0x407   :  { %v6081_v0 = vmax.f32 %v5047_v57, 0.0  ;;  %v6080_v5 = vmax.f32 %v5042_v21, 0.0  ;;  %v2959_v16 = vmul.f32 %v10916_v12, %v13297_v25  ;;  %v5057_v27 = vadd.f32 %v12969_v58, %v13276_v18  ;;  %8901 = vmatprep.mubr.msk.f32.mxu1 %vm3906_vm0, %v3843_v39  ;;  %2853 = vperm.xlu0 %9058, %v9320_v52   ;;  %v13554_v45 = vpop.f32.mrb[8].mxu1  ;;  %v16005_v25 = vld [vmem:[#allocation21_spill] sm:$0xff]  ;;  %v13560_v57 = vpop.permute.xlu0 %2253  ;;  %v16006_v30 = vld [vmem:[#allocation20_spill] sm:$0xff] }
 0x408   :  { %16003 = vst [vmem:[#allocation122_spill] sm:$0xff] %v13554_v45  ;;  %v13557_v20 = vmax.f32 %v13352_v32, %v6418_v13  ;;  %v6470_v17 = vrot.slane %v6469_v8, 2  ;;  %v3844_v26 = vmax.f32 %v3588_v47, 0.0  ;;  %v3214_v24 = vadd.f32 %v2958_v22, %v16005_v25  ;;  %v13562_v18 = vpop.f32.mrb[9].mxu1 }
 0x409   :  { %v6547_v39 = vsel %vm3906_vm0, %v6081_v0, -inf  ;;  %v6546_v21 = vsel %vm3906_vm0, %v6080_v5, -inf  ;;  %v3215_v35 = vadd.f32 %v2959_v16, %v16006_v30  ;;  %v6083_v52 = vmax.f32 %v5057_v27, 0.0 }
 0x40a   :  { %16004 = vst [vmem:[#allocation123_spill] sm:$0xff] %v13557_v20  ;;  %v13568_v45 = vmax.f32 %v13483_v2, %v6454_v62  ;;  %v6479_v32 = vrot.slane %v6478_v19, 2  ;;  %v13570_v13 = vmax.f32 %v6546_v21, %v6547_v39  ;;  %v3477_v47 = vadd.f32 %v13050_v51, %v3214_v24  ;;  %8902 = vmatmul.mubr.msk.f32.gmra.mrb[72].mxu1 %vm3906_vm0, %v3844_v26  ;;  %v13590_v24 = vpop.permute.xlu1 %2697 }
 0x40b   :  { %v6462_v22 = vmax.f32 %v6460_v59, %v6461_v53  ;;  %v3478_v25 = vadd.f32 %v13050_v51, %v3215_v35  ;;  %v5052_v0 = vadd.f32 %v12969_v58, %v13283_v4  ;;  %v3070_v5 = vmul.f32 %v10916_v12, %v13330_v15  ;;  %v13579_v16 = vpop.f32.mrb[10].mxu1 }
 0x40c   :  { %16007 = vst [vmem:[#allocation124_spill] sm:$0xff] %v13568_v45  ;;  %v16008_v2 = vmov 0   ;;  %v6471_v62 = vmax.f32 %v6469_v8, %v6470_v17  ;;  %v3733_v27 = vmax.f32 %v3477_v47, 0.0  ;;  %v6556_v39 = vsel %vm3906_vm0, %v6083_v52, -inf  ;;  %v13585_v59 = vpop.f32.mrb[11].mxu1  ;;  %v16009_v17 = vld [vmem:[#allocation67_spill] sm:$0xff] }
 0x40d   :  { %9060 = vset.pattern.permute.xlu0 %v16008_v2  ;;  %v3071_v26 = vmul.f32 %v10916_v12, %v13343_v41  ;;  %v3734_v35 = vmax.f32 %v3478_v25, 0.0  ;;  %v6082_v53 = vmax.f32 %v5052_v0, 0.0  ;;  %v3326_v4 = vadd.f32 %v3070_v5, %v12260_v61  ;;  %v13597_v41 = vpop.permute.xlu0 %2701 }
 0x40e   :  { %v5067_v15 = vadd.f32 %v12969_v58, %v13308_v31  ;;  %v6480_v21 = vmax.f32 %v6478_v19, %v6479_v32  ;;  %v6486_v8 = vrot.slane %v13301_v11, 4  ;;  %v5062_v52 = vadd.f32 %v12969_v58, %v13315_v46  ;;  %8736 = vmatprep.mubr.msk.f32.mxu0 %vm3906_vm0, %v3733_v27 }
 0x40f   :  { %v3327_v30 = vadd.f32 %v3071_v26, %v16009_v17  ;;  %v6555_v47 = vsel %vm3906_vm0, %v6082_v53, -inf  ;;  %v3589_v61 = vadd.f32 %v13050_v51, %v3326_v4  ;;  %v2960_v31 = vmul.f32 %v10916_v12, %v13381_v28  ;;  %8737 = vmatmul.mubr.msk.f32.gmra.mrb[98].mxu0 %vm3906_vm0, %v3734_v35  ;;  %v13604_v19 = vpop.f32.mrb[12].mxu1  ;;  %v16010_v4 = vld [vmem:[#allocation23_spill] sm:$0xff] }
 0x410   :  { %v6085_v25 = vmax.f32 %v5067_v15, 0.0  ;;  %v6463_v32 = vrot.slane %v6462_v22, 1  ;;  %v6472_v0 = vrot.slane %v6471_v62, 1  ;;  %v13606_v5 = vmax.f32 %v6555_v47, %v6556_v39  ;;  %v13609_v2 = vpop.f32.mrb[13].mxu1 }
 0x411   :  { %v3590_v46 = vadd.f32 %v13050_v51, %v3327_v30  ;;  %v3845_v27 = vmax.f32 %v3589_v61, 0.0  ;;  %v6084_v53 = vmax.f32 %v5062_v52, 0.0  ;;  %v3216_v15 = vadd.f32 %v2960_v31, %v16010_v4  ;;  %v13625_v61 = vpop.permute.xlu1 %2257  ;;  %v16013_v31 = vld [vmem:[#allocation22_spill] sm:$0xff] }
 0x412   :  { %v6565_v26 = vsel %vm3906_vm0, %v6085_v25, -inf  ;;  %v6481_v17 = vrot.slane %v6480_v21, 1  ;;  %v13614_v28 = vmax.f32 %v13301_v11, %v6486_v8  ;;  %v2961_v45 = vmul.f32 %v10916_v12, %v13390_v42 }
 0x413   :  { %v3846_v35 = vmax.f32 %v3590_v46, 0.0  ;;  %v6564_v39 = vsel %vm3906_vm0, %v6084_v53, -inf  ;;  %v3479_v30 = vadd.f32 %v13050_v51, %v3216_v15  ;;  %v5077_v47 = vadd.f32 %v12969_v58, %v13335_v3  ;;  %8904 = vmatprep.mubr.msk.f32.mxu1 %vm3906_vm0, %v3845_v27  ;;  %v13627_v11 = vpop.f32.mrb[14].mxu1  ;;  %v13635_v53 = vpop.permute.xlu0 %2261 }
 0x414   :  { %v5072_v52 = vadd.f32 %v12969_v58, %v13348_v50  ;;  %v13629_v8 = vmax.f32 %v6462_v22, %v6463_v32  ;;  %v13631_v25 = vmax.f32 %v6471_v62, %v6472_v0  ;;  %v6566_v42 = vmax.f32 %v6564_v39, %v6565_v26  ;;  %v13637_v3 = vpop.f32.mrb[15].mxu1  ;;  %v16015_v26 = vld [vmem:[#allocation96_spill] sm:$0xff] }
 0x415   :  { %v3217_v46 = vadd.f32 %v2961_v45, %v16013_v31  ;;  %8905 = vmatmul.mubr.msk.f32.gmra.mrb[74].mxu1 %vm3906_vm0, %v3846_v35  ;;  %v3735_v58 = vmax.f32 %v3479_v30, 0.0  ;;  %v6087_v50 = vmax.f32 %v5077_v47, 0.0  ;;  %v3072_v4 = vmul.f32 %v10916_v12, %v13416_v6  ;;  %v16017_v6 = vld [vmem:[#allocation25_spill] sm:$0xff] }
 0x416   :  { %16011 = vst [vmem:[#allocation125_spill] sm:$0xff] %v13629_v8  ;;  %16012 = vst [vmem:[#allocation126_spill] sm:$0xff] %v13631_v25  ;;  %v6086_v27 = vmax.f32 %v5072_v52, 0.0  ;;  %v13641_v15 = vmax.f32 %v6480_v21, %v6481_v17  ;;  %v6567_v62 = vrot.slane %v6566_v42, 4  ;;  %v3073_v39 = vmul.f32 %v10916_v12, %v13423_v44  ;;  %v16018_v25 = vld [vmem:[#allocation24_spill] sm:$0xff] }
 0x417   :  { %v3480_v32 = vadd.f32 %v13050_v51, %v3217_v46  ;;  %v6574_v45 = vsel %vm3906_vm0, %v6087_v50, -inf  ;;  %v3328_v35 = vadd.f32 %v3072_v4, %v16015_v26  ;;  %8739 = vmatprep.mubr.msk.f32.mxu0 %vm3906_vm0, %v3735_v58  ;;  %v13651_v30 = vpop.f32.mrb[16].mxu1  ;;  %v16016_v46 = vld [vmem:[#allocation68_spill] sm:$0xff] }
 0x418   :  { %16014 = vst [vmem:[#allocation127_spill] sm:$0xff] %v13641_v15  ;;  %v6573_v0 = vsel %vm3906_vm0, %v6086_v27, -inf  ;;  %v6568_v21 = vmax.f32 %v6566_v42, %v6567_v62  ;;  %v13654_v52 = vpop.f32.mrb[17].mxu1  ;;  %v3329_v50 = vadd.f32 %v3073_v39, %v16016_v46  ;;  %v13661_v27 = vld [vmem:[%s15426_s4] ss:$0 sm:$0xff]  ;;  %v13667_v42 = vpop.permute.xlu1 %2705 }
 0x419   :  { %v3736_v17 = vmax.f32 %v3480_v32, 0.0  ;;  %v6575_v47 = vmax.f32 %v6573_v0, %v6574_v45  ;;  %v3591_v31 = vadd.f32 %v13050_v51, %v3328_v35  ;;  %v5087_v44 = vadd.f32 %v13661_v27, %v13367_v29  ;;  %v13674_v0 = vpop.permute.xlu0 %2709 }
 0x41a   :  { %v5082_v58 = vadd.f32 %v13661_v27, %v13377_v63  ;;  %v6569_v4 = vrot.slane %v6568_v21, 2  ;;  %v2962_v32 = vmul.f32 %v10916_v12, %v13456_v10  ;;  %v2963_v45 = vmul.f32 %v10916_v12, %v13463_v34 }
 0x41b   :  { %v6576_v62 = vrot.slane %v6575_v47, 4  ;;  %8740 = vmatmul.mubr.msk.f32.gmra.mrb[100].mxu0 %vm3906_vm0, %v3736_v17  ;;  %v3847_v26 = vmax.f32 %v3591_v31, 0.0  ;;  %v3592_v29 = vadd.f32 %v13050_v51, %v3329_v50  ;;  %v6089_v35 = vmax.f32 %v5087_v44, 0.0  ;;  %v13677_v63 = vpop.f32.mrb[18].mxu1 }
 0x41c   :  { %v6088_v39 = vmax.f32 %v5082_v58, 0.0  ;;  %v6570_v46 = vmax.f32 %v6568_v21, %v6569_v4  ;;  %v3218_v15 = vadd.f32 %v2962_v32, %v16017_v6  ;;  %v3219_v10 = vadd.f32 %v2963_v45, %v16018_v25  ;;  %v13681_v8 = vpop.f32.mrb[19].mxu1 }
 0x41d   :  { %v6577_v22 = vmax.f32 %v6575_v47, %v6576_v62  ;;  %v3848_v34 = vmax.f32 %v3592_v29, 0.0  ;;  %v6583_v17 = vsel %vm3906_vm0, %v6089_v35, -inf  ;;  %v5097_v31 = vadd.f32 %v13661_v27, %v13396_v49  ;;  %8907 = vmatprep.mubr.msk.f32.mxu1 %vm3906_vm0, %v3847_v26  ;;  %v13695_v62 = vpop.permute.xlu1 %2265 }
 0x41e   :  { %v6582_v20 = vsel %vm3906_vm0, %v6088_v39, -inf  ;;  %v6571_v50 = vrot.slane %v6570_v46, 1  ;;  %v3481_v47 = vadd.f32 %v13050_v51, %v3218_v15  ;;  %v3482_v6 = vadd.f32 %v13050_v51, %v3219_v10  ;;  %v13699_v15 = vpop.permute.xlu0 %2269 }
 0x41f   :  { %v6578_v44 = vrot.slane %v6577_v22, 2  ;;  %v6584_v21 = vmax.f32 %v6582_v20, %v6583_v17  ;;  %v6091_v25 = vmax.f32 %v5097_v31, 0.0  ;;  %v5092_v58 = vadd.f32 %v13661_v27, %v13404_v36  ;;  %8908 = vmatmul.mubr.msk.f32.gmra.mrb[76].mxu1 %vm3906_vm0, %v3848_v34  ;;  %v13697_v49 = vpop.f32.mrb[20].mxu1  ;;  %v13714_v17 = vld [vmem:[%s15424_s2] ss:$0 sm:$0xff] }
 0x420   :  { %v3074_v4 = vmul.f32 %v10916_v12, %v13501_v40  ;;  %v6572_v32 = vmax.f32 %v6570_v46, %v6571_v50  ;;  %v3737_v26 = vmax.f32 %v3481_v47, 0.0  ;;  %v13701_v51 = vpop.f32.mrb[21].mxu1  ;;  %v3738_v29 = vmax.f32 %v3482_v6, 0.0  ;;  %v16019_v47 = vld [vmem:[#allocation69_spill] sm:$0xff] }
 0x421   :  { %v6579_v45 = vmax.f32 %v6577_v22, %v6578_v44  ;;  %v6585_v20 = vrot.slane %v6584_v21, 4  ;;  %v6592_v36 = vsel %vm3906_vm0, %v6091_v25, -inf  ;;  %v6090_v35 = vmax.f32 %v5092_v58, 0.0 }
 0x422   :  { %v3330_v40 = vadd.f32 %v3074_v4, %v12289_v60  ;;  %v3075_v34 = vmul.f32 %v10916_v12, %v13512_v56  ;;  %v2964_v22 = vmul.f32 %v10916_v12, %v13549_v48  ;;  %8742 = vmatprep.mubr.msk.f32.mxu0 %vm3906_vm0, %v3737_v26  ;;  %v5427_v60 = vadd.f32 %v13661_v27, %v13431_v23  ;;  %v16020_v4 = vld [vmem:[#allocation27_spill] sm:$0xff]  ;;  %v16021_v23 = vld [vmem:[#allocation26_spill] sm:$0xff] }
 0x423   :  { %v6580_v39 = vrot.slane %v6579_v45, 1  ;;  %v6586_v10 = vmax.f32 %v6584_v21, %v6585_v20  ;;  %v6591_v46 = vsel %vm3906_vm0, %v6090_v35, -inf  ;;  %v2965_v56 = vmul.f32 %v10916_v12, %v13560_v57  ;;  %8743 = vmatmul.mubr.msk.f32.gmra.mrb[102].mxu0 %vm3906_vm0, %v3738_v29  ;;  %v13722_v48 = vpop.f32.mrb[22].mxu1 }
 0x424   :  { %v3593_v31 = vadd.f32 %v13714_v17, %v3330_v40  ;;  %v13724_v21 = vmax.f32 %v6591_v46, %v6592_v36  ;;  %v3331_v6 = vadd.f32 %v3075_v34, %v16019_v47  ;;  %v13727_v25 = vpop.f32.mrb[23].mxu1  ;;  %v3220_v20 = vadd.f32 %v2964_v22, %v16020_v4  ;;  %v13731_v40 = vpop.permute.xlu1 %2713 }
 0x425   :  { %v6581_v50 = vmax.f32 %v6579_v45, %v6580_v39  ;;  %v6587_v44 = vrot.slane %v6586_v10, 2  ;;  %v6157_v26 = vmax.f32 %v5427_v60, 0.0  ;;  %v3221_v35 = vadd.f32 %v2965_v56, %v16021_v23  ;;  %v13736_v39 = vpop.permute.xlu0 %2717  ;;  %v16023_v23 = vld [vmem:[#allocation71_spill] sm:$0xff] }
 0x426   :  { %v3849_v58 = vmax.f32 %v3593_v31, 0.0  ;;  %v6531_v57 = vrot.slane %v13472_v1, 4  ;;  %v3594_v36 = vadd.f32 %v13714_v17, %v3331_v6  ;;  %v16022_v34 = vrot.slane %v13442_v43, 4 }
 0x427   :  { %v7606_v29 = vsel %vm7571_vm1, %v6581_v50, %v6572_v32  ;;  %v6588_v45 = vmax.f32 %v6586_v10, %v6587_v44  ;;  %v3483_v22 = vadd.f32 %v13714_v17, %v3220_v20  ;;  %v3484_v31 = vadd.f32 %v13714_v17, %v3221_v35  ;;  %v13746_v56 = vpop.f32.mrb[24].mxu1 }
 0x428   :  { %v6523_v46 = vmax.f32 %v13442_v43, %v16022_v34  ;;  %v5422_v60 = vadd.f32 %v13661_v27, %v13440_v7  ;;  %8910 = vmatprep.mubr.msk.f32.mxu1 %vm3906_vm0, %v3849_v58  ;;  %v3850_v10 = vmax.f32 %v3594_v36, 0.0  ;;  %v6889_v50 = vsel %vm3906_vm0, %v6157_v26, -inf  ;;  %v13751_v47 = vpop.f32.mrb[25].mxu1 }
 0x429   :  { %v6589_v32 = vrot.slane %v6588_v45, 1  ;;  %v3076_v44 = vmul.f32 %v10916_v12, %v13590_v24  ;;  %v3739_v43 = vmax.f32 %v3483_v22, 0.0  ;;  %v3740_v6 = vmax.f32 %v3484_v31, 0.0 }
 0x42a   :  { %v6156_v4 = vmax.f32 %v5422_v60, 0.0  ;;  %v5437_v20 = vadd.f32 %v13661_v27, %v13458_v14  ;;  %v6532_v7 = vmax.f32 %v13472_v1, %v6531_v57  ;;  %v3077_v36 = vmul.f32 %v10916_v12, %v13597_v41  ;;  %8911 = vmatmul.mubr.msk.f32.gmra.mrb[78].mxu1 %vm3906_vm0, %v3850_v10  ;;  %v13766_v14 = vpop.permute.xlu1 %2273 }
 0x42b   :  { %v6590_v58 = vmax.f32 %v6588_v45, %v6589_v32  ;;  %v3332_v35 = vadd.f32 %v3076_v44, %v16023_v23  ;;  %v5432_v34 = vadd.f32 %v13661_v27, %v13465_v37  ;;  %v2966_v22 = vmul.f32 %v10916_v12, %v13625_v61  ;;  %8745 = vmatprep.mubr.msk.f32.mxu0 %vm3906_vm0, %v3739_v43  ;;  %v13768_v1 = vpop.f32.mrb[26].mxu1  ;;  %v13778_v37 = vpop.permute.xlu0 %2277  ;;  %v16026_v32 = vld [vmem:[#allocation70_spill] sm:$0xff]  ;;  %v16027_v43 = vld [vmem:[#allocation29_spill] sm:$0xff] }
 0x42c   :  { %v6888_v24 = vsel %vm3906_vm0, %v6156_v4, -inf  ;;  %v6159_v26 = vmax.f32 %v5437_v20, 0.0  ;;  %v6540_v57 = vrot.slane %v13526_v54, 4  ;;  %8746 = vmatmul.mubr.msk.f32.gmra.mrb[104].mxu0 %vm3906_vm0, %v3740_v6  ;;  %v13780_v61 = vpop.f32.mrb[27].mxu1  ;;  %v3333_v10 = vadd.f32 %v3077_v36, %v16026_v32 }
 0x42d   :  { %v13772_v41 = vsel %vm7573_vm2, %v6590_v58, %v7606_v29  ;;  %v13774_v45 = vmax.f32 %v6888_v24, %v6889_v50  ;;  %v3595_v31 = vadd.f32 %v13714_v17, %v3332_v35  ;;  %v6158_v44 = vmax.f32 %v5432_v34, 0.0 }
 0x42e   :  { %16024 = vst [vmem:[#allocation128_spill] sm:$0xff] %v13772_v41  ;;  %v6898_v60 = vsel %vm3906_vm0, %v6159_v26, -inf  ;;  %v3222_v4 = vadd.f32 %v2966_v22, %v16027_v43  ;;  %v6524_v20 = vrot.slane %v6523_v46, 2  ;;  %v6549_v29 = vrot.slane %v13570_v13, 4 }
 0x42f   :  { %16025 = vst [vmem:[#allocation129_spill] sm:$0xff] %v13774_v45  ;;  %v3851_v50 = vmax.f32 %v3595_v31, 0.0  ;;  %v5447_v58 = vadd.f32 %v13661_v27, %v13493_v55  ;;  %v3596_v6 = vadd.f32 %v13714_v17, %v3333_v10  ;;  %v6897_v23 = vsel %vm3906_vm0, %v6158_v44, -inf  ;;  %v13793_v36 = vpop.f32.mrb[28].mxu1  ;;  %v16029_v10 = vld [vmem:[#allocation28_spill] sm:$0xff] }
 0x430   :  { %v3485_v35 = vadd.f32 %v13714_v17, %v3222_v4  ;;  %v2967_v24 = vmul.f32 %v10916_v12, %v13635_v53  ;;  %v6533_v26 = vrot.slane %v6532_v7, 2  ;;  %v6541_v34 = vmax.f32 %v13526_v54, %v6540_v57  ;;  %v13802_v4 = vpop.permute.xlu1 %2721  ;;  %v13804_v53 = vpop.f32.mrb[29].mxu1 }
 0x431   :  { %v13796_v22 = vmax.f32 %v6897_v23, %v6898_v60  ;;  %v6161_v31 = vmax.f32 %v5447_v58, 0.0  ;;  %8913 = vmatprep.mubr.msk.f32.mxu1 %vm3906_vm0, %v3851_v50  ;;  %v3852_v55 = vmax.f32 %v3596_v6, 0.0  ;;  %v5442_v44 = vadd.f32 %v13661_v27, %v13497_v33  ;;  %v13810_v60 = vpop.permute.xlu0 %2725 }
 0x432   :  { %v3741_v32 = vmax.f32 %v3485_v35, 0.0  ;;  %v3223_v43 = vadd.f32 %v2967_v24, %v16029_v10  ;;  %v6525_v45 = vmax.f32 %v6523_v46, %v6524_v20  ;;  %v6550_v41 = vmax.f32 %v13570_v13, %v6549_v29 }
 0x433   :  { %16028 = vst [vmem:[#allocation130_spill] sm:$0xff] %v13796_v22  ;;  %v6907_v54 = vsel %vm3906_vm0, %v6161_v31, -inf  ;;  %v3078_v57 = vmul.f32 %v10916_v12, %v13667_v42  ;;  %v6160_v58 = vmax.f32 %v5442_v44, 0.0  ;;  %v5457_v33 = vadd.f32 %v13661_v27, %v13523_v9  ;;  %8914 = vmatmul.mubr.msk.f32.gmra.mrb[80].mxu1 %vm3906_vm0, %v3852_v55  ;;  %v13819_v13 = vpop.f32.mrb[30].mxu1  ;;  %v16030_v42 = vld [vmem:[#allocation95_spill] sm:$0xff]  ;;  %v16031_v31 = vld [vmem:[#allocation72_spill] sm:$0xff] }
 0x434   :  { %v3486_v50 = vadd.f32 %v13714_v17, %v3223_v43  ;;  %v3079_v6 = vmul.f32 %v10916_v12, %v13674_v0  ;;  %8748 = vmatprep.mubr.msk.f32.mxu0 %vm3906_vm0, %v3741_v32  ;;  %v6534_v46 = vmax.f32 %v6532_v7, %v6533_v26  ;;  %v6542_v20 = vrot.slane %v6541_v34, 2  ;;  %v13826_v0 = vpop.f32.mrb[31].mxu1 }
 0x435   :  { %v3334_v29 = vadd.f32 %v3078_v57, %v16030_v42  ;;  %v5452_v23 = vadd.f32 %v13661_v27, %v13529_v38  ;;  %v6906_v24 = vsel %vm3906_vm0, %v6160_v58, -inf  ;;  %v6163_v9 = vmax.f32 %v5457_v33, 0.0 }
 0x436   :  { %v3742_v35 = vmax.f32 %v3486_v50, 0.0  ;;  %v3335_v10 = vadd.f32 %v3079_v6, %v16031_v31  ;;  %v6526_v55 = vrot.slane %v6525_v45, 1  ;;  %v6551_v43 = vrot.slane %v6550_v41, 2  ;;  %v13836_v50 = vpop.permute.xlu1 %2281 }
 0x437   :  { %v13828_v32 = vmax.f32 %v6906_v24, %v6907_v54  ;;  %v3597_v7 = vadd.f32 %v13714_v17, %v3334_v29  ;;  %v6916_v26 = vsel %vm3906_vm0, %v6163_v9, -inf  ;;  %v6162_v57 = vmax.f32 %v5452_v23, 0.0  ;;  %v13838_v58 = vpop.f32.mrb[32].mxu1  ;;  %v13845_v24 = vpop.permute.xlu0 %2285 }
 0x438   :  { %v3598_v44 = vadd.f32 %v13714_v17, %v3335_v10  ;;  %v2968_v38 = vmul.f32 %v10916_v12, %v13695_v62  ;;  %8749 = vmatmul.mubr.msk.f32.gmra.mrb[106].mxu0 %vm3906_vm0, %v3742_v35  ;;  %16033 = vst [vmem:[#allocation132_spill] sm:$0xff] %v13838_v58  ;;  %v16034_v33 = vrot.slane %v13614_v28, 2  ;;  %v6535_v6 = vrot.slane %v6534_v46, 1  ;;  %v16035_v62 = vld [vmem:[#allocation31_spill] sm:$0xff]  ;;  %v16036_v35 = vld [vmem:[#allocation122_spill] sm:$0xff] }
 0x439   :  { %16032 = vst [vmem:[#allocation131_spill] sm:$0xff] %v13828_v32  ;;  %v6543_v42 = vmax.f32 %v6541_v34, %v6542_v20  ;;  %v3853_v29 = vmax.f32 %v3597_v7, 0.0  ;;  %v6915_v9 = vsel %vm3906_vm0, %v6162_v57, -inf  ;;  %v5467_v10 = vadd.f32 %v13661_v27, %v16036_v35  ;;  %v13851_v32 = vpop.f32.mrb[33].mxu1 }
 0x43a   :  { %v13843_v54 = vmax.f32 %v13614_v28, %v16034_v33  ;;  %v3854_v23 = vmax.f32 %v3598_v44, 0.0  ;;  %v3224_v31 = vadd.f32 %v2968_v38, %v16035_v62  ;;  %v13853_v22 = vmax.f32 %v6525_v45, %v6526_v55  ;;  %v13874_v62 = vpop.permute.xlu1 %2729 }
 0x43b   :  { %v6552_v58 = vmax.f32 %v6550_v41, %v6551_v43  ;;  %v13855_v28 = vmax.f32 %v6915_v9, %v6916_v26  ;;  %v2969_v34 = vmul.f32 %v10916_v12, %v13699_v15  ;;  %8916 = vmatprep.mubr.msk.f32.mxu1 %vm3906_vm0, %v3853_v29  ;;  %v6165_v7 = vmax.f32 %v5467_v10, 0.0  ;;  %v13866_v45 = vpop.f32.mrb[34].mxu1  ;;  %v16040_v43 = vld [vmem:[#allocation30_spill] sm:$0xff]  ;;  %v13882_v35 = vpop.permute.xlu0 %2733 }
 0x43c   :  { %16037 = vst [vmem:[#allocation133_spill] sm:$0xff] %v13853_v22  ;;  %v3487_v20 = vadd.f32 %v13714_v17, %v3224_v31  ;;  %v5462_v44 = vadd.f32 %v13661_v27, %v13562_v18  ;;  %v3080_v57 = vmul.f32 %v10916_v12, %v13731_v40  ;;  %8917 = vmatmul.mubr.msk.f32.gmra.mrb[82].mxu1 %vm3906_vm0, %v3854_v23  ;;  %v6544_v55 = vrot.slane %v6543_v42, 1  ;;  %v16041_v9 = vld [vmem:[#allocation98_spill] sm:$0xff]  ;;  %v13876_v40 = vpop.f32.mrb[35].mxu1 }
 0x43d   :  { %16038 = vst [vmem:[#allocation134_spill] sm:$0xff] %v13855_v28  ;;  %v13868_v41 = vmax.f32 %v6534_v46, %v6535_v6  ;;  %v6558_v15 = vrot.slane %v13606_v5, 4  ;;  %v3225_v26 = vadd.f32 %v2969_v34, %v16040_v43  ;;  %v6925_v33 = vsel %vm3906_vm0, %v6165_v7, -inf }
 0x43e   :  { %v3743_v38 = vmax.f32 %v3487_v20, 0.0  ;;  %v6164_v29 = vmax.f32 %v5462_v44, 0.0  ;;  %v3336_v18 = vadd.f32 %v3080_v57, %v16041_v9  ;;  %v6553_v23 = vrot.slane %v6552_v58, 1 }
 0x43f   :  { %16039 = vst [vmem:[#allocation135_spill] sm:$0xff] %v13868_v41  ;;  %v6594_v31 = vrot.slane %v13724_v21, 4  ;;  %v3488_v46 = vadd.f32 %v13714_v17, %v3225_v26  ;;  %v5477_v6 = vadd.f32 %v13661_v27, %v13579_v16  ;;  %v3081_v20 = vmul.f32 %v10916_v12, %v13736_v39  ;;  %v13891_v44 = vpop.f32.mrb[36].mxu1 }
 0x440   :  { %v6924_v10 = vsel %vm3906_vm0, %v6164_v29, -inf  ;;  %v3599_v34 = vadd.f32 %v13714_v17, %v3336_v18  ;;  %v5472_v7 = vadd.f32 %v13661_v27, %v13585_v59  ;;  %8751 = vmatprep.mubr.msk.f32.mxu0 %vm3906_vm0, %v3743_v38  ;;  %v13893_v57 = vmax.f32 %v6543_v42, %v6544_v55  ;;  %v16043_v18 = vld [vmem:[#allocation73_spill] sm:$0xff]  ;;  %v13899_v39 = vpop.f32.mrb[37].mxu1 }
 0x441   :  { %v13896_v16 = vmax.f32 %v13606_v5, %v6558_v15  ;;  %v3744_v43 = vmax.f32 %v3488_v46, 0.0  ;;  %v6926_v26 = vmax.f32 %v6924_v10, %v6925_v33  ;;  %v6167_v9 = vmax.f32 %v5477_v6, 0.0  ;;  %v13920_v6 = vpop.permute.xlu0 %2293 }
 0x442   :  { %16042 = vst [vmem:[#allocation136_spill] sm:$0xff] %v13893_v57  ;;  %v3855_v29 = vmax.f32 %v3599_v34, 0.0  ;;  %v3337_v28 = vadd.f32 %v3081_v20, %v16043_v18  ;;  %v6166_v41 = vmax.f32 %v5472_v7, 0.0  ;;  %v13901_v22 = vmax.f32 %v6552_v58, %v6553_v23  ;;  %v13915_v58 = vpop.permute.xlu1 %2289 }
 0x443   :  { %v13904_v59 = vmax.f32 %v13724_v21, %v6594_v31  ;;  %v6927_v38 = vrot.slane %v6926_v26, 4  ;;  %v2970_v42 = vmul.f32 %v10916_v12, %v13766_v14  ;;  %8752 = vmatmul.mubr.msk.f32.gmra.mrb[108].mxu0 %vm3906_vm0, %v3744_v43  ;;  %v6934_v5 = vsel %vm3906_vm0, %v6167_v9, -inf  ;;  %v16045_v31 = vld [vmem:[#allocation33_spill] sm:$0xff]  ;;  %v13922_v10 = vpop.f32.mrb[38].mxu1 }
 0x444   :  { %16044 = vst [vmem:[#allocation137_spill] sm:$0xff] %v13901_v22  ;;  %v3600_v55 = vadd.f32 %v13714_v17, %v3337_v28  ;;  %v6933_v15 = vsel %vm3906_vm0, %v6166_v41, -inf  ;;  %v5487_v33 = vadd.f32 %v13661_v27, %v13604_v19  ;;  %8919 = vmatprep.mubr.msk.f32.mxu1 %vm3906_vm0, %v3855_v29  ;;  %v2971_v14 = vmul.f32 %v10916_v12, %v13778_v37  ;;  %v13928_v20 = vpop.f32.mrb[39].mxu1  ;;  %v16046_v29 = vld [vmem:[#allocation32_spill] sm:$0xff] }
 0x445   :  { %v6928_v21 = vmax.f32 %v6926_v26, %v6927_v38  ;;  %v6935_v23 = vmax.f32 %v6933_v15, %v6934_v5  ;;  %v3226_v46 = vadd.f32 %v2970_v42, %v16045_v31  ;;  %v5482_v19 = vadd.f32 %v13661_v27, %v13609_v2  ;;  %v16047_v38 = vld [vmem:[#allocation75_spill] sm:$0xff] }
 0x446   :  { %v3856_v28 = vmax.f32 %v3600_v55, 0.0  ;;  %v6169_v41 = vmax.f32 %v5487_v33, 0.0  ;;  %v3082_v34 = vmul.f32 %v10916_v12, %v13802_v4  ;;  %v3227_v37 = vadd.f32 %v2971_v14, %v16046_v29  ;;  %v16048_v29 = vld [vmem:[#allocation74_spill] sm:$0xff] }
 0x447   :  { %v6929_v7 = vrot.slane %v6928_v21, 2  ;;  %v6936_v43 = vrot.slane %v6935_v23, 4  ;;  %v3489_v26 = vadd.f32 %v13714_v17, %v3226_v46  ;;  %v6168_v18 = vmax.f32 %v5482_v19, 0.0  ;;  %v13944_v19 = vpop.f32.mrb[40].mxu1 }
 0x448   :  { %v6943_v9 = vsel %vm3906_vm0, %v6169_v41, -inf  ;;  %v3338_v42 = vadd.f32 %v3082_v34, %v16047_v38  ;;  %v5497_v5 = vadd.f32 %v13661_v27, %v13627_v11  ;;  %8920 = vmatmul.mubr.msk.f32.gmra.mrb[84].mxu1 %vm3906_vm0, %v3856_v28  ;;  %v3490_v15 = vadd.f32 %v13714_v17, %v3227_v37  ;;  %v13942_v41 = vpop.permute.xlu1 %2737 }
 0x449   :  { %v6930_v2 = vmax.f32 %v6928_v21, %v6929_v7  ;;  %v6937_v4 = vmax.f32 %v6935_v23, %v6936_v43  ;;  %v3745_v55 = vmax.f32 %v3489_v26, 0.0  ;;  %v6942_v33 = vsel %vm3906_vm0, %v6168_v18, -inf  ;;  %v13947_v23 = vpop.permute.xlu0 %2741  ;;  %v13949_v7 = vpop.f32.mrb[41].mxu1 }
 0x44a   :  { %v3601_v31 = vadd.f32 %v13714_v17, %v3338_v42  ;;  %v6171_v46 = vmax.f32 %v5497_v5, 0.0  ;;  %v3083_v14 = vmul.f32 %v10916_v12, %v13810_v60  ;;  %v3746_v28 = vmax.f32 %v3490_v15, 0.0 }
 0x44b   :  { %v6931_v11 = vrot.slane %v6930_v2, 1  ;;  %v6938_v34 = vrot.slane %v6937_v4, 2  ;;  %v6944_v21 = vmax.f32 %v6942_v33, %v6943_v9  ;;  %8754 = vmatprep.mubr.msk.f32.mxu0 %vm3906_vm0, %v3745_v55  ;;  %v5492_v60 = vadd.f32 %v13661_v27, %v13637_v3 }
 0x44c   :  { %v3857_v43 = vmax.f32 %v3601_v31, 0.0  ;;  %v6952_v26 = vsel %vm3906_vm0, %v6171_v46, -inf  ;;  %v3339_v37 = vadd.f32 %v3083_v14, %v16048_v29  ;;  %v2972_v9 = vmul.f32 %v10916_v12, %v13836_v50  ;;  %8755 = vmatmul.mubr.msk.f32.gmra.mrb[110].mxu0 %vm3906_vm0, %v3746_v28  ;;  %v16049_v31 = vld [vmem:[#allocation35_spill] sm:$0xff]  ;;  %v16050_v28 = vld [vmem:[#allocation34_spill] sm:$0xff] }
 0x44d   :  { %v6932_v18 = vmax.f32 %v6930_v2, %v6931_v11  ;;  %v6939_v38 = vmax.f32 %v6937_v4, %v6938_v34  ;;  %v6945_v42 = vrot.slane %v6944_v21, 4  ;;  %v6170_v55 = vmax.f32 %v5492_v60, 0.0  ;;  %v13964_v3 = vpop.f32.mrb[42].mxu1 }
 0x44e   :  { %v3602_v5 = vadd.f32 %v13714_v17, %v3339_v37  ;;  %v5507_v15 = vadd.f32 %v13661_v27, %v13651_v30  ;;  %v2973_v33 = vmul.f32 %v10916_v12, %v13845_v24  ;;  %8922 = vmatprep.mubr.msk.f32.mxu1 %vm3906_vm0, %v3857_v43  ;;  %v3228_v46 = vadd.f32 %v2972_v9, %v16049_v31  ;;  %v13969_v14 = vpop.f32.mrb[43].mxu1  ;;  %v13973_v24 = vpop.permute.xlu1 %2297 }
 0x44f   :  { %v6940_v2 = vrot.slane %v6939_v38, 1  ;;  %v6946_v4 = vmax.f32 %v6944_v21, %v6945_v42  ;;  %v5502_v50 = vadd.f32 %v13661_v27, %v13654_v52  ;;  %v6951_v34 = vsel %vm3906_vm0, %v6170_v55, -inf  ;;  %v13976_v42 = vpop.permute.xlu0 %2301 }
 0x450   :  { %v3858_v11 = vmax.f32 %v3602_v5, 0.0  ;;  %v6173_v30 = vmax.f32 %v5507_v15, 0.0  ;;  %v3229_v29 = vadd.f32 %v2973_v33, %v16050_v28  ;;  %v6953_v60 = vmax.f32 %v6951_v34, %v6952_v26 }
 0x451   :  { %v6941_v43 = vmax.f32 %v6939_v38, %v6940_v2  ;;  %v6947_v37 = vrot.slane %v6946_v4, 2  ;;  %v3491_v21 = vadd.f32 %v13714_v17, %v3228_v46  ;;  %v6172_v31 = vmax.f32 %v5502_v50, 0.0  ;;  %v13983_v55 = vpop.f32.mrb[44].mxu1 }
 0x452   :  { %v6961_v9 = vsel %vm3906_vm0, %v6173_v30, -inf  ;;  %v3492_v52 = vadd.f32 %v13714_v17, %v3229_v29  ;;  %v3084_v5 = vmul.f32 %v10916_v12, %v13874_v62  ;;  %8923 = vmatmul.mubr.msk.f32.gmra.mrb[86].mxu1 %vm3906_vm0, %v3858_v11  ;;  %v6596_v38 = vrot.slane %v13904_v59, 2  ;;  %v13987_v2 = vpop.f32.mrb[45].mxu1  ;;  %v16051_v30 = vld [vmem:[#allocation77_spill] sm:$0xff] }
 0x453   :  { %v7641_v26 = vsel %vm7571_vm1, %v6941_v43, %v6932_v18  ;;  %v6948_v15 = vmax.f32 %v6946_v4, %v6947_v37  ;;  %v3747_v33 = vmax.f32 %v3491_v21, 0.0  ;;  %v6960_v34 = vsel %vm3906_vm0, %v6172_v31, -inf }
 0x454   :  { %v3748_v46 = vmax.f32 %v3492_v52, 0.0  ;;  %v3340_v50 = vadd.f32 %v3084_v5, %v16051_v30  ;;  %v5517_v62 = vadd.f32 %v13661_v27, %v13677_v63  ;;  %v6954_v11 = vrot.slane %v6953_v60, 4  ;;  %v14002_v63 = vpop.permute.xlu1 %2745  ;;  %v14006_v5 = vpop.permute.xlu0 %2749 }
 0x455   :  { %v6949_v28 = vrot.slane %v6948_v15, 1  ;;  %v6962_v29 = vmax.f32 %v6960_v34, %v6961_v9  ;;  %v3085_v22 = vmul.f32 %v10916_v12, %v13882_v35  ;;  %8757 = vmatprep.mubr.msk.f32.mxu0 %vm3906_vm0, %v3747_v33  ;;  %v5512_v43 = vadd.f32 %v13661_v27, %v13681_v8  ;;  %v16052_v35 = vld [vmem:[#allocation76_spill] sm:$0xff] }
 0x456   :  { %v3603_v18 = vadd.f32 %v13714_v17, %v3340_v50  ;;  %v6175_v4 = vmax.f32 %v5517_v62, 0.0  ;;  %v2974_v37 = vmul.f32 %v10916_v12, %v13915_v58  ;;  %8758 = vmatmul.mubr.msk.f32.gmra.mrb[112].mxu0 %vm3906_vm0, %v3748_v46  ;;  %v6560_v21 = vrot.slane %v13896_v16, 2  ;;  %v14008_v33 = vpop.f32.mrb[46].mxu1  ;;  %v16053_v50 = vld [vmem:[#allocation37_spill] sm:$0xff] }
 0x457   :  { %v6950_v9 = vmax.f32 %v6948_v15, %v6949_v28  ;;  %v6963_v52 = vrot.slane %v6962_v29, 4  ;;  %v3341_v31 = vadd.f32 %v3085_v22, %v16052_v35  ;;  %v6174_v30 = vmax.f32 %v5512_v43, 0.0  ;;  %v14012_v62 = vpop.f32.mrb[47].mxu1 }
 0x458   :  { %v3859_v34 = vmax.f32 %v3603_v18, 0.0  ;;  %v6970_v8 = vsel %vm3906_vm0, %v6175_v4, -inf  ;;  %v3230_v58 = vadd.f32 %v2974_v37, %v16053_v50  ;;  %v14015_v46 = vmax.f32 %v13904_v59, %v6596_v38 }
 0x459   :  { %v14018_v15 = vsel %vm7573_vm2, %v6950_v9, %v7641_v26  ;;  %v6955_v28 = vmax.f32 %v6953_v60, %v6954_v11  ;;  %v3604_v22 = vadd.f32 %v13714_v17, %v3341_v31  ;;  %v6969_v35 = vsel %vm3906_vm0, %v6174_v30, -inf  ;;  %v14028_v59 = vpop.f32.mrb[72].mxu0  ;;  %v16056_v30 = vld [vmem:[#allocation36_spill] sm:$0xff] }
 0x45a   :  { %16054 = vst [vmem:[#allocation138_spill] sm:$0xff] %v14018_v15  ;;  %v3493_v18 = vadd.f32 %v13714_v17, %v3230_v58  ;;  %v5527_v4 = vadd.f32 %v13661_v27, %v13697_v49  ;;  %v2975_v43 = vmul.f32 %v10916_v12, %v13920_v6  ;;  %8925 = vmatprep.mubr.msk.f32.mxu1 %vm3906_vm0, %v3859_v34  ;;  %v14033_v37 = vpop.f32.mrb[73].mxu0  ;;  %v14038_v6 = vpop.permute.xlu1 %2305  ;;  %v6598_v34 = vrot.slane %v14015_v46, 1 }
 0x45b   :  { %v14031_v38 = vmax.f32 %v13896_v16, %v6560_v21  ;;  %v6964_v60 = vmax.f32 %v6962_v29, %v6963_v52  ;;  %v3860_v26 = vmax.f32 %v3604_v22, 0.0  ;;  %v6971_v11 = vmax.f32 %v6969_v35, %v6970_v8  ;;  %v14044_v29 = vpop.permute.xlu0 %2309 }
 0x45c   :  { %v3749_v9 = vmax.f32 %v3493_v18, 0.0  ;;  %v6177_v31 = vmax.f32 %v5527_v4, 0.0  ;;  %v3231_v50 = vadd.f32 %v2975_v43, %v16056_v30  ;;  %v5522_v49 = vadd.f32 %v13661_v27, %v13701_v51  ;;  %v16057_v18 = vld [vmem:[#allocation100_spill] sm:$0xff] }
 0x45d   :  { %16055 = vst [vmem:[#allocation139_spill] sm:$0xff] %v14031_v38  ;;  %v6956_v58 = vrot.slane %v6955_v28, 2  ;;  %v6972_v15 = vrot.slane %v6971_v11, 4  ;;  %v3086_v16 = vmul.f32 %v10916_v12, %v13942_v41  ;;  %8926 = vmatmul.mubr.msk.f32.gmra.mrb[88].mxu1 %vm3906_vm0, %v3860_v26  ;;  %v5537_v51 = vadd.f32 %v13661_v27, %v13722_v48 }
 0x45e   :  { %v6979_v21 = vsel %vm3906_vm0, %v6177_v31, -inf  ;;  %v3494_v52 = vadd.f32 %v13714_v17, %v3231_v50  ;;  %v6176_v8 = vmax.f32 %v5522_v49, 0.0  ;;  %8760 = vmatprep.mubr.msk.f32.mxu0 %vm3906_vm0, %v3749_v9  ;;  %v6965_v22 = vrot.slane %v6964_v60, 2  ;;  %v14054_v43 = vpop.f32.mrb[48].mxu1 }
 0x45f   :  { %v6973_v35 = vmax.f32 %v6971_v11, %v6972_v15  ;;  %v3342_v4 = vadd.f32 %v3086_v16, %v16057_v18  ;;  %v3087_v41 = vmul.f32 %v10916_v12, %v13947_v23  ;;  %v6179_v30 = vmax.f32 %v5537_v51, 0.0  ;;  %v14059_v49 = vpop.f32.mrb[49].mxu1  ;;  %v16058_v16 = vld [vmem:[#allocation97_spill] sm:$0xff] }
 0x460   :  { %v3750_v26 = vmax.f32 %v3494_v52, 0.0  ;;  %v6978_v31 = vsel %vm3906_vm0, %v6176_v8, -inf  ;;  %v5532_v50 = vadd.f32 %v13661_v27, %v13727_v25  ;;  %v6957_v48 = vmax.f32 %v6955_v28, %v6956_v58  ;;  %v14067_v8 = vpop.permute.xlu1 %2753  ;;  %v14071_v58 = vpop.permute.xlu0 %2757 }
 0x461   :  { %v6974_v9 = vrot.slane %v6973_v35, 2  ;;  %v6980_v57 = vmax.f32 %v6978_v31, %v6979_v21  ;;  %v3605_v15 = vadd.f32 %v13714_v17, %v3342_v4  ;;  %v6988_v11 = vsel %vm3906_vm0, %v6179_v30, -inf }
 0x462   :  { %v3343_v23 = vadd.f32 %v3087_v41, %v16058_v16  ;;  %v6178_v18 = vmax.f32 %v5532_v50, 0.0  ;;  %v2976_v52 = vmul.f32 %v10916_v12, %v13973_v24  ;;  %8761 = vmatmul.mubr.msk.f32.gmra.mrb[114].mxu0 %vm3906_vm0, %v3750_v26  ;;  %v6966_v25 = vmax.f32 %v6964_v60, %v6965_v22  ;;  %v16059_v41 = vld [vmem:[#allocation39_spill] sm:$0xff] }
 0x463   :  { %v6975_v51 = vmax.f32 %v6973_v35, %v6974_v9  ;;  %v3861_v38 = vmax.f32 %v3605_v15, 0.0  ;;  %v5547_v28 = vadd.f32 %v13661_v27, %v13746_v56  ;;  %v2977_v24 = vmul.f32 %v10916_v12, %v13976_v42  ;;  %v14078_v26 = vpop.f32.mrb[74].mxu0  ;;  %v16060_v15 = vld [vmem:[#allocation38_spill] sm:$0xff] }
 0x464   :  { %v3606_v21 = vadd.f32 %v13714_v17, %v3343_v23  ;;  %v6987_v4 = vsel %vm3906_vm0, %v6178_v18, -inf  ;;  %v3232_v31 = vadd.f32 %v2976_v52, %v16059_v41  ;;  %v6958_v30 = vrot.slane %v6957_v48, 1  ;;  %v14083_v56 = vpop.f32.mrb[75].mxu0  ;;  %v14097_v41 = vpop.permute.xlu1 %2313 }
 0x465   :  { %v6981_v60 = vrot.slane %v6980_v57, 4  ;;  %v14080_v22 = vmax.f32 %v6987_v4, %v6988_v11  ;;  %v6181_v35 = vmax.f32 %v5547_v28, 0.0  ;;  %8928 = vmatprep.mubr.msk.f32.mxu1 %vm3906_vm0, %v3861_v38  ;;  %v3233_v16 = vadd.f32 %v2977_v24, %v16060_v15  ;;  %v14107_v24 = vpop.permute.xlu0 %2317 }
 0x466   :  { %v3862_v50 = vmax.f32 %v3606_v21, 0.0  ;;  %v3495_v9 = vadd.f32 %v13714_v17, %v3232_v31  ;;  %v5542_v23 = vadd.f32 %v13661_v27, %v13751_v47  ;;  %v14090_v42 = vmax.f32 %v14015_v46, %v6598_v34 }
 0x467   :  { %v6967_v18 = vrot.slane %v6966_v25, 1  ;;  %v6976_v52 = vrot.slane %v6975_v51, 1  ;;  %v6997_v11 = vsel %vm3906_vm0, %v6181_v35, -inf  ;;  %v3496_v38 = vadd.f32 %v13714_v17, %v3233_v16 }
 0x468   :  { %16061 = vst [vmem:[#allocation140_spill] sm:$0xff] %v14090_v42  ;;  %v3751_v28 = vmax.f32 %v3495_v9, 0.0  ;;  %v6180_v4 = vmax.f32 %v5542_v23, 0.0  ;;  %v3088_v21 = vmul.f32 %v10916_v12, %v14002_v63  ;;  %8929 = vmatmul.mubr.msk.f32.gmra.mrb[90].mxu1 %vm3906_vm0, %v3862_v50  ;;  %v14099_v31 = vmax.f32 %v6957_v48, %v6958_v30  ;;  %v14109_v35 = vpop.f32.mrb[50].mxu1  ;;  %v16063_v50 = vld [vmem:[#allocation79_spill] sm:$0xff]  ;;  %v16066_v23 = vld [vmem:[#allocation78_spill] sm:$0xff] }
 0x469   :  { %v14101_v47 = vmax.f32 %v6980_v57, %v6981_v60  ;;  %v5557_v46 = vadd.f32 %v13661_v27, %v13768_v1  ;;  %v3089_v34 = vmul.f32 %v10916_v12, %v14006_v5  ;;  %v3752_v9 = vmax.f32 %v3496_v38, 0.0  ;;  %v14116_v57 = vpop.f32.mrb[51].mxu1  ;;  %v16086_v42 = vld [vmem:[#allocation46_spill] sm:$0xff] }
 0x46a   :  { %16062 = vst [vmem:[#allocation141_spill] sm:$0xff] %v14099_v31  ;;  %v6996_v63 = vsel %vm3906_vm0, %v6180_v4, -inf  ;;  %v3344_v15 = vadd.f32 %v3088_v21, %v16063_v50  ;;  %v5552_v48 = vadd.f32 %v13661_v27, %v13780_v61  ;;  %8763 = vmatprep.mubr.msk.f32.mxu0 %vm3906_vm0, %v3751_v28  ;;  %v14118_v1 = vmax.f32 %v6966_v25, %v6967_v18 }
 0x46b   :  { %v14120_v30 = vmax.f32 %v6975_v51, %v6976_v52  ;;  %v6998_v5 = vmax.f32 %v6996_v63, %v6997_v11  ;;  %v6183_v60 = vmax.f32 %v5557_v46, 0.0  ;;  %v3345_v38 = vadd.f32 %v3089_v34, %v16066_v23  ;;  %8764 = vmatmul.mubr.msk.f32.gmra.mrb[116].mxu0 %vm3906_vm0, %v3752_v9  ;;  %v16067_v46 = vld [vmem:[#allocation41_spill] sm:$0xff]  ;;  %v14133_v63 = vpop.permute.xlu1 %2761 }
 0x46c   :  { %16064 = vst [vmem:[#allocation142_spill] sm:$0xff] %v14118_v1  ;;  %v3607_v16 = vadd.f32 %v13714_v17, %v3344_v15  ;;  %v6182_v4 = vmax.f32 %v5552_v48, 0.0  ;;  %v2978_v21 = vmul.f32 %v10916_v12, %v14038_v6  ;;  %v5567_v9 = vadd.f32 %v13661_v27, %v13793_v36  ;;  %v14139_v48 = vpop.permute.xlu0 %2765 }
 0x46d   :  { %16065 = vst [vmem:[#allocation143_spill] sm:$0xff] %v14120_v30  ;;  %v6999_v25 = vrot.slane %v6998_v5, 4  ;;  %v7006_v51 = vsel %vm3906_vm0, %v6183_v60, -inf  ;;  %v3608_v52 = vadd.f32 %v13714_v17, %v3345_v38  ;;  %v2979_v15 = vmul.f32 %v10916_v12, %v14044_v29 }
 0x46e   :  { %v3863_v18 = vmax.f32 %v3607_v16, 0.0  ;;  %v7005_v11 = vsel %vm3906_vm0, %v6182_v4, -inf  ;;  %v3234_v34 = vadd.f32 %v2978_v21, %v16067_v46  ;;  %v14141_v60 = vpop.f32.mrb[76].mxu0  ;;  %v5562_v38 = vadd.f32 %v13661_v27, %v13804_v53 }
 0x46f   :  { %v7000_v50 = vmax.f32 %v6998_v5, %v6999_v25  ;;  %v7007_v6 = vmax.f32 %v7005_v11, %v7006_v51  ;;  %v3864_v16 = vmax.f32 %v3608_v52, 0.0  ;;  %v3090_v5 = vmul.f32 %v10916_v12, %v14067_v8  ;;  %v14149_v4 = vpop.f32.mrb[77].mxu0  ;;  %v16068_v25 = vld [vmem:[#allocation40_spill] sm:$0xff]  ;;  %v16069_v52 = vld [vmem:[#allocation81_spill] sm:$0xff] }
 0x470   :  { %v3497_v23 = vadd.f32 %v13714_v17, %v3234_v34  ;;  %8931 = vmatprep.mubr.msk.f32.mxu1 %vm3906_vm0, %v3863_v18  ;;  %v6185_v29 = vmax.f32 %v5567_v9, 0.0  ;;  %v3235_v51 = vadd.f32 %v2979_v15, %v16068_v25  ;;  %v6184_v46 = vmax.f32 %v5562_v38, 0.0  ;;  %v2322_v38 = vpop.permute.xlu1 %2321  ;;  %v16070_v25 = vld [vmem:[#allocation80_spill] sm:$0xff] }
 0x471   :  { %v7001_v36 = vrot.slane %v7000_v50, 2  ;;  %v7008_v21 = vrot.slane %v7007_v6, 4  ;;  %v3346_v28 = vadd.f32 %v3090_v5, %v16069_v52  ;;  %v5577_v34 = vadd.f32 %v13661_v27, %v13819_v13  ;;  %8932 = vmatmul.mubr.msk.f32.gmra.mrb[92].mxu1 %vm3906_vm0, %v3864_v16 }
 0x472   :  { %v3753_v11 = vmax.f32 %v3497_v23, 0.0  ;;  %v7015_v18 = vsel %vm3906_vm0, %v6185_v29, -inf  ;;  %v3498_v61 = vadd.f32 %v13714_v17, %v3235_v51  ;;  %v7014_v30 = vsel %vm3906_vm0, %v6184_v46, -inf }
 0x473   :  { %v7002_v53 = vmax.f32 %v7000_v50, %v7001_v36  ;;  %v7009_v8 = vmax.f32 %v7007_v6, %v7008_v21  ;;  %v3609_v9 = vadd.f32 %v13714_v17, %v3346_v28  ;;  %v6187_v15 = vmax.f32 %v5577_v34, 0.0  ;;  %v14163_v13 = vpop.f32.mrb[52].mxu1  ;;  %v14165_v36 = vpop.permute.xlu0 %2325 }
 0x474   :  { %v3091_v23 = vmul.f32 %v10916_v12, %v14071_v58  ;;  %8766 = vmatprep.mubr.msk.f32.mxu0 %vm3906_vm0, %v3753_v11  ;;  %v3754_v6 = vmax.f32 %v3498_v61, 0.0  ;;  %v7016_v5 = vmax.f32 %v7014_v30, %v7015_v18  ;;  %v14167_v21 = vpop.f32.mrb[53].mxu1  ;;  %v5572_v58 = vadd.f32 %v13661_v27, %v13826_v0  ;;  %v16071_v18 = vld [vmem:[#allocation132_spill] sm:$0xff] }
 0x475   :  { %v7003_v16 = vrot.slane %v7002_v53, 1  ;;  %v7010_v50 = vrot.slane %v7009_v8, 2  ;;  %v3865_v29 = vmax.f32 %v3609_v9, 0.0  ;;  %v7024_v28 = vsel %vm3906_vm0, %v6187_v15, -inf }
 0x476   :  { %v3347_v51 = vadd.f32 %v3091_v23, %v16070_v25  ;;  %v7017_v52 = vrot.slane %v7016_v5, 4  ;;  %v2980_v34 = vmul.f32 %v10916_v12, %v14097_v41  ;;  %8767 = vmatmul.mubr.msk.f32.gmra.mrb[118].mxu0 %vm3906_vm0, %v3754_v6  ;;  %v6186_v61 = vmax.f32 %v5572_v58, 0.0  ;;  %v14182_v0 = vpop.f32.mrb[78].mxu0  ;;  %v16072_v23 = vld [vmem:[#allocation43_spill] sm:$0xff]  ;;  %v16073_v58 = vld [vmem:[#allocation42_spill] sm:$0xff] }
 0x477   :  { %v7004_v11 = vmax.f32 %v7002_v53, %v7003_v16  ;;  %v7011_v46 = vmax.f32 %v7009_v8, %v7010_v50  ;;  %v5587_v9 = vadd.f32 %v13661_v27, %v16071_v18  ;;  %v2981_v15 = vmul.f32 %v10916_v12, %v14107_v24  ;;  %8934 = vmatprep.mubr.msk.f32.mxu1 %vm3906_vm0, %v3865_v29  ;;  %v14187_v50 = vpop.f32.mrb[79].mxu0  ;;  %v14191_v24 = vpop.permute.xlu1 %2769 }
 0x478   :  { %v3610_v30 = vadd.f32 %v13714_v17, %v3347_v51  ;;  %v7018_v8 = vmax.f32 %v7016_v5, %v7017_v52  ;;  %v3236_v16 = vadd.f32 %v2980_v34, %v16072_v23  ;;  %v5582_v41 = vadd.f32 %v13661_v27, %v13851_v32  ;;  %v14194_v52 = vpop.permute.xlu0 %2773  ;;  %v16074_v23 = vld [vmem:[#allocation102_spill] sm:$0xff] }
 0x479   :  { %v7012_v53 = vrot.slane %v7011_v46, 1  ;;  %v7023_v25 = vsel %vm3906_vm0, %v6186_v61, -inf  ;;  %v6189_v51 = vmax.f32 %v5587_v9, 0.0  ;;  %v3237_v18 = vadd.f32 %v2981_v15, %v16073_v58 }
 0x47a   :  { %v3866_v6 = vmax.f32 %v3610_v30, 0.0  ;;  %v7019_v1 = vrot.slane %v7018_v8, 2  ;;  %v7025_v31 = vmax.f32 %v7023_v25, %v7024_v28  ;;  %v3499_v5 = vadd.f32 %v13714_v17, %v3236_v16  ;;  %v14207_v25 = vld [vmem:[%s15426_s4] ss:$0 sm:$0xff] }
 0x47b   :  { %v7013_v29 = vmax.f32 %v7011_v46, %v7012_v53  ;;  %v7033_v34 = vsel %vm3906_vm0, %v6189_v51, -inf  ;;  %v3500_v27 = vadd.f32 %v13714_v17, %v3237_v18  ;;  %v6188_v32 = vmax.f32 %v5582_v41, 0.0 }
 0x47c   :  { %v3092_v30 = vmul.f32 %v10916_v12, %v14133_v63  ;;  %8935 = vmatmul.mubr.msk.f32.gmra.mrb[94].mxu1 %vm3906_vm0, %v3866_v6  ;;  %v7020_v9 = vmax.f32 %v7018_v8, %v7019_v1  ;;  %v7026_v46 = vrot.slane %v7025_v31, 4  ;;  %v3755_v15 = vmax.f32 %v3499_v5, 0.0 }
 0x47d   :  { %v7648_v61 = vsel %vm7571_vm1, %v7013_v29, %v7004_v11  ;;  %v3756_v28 = vmax.f32 %v3500_v27, 0.0  ;;  %v7032_v53 = vsel %vm3906_vm0, %v6188_v32, -inf  ;;  %v5597_v63 = vadd.f32 %v14207_v25, %v13866_v45  ;;  %v14214_v11 = vpop.f32.mrb[54].mxu1  ;;  %v2330_v45 = vpop.permute.xlu1 %2329 }
 0x47e   :  { %v3348_v16 = vadd.f32 %v3092_v30, %v16074_v23  ;;  %v7021_v41 = vrot.slane %v7020_v9, 1  ;;  %v7027_v6 = vmax.f32 %v7025_v31, %v7026_v46  ;;  %v7034_v51 = vmax.f32 %v7032_v53, %v7033_v34  ;;  %8769 = vmatprep.mubr.msk.f32.mxu0 %vm3906_vm0, %v3755_v15  ;;  %v14221_v31 = vpop.f32.mrb[55].mxu1  ;;  %v16077_v30 = vld [vmem:[#allocation99_spill] sm:$0xff]  ;;  %v16078_v53 = vld [vmem:[#allocation45_spill] sm:$0xff] }
 0x47f   :  { %v3093_v1 = vmul.f32 %v10916_v12, %v14139_v48  ;;  %v6191_v58 = vmax.f32 %v5597_v63, 0.0  ;;  %v5592_v18 = vadd.f32 %v14207_v25, %v13876_v40  ;;  %v2982_v29 = vmul.f32 %v10916_v12, %v2322_v38  ;;  %8770 = vmatmul.mubr.msk.f32.gmra.mrb[120].mxu0 %vm3906_vm0, %v3756_v28  ;;  %v14232_v40 = vpop.permute.xlu0 %2333 }
 0x480   :  { %v3611_v8 = vadd.f32 %v13714_v17, %v3348_v16  ;;  %v16075_v5 = vrot.slane %v14101_v47, 2  ;;  %v16076_v34 = vrot.slane %v14080_v22, 4  ;;  %v7022_v32 = vmax.f32 %v7020_v9, %v7021_v41 }
 0x481   :  { %v3349_v46 = vadd.f32 %v3093_v1, %v16077_v30  ;;  %v7042_v15 = vsel %vm3906_vm0, %v6191_v58, -inf  ;;  %v6190_v28 = vmax.f32 %v5592_v18, 0.0  ;;  %v3238_v23 = vadd.f32 %v2982_v29, %v16078_v53 }
 0x482   :  { %v6984_v48 = vmax.f32 %v14101_v47, %v16075_v5  ;;  %v14229_v27 = vmax.f32 %v14080_v22, %v16076_v34  ;;  %v3867_v38 = vmax.f32 %v3611_v8, 0.0  ;;  %v14237_v16 = vsel %vm7573_vm2, %v7022_v32, %v7648_v61 }
 0x483   :  { %16079 = vst [vmem:[#allocation144_spill] sm:$0xff] %v14237_v16  ;;  %v7028_v47 = vrot.slane %v7027_v6, 2  ;;  %v7035_v63 = vrot.slane %v7034_v51, 4  ;;  %v3612_v5 = vadd.f32 %v13714_v17, %v3349_v46  ;;  %v7041_v22 = vsel %vm3906_vm0, %v6190_v28, -inf  ;;  %v14247_v8 = vpop.f32.mrb[80].mxu0  ;;  %v2778_v28 = vpop.permute.xlu1 %2777 }
 0x484   :  { %v3501_v9 = vadd.f32 %v13714_v17, %v3238_v23  ;;  %v5607_v41 = vadd.f32 %v14207_v25, %v13891_v44  ;;  %v2983_v1 = vmul.f32 %v10916_v12, %v14165_v36  ;;  %8937 = vmatprep.mubr.msk.f32.mxu1 %vm3906_vm0, %v3867_v38  ;;  %v6985_v61 = vrot.slane %v6984_v48, 1  ;;  %v14250_v34 = vpop.f32.mrb[81].mxu0  ;;  %v16080_v17 = vld [vmem:[#allocation44_spill] sm:$0xff] }
 0x485   :  { %v6992_v58 = vrot.slane %v14229_v27, 2  ;;  %v3868_v18 = vmax.f32 %v3612_v5, 0.0  ;;  %v7043_v29 = vmax.f32 %v7041_v22, %v7042_v15  ;;  %v5602_v44 = vadd.f32 %v14207_v25, %v13899_v39  ;;  %v2782_v5 = vpop.permute.xlu0 %2781  ;;  %v14262_v22 = vld [vmem:[%s15424_s2] ss:$0 sm:$0xff] }
 0x486   :  { %v3757_v32 = vmax.f32 %v3501_v9, 0.0  ;;  %v6193_v30 = vmax.f32 %v5607_v41, 0.0  ;;  %v3239_v46 = vadd.f32 %v2983_v1, %v16080_v17  ;;  %v7029_v36 = vmax.f32 %v7027_v6, %v7028_v47 }
 0x487   :  { %v7036_v53 = vmax.f32 %v7034_v51, %v7035_v63  ;;  %v7044_v38 = vrot.slane %v7043_v29, 4  ;;  %v3094_v23 = vmul.f32 %v10916_v12, %v14191_v24  ;;  %8938 = vmatmul.mubr.msk.f32.gmra.mrb[96].mxu1 %vm3906_vm0, %v3868_v18  ;;  %v6192_v39 = vmax.f32 %v5602_v44, 0.0  ;;  %v14268_v51 = vpop.f32.mrb[56].mxu1  ;;  %v16082_v63 = vld [vmem:[#allocation84_spill] sm:$0xff] }
 0x488   :  { %v7051_v15 = vsel %vm3906_vm0, %v6193_v30, -inf  ;;  %v3502_v9 = vadd.f32 %v14262_v22, %v3239_v46  ;;  %v5617_v6 = vadd.f32 %v14207_v25, %v13922_v10  ;;  %8772 = vmatprep.mubr.msk.f32.mxu0 %vm3906_vm0, %v3757_v32  ;;  %v14270_v24 = vmax.f32 %v6984_v48, %v6985_v61  ;;  %v14275_v18 = vpop.f32.mrb[57].mxu1 }
 0x489   :  { %v7045_v47 = vmax.f32 %v7043_v29, %v7044_v38  ;;  %v3350_v41 = vadd.f32 %v3094_v23, %v16082_v63  ;;  %v3095_v1 = vmul.f32 %v10916_v12, %v14194_v52  ;;  %v7050_v17 = vsel %vm3906_vm0, %v6192_v39, -inf  ;;  %v16083_v29 = vld [vmem:[#allocation82_spill] sm:$0xff] }
 0x48a   :  { %16081 = vst [vmem:[#allocation145_spill] sm:$0xff] %v14270_v24  ;;  %v3758_v30 = vmax.f32 %v3502_v9, 0.0  ;;  %v6195_v46 = vmax.f32 %v5617_v6, 0.0  ;;  %v5612_v10 = vadd.f32 %v14207_v25, %v13928_v20  ;;  %v7030_v32 = vrot.slane %v7029_v36, 1  ;;  %v2338_v9 = vpop.permute.xlu1 %2337  ;;  %v2342_v24 = vpop.permute.xlu0 %2341 }
 0x48b   :  { %v7037_v44 = vrot.slane %v7036_v53, 2  ;;  %v7052_v16 = vmax.f32 %v7050_v17, %v7051_v15  ;;  %v3613_v48 = vadd.f32 %v14262_v22, %v3350_v41  ;;  %v3351_v38 = vadd.f32 %v3095_v1, %v16083_v29  ;;  %v16084_v17 = vld [vmem:[#allocation47_spill] sm:$0xff] }
 0x48c   :  { %v7060_v61 = vsel %vm3906_vm0, %v6195_v46, -inf  ;;  %v6194_v23 = vmax.f32 %v5612_v10, 0.0  ;;  %v2984_v52 = vmul.f32 %v10916_v12, %v2330_v45  ;;  %8773 = vmatmul.mubr.msk.f32.gmra.mrb[122].mxu0 %vm3906_vm0, %v3758_v30  ;;  %v7046_v39 = vrot.slane %v7045_v47, 2 }
 0x48d   :  { %v7053_v6 = vrot.slane %v7052_v16, 4  ;;  %v3869_v63 = vmax.f32 %v3613_v48, 0.0  ;;  %v5627_v20 = vadd.f32 %v14207_v25, %v13944_v19  ;;  %v3614_v15 = vadd.f32 %v14262_v22, %v3351_v38 }
 0x48e   :  { %v7059_v41 = vsel %vm3906_vm0, %v6194_v23, -inf  ;;  %v3240_v46 = vadd.f32 %v2984_v52, %v16084_v17  ;;  %v2985_v1 = vmul.f32 %v10916_v12, %v14232_v40  ;;  %v14293_v45 = vmax.f32 %v14229_v27, %v6992_v58  ;;  %v14296_v48 = vpop.f32.mrb[82].mxu0 }
 0x48f   :  { %v7054_v30 = vmax.f32 %v7052_v16, %v7053_v6  ;;  %v7061_v10 = vmax.f32 %v7059_v41, %v7060_v61  ;;  %v6197_v29 = vmax.f32 %v5627_v20, 0.0  ;;  %8940 = vmatprep.mubr.msk.f32.mxu1 %vm3906_vm0, %v3869_v63  ;;  %v3870_v19 = vmax.f32 %v3614_v15, 0.0  ;;  %v14302_v17 = vpop.f32.mrb[83].mxu0 }
 0x490   :  { %16085 = vst [vmem:[#allocation146_spill] sm:$0xff] %v14293_v45  ;;  %v3503_v38 = vadd.f32 %v14262_v22, %v3240_v46  ;;  %v3241_v23 = vadd.f32 %v2985_v1, %v16086_v42  ;;  %v5622_v52 = vadd.f32 %v14207_v25, %v13949_v7  ;;  %v14304_v40 = vmax.f32 %v7029_v36, %v7030_v32  ;;  %v2786_v42 = vpop.permute.xlu1 %2785 }
 0x491   :  { %v14306_v27 = vmax.f32 %v7036_v53, %v7037_v44  ;;  %v14308_v16 = vmax.f32 %v7045_v47, %v7046_v39  ;;  %v7069_v58 = vsel %vm3906_vm0, %v6197_v29, -inf  ;;  %v3096_v20 = vmul.f32 %v10916_v12, %v2778_v28  ;;  %8941 = vmatmul.mubr.msk.f32.gmra.mrb[98].mxu1 %vm3906_vm0, %v3870_v19  ;;  %v14317_v47 = vpop.permute.xlu0 %2789  ;;  %v16088_v39 = vld [vmem:[#allocation101_spill] sm:$0xff] }
 0x492   :  { %16087 = vst [vmem:[#allocation147_spill] sm:$0xff] %v14304_v40  ;;  %v3759_v61 = vmax.f32 %v3503_v38, 0.0  ;;  %v3504_v6 = vadd.f32 %v14262_v22, %v3241_v23  ;;  %v6196_v63 = vmax.f32 %v5622_v52, 0.0  ;;  %v7055_v7 = vrot.slane %v7054_v30, 2  ;;  %v16089_v23 = vld [vmem:[#allocation85_spill] sm:$0xff] }
 0x493   :  { %v7062_v15 = vrot.slane %v7061_v10, 4  ;;  %v5637_v36 = vadd.f32 %v14207_v25, %v13964_v3  ;;  %v3097_v53 = vmul.f32 %v10916_v12, %v2782_v5  ;;  %v3352_v41 = vadd.f32 %v3096_v20, %v16088_v39  ;;  %v14324_v46 = vpop.f32.mrb[58].mxu1 }
 0x494   :  { %v3760_v32 = vmax.f32 %v3504_v6, 0.0  ;;  %v7068_v44 = vsel %vm3906_vm0, %v6196_v63, -inf  ;;  %v5632_v28 = vadd.f32 %v14207_v25, %v13969_v14  ;;  %8775 = vmatprep.mubr.msk.f32.mxu0 %vm3906_vm0, %v3759_v61  ;;  %v14328_v19 = vpop.f32.mrb[59].mxu1  ;;  %v2986_v63 = vmul.f32 %v10916_v12, %v2338_v9 }
 0x495   :  { %v7070_v29 = vmax.f32 %v7068_v44, %v7069_v58  ;;  %v6199_v5 = vmax.f32 %v5637_v36, 0.0  ;;  %v3615_v38 = vadd.f32 %v14262_v22, %v3352_v41  ;;  %v3353_v52 = vadd.f32 %v3097_v53, %v16089_v23  ;;  %v16090_v41 = vld [vmem:[#allocation49_spill] sm:$0xff]  ;;  %v2346_v53 = vpop.permute.xlu1 %2345 }
 0x496   :  { %v6198_v6 = vmax.f32 %v5632_v28, 0.0  ;;  %8776 = vmatmul.mubr.msk.f32.gmra.mrb[124].mxu0 %vm3906_vm0, %v3760_v32  ;;  %v14334_v14 = vmax.f32 %v7054_v30, %v7055_v7  ;;  %v14336_v61 = vmax.f32 %v7061_v10, %v7062_v15  ;;  %v3242_v3 = vadd.f32 %v2986_v63, %v16090_v41  ;;  %v2350_v10 = vpop.permute.xlu0 %2349  ;;  %v16091_v63 = vld [vmem:[#allocation48_spill] sm:$0xff] }
 0x497   :  { %v7071_v20 = vrot.slane %v7070_v29, 4  ;;  %v7078_v39 = vsel %vm3906_vm0, %v6199_v5, -inf  ;;  %v3871_v58 = vmax.f32 %v3615_v38, 0.0  ;;  %v3616_v36 = vadd.f32 %v14262_v22, %v3353_v52 }
 0x498   :  { %v7077_v44 = vsel %vm3906_vm0, %v6198_v6, -inf  ;;  %v5647_v9 = vadd.f32 %v14207_v25, %v13983_v55  ;;  %v2987_v30 = vmul.f32 %v10916_v12, %v2342_v24  ;;  %v14345_v7 = vpop.f32.mrb[84].mxu0  ;;  %v3505_v32 = vadd.f32 %v14262_v22, %v3242_v3 }
 0x499   :  { %v7072_v28 = vmax.f32 %v7070_v29, %v7071_v20  ;;  %v7079_v23 = vmax.f32 %v7077_v44, %v7078_v39  ;;  %v3872_v15 = vmax.f32 %v3616_v36, 0.0  ;;  %v5642_v5 = vadd.f32 %v14207_v25, %v13987_v2  ;;  %8943 = vmatprep.mubr.msk.f32.mxu1 %vm3906_vm0, %v3871_v58  ;;  %v14352_v29 = vpop.f32.mrb[85].mxu0  ;;  %v16092_v44 = vld [vmem:[#allocation86_spill] sm:$0xff] }
 0x49a   :  { %v3098_v38 = vmul.f32 %v10916_v12, %v2786_v42  ;;  %v6201_v55 = vmax.f32 %v5647_v9, 0.0  ;;  %v3243_v24 = vadd.f32 %v2987_v30, %v16091_v63  ;;  %v3761_v20 = vmax.f32 %v3505_v32, 0.0 }
 0x49b   :  { %v7073_v52 = vrot.slane %v7072_v28, 2  ;;  %v7080_v6 = vrot.slane %v7079_v23, 4  ;;  %v6200_v39 = vmax.f32 %v5642_v5, 0.0  ;;  %v5107_v3 = vadd.f32 %v14207_v25, %v14028_v59  ;;  %8944 = vmatmul.mubr.msk.f32.gmra.mrb[100].mxu1 %vm3906_vm0, %v3872_v15  ;;  %v2794_v5 = vpop.permute.xlu1 %2793 }
 0x49c   :  { %v3354_v36 = vadd.f32 %v3098_v38, %v16092_v44  ;;  %v7087_v58 = vsel %vm3906_vm0, %v6201_v55, -inf  ;;  %v3506_v41 = vadd.f32 %v14262_v22, %v3243_v24  ;;  %v5657_v32 = vadd.f32 %v14207_v25, %v14008_v33  ;;  %8778 = vmatprep.mubr.msk.f32.mxu0 %vm3906_vm0, %v3761_v20 }
 0x49d   :  { %v7074_v2 = vmax.f32 %v7072_v28, %v7073_v52  ;;  %v7081_v42 = vmax.f32 %v7079_v23, %v7080_v6  ;;  %v7086_v1 = vsel %vm3906_vm0, %v6200_v39, -inf  ;;  %v6093_v30 = vmax.f32 %v5107_v3, 0.0  ;;  %v7428_v23 = vld [vmem:[%s15427_s5] sm:$0xff]  ;;  %v7429_v52 = vld [vmem:[%s15427_s5 + $0x8] sm:$0xff]  ;;  %v2798_v6 = vpop.permute.xlu0 %2797 }
 0x49e   :  { %v3617_v9 = vadd.f32 %v14262_v22, %v3354_v36  ;;  %v3762_v15 = vmax.f32 %v3506_v41, 0.0  ;;  %v7088_v28 = vmax.f32 %v7086_v1, %v7087_v58  ;;  %v14372_v55 = vpop.f32.mrb[60].mxu1  ;;  %v6203_v24 = vmax.f32 %v5657_v32, 0.0  ;;  %v16093_v41 = vld [vmem:[#allocation104_spill] sm:$0xff] }
 0x49f   :  { %v7075_v59 = vrot.slane %v7074_v2, 1  ;;  %v7082_v38 = vrot.slane %v7081_v42, 2  ;;  %v6601_v33 = vsel %vm3906_vm0, %v6093_v30, -inf  ;;  %v3099_v20 = vmul.f32 %v10916_v12, %v14317_v47  ;;  %v14377_v39 = vpop.f32.mrb[61].mxu1 }
 0x4a0   :  { %v3873_v63 = vmax.f32 %v3617_v9, 0.0  ;;  %v7089_v36 = vrot.slane %v7088_v28, 4  ;;  %v5102_v3 = vadd.f32 %v14207_v25, %v14033_v37  ;;  %8779 = vmatmul.mubr.msk.f32.gmra.mrb[126].mxu0 %vm3906_vm0, %v3762_v15  ;;  %v7096_v58 = vsel %vm3906_vm0, %v6203_v24, -inf  ;;  %v2354_v24 = vpop.permute.xlu1 %2353 }
 0x4a1   :  { %v7076_v1 = vmax.f32 %v7074_v2, %v7075_v59  ;;  %v7083_v44 = vmax.f32 %v7081_v42, %v7082_v38  ;;  %v3355_v9 = vadd.f32 %v3099_v20, %v16093_v41  ;;  %v5652_v30 = vadd.f32 %v14207_v25, %v14012_v62 }
 0x4a2   :  { %v9029_v32 = vpack.c.bf16 %v7429_v52, %v7428_v23  ;;  %8946 = vmatprep.mubr.msk.f32.mxu1 %vm3906_vm0, %v3873_v63  ;;  %v7090_v40 = vmax.f32 %v7088_v28, %v7089_v36  ;;  %v6092_v2 = vmax.f32 %v5102_v3, 0.0  ;;  %v2988_v42 = vmul.f32 %v10916_v12, %v2346_v53  ;;  %v14392_v20 = vpop.f32.mrb[86].mxu0  ;;  %v16094_v28 = vld [vmem:[#allocation51_spill] sm:$0xff]  ;;  %v14396_v53 = vpop.permute.xlu0 %2357 }
 0x4a3   :  { %v7084_v47 = vrot.slane %v7083_v44, 1  ;;  %v3618_v59 = vadd.f32 %v14262_v22, %v3355_v9  ;;  %v6202_v37 = vmax.f32 %v5652_v30, 0.0  ;;  %v2989_v38 = vmul.f32 %v10916_v12, %v2350_v10  ;;  %v14398_v36 = vpop.f32.mrb[87].mxu0  ;;  %v16095_v9 = vld [vmem:[#allocation50_spill] sm:$0xff] }
 0x4a4   :  { %9030 = vmatprep.subr.bf16.mxu1 %v9029_v32  ;;  %v5667_v15 = vadd.f32 %v14207_v25, %v14054_v43  ;;  %v7091_v23 = vrot.slane %v7090_v40, 2  ;;  %v6600_v52 = vsel %vm3906_vm0, %v6092_v2, -inf  ;;  %v3244_v63 = vadd.f32 %v2988_v42, %v16094_v28 }
 0x4a5   :  { %v7085_v62 = vmax.f32 %v7083_v44, %v7084_v47  ;;  %9032 = vmatpush3.bf16.msra.mxu1 %v9029_v32  ;;  %v3874_v3 = vmax.f32 %v3618_v59, 0.0  ;;  %v6602_v41 = vmax.f32 %v6600_v52, %v6601_v33  ;;  %v7095_v10 = vsel %vm3906_vm0, %v6202_v37, -inf }
 0x4a6   :  { %v3245_v43 = vadd.f32 %v2989_v38, %v16095_v9  ;;  %v7092_v45 = vmax.f32 %v7090_v40, %v7091_v23  ;;  %v7097_v44 = vmax.f32 %v7095_v10, %v7096_v58  ;;  %v3507_v47 = vadd.f32 %v14262_v22, %v3244_v63  ;;  %v16096_v10 = vld [vmem:[#allocation88_spill] sm:$0xff] }
 0x4a7   :  { %v7655_v30 = vsel %vm7571_vm1, %v7085_v62, %v7076_v1  ;;  %v6603_v2 = vrot.slane %v6602_v41, 4  ;;  %v6205_v32 = vmax.f32 %v5667_v15, 0.0  ;;  %v5662_v28 = vadd.f32 %v14207_v25, %v14059_v49  ;;  %8947 = vmatmul.mubr.msk.f32.gmra.mrb[102].mxu1 %vm3906_vm0, %v3874_v3  ;;  %v2802_v62 = vpop.permute.xlu1 %2801  ;;  %v2806_v3 = vpop.permute.xlu0 %2805 }
 0x4a8   :  { %v3508_v42 = vadd.f32 %v14262_v22, %v3245_v43  ;;  %v7093_v33 = vrot.slane %v7092_v45, 1  ;;  %v7098_v59 = vrot.slane %v7097_v44, 4  ;;  %v3763_v37 = vmax.f32 %v3507_v47, 0.0 }
 0x4a9   :  { %v3100_v38 = vmul.f32 %v10916_v12, %v2794_v5  ;;  %v6604_v52 = vmax.f32 %v6602_v41, %v6603_v2  ;;  %v7105_v40 = vsel %vm3906_vm0, %v6205_v32, -inf  ;;  %v6204_v58 = vmax.f32 %v5662_v28, 0.0  ;;  %v14410_v23 = vpop.f32.mrb[62].mxu1  ;;  %v16098_v28 = vld [vmem:[#allocation87_spill] sm:$0xff] }
 0x4aa   :  { %v3764_v1 = vmax.f32 %v3508_v42, 0.0  ;;  %v7094_v63 = vmax.f32 %v7092_v45, %v7093_v33  ;;  %v7099_v15 = vmax.f32 %v7097_v44, %v7098_v59  ;;  %v3101_v49 = vmul.f32 %v10916_v12, %v2798_v6  ;;  %8781 = vmatprep.mubr.msk.f32.mxu0 %vm3906_vm0, %v3763_v37  ;;  %v14415_v43 = vpop.f32.mrb[63].mxu1 }
 0x4ab   :  { %v3356_v9 = vadd.f32 %v3100_v38, %v16096_v10  ;;  %v6605_v5 = vrot.slane %v6604_v52, 2  ;;  %v7104_v41 = vsel %vm3906_vm0, %v6204_v58, -inf  ;;  %v5117_v47 = vadd.f32 %v14207_v25, %v14078_v26 }
 0x4ac   :  { %v5112_v2 = vadd.f32 %v14207_v25, %v14083_v56  ;;  %8782 = vmatmul.mubr.msk.f32.gmra.mrb[128].mxu0 %vm3906_vm0, %v3764_v1  ;;  %v14424_v45 = vsel %vm7573_vm2, %v7094_v63, %v7655_v30  ;;  %v7100_v6 = vrot.slane %v7099_v15, 2  ;;  %v7106_v44 = vmax.f32 %v7104_v41, %v7105_v40 }
 0x4ad   :  { %16097 = vst [vmem:[#allocation148_spill] sm:$0xff] %v14424_v45  ;;  %v3619_v42 = vadd.f32 %v14262_v22, %v3356_v9  ;;  %v7057_v32 = vrot.slane %v14334_v14, 1  ;;  %v3357_v33 = vadd.f32 %v3101_v49, %v16098_v28  ;;  %v6095_v59 = vmax.f32 %v5117_v47, 0.0  ;;  %v2362_v49 = vpop.permute.xlu1 %2361 }
 0x4ae   :  { %v6094_v37 = vmax.f32 %v5112_v2, 0.0  ;;  %v7064_v26 = vrot.slane %v14336_v61, 2  ;;  %v6606_v38 = vmax.f32 %v6604_v52, %v6605_v5  ;;  %v2990_v56 = vmul.f32 %v10916_v12, %v2354_v24  ;;  %v14431_v1 = vpop.f32.mrb[88].mxu0  ;;  %v16100_v24 = vld [vmem:[#allocation53_spill] sm:$0xff] }
 0x4af   :  { %v3875_v58 = vmax.f32 %v3619_v42, 0.0  ;;  %v16099_v30 = vrot.slane %v14306_v27, 1  ;;  %v3620_v63 = vadd.f32 %v14262_v22, %v3357_v33  ;;  %v6610_v10 = vsel %vm3906_vm0, %v6095_v59, -inf  ;;  %v14441_v41 = vpop.f32.mrb[89].mxu0  ;;  %v2366_v42 = vpop.permute.xlu0 %2365 }
 0x4b0   :  { %v6609_v9 = vsel %vm3906_vm0, %v6094_v37, -inf  ;;  %v7101_v52 = vmax.f32 %v7099_v15, %v7100_v6  ;;  %v7107_v5 = vrot.slane %v7106_v44, 4  ;;  %v3246_v2 = vadd.f32 %v2990_v56, %v16100_v24 }
 0x4b1   :  { %v14436_v40 = vmax.f32 %v14306_v27, %v16099_v30  ;;  %v6611_v47 = vmax.f32 %v6609_v9, %v6610_v10  ;;  %8949 = vmatprep.mubr.msk.f32.mxu1 %vm3906_vm0, %v3875_v58  ;;  %v16101_v27 = vrot.slane %v14308_v16, 1  ;;  %v3876_v33 = vmax.f32 %v3620_v63, 0.0  ;;  %v16104_v30 = vld [vmem:[#allocation52_spill] sm:$0xff] }
 0x4b2   :  { %v2991_v59 = vmul.f32 %v10916_v12, %v14396_v53  ;;  %v5677_v37 = vadd.f32 %v14207_v25, %v14109_v35  ;;  %v14455_v15 = vmax.f32 %v14334_v14, %v7057_v32  ;;  %v14458_v6 = vmax.f32 %v14336_v61, %v7064_v26 }
 0x4b3   :  { %v14448_v28 = vmax.f32 %v14308_v16, %v16101_v27  ;;  %v6607_v58 = vrot.slane %v6606_v38, 1  ;;  %v3509_v56 = vadd.f32 %v14262_v22, %v3246_v2  ;;  %v5672_v63 = vadd.f32 %v14207_v25, %v14116_v57  ;;  %8950 = vmatmul.mubr.msk.f32.gmra.mrb[104].mxu1 %vm3906_vm0, %v3876_v33  ;;  %v14466_v35 = vpop.f32.mrb[64].mxu1 }
 0x4b4   :  { %16103 = vst [vmem:[#allocation150_spill] sm:$0xff] %v14455_v15  ;;  %v3247_v10 = vadd.f32 %v2991_v59, %v16104_v30  ;;  %v6207_v16 = vmax.f32 %v5677_v37, 0.0  ;;  %v3102_v53 = vmul.f32 %v10916_v12, %v2802_v62  ;;  %v7102_v14 = vrot.slane %v7101_v52, 1  ;;  %v14469_v26 = vpop.f32.mrb[65].mxu1  ;;  %v16105_v59 = vld [vmem:[#allocation103_spill] sm:$0xff]  ;;  %v2810_v37 = vpop.permute.xlu1 %2809  ;;  %v16106_v30 = vld [vmem:[#allocation89_spill] sm:$0xff] }
 0x4b5   :  { %16102 = vst [vmem:[#allocation149_spill] sm:$0xff] %v14448_v28  ;;  %v7108_v32 = vmax.f32 %v7106_v44, %v7107_v5  ;;  %v3765_v9 = vmax.f32 %v3509_v56, 0.0  ;;  %v3103_v61 = vmul.f32 %v10916_v12, %v2806_v3  ;;  %v6206_v27 = vmax.f32 %v5672_v63, 0.0  ;;  %v2814_v3 = vpop.permute.xlu0 %2813 }
 0x4b6   :  { %v3510_v24 = vadd.f32 %v14262_v22, %v3247_v10  ;;  %v7114_v2 = vsel %vm3906_vm0, %v6207_v16, -inf  ;;  %v3358_v57 = vadd.f32 %v3102_v53, %v16105_v59  ;;  %v14474_v62 = vmax.f32 %v6606_v38, %v6607_v58 }
 0x4b7   :  { %v6612_v33 = vrot.slane %v6611_v47, 4  ;;  %v3359_v45 = vadd.f32 %v3103_v61, %v16106_v30  ;;  %v5127_v44 = vadd.f32 %v14207_v25, %v14141_v60  ;;  %8784 = vmatprep.mubr.msk.f32.mxu0 %vm3906_vm0, %v3765_v9  ;;  %v7113_v56 = vsel %vm3906_vm0, %v6206_v27, -inf }
 0x4b8   :  { %v3766_v5 = vmax.f32 %v3510_v24, 0.0  ;;  %v3621_v10 = vadd.f32 %v14262_v22, %v3358_v57  ;;  %v5122_v16 = vadd.f32 %v14207_v25, %v14149_v4  ;;  %v14484_v63 = vmax.f32 %v7101_v52, %v7102_v14  ;;  %v14487_v61 = vpop.f32.mrb[90].mxu0 }
 0x4b9   :  { %v7109_v38 = vrot.slane %v7108_v32, 2  ;;  %v7115_v58 = vmax.f32 %v7113_v56, %v7114_v2  ;;  %v3622_v53 = vadd.f32 %v14262_v22, %v3359_v45  ;;  %v6097_v59 = vmax.f32 %v5127_v44, 0.0  ;;  %v14491_v27 = vpop.f32.mrb[91].mxu0  ;;  %v16108_v2 = vld [vmem:[#allocation55_spill] sm:$0xff] }
 0x4ba   :  { %16107 = vst [vmem:[#allocation151_spill] sm:$0xff] %v14484_v63  ;;  %v3877_v60 = vmax.f32 %v3621_v10, 0.0  ;;  %v6096_v9 = vmax.f32 %v5122_v16, 0.0  ;;  %v2992_v24 = vmul.f32 %v10916_v12, %v2362_v49  ;;  %8785 = vmatmul.mubr.msk.f32.gmra.mrb[130].mxu0 %vm3906_vm0, %v3766_v5  ;;  %v6613_v57 = vmax.f32 %v6611_v47, %v6612_v33  ;;  %v2370_v49 = vpop.permute.xlu1 %2369  ;;  %v16109_v47 = vld [vmem:[#allocation54_spill] sm:$0xff] }
 0x4bb   :  { %v7116_v30 = vrot.slane %v7115_v58, 4  ;;  %v3878_v4 = vmax.f32 %v3622_v53, 0.0  ;;  %v2993_v52 = vmul.f32 %v10916_v12, %v2366_v42  ;;  %v6619_v14 = vsel %vm3906_vm0, %v6097_v59, -inf  ;;  %v2374_v42 = vpop.permute.xlu0 %2373 }
 0x4bc   :  { %v6618_v45 = vsel %vm3906_vm0, %v6096_v9, -inf  ;;  %v3248_v56 = vadd.f32 %v2992_v24, %v16108_v2  ;;  %v5687_v44 = vadd.f32 %v14207_v25, %v14163_v13  ;;  %8952 = vmatprep.mubr.msk.f32.mxu1 %vm3906_vm0, %v3877_v60  ;;  %v7110_v5 = vmax.f32 %v7108_v32, %v7109_v38 }
 0x4bd   :  { %v7117_v10 = vmax.f32 %v7115_v58, %v7116_v30  ;;  %v6620_v16 = vmax.f32 %v6618_v45, %v6619_v14  ;;  %v3249_v33 = vadd.f32 %v2993_v52, %v16109_v47  ;;  %8953 = vmatmul.mubr.msk.f32.gmra.mrb[106].mxu1 %vm3906_vm0, %v3878_v4  ;;  %v5682_v9 = vadd.f32 %v14207_v25, %v14167_v21  ;;  %v16110_v52 = vld [vmem:[#allocation90_spill] sm:$0xff] }
 0x4be   :  { %v3511_v53 = vadd.f32 %v14262_v22, %v3248_v56  ;;  %v6209_v59 = vmax.f32 %v5687_v44, 0.0  ;;  %v3104_v24 = vmul.f32 %v10916_v12, %v2810_v37  ;;  %v6614_v13 = vrot.slane %v6613_v57, 2  ;;  %v14508_v38 = vpop.f32.mrb[66].mxu1  ;;  %v16111_v37 = vld [vmem:[#allocation106_spill] sm:$0xff] }
 0x4bf   :  { %v6621_v2 = vrot.slane %v6620_v16, 4  ;;  %v3512_v60 = vadd.f32 %v14262_v22, %v3249_v33  ;;  %v3105_v32 = vmul.f32 %v10916_v12, %v2814_v3  ;;  %v6208_v4 = vmax.f32 %v5682_v9, 0.0  ;;  %v14512_v45 = vpop.f32.mrb[67].mxu1 }
 0x4c0   :  { %v3767_v58 = vmax.f32 %v3511_v53, 0.0  ;;  %v7123_v30 = vsel %vm3906_vm0, %v6209_v59, -inf  ;;  %v3360_v14 = vadd.f32 %v3104_v24, %v16110_v52  ;;  %v7118_v56 = vrot.slane %v7117_v10, 2  ;;  %v2818_v59 = vpop.permute.xlu1 %2817 }
 0x4c1   :  { %v6622_v21 = vmax.f32 %v6620_v16, %v6621_v2  ;;  %v3768_v44 = vmax.f32 %v3512_v60, 0.0  ;;  %v3361_v47 = vadd.f32 %v3105_v32, %v16111_v37  ;;  %v7122_v63 = vsel %vm3906_vm0, %v6208_v4, -inf  ;;  %v2822_v2 = vpop.permute.xlu0 %2821 }
 0x4c2   :  { %v3623_v33 = vadd.f32 %v14262_v22, %v3360_v14  ;;  %v5137_v3 = vadd.f32 %v14207_v25, %v14182_v0  ;;  %v5132_v53 = vadd.f32 %v14207_v25, %v14187_v50  ;;  %8787 = vmatprep.mubr.msk.f32.mxu0 %vm3906_vm0, %v3767_v58  ;;  %v7111_v9 = vrot.slane %v7110_v5, 1 }
 0x4c3   :  { %v6623_v24 = vrot.slane %v6622_v21, 2  ;;  %v7124_v52 = vmax.f32 %v7122_v63, %v7123_v30  ;;  %v3624_v16 = vadd.f32 %v14262_v22, %v3361_v47  ;;  %8788 = vmatmul.mubr.msk.f32.gmra.mrb[132].mxu0 %vm3906_vm0, %v3768_v44  ;;  %v2994_v14 = vmul.f32 %v10916_v12, %v2370_v49  ;;  %v14525_v0 = vpop.f32.mrb[92].mxu0  ;;  %v16112_v47 = vld [vmem:[#allocation57_spill] sm:$0xff] }
 0x4c4   :  { %v3879_v60 = vmax.f32 %v3623_v33, 0.0  ;;  %v6099_v32 = vmax.f32 %v5137_v3, 0.0  ;;  %v6098_v4 = vmax.f32 %v5132_v53, 0.0  ;;  %v6615_v37 = vmax.f32 %v6613_v57, %v6614_v13  ;;  %v14527_v28 = vpop.f32.mrb[93].mxu0  ;;  %v16113_v13 = vld [vmem:[#allocation56_spill] sm:$0xff] }
 0x4c5   :  { %v7119_v50 = vmax.f32 %v7117_v10, %v7118_v56  ;;  %v7125_v15 = vrot.slane %v7124_v52, 4  ;;  %v3880_v58 = vmax.f32 %v3624_v16, 0.0  ;;  %v3250_v44 = vadd.f32 %v2994_v14, %v16112_v47 }
 0x4c6   :  { %v6628_v63 = vsel %vm3906_vm0, %v6099_v32, -inf  ;;  %v6627_v30 = vsel %vm3906_vm0, %v6098_v4, -inf  ;;  %v2995_v33 = vmul.f32 %v10916_v12, %v2374_v42  ;;  %8955 = vmatprep.mubr.msk.f32.mxu1 %vm3906_vm0, %v3879_v60  ;;  %v6624_v3 = vmax.f32 %v6622_v21, %v6623_v24  ;;  %v2826_v42 = vpop.permute.xlu1 %2825 }
 0x4c7   :  { %v7126_v49 = vmax.f32 %v7124_v52, %v7125_v15  ;;  %v6629_v53 = vmax.f32 %v6627_v30, %v6628_v63  ;;  %v5697_v57 = vadd.f32 %v14207_v25, %v14214_v11  ;;  %8956 = vmatmul.mubr.msk.f32.gmra.mrb[108].mxu1 %vm3906_vm0, %v3880_v58  ;;  %v3513_v10 = vadd.f32 %v14262_v22, %v3250_v44  ;;  %v2830_v52 = vpop.permute.xlu0 %2829  ;;  %v16114_v63 = vld [vmem:[#allocation92_spill] sm:$0xff] }
 0x4c8   :  { %v3251_v56 = vadd.f32 %v2995_v33, %v16113_v13  ;;  %v5692_v16 = vadd.f32 %v14207_v25, %v14221_v31  ;;  %v3106_v32 = vmul.f32 %v10916_v12, %v2818_v59  ;;  %v14542_v4 = vmax.f32 %v7110_v5, %v7111_v9  ;;  %v14544_v60 = vpop.f32.mrb[68].mxu1 }
 0x4c9   :  { %v6616_v21 = vrot.slane %v6615_v37, 1  ;;  %v7120_v15 = vrot.slane %v7119_v50, 1  ;;  %v6211_v24 = vmax.f32 %v5697_v57, 0.0  ;;  %v3769_v11 = vmax.f32 %v3513_v10, 0.0  ;;  %v14548_v47 = vpop.f32.mrb[69].mxu1 }
 0x4ca   :  { %v3514_v14 = vadd.f32 %v14262_v22, %v3251_v56  ;;  %v6210_v58 = vmax.f32 %v5692_v16, 0.0  ;;  %v3362_v30 = vadd.f32 %v3106_v32, %v16114_v63  ;;  %v6625_v31 = vrot.slane %v6624_v3, 1  ;;  %v16115_v32 = vld [vmem:[#allocation91_spill] sm:$0xff] }
 0x4cb   :  { %v7127_v44 = vrot.slane %v7126_v49, 2  ;;  %v7132_v59 = vsel %vm3906_vm0, %v6211_v24, -inf  ;;  %v3107_v5 = vmul.f32 %v10916_v12, %v2822_v2  ;;  %v5147_v10 = vadd.f32 %v14207_v25, %v14247_v8  ;;  %8790 = vmatprep.mubr.msk.f32.mxu0 %vm3906_vm0, %v3769_v11  ;;  %v2834_v8 = vpop.permute.xlu1 %2833 }
 0x4cc   :  { %v3770_v9 = vmax.f32 %v3514_v14, 0.0  ;;  %v7131_v33 = vsel %vm3906_vm0, %v6210_v58, -inf  ;;  %v3625_v57 = vadd.f32 %v14262_v22, %v3362_v30  ;;  %v14557_v13 = vmax.f32 %v6615_v37, %v6616_v21  ;;  %v14562_v24 = vpop.f32.mrb[94].mxu0 }
 0x4cd   :  { %v6630_v56 = vrot.slane %v6629_v53, 4  ;;  %v14559_v16 = vmax.f32 %v7131_v33, %v7132_v59  ;;  %v3363_v63 = vadd.f32 %v3107_v5, %v16115_v32  ;;  %v6101_v14 = vmax.f32 %v5147_v10, 0.0  ;;  %v14568_v11 = vpop.f32.mrb[95].mxu0  ;;  %v2838_v33 = vpop.permute.xlu0 %2837 }
 0x4ce   :  { %v3881_v2 = vmax.f32 %v3625_v57, 0.0  ;;  %v5142_v58 = vadd.f32 %v14207_v25, %v14250_v34  ;;  %v3108_v30 = vmul.f32 %v10916_v12, %v2826_v42  ;;  %8791 = vmatmul.mubr.msk.f32.gmra.mrb[134].mxu0 %vm3906_vm0, %v3770_v9  ;;  %v14570_v37 = vmax.f32 %v7119_v50, %v7120_v15  ;;  %v16117_v34 = vld [vmem:[#allocation105_spill] sm:$0xff] }
 0x4cf   :  { %v14572_v21 = vmax.f32 %v6624_v3, %v6625_v31  ;;  %v14574_v59 = vmax.f32 %v7126_v49, %v7127_v44  ;;  %v3626_v5 = vadd.f32 %v14262_v22, %v3363_v63  ;;  %v6637_v57 = vsel %vm3906_vm0, %v6101_v14, -inf  ;;  %v16118_v44 = vld [vmem:[#allocation93_spill] sm:$0xff] }
 0x4d0   :  { %16116 = vst [vmem:[#allocation152_spill] sm:$0xff] %v14570_v37  ;;  %v6100_v10 = vmax.f32 %v5142_v58, 0.0  ;;  %v3364_v32 = vadd.f32 %v3108_v30, %v16117_v34  ;;  %v3109_v42 = vmul.f32 %v10916_v12, %v2830_v52  ;;  %8958 = vmatprep.mubr.msk.f32.mxu1 %vm3906_vm0, %v3881_v2  ;;  %v14581_v9 = vmax.f32 %v6629_v53, %v6630_v56  ;;  %v16119_v30 = vld [vmem:[#allocation94_spill] sm:$0xff]  ;;  %v2842_v34 = vpop.permute.xlu1 %2841 }
 0x4d1   :  { %v3882_v50 = vmax.f32 %v3626_v5, 0.0  ;;  %v5707_v3 = vadd.f32 %v14207_v25, %v14268_v51  ;;  %v5702_v49 = vadd.f32 %v14207_v25, %v14275_v18  ;;  %v3110_v14 = vmul.f32 %v10916_v12, %v2834_v8  ;;  %v16128_v37 = vld [vmem:[#allocation114_spill] sm:$0xff] }
 0x4d2   :  { %v6636_v15 = vsel %vm3906_vm0, %v6100_v10, -inf  ;;  %v3627_v31 = vadd.f32 %v14262_v22, %v3364_v32  ;;  %v3365_v63 = vadd.f32 %v3109_v42, %v16118_v44  ;;  %v14593_v58 = vpop.f32.mrb[70].mxu1  ;;  %v3111_v10 = vmul.f32 %v10916_v12, %v2838_v33  ;;  %v16120_v44 = vld [vmem:[#allocation108_spill] sm:$0xff] }
 0x4d3   :  { %v6638_v2 = vmax.f32 %v6636_v15, %v6637_v57  ;;  %v6213_v53 = vmax.f32 %v5707_v3, 0.0  ;;  %v6212_v56 = vmax.f32 %v5702_v49, 0.0  ;;  %8959 = vmatmul.mubr.msk.f32.gmra.mrb[110].mxu1 %vm3906_vm0, %v3882_v50  ;;  %v3366_v5 = vadd.f32 %v3110_v14, %v16119_v30  ;;  %v14598_v32 = vpop.f32.mrb[71].mxu1  ;;  %v2846_v50 = vpop.permute.xlu0 %2845 }
 0x4d4   :  { %v3883_v51 = vmax.f32 %v3627_v31, 0.0  ;;  %v3628_v18 = vadd.f32 %v14262_v22, %v3365_v63  ;;  %v3367_v63 = vadd.f32 %v3111_v10, %v16120_v44  ;;  %v5157_v14 = vadd.f32 %v14207_v25, %v14296_v48  ;;  %v16122_v44 = vld [vmem:[#allocation107_spill] sm:$0xff] }
 0x4d5   :  { %v6639_v42 = vrot.slane %v6638_v2, 4  ;;  %v7141_v57 = vsel %vm3906_vm0, %v6213_v53, -inf  ;;  %v7140_v3 = vsel %vm3906_vm0, %v6212_v56, -inf  ;;  %v3629_v31 = vadd.f32 %v14262_v22, %v3366_v5 }
 0x4d6   :  { %v3884_v49 = vmax.f32 %v3628_v18, 0.0  ;;  %v7142_v15 = vmax.f32 %v7140_v3, %v7141_v57  ;;  %8961 = vmatprep.mubr.msk.f32.mxu1 %vm3906_vm0, %v3883_v51  ;;  %v5152_v30 = vadd.f32 %v14207_v25, %v14302_v17  ;;  %v3112_v53 = vmul.f32 %v10916_v12, %v2842_v34  ;;  %v2850_v34 = vpop.permute.xlu1 %2849 }
 0x4d7   :  { %v6640_v33 = vmax.f32 %v6638_v2, %v6639_v42  ;;  %v3885_v56 = vmax.f32 %v3629_v31, 0.0  ;;  %v3630_v18 = vadd.f32 %v14262_v22, %v3367_v63  ;;  %v3113_v57 = vmul.f32 %v10916_v12, %v2846_v50  ;;  %v16121_v2 = vld [vmem:[#allocation109_spill] sm:$0xff] }
 0x4d8   :  { %v7143_v8 = vrot.slane %v7142_v15, 4  ;;  %8962 = vmatmul.mubr.msk.f32.gmra.mrb[112].mxu1 %vm3906_vm0, %v3884_v49  ;;  %v6103_v10 = vmax.f32 %v5157_v14, 0.0  ;;  %v6102_v51 = vmax.f32 %v5152_v30, 0.0  ;;  %v3368_v42 = vadd.f32 %v3112_v53, %v16121_v2 }
 0x4d9   :  { %v6641_v5 = vrot.slane %v6640_v33, 2  ;;  %v3886_v48 = vmax.f32 %v3630_v18, 0.0  ;;  %v3369_v52 = vadd.f32 %v3113_v57, %v16122_v44  ;;  %v5717_v17 = vadd.f32 %v14207_v25, %v14324_v46  ;;  %8964 = vmatprep.mubr.msk.f32.mxu1 %vm3906_vm0, %v3885_v56  ;;  %v14619_v31 = vpop.f32.mrb[96].mxu0  ;;  %v2854_v46 = vpop.permute.xlu0 %2853 }
 0x4da   :  { %v7144_v3 = vmax.f32 %v7142_v15, %v7143_v8  ;;  %v6646_v49 = vsel %vm3906_vm0, %v6103_v10, -inf  ;;  %v6645_v63 = vsel %vm3906_vm0, %v6102_v51, -inf  ;;  %v3631_v14 = vadd.f32 %v14262_v22, %v3368_v42  ;;  %v14624_v30 = vpop.f32.mrb[97].mxu0 }
 0x4db   :  { %v6642_v50 = vmax.f32 %v6640_v33, %v6641_v5  ;;  %v6647_v15 = vmax.f32 %v6645_v63, %v6646_v49  ;;  %v3632_v53 = vadd.f32 %v14262_v22, %v3369_v52  ;;  %v6215_v18 = vmax.f32 %v5717_v17, 0.0  ;;  %v7430_v52 = vld [vmem:[%s15427_s5 + $0x10] sm:$0xff] }
 0x4dc   :  { %v7145_v8 = vrot.slane %v7144_v3, 2  ;;  %8965 = vmatmul.mubr.msk.f32.gmra.mrb[114].mxu1 %vm3906_vm0, %v3886_v48  ;;  %v3887_v57 = vmax.f32 %v3631_v14, 0.0  ;;  %v5712_v33 = vadd.f32 %v14207_v25, %v14328_v19  ;;  %v3114_v5 = vmul.f32 %v10916_v12, %v2850_v34  ;;  %v7431_v48 = vld [vmem:[%s15427_s5 + $0x18] sm:$0xff] }
 0x4dd   :  { %v6643_v56 = vrot.slane %v6642_v50, 1  ;;  %v6648_v2 = vrot.slane %v6647_v15, 4  ;;  %v3888_v42 = vmax.f32 %v3632_v53, 0.0  ;;  %v14640_v44 = vpop.f32.mrb[72].mxu1  ;;  %v7150_v19 = vsel %vm3906_vm0, %v6215_v18, -inf  ;;  %v16123_v34 = vld [vmem:[#allocation112_spill] sm:$0xff] }
 0x4de   :  { %v14632_v51 = vmax.f32 %v7144_v3, %v7145_v8  ;;  %v6214_v17 = vmax.f32 %v5712_v33, 0.0  ;;  %v3370_v49 = vadd.f32 %v3114_v5, %v16123_v34  ;;  %v3115_v3 = vmul.f32 %v10916_v12, %v2854_v46  ;;  %8967 = vmatprep.mubr.msk.f32.mxu1 %vm3906_vm0, %v3887_v57  ;;  %v14646_v63 = vpop.f32.mrb[73].mxu1  ;;  %v16124_v5 = vld [vmem:[#allocation111_spill] sm:$0xff] }
 0x4df   :  { %v6644_v14 = vmax.f32 %v6642_v50, %v6643_v56  ;;  %v6649_v8 = vmax.f32 %v6647_v15, %v6648_v2  ;;  %v5167_v53 = vadd.f32 %v14207_v25, %v14345_v7  ;;  %v5162_v10 = vadd.f32 %v14207_v25, %v14352_v29  ;;  %v7432_v7 = vld [vmem:[%s15427_s5 + $0x20] sm:$0xff]  ;;  %v7433_v25 = vld [vmem:[%s15427_s5 + $0x28] sm:$0xff] }
 0x4e0   :  { %8968 = vmatmul.mubr.msk.f32.gmra.mrb[116].mxu1 %vm3906_vm0, %v3888_v42  ;;  %v7149_v18 = vsel %vm3906_vm0, %v6214_v17, -inf  ;;  %v3633_v33 = vadd.f32 %v14262_v22, %v3370_v49  ;;  %v3371_v12 = vadd.f32 %v3115_v3, %v16124_v5  ;;  %v9033_v46 = vpack.c.bf16 %v7431_v48, %v7430_v52  ;;  %v14667_v42 = vld [vmem:[%s15426_s4] ss:$0 sm:$0xff]  ;;  %v7435_v3 = vld [vmem:[%s15427_s5 + $0x38] sm:$0xff] }
 0x4e1   :  { %v6650_v34 = vrot.slane %v6649_v8, 2  ;;  %v7151_v50 = vmax.f32 %v7149_v18, %v7150_v19  ;;  %v6105_v15 = vmax.f32 %v5167_v53, 0.0  ;;  %v6104_v2 = vmax.f32 %v5162_v10, 0.0  ;;  %v7434_v10 = vld [vmem:[%s15427_s5 + $0x30] sm:$0xff] }
 0x4e2   :  { %v3889_v29 = vmax.f32 %v3633_v33, 0.0  ;;  %v3634_v56 = vadd.f32 %v14262_v22, %v3371_v12  ;;  %9034 = vmatprep.subr.bf16.mxu1 %v9033_v46  ;;  %v5727_v52 = vadd.f32 %v14667_v42, %v14372_v55  ;;  %v14671_v48 = vpop.f32.mrb[98].mxu0  ;;  %v5722_v22 = vadd.f32 %v14667_v42, %v14377_v39 }
 0x4e3   :  { %v6651_v19 = vmax.f32 %v6649_v8, %v6650_v34  ;;  %v7152_v17 = vrot.slane %v7151_v50, 4  ;;  %v6655_v49 = vsel %vm3906_vm0, %v6105_v15, -inf  ;;  %9036 = vmatpush3.bf16.msra.mxu1 %v9033_v46  ;;  %v14682_v53 = vpop.f32.mrb[99].mxu0  ;;  %v6654_v8 = vsel %vm3906_vm0, %v6104_v2, -inf }
 0x4e4   :  { %v3890_v55 = vmax.f32 %v3634_v56, 0.0  ;;  %v6217_v18 = vmax.f32 %v5727_v52, 0.0  ;;  %v9037_v33 = vpack.c.bf16 %v7433_v25, %v7432_v7  ;;  %8970 = vmatprep.mubr.msk.f32.mxu1 %vm3906_vm0, %v3889_v29  ;;  %v6656_v39 = vmax.f32 %v6654_v8, %v6655_v49 }
 0x4e5   :  { %v6652_v5 = vrot.slane %v6651_v19, 1  ;;  %v7153_v12 = vmax.f32 %v7151_v50, %v7152_v17  ;;  %v6216_v46 = vmax.f32 %v5722_v22, 0.0  ;;  %v5177_v15 = vadd.f32 %v14667_v42, %v14392_v20  ;;  %v16125_v22 = vld [vmem:[#allocation118_spill] sm:$0xff] }
 0x4e6   :  { %v7159_v34 = vsel %vm3906_vm0, %v6217_v18, -inf  ;;  %9038 = vmatprep.subr.bf16.mxu1 %v9037_v33  ;;  %v5172_v57 = vadd.f32 %v14667_v42, %v14398_v36  ;;  %8971 = vmatmul.mubr.msk.f32.gmra.mrb[118].mxu1 %vm3906_vm0, %v3890_v55  ;;  %v9041_v56 = vpack.c.bf16 %v7435_v3, %v7434_v10  ;;  %v6657_v25 = vrot.slane %v6656_v39, 4  ;;  %v16127_v3 = vld [vmem:[#allocation113_spill] sm:$0xff] }
 0x4e7   :  { %v6653_v2 = vmax.f32 %v6651_v19, %v6652_v5  ;;  %v7154_v7 = vrot.slane %v7153_v12, 2  ;;  %v7158_v29 = vsel %vm3906_vm0, %v6216_v46, -inf  ;;  %9040 = vmatpush3.bf16.msra.mxu1 %v9037_v33  ;;  %v6107_v17 = vmax.f32 %v5177_v15, 0.0  ;;  %v16126_v19 = vld [vmem:[#allocation83_spill] sm:$0xff] }
 0x4e8   :  { %v14693_v50 = vpop.f32.mrb[74].mxu1  ;;  %v7160_v52 = vmax.f32 %v7158_v29, %v7159_v34  ;;  %v6106_v49 = vmax.f32 %v5172_v57, 0.0  ;;  %9042 = vmatprep.subr.bf16.mxu1 %v9041_v56  ;;  %v6346_v20 = vrot.slane %v16125_v22, 1  ;;  %v6658_v10 = vmax.f32 %v6656_v39, %v6657_v25 }
 0x4e9   :  { %v14696_v8 = vpop.f32.mrb[75].mxu1  ;;  %v7613_v36 = vsel %vm7571_vm1, %v6653_v2, %v6644_v14  ;;  %v7155_v55 = vmax.f32 %v7153_v12, %v7154_v7  ;;  %v7576_v18 = vsel %vm7575_vm3, %v16127_v3, %v16126_v19  ;;  %v6664_v33 = vsel %vm3906_vm0, %v6107_v17, -inf  ;;  %v16130_v17 = vld [vmem:[#allocation115_spill] sm:$0xff] }
 0x4ea   :  { %v7161_v5 = vrot.slane %v7160_v52, 4  ;;  %v6663_v46 = vsel %vm3906_vm0, %v6106_v49, -inf  ;;  %v6347_v57 = vmax.f32 %v16125_v22, %v6346_v20  ;;  %v6659_v15 = vrot.slane %v6658_v10, 2 }
 0x4eb   :  { %v7156_v34 = vrot.slane %v7155_v55, 1  ;;  %v6665_v29 = vmax.f32 %v6663_v46, %v6664_v33  ;;  %9044 = vmatpush3.bf16.msra.mxu1 %v9041_v56  ;;  %v7578_v14 = vsel %vm7577_vm4, %v16128_v37, %v7576_v18  ;;  %v16129_v39 = vrot.slane %v14632_v51, 1  ;;  %v16131_v56 = vld [vmem:[#allocation117_spill] sm:$0xff] }
 0x4ec   :  { %v7162_v12 = vmax.f32 %v7160_v52, %v7161_v5  ;;  %v6660_v25 = vmax.f32 %v6658_v10, %v6659_v15  ;;  %v7580_v49 = vsel %vm7579_vm5, %v16130_v17, %v7578_v14  ;;  %v5737_v37 = vadd.f32 %v14667_v42, %v14410_v23  ;;  %v16134_v15 = vld [vmem:[#allocation119_spill] sm:$0xff]  ;;  %v16136_v17 = vld [vmem:[#allocation120_spill] sm:$0xff] }
 0x4ed   :  { %v7148_v2 = vmax.f32 %v14632_v51, %v16129_v39  ;;  %v7157_v7 = vmax.f32 %v7155_v55, %v7156_v34  ;;  %v7582_v19 = vsel %vm7581_vm6, %v16131_v56, %v7580_v49  ;;  %v5732_v52 = vadd.f32 %v14667_v42, %v14415_v43  ;;  %v16133_v34 = vld [vmem:[#allocation110_spill] sm:$0xff] }
 0x4ee   :  { %v14712_v22 = vpop.f32.mrb[100].mxu0  ;;  %v7163_v20 = vrot.slane %v7162_v12, 2  ;;  %v16132_v51 = vrot.slane %v14574_v59, 1  ;;  %v6661_v18 = vrot.slane %v6660_v25, 1  ;;  %v7584_v5 = vsel %vm7583_vm7, %v6347_v57, %v7582_v19 }
 0x4ef   :  { %v14720_v3 = vpop.f32.mrb[101].mxu0  ;;  %v7662_v10 = vsel %vm7571_vm1, %v7157_v7, %v7148_v2  ;;  %8989 = vmatprep.mubr.msk.f32.mxu1 %vm3906_vm0, %v7584_v5  ;;  %v6219_v46 = vmax.f32 %v5737_v37, 0.0  ;;  %v6218_v23 = vmax.f32 %v5732_v52, 0.0  ;;  %v7589_v43 = vsel %vm7579_vm5, %v16134_v15, %v16133_v34  ;;  %v16138_v5 = vld [vmem:[#allocation116_spill] sm:$0xff] }
 0x4f0   :  { %v14725_v55 = vmax.f32 %v14574_v59, %v16132_v51  ;;  %v7164_v33 = vmax.f32 %v7162_v12, %v7163_v20  ;;  %v16135_v14 = vrot.slane %v14559_v16, 4  ;;  %v6662_v59 = vmax.f32 %v6660_v25, %v6661_v18  ;;  %v16137_v20 = vld [vmem:[#allocation123_spill] sm:$0xff] }
 0x4f1   :  { %v7590_v2 = vsel %vm7581_vm6, %v16136_v17, %v7589_v43  ;;  %v6490_v7 = vrot.slane %v13843_v54, 1  ;;  %v7168_v12 = vsel %vm3906_vm0, %v6219_v46, -inf  ;;  %v7167_v49 = vsel %vm3906_vm0, %v6218_v23, -inf  ;;  %v16139_v46 = vld [vmem:[#allocation124_spill] sm:$0xff]  ;;  %v16142_v17 = vld [vmem:[#allocation139_spill] sm:$0xff] }
 0x4f2   :  { %v7135_v39 = vmax.f32 %v14559_v16, %v16135_v14  ;;  %v7165_v57 = vrot.slane %v7164_v33, 1  ;;  %v7591_v56 = vsel %vm7583_vm7, %v16137_v20, %v7590_v2  ;;  %v14743_v19 = vpop.f32.mrb[76].mxu1  ;;  %v14746_v37 = vsel %vm7573_vm2, %v6662_v59, %v7613_v36  ;;  %v16141_v59 = vld [vmem:[#allocation125_spill] sm:$0xff] }
 0x4f3   :  { %v6666_v16 = vrot.slane %v6665_v29, 4  ;;  %v7169_v25 = vmax.f32 %v7167_v49, %v7168_v12  ;;  %8990 = vmatmul.mubr.msk.f32.vlgmr.msra.gmra.mrb[120].mxu1 %vm3906_vm0, %v7591_v56  ;;  %v6491_v52 = vmax.f32 %v13843_v54, %v6490_v7  ;;  %v14750_v51 = vpop.f32.mrb[77].mxu1  ;;  %v7594_v23 = vsel %vm7575_vm3, %v16139_v46, %v16138_v5  ;;  %v16143_v7 = vld [vmem:[#allocation126_spill] sm:$0xff]  ;;  %v16144_v56 = vld [vmem:[#allocation127_spill] sm:$0xff] }
 0x4f4   :  { %v7166_v18 = vmax.f32 %v7164_v33, %v7165_v57  ;;  %v5187_v34 = vadd.f32 %v14667_v42, %v14431_v1  ;;  %v5182_v36 = vadd.f32 %v14667_v42, %v14441_v41  ;;  %v16140_v15 = vrot.slane %v14581_v9, 2 }
 0x4f5   :  { %v7170_v14 = vrot.slane %v7169_v25, 4  ;;  %v7595_v54 = vsel %vm7577_vm4, %v16141_v59, %v7594_v23  ;;  %v6562_v33 = vrot.slane %v16142_v17, 1  ;;  %v7136_v41 = vrot.slane %v7135_v39, 2 }
 0x4f6   :  { %v6633_v43 = vmax.f32 %v14581_v9, %v16140_v15  ;;  %v14766_v2 = vsel %vm7573_vm2, %v7166_v18, %v7662_v10  ;;  %v7596_v57 = vsel %vm7579_vm5, %v16143_v7, %v7595_v54  ;;  %v6109_v1 = vmax.f32 %v5187_v34, 0.0  ;;  %v14770_v49 = vpop.f32.mrb[102].mxu0  ;;  %v16145_v15 = vld [vmem:[#allocation121_spill] sm:$0xff] }
 0x4f7   :  { %v6108_v12 = vmax.f32 %v5182_v36, 0.0  ;;  %v6667_v20 = vmax.f32 %v6665_v29, %v6666_v16  ;;  %v7597_v9 = vsel %vm7581_vm6, %v16144_v56, %v7596_v57  ;;  %v6563_v5 = vmax.f32 %v16142_v17, %v6562_v33  ;;  %v14775_v46 = vpop.f32.mrb[103].mxu0  ;;  %v16146_v34 = vld [vmem:[#allocation133_spill] sm:$0xff]  ;;  %v16147_v16 = vld [vmem:[#allocation135_spill] sm:$0xff]  ;;  %v16148_v33 = vld [vmem:[#allocation136_spill] sm:$0xff] }
 0x4f8   :  { %v7598_v23 = vsel %vm7583_vm7, %v6491_v52, %v7597_v9  ;;  %v6673_v10 = vsel %vm3906_vm0, %v6109_v1, -inf  ;;  %v7601_v36 = vsel %vm7575_vm3, %v16146_v34, %v16145_v15  ;;  %v7171_v59 = vmax.f32 %v7169_v25, %v7170_v14  ;;  %v16149_v52 = vld [vmem:[#allocation128_spill] sm:$0xff]  ;;  %v16151_v9 = vld [vmem:[#allocation137_spill] sm:$0xff] }
 0x4f9   :  { %v6672_v18 = vsel %vm3906_vm0, %v6108_v12, -inf  ;;  %8992 = vmatprep.mubr.msk.f32.mxu1 %vm3906_vm0, %v7598_v23  ;;  %v7602_v54 = vsel %vm7577_vm4, %v16147_v16, %v7601_v36  ;;  %v6634_v17 = vrot.slane %v6633_v43, 1  ;;  %v16150_v57 = vld [vmem:[#allocation140_spill] sm:$0xff]  ;;  %v5747_v12 = vadd.f32 %v14667_v42, %v14466_v35 }
 0x4fa   :  { %v6674_v29 = vmax.f32 %v6672_v18, %v6673_v10  ;;  %v7603_v7 = vsel %vm7579_vm5, %v16148_v33, %v7602_v54  ;;  %v7608_v1 = vsel %vm7575_vm3, %v16150_v57, %v16149_v52  ;;  %v5742_v25 = vadd.f32 %v14667_v42, %v14469_v26 }
 0x4fb   :  { %v6668_v14 = vrot.slane %v6667_v20, 2  ;;  %v7604_v23 = vsel %vm7581_vm6, %v16151_v9, %v7603_v7  ;;  %v6635_v10 = vmax.f32 %v6633_v43, %v6634_v17  ;;  %v7609_v15 = vsel %vm7577_vm4, %v14474_v62, %v7608_v1 }
 0x4fc   :  { %v6675_v56 = vrot.slane %v6674_v29, 4  ;;  %v7605_v18 = vsel %vm7583_vm7, %v6563_v5, %v7604_v23  ;;  %v6221_v34 = vmax.f32 %v5747_v12, 0.0  ;;  %v6220_v36 = vmax.f32 %v5742_v25, 0.0 }
 0x4fd   :  { %v14800_v16 = vmax.f32 %v7135_v39, %v7136_v41  ;;  %v7172_v54 = vrot.slane %v7171_v59, 2  ;;  %8993 = vmatmul.mubr.msk.f32.gmra.mrb[122].mxu1 %vm3906_vm0, %v7605_v18  ;;  %v7610_v35 = vsel %vm7579_vm5, %v14557_v13, %v7609_v15  ;;  %v5197_v26 = vadd.f32 %v14667_v42, %v14487_v61  ;;  %v14807_v33 = vpop.f32.mrb[78].mxu1 }
 0x4fe   :  { %v7611_v43 = vsel %vm7581_vm6, %v14572_v21, %v7610_v35  ;;  %v7177_v62 = vsel %vm3906_vm0, %v6221_v34, -inf  ;;  %v7176_v5 = vsel %vm3906_vm0, %v6220_v36, -inf  ;;  %v5192_v39 = vadd.f32 %v14667_v42, %v14491_v27  ;;  %v14815_v41 = vpop.f32.mrb[79].mxu1 }
 0x4ff   :  { %v6669_v17 = vmax.f32 %v6667_v20, %v6668_v14  ;;  %v6676_v7 = vmax.f32 %v6674_v29, %v6675_v56  ;;  %v7612_v13 = vsel %vm7583_vm7, %v6635_v10, %v7611_v43  ;;  %v7178_v52 = vmax.f32 %v7176_v5, %v7177_v62  ;;  %v14818_v61 = vpop.f32.mrb[104].mxu0 }
 0x500   :  { %8995 = vmatprep.mubr.msk.f32.mxu1 %vm3906_vm0, %v7612_v13  ;;  %v6111_v57 = vmax.f32 %v5197_v26, 0.0  ;;  %v6110_v21 = vmax.f32 %v5192_v39, 0.0  ;;  %v5757_v1 = vadd.f32 %v14667_v42, %v14508_v38  ;;  %v5752_v12 = vadd.f32 %v14667_v42, %v14512_v45  ;;  %v14825_v27 = vpop.f32.mrb[105].mxu0 }
 0x501   :  { %v7173_v25 = vmax.f32 %v7171_v59, %v7172_v54  ;;  %v7179_v20 = vrot.slane %v7178_v52, 4  ;;  %v5207_v29 = vadd.f32 %v14667_v42, %v14525_v0  ;;  %v5202_v14 = vadd.f32 %v14667_v42, %v14527_v28 }
 0x502   :  { %v6682_v56 = vsel %vm3906_vm0, %v6111_v57, -inf  ;;  %v6681_v9 = vsel %vm3906_vm0, %v6110_v21, -inf  ;;  %v6223_v23 = vmax.f32 %v5757_v1, 0.0  ;;  %v6222_v10 = vmax.f32 %v5752_v12, 0.0 }
 0x503   :  { %v6677_v38 = vrot.slane %v6676_v7, 2  ;;  %v7180_v18 = vmax.f32 %v7178_v52, %v7179_v20  ;;  %v6683_v15 = vmax.f32 %v6681_v9, %v6682_v56  ;;  %v6113_v45 = vmax.f32 %v5207_v29, 0.0 }
 0x504   :  { %v7186_v34 = vsel %vm3906_vm0, %v6223_v23, -inf  ;;  %v7185_v59 = vsel %vm3906_vm0, %v6222_v10, -inf  ;;  %v6112_v36 = vmax.f32 %v5202_v14, 0.0  ;;  %v5767_v0 = vadd.f32 %v14667_v42, %v14544_v60 }
 0x505   :  { %v6670_v54 = vrot.slane %v6669_v17, 1  ;;  %v7181_v28 = vrot.slane %v7180_v18, 2  ;;  %v6684_v35 = vrot.slane %v6683_v15, 4  ;;  %v7187_v26 = vmax.f32 %v7185_v59, %v7186_v34 }
 0x506   :  { %v6691_v43 = vsel %vm3906_vm0, %v6113_v45, -inf  ;;  %v6690_v62 = vsel %vm3906_vm0, %v6112_v36, -inf  ;;  %v6225_v5 = vmax.f32 %v5767_v0, 0.0  ;;  %v5762_v39 = vadd.f32 %v14667_v42, %v14548_v47  ;;  %v14841_v13 = vpop.f32.mrb[80].mxu1 }
 0x507   :  { %v6678_v52 = vmax.f32 %v6676_v7, %v6677_v38  ;;  %v6685_v57 = vmax.f32 %v6683_v15, %v6684_v35  ;;  %v7188_v21 = vrot.slane %v7187_v26, 4  ;;  %v6692_v1 = vmax.f32 %v6690_v62, %v6691_v43  ;;  %v14843_v12 = vpop.f32.mrb[81].mxu1 }
 0x508   :  { %v7174_v60 = vrot.slane %v7173_v25, 1  ;;  %v6224_v20 = vmax.f32 %v5762_v39, 0.0  ;;  %v5217_v29 = vadd.f32 %v14667_v42, %v14562_v24  ;;  %v5212_v14 = vadd.f32 %v14667_v42, %v14568_v11 }
 0x509   :  { %v7182_v56 = vmax.f32 %v7180_v18, %v7181_v28  ;;  %v6686_v9 = vrot.slane %v6685_v57, 2  ;;  %v6693_v23 = vrot.slane %v6692_v1, 4  ;;  %v7195_v47 = vsel %vm3906_vm0, %v6225_v5, -inf }
 0x50a   :  { %v7194_v7 = vsel %vm3906_vm0, %v6224_v20, -inf  ;;  %v6115_v10 = vmax.f32 %v5217_v29, 0.0  ;;  %v6114_v38 = vmax.f32 %v5212_v14, 0.0  ;;  %v5777_v15 = vadd.f32 %v14667_v42, %v14593_v58 }
 0x50b   :  { %v14853_v45 = vpop.f32.mrb[106].mxu0  ;;  %v14855_v34 = vmax.f32 %v6669_v17, %v6670_v54  ;;  %v6679_v24 = vrot.slane %v6678_v52, 1  ;;  %v7189_v59 = vmax.f32 %v7187_v26, %v7188_v21  ;;  %v6694_v36 = vmax.f32 %v6692_v1, %v6693_v23 }
 0x50c   :  { %v14857_v11 = vpop.f32.mrb[107].mxu0  ;;  %v7196_v18 = vmax.f32 %v7194_v7, %v7195_v47  ;;  %v6700_v0 = vsel %vm3906_vm0, %v6115_v10, -inf  ;;  %v6699_v28 = vsel %vm3906_vm0, %v6114_v38, -inf  ;;  %v6227_v35 = vmax.f32 %v5777_v15, 0.0 }
 0x50d   :  { %v14861_v43 = vmax.f32 %v7173_v25, %v7174_v60  ;;  %v6687_v62 = vmax.f32 %v6685_v57, %v6686_v9  ;;  %v6695_v5 = vrot.slane %v6694_v36, 2  ;;  %v6701_v58 = vmax.f32 %v6699_v28, %v6700_v0 }
 0x50e   :  { %v7183_v39 = vrot.slane %v7182_v56, 1  ;;  %v7197_v20 = vrot.slane %v7196_v18, 4  ;;  %v5772_v17 = vadd.f32 %v14667_v42, %v14598_v32  ;;  %v5227_v54 = vadd.f32 %v14667_v42, %v14619_v31 }
 0x50f   :  { %v14867_v26 = vpop.f32.mrb[82].mxu1  ;;  %v6680_v21 = vmax.f32 %v6678_v52, %v6679_v24  ;;  %v7190_v1 = vrot.slane %v7189_v59, 2  ;;  %v6702_v29 = vrot.slane %v6701_v58, 4  ;;  %v7204_v14 = vsel %vm3906_vm0, %v6227_v35, -inf }
 0x510   :  { %v14870_v25 = vpop.f32.mrb[83].mxu1  ;;  %v6696_v57 = vmax.f32 %v6694_v36, %v6695_v5  ;;  %v6226_v60 = vmax.f32 %v5772_v17, 0.0  ;;  %v6117_v9 = vmax.f32 %v5227_v54, 0.0  ;;  %v5222_v23 = vadd.f32 %v14667_v42, %v14624_v30 }
 0x511   :  { %v6688_v47 = vrot.slane %v6687_v62, 1  ;;  %v7198_v32 = vmax.f32 %v7196_v18, %v7197_v20  ;;  %v6703_v7 = vmax.f32 %v6701_v58, %v6702_v29  ;;  %v5787_v31 = vadd.f32 %v14667_v42, %v14640_v44 }
 0x512   :  { %v14876_v10 = vmax.f32 %v7182_v56, %v7183_v39  ;;  %v7203_v52 = vsel %vm3906_vm0, %v6226_v60, -inf  ;;  %v6709_v38 = vsel %vm3906_vm0, %v6117_v9, -inf  ;;  %v6116_v15 = vmax.f32 %v5222_v23, 0.0 }
 0x513   :  { %v14880_v24 = vmax.f32 %v7189_v59, %v7190_v1  ;;  %v6704_v36 = vrot.slane %v6703_v7, 2  ;;  %v7205_v0 = vmax.f32 %v7203_v52, %v7204_v14  ;;  %v6229_v28 = vmax.f32 %v5787_v31, 0.0 }
 0x514   :  { %v6697_v35 = vrot.slane %v6696_v57, 1  ;;  %v6708_v30 = vsel %vm3906_vm0, %v6116_v15, -inf  ;;  %v5782_v18 = vadd.f32 %v14667_v42, %v14646_v63  ;;  %v5237_v44 = vadd.f32 %v14667_v42, %v14671_v48 }
 0x515   :  { %v6689_v56 = vmax.f32 %v6687_v62, %v6688_v47  ;;  %v7199_v5 = vrot.slane %v7198_v32, 2  ;;  %v6705_v58 = vmax.f32 %v6703_v7, %v6704_v36  ;;  %v6710_v39 = vmax.f32 %v6708_v30, %v6709_v38 }
 0x516   :  { %v14887_v20 = vpop.f32.mrb[108].mxu0  ;;  %v7213_v59 = vsel %vm3906_vm0, %v6229_v28, -inf  ;;  %v6228_v17 = vmax.f32 %v5782_v18, 0.0  ;;  %v6119_v54 = vmax.f32 %v5237_v44, 0.0  ;;  %v5232_v1 = vadd.f32 %v14667_v42, %v14682_v53 }
 0x517   :  { %v14892_v29 = vpop.f32.mrb[109].mxu0  ;;  %v7206_v14 = vrot.slane %v7205_v0, 4  ;;  %v6711_v63 = vrot.slane %v6710_v39, 4  ;;  %v5797_v48 = vadd.f32 %v14667_v42, %v14693_v50  ;;  %v5792_v62 = vadd.f32 %v14667_v42, %v14696_v8 }
 0x518   :  { %v6698_v60 = vmax.f32 %v6696_v57, %v6697_v35  ;;  %v7212_v9 = vsel %vm3906_vm0, %v6228_v17, -inf  ;;  %v6718_v23 = vsel %vm3906_vm0, %v6119_v54, -inf  ;;  %v6118_v47 = vmax.f32 %v5232_v1, 0.0 }
 0x519   :  { %v14900_v7 = vmax.f32 %v7198_v32, %v7199_v5  ;;  %v6712_v31 = vmax.f32 %v6710_v39, %v6711_v63  ;;  %v7214_v53 = vmax.f32 %v7212_v9, %v7213_v59  ;;  %v6231_v52 = vmax.f32 %v5797_v48, 0.0 }
 0x51a   :  { %v6717_v38 = vsel %vm3906_vm0, %v6118_v47, -inf  ;;  %v6230_v15 = vmax.f32 %v5792_v62, 0.0  ;;  %v6706_v36 = vrot.slane %v6705_v58, 1  ;;  %v7615_v50 = vsel %vm7575_vm3, %v14855_v34, %v14746_v37 }
 0x51b   :  { %v14906_v8 = vpop.f32.mrb[84].mxu1  ;;  %v14908_v57 = vmax.f32 %v7205_v0, %v7206_v14  ;;  %v6713_v28 = vrot.slane %v6712_v31, 2  ;;  %v7215_v35 = vrot.slane %v7214_v53, 4  ;;  %v6719_v30 = vmax.f32 %v6717_v38, %v6718_v23 }
 0x51c   :  { %v14910_v32 = vpop.f32.mrb[85].mxu1  ;;  %v7222_v18 = vsel %vm3906_vm0, %v6231_v52, -inf  ;;  %v7221_v44 = vsel %vm3906_vm0, %v6230_v15, -inf  ;;  %v6707_v5 = vmax.f32 %v6705_v58, %v6706_v36  ;;  %v7616_v39 = vsel %vm7577_vm4, %v6680_v21, %v7615_v50 }
 0x51d   :  { %v6714_v59 = vmax.f32 %v6712_v31, %v6713_v28  ;;  %v7216_v17 = vmax.f32 %v7214_v53, %v7215_v35  ;;  %v6720_v54 = vrot.slane %v6719_v30, 4  ;;  %v7223_v37 = vmax.f32 %v7221_v44, %v7222_v18 }
 0x51e   :  { %v7617_v34 = vsel %vm7579_vm5, %v6689_v56, %v7616_v39  ;;  %v5247_v0 = vadd.f32 %v14667_v42, %v14712_v22  ;;  %v5242_v1 = vadd.f32 %v14667_v42, %v14720_v3  ;;  %v5807_v14 = vadd.f32 %v14667_v42, %v14743_v19 }
 0x51f   :  { %v6715_v63 = vrot.slane %v6714_v59, 1  ;;  %v7217_v48 = vrot.slane %v7216_v17, 2  ;;  %v6721_v58 = vmax.f32 %v6719_v30, %v6720_v54  ;;  %v7224_v62 = vrot.slane %v7223_v37, 4  ;;  %v14922_v21 = vpop.f32.mrb[110].mxu0 }
 0x520   :  { %v7618_v9 = vsel %vm7581_vm6, %v6698_v60, %v7617_v34  ;;  %v6121_v23 = vmax.f32 %v5247_v0, 0.0  ;;  %v6120_v47 = vmax.f32 %v5242_v1, 0.0  ;;  %v6233_v56 = vmax.f32 %v5807_v14, 0.0  ;;  %v14925_v31 = vpop.f32.mrb[111].mxu0 }
 0x521   :  { %v6716_v22 = vmax.f32 %v6714_v59, %v6715_v63  ;;  %v7218_v53 = vmax.f32 %v7216_v17, %v7217_v48  ;;  %v6722_v52 = vrot.slane %v6721_v58, 2  ;;  %v7225_v3 = vmax.f32 %v7223_v37, %v7224_v62 }
 0x522   :  { %v7619_v38 = vsel %vm7583_vm7, %v6707_v5, %v7618_v9  ;;  %v6727_v19 = vsel %vm3906_vm0, %v6121_v23, -inf  ;;  %v6726_v15 = vsel %vm3906_vm0, %v6120_v47, -inf  ;;  %v7231_v36 = vsel %vm3906_vm0, %v6233_v56, -inf }
 0x523   :  { %v7219_v50 = vrot.slane %v7218_v53, 1  ;;  %v6723_v28 = vmax.f32 %v6721_v58, %v6722_v52  ;;  %v7226_v60 = vrot.slane %v7225_v3, 2  ;;  %8996 = vmatmul.mubr.msk.f32.gmra.mrb[124].mxu1 %vm3906_vm0, %v7619_v38  ;;  %v6728_v35 = vmax.f32 %v6726_v15, %v6727_v19 }
 0x524   :  { %v5802_v30 = vadd.f32 %v14667_v42, %v14750_v51  ;;  %v5257_v18 = vadd.f32 %v14667_v42, %v14770_v49  ;;  %v5252_v44 = vadd.f32 %v14667_v42, %v14775_v46  ;;  %v5817_v5 = vadd.f32 %v14667_v42, %v14807_v33 }
 0x525   :  { %v14940_v39 = vpop.f32.mrb[86].mxu1  ;;  %v7220_v59 = vmax.f32 %v7218_v53, %v7219_v50  ;;  %v6724_v17 = vrot.slane %v6723_v28, 1  ;;  %v7227_v54 = vmax.f32 %v7225_v3, %v7226_v60  ;;  %v6729_v37 = vrot.slane %v6728_v35, 4 }
 0x526   :  { %v14942_v34 = vpop.f32.mrb[87].mxu1  ;;  %v6232_v0 = vmax.f32 %v5802_v30, 0.0  ;;  %v6123_v1 = vmax.f32 %v5257_v18, 0.0  ;;  %v6122_v51 = vmax.f32 %v5252_v44, 0.0  ;;  %v6235_v14 = vmax.f32 %v5817_v5, 0.0 }
 0x527   :  { %v6725_v63 = vmax.f32 %v6723_v28, %v6724_v17  ;;  %v7228_v49 = vrot.slane %v7227_v54, 1  ;;  %v6730_v48 = vmax.f32 %v6728_v35, %v6729_v37  ;;  %v5812_v46 = vadd.f32 %v14667_v42, %v14815_v41 }
 0x528   :  { %v7230_v33 = vsel %vm3906_vm0, %v6232_v0, -inf  ;;  %v6736_v58 = vsel %vm3906_vm0, %v6123_v1, -inf  ;;  %v6735_v62 = vsel %vm3906_vm0, %v6122_v51, -inf  ;;  %v7240_v9 = vsel %vm3906_vm0, %v6235_v14, -inf }
 0x529   :  { %v14950_v23 = vpop.f32.mrb[112].mxu0  ;;  %v7620_v47 = vsel %vm7571_vm1, %v6725_v63, %v6716_v22  ;;  %v7229_v56 = vmax.f32 %v7227_v54, %v7228_v49  ;;  %v6731_v53 = vrot.slane %v6730_v48, 2  ;;  %v7232_v52 = vmax.f32 %v7230_v33, %v7231_v36 }
 0x52a   :  { %v14953_v3 = vpop.f32.mrb[113].mxu0  ;;  %v6737_v38 = vmax.f32 %v6735_v62, %v6736_v58  ;;  %v6234_v19 = vmax.f32 %v5812_v46, 0.0  ;;  %v5267_v41 = vadd.f32 %v14667_v42, %v14818_v61  ;;  %v5262_v15 = vadd.f32 %v14667_v42, %v14825_v27 }
 0x52b   :  { %v7669_v50 = vsel %vm7571_vm1, %v7229_v56, %v7220_v59  ;;  %v6732_v28 = vmax.f32 %v6730_v48, %v6731_v53  ;;  %v7233_v60 = vrot.slane %v7232_v52, 4  ;;  %v5827_v22 = vadd.f32 %v14667_v42, %v14841_v13 }
 0x52c   :  { %v6738_v35 = vrot.slane %v6737_v38, 4  ;;  %v7239_v36 = vsel %vm3906_vm0, %v6234_v19, -inf  ;;  %v6125_v30 = vmax.f32 %v5267_v41, 0.0  ;;  %v6124_v18 = vmax.f32 %v5262_v15, 0.0 }
 0x52d   :  { %v6733_v44 = vrot.slane %v6732_v28, 1  ;;  %v7234_v5 = vmax.f32 %v7232_v52, %v7233_v60  ;;  %v7241_v17 = vmax.f32 %v7239_v36, %v7240_v9  ;;  %v6237_v54 = vmax.f32 %v5827_v22, 0.0 }
 0x52e   :  { %v6739_v61 = vmax.f32 %v6737_v38, %v6738_v35  ;;  %v6745_v37 = vsel %vm3906_vm0, %v6125_v30, -inf  ;;  %v6744_v27 = vsel %vm3906_vm0, %v6124_v18, -inf  ;;  %v5822_v59 = vadd.f32 %v14667_v42, %v14843_v12 }
 0x52f   :  { %v6734_v0 = vmax.f32 %v6732_v28, %v6733_v44  ;;  %v7235_v1 = vrot.slane %v7234_v5, 2  ;;  %v7242_v13 = vrot.slane %v7241_v17, 4  ;;  %v6746_v51 = vmax.f32 %v6744_v27, %v6745_v37 }
 0x530   :  { %v14967_v14 = vpop.f32.mrb[88].mxu1  ;;  %v6740_v63 = vrot.slane %v6739_v61, 2  ;;  %v7249_v49 = vsel %vm3906_vm0, %v6237_v54, -inf  ;;  %v6236_v48 = vmax.f32 %v5822_v59, 0.0  ;;  %v5277_v46 = vadd.f32 %v14667_v42, %v14853_v45 }
 0x531   :  { %v14972_v33 = vpop.f32.mrb[89].mxu1  ;;  %v14975_v58 = vsel %vm7573_vm2, %v6734_v0, %v7620_v47  ;;  %v7236_v62 = vmax.f32 %v7234_v5, %v7235_v1  ;;  %v7243_v12 = vmax.f32 %v7241_v17, %v7242_v13  ;;  %v6747_v9 = vrot.slane %v6746_v51, 4 }
 0x532   :  { %v7192_v56 = vrot.slane %v14880_v24, 1  ;;  %v7248_v53 = vsel %vm3906_vm0, %v6236_v48, -inf  ;;  %v6127_v52 = vmax.f32 %v5277_v46, 0.0  ;;  %v5272_v38 = vadd.f32 %v14667_v42, %v14857_v11 }
 0x533   :  { %v7201_v19 = vrot.slane %v14900_v7, 1  ;;  %v7237_v41 = vrot.slane %v7236_v62, 1  ;;  %v6741_v45 = vmax.f32 %v6739_v61, %v6740_v63  ;;  %v7250_v15 = vmax.f32 %v7248_v53, %v7249_v49 }
 0x534   :  { %v7208_v28 = vrot.slane %v14908_v57, 2  ;;  %v7244_v47 = vrot.slane %v7243_v12, 2  ;;  %v6126_v60 = vmax.f32 %v5272_v38, 0.0  ;;  %v5837_v22 = vadd.f32 %v14667_v42, %v14867_v26 }
 0x535   :  { %v14985_v35 = vpop.f32.mrb[114].mxu0  ;;  %v7238_v36 = vmax.f32 %v7236_v62, %v7237_v41  ;;  %v6748_v30 = vmax.f32 %v6746_v51, %v6747_v9  ;;  %v7251_v18 = vrot.slane %v7250_v15, 4  ;;  %v6754_v44 = vsel %vm3906_vm0, %v6127_v52, -inf }
 0x536   :  { %v14988_v11 = vpop.f32.mrb[115].mxu0  ;;  %v14991_v5 = vmax.f32 %v14880_v24, %v7192_v56  ;;  %v6753_v17 = vsel %vm3906_vm0, %v6126_v60, -inf  ;;  %v6239_v54 = vmax.f32 %v5837_v22, 0.0  ;;  %v5832_v61 = vadd.f32 %v14667_v42, %v14870_v25 }
 0x537   :  { %v14997_v26 = vmax.f32 %v14900_v7, %v7201_v19  ;;  %v15000_v37 = vsel %vm7573_vm2, %v7238_v36, %v7669_v50  ;;  %v6742_v27 = vrot.slane %v6741_v45, 1  ;;  %v7252_v59 = vmax.f32 %v7250_v15, %v7251_v18 }
 0x538   :  { %v6755_v0 = vmax.f32 %v6753_v17, %v6754_v44  ;;  %v7258_v1 = vsel %vm3906_vm0, %v6239_v54, -inf  ;;  %v6238_v13 = vmax.f32 %v5832_v61, 0.0  ;;  %v5287_v24 = vadd.f32 %v14667_v42, %v14887_v20 }
 0x539   :  { %v15006_v51 = vmax.f32 %v14908_v57, %v7208_v28  ;;  %v7245_v63 = vmax.f32 %v7243_v12, %v7244_v47  ;;  %v6749_v25 = vrot.slane %v6748_v30, 2  ;;  %v5282_v7 = vadd.f32 %v14667_v42, %v14892_v29 }
 0x53a   :  { %v6756_v49 = vrot.slane %v6755_v0, 4  ;;  %v7257_v50 = vsel %vm3906_vm0, %v6238_v13, -inf  ;;  %v6129_v48 = vmax.f32 %v5287_v24, 0.0  ;;  %v5847_v46 = vadd.f32 %v14667_v42, %v14906_v8 }
 0x53b   :  { %v15013_v62 = vpop.f32.mrb[90].mxu1  ;;  %v15015_v9 = vmax.f32 %v6741_v45, %v6742_v27  ;;  %v7253_v20 = vrot.slane %v7252_v59, 2  ;;  %v7259_v56 = vmax.f32 %v7257_v50, %v7258_v1  ;;  %v6128_v57 = vmax.f32 %v5282_v7, 0.0 }
 0x53c   :  { %v15017_v53 = vpop.f32.mrb[91].mxu1  ;;  %v6757_v12 = vmax.f32 %v6755_v0, %v6756_v49  ;;  %v6763_v52 = vsel %vm3906_vm0, %v6129_v48, -inf  ;;  %v6241_v29 = vmax.f32 %v5847_v46, 0.0  ;;  %v5842_v38 = vadd.f32 %v14667_v42, %v14910_v32 }
 0x53d   :  { %v6750_v19 = vmax.f32 %v6748_v30, %v6749_v25  ;;  %v7260_v41 = vrot.slane %v7259_v56, 4  ;;  %v6762_v8 = vsel %vm3906_vm0, %v6128_v57, -inf  ;;  %v5297_v45 = vadd.f32 %v14667_v42, %v14922_v21 }
 0x53e   :  { %v6758_v15 = vrot.slane %v6757_v12, 2  ;;  %v6764_v28 = vmax.f32 %v6762_v8, %v6763_v52  ;;  %v7267_v47 = vsel %vm3906_vm0, %v6241_v29, -inf  ;;  %v6240_v60 = vmax.f32 %v5842_v38, 0.0  ;;  %v15026_v22 = vpop.f32.mrb[116].mxu0 }
 0x53f   :  { %v7246_v36 = vrot.slane %v7245_v63, 1  ;;  %v7261_v18 = vmax.f32 %v7259_v56, %v7260_v41  ;;  %v6131_v44 = vmax.f32 %v5297_v45, 0.0  ;;  %v5292_v32 = vadd.f32 %v14667_v42, %v14925_v31  ;;  %v15030_v30 = vpop.f32.mrb[117].mxu0 }
 0x540   :  { %v7254_v17 = vmax.f32 %v7252_v59, %v7253_v20  ;;  %v6765_v54 = vrot.slane %v6764_v28, 4  ;;  %v7266_v61 = vsel %vm3906_vm0, %v6240_v60, -inf  ;;  %v5857_v21 = vadd.f32 %v14667_v42, %v14940_v39 }
 0x541   :  { %v6751_v27 = vrot.slane %v6750_v19, 1  ;;  %v7268_v0 = vmax.f32 %v7266_v61, %v7267_v47  ;;  %v6772_v1 = vsel %vm3906_vm0, %v6131_v44, -inf  ;;  %v6130_v13 = vmax.f32 %v5292_v32, 0.0 }
 0x542   :  { %v6759_v24 = vmax.f32 %v6757_v12, %v6758_v15  ;;  %v6766_v25 = vmax.f32 %v6764_v28, %v6765_v54  ;;  %v6243_v7 = vmax.f32 %v5857_v21, 0.0  ;;  %v5852_v31 = vadd.f32 %v14667_v42, %v14942_v34 }
 0x543   :  { %v7262_v49 = vrot.slane %v7261_v18, 2  ;;  %v7269_v50 = vrot.slane %v7268_v0, 4  ;;  %v6771_v59 = vsel %vm3906_vm0, %v6130_v13, -inf  ;;  %v5307_v48 = vadd.f32 %v14667_v42, %v14950_v23 }
 0x544   :  { %v15041_v46 = vmax.f32 %v7245_v63, %v7246_v36  ;;  %v7255_v39 = vrot.slane %v7254_v17, 1  ;;  %v6767_v20 = vrot.slane %v6766_v25, 2  ;;  %v6773_v56 = vmax.f32 %v6771_v59, %v6772_v1  ;;  %v15043_v57 = vpop.f32.mrb[92].mxu1 }
 0x545   :  { %v7270_v12 = vmax.f32 %v7268_v0, %v7269_v50  ;;  %v7276_v52 = vsel %vm3906_vm0, %v6243_v7, -inf  ;;  %v6242_v29 = vmax.f32 %v5852_v31, 0.0  ;;  %v6133_v38 = vmax.f32 %v5307_v48, 0.0  ;;  %v15046_v34 = vpop.f32.mrb[93].mxu1 }
 0x546   :  { %v6768_v41 = vmax.f32 %v6766_v25, %v6767_v20  ;;  %v6774_v8 = vrot.slane %v6773_v56, 4  ;;  %v5302_v45 = vadd.f32 %v14667_v42, %v14953_v3  ;;  %v5867_v23 = vadd.f32 %v14667_v42, %v14967_v14 }
 0x547   :  { %v6752_v63 = vmax.f32 %v6750_v19, %v6751_v27  ;;  %v6760_v15 = vrot.slane %v6759_v24, 1  ;;  %v15052_v28 = vmax.f32 %v7261_v18, %v7262_v49  ;;  %v7275_v47 = vsel %vm3906_vm0, %v6242_v29, -inf }
 0x548   :  { %v6775_v60 = vmax.f32 %v6773_v56, %v6774_v8  ;;  %v15055_v36 = vmax.f32 %v7275_v47, %v7276_v52  ;;  %v6781_v44 = vsel %vm3906_vm0, %v6133_v38, -inf  ;;  %v6132_v32 = vmax.f32 %v5302_v45, 0.0 }
 0x549   :  { %v7271_v54 = vrot.slane %v7270_v12, 2  ;;  %v6245_v61 = vmax.f32 %v5867_v23, 0.0  ;;  %v5862_v3 = vadd.f32 %v14667_v42, %v14972_v33  ;;  %v5317_v14 = vadd.f32 %v14667_v42, %v14985_v35  ;;  %v15062_v19 = vpop.f32.mrb[118].mxu0 }
 0x54a   :  { %v15064_v18 = vmax.f32 %v7254_v17, %v7255_v39  ;;  %v6769_v21 = vrot.slane %v6768_v41, 1  ;;  %v6776_v27 = vrot.slane %v6775_v60, 2  ;;  %v6780_v0 = vsel %vm3906_vm0, %v6132_v32, -inf  ;;  %v15067_v1 = vpop.f32.mrb[119].mxu0 }
 0x54b   :  { %v6761_v13 = vmax.f32 %v6759_v24, %v6760_v15  ;;  %v6782_v25 = vmax.f32 %v6780_v0, %v6781_v44  ;;  %v7285_v7 = vsel %vm3906_vm0, %v6245_v61, -inf  ;;  %v6244_v31 = vmax.f32 %v5862_v3, 0.0 }
 0x54c   :  { %v7264_v33 = vrot.slane %v15052_v28, 1  ;;  %v6777_v49 = vmax.f32 %v6775_v60, %v6776_v27  ;;  %v6135_v50 = vmax.f32 %v5317_v14, 0.0  ;;  %v5312_v35 = vadd.f32 %v14667_v42, %v14988_v11 }
 0x54d   :  { %v15073_v17 = vmax.f32 %v7270_v12, %v7271_v54  ;;  %v6783_v59 = vrot.slane %v6782_v25, 4  ;;  %v7284_v48 = vsel %vm3906_vm0, %v6244_v31, -inf  ;;  %v5877_v39 = vadd.f32 %v14667_v42, %v15013_v62 }
 0x54e   :  { %v6770_v24 = vmax.f32 %v6768_v41, %v6769_v21  ;;  %v7286_v20 = vmax.f32 %v7284_v48, %v7285_v7  ;;  %v6790_v56 = vsel %vm3906_vm0, %v6135_v50, -inf  ;;  %v6134_v52 = vmax.f32 %v5312_v35, 0.0 }
 0x54f   :  { %v15079_v29 = vpop.f32.mrb[94].mxu1  ;;  %v6784_v38 = vmax.f32 %v6782_v25, %v6783_v59  ;;  %v6247_v8 = vmax.f32 %v5877_v39, 0.0  ;;  %v5872_v11 = vadd.f32 %v14667_v42, %v15017_v53  ;;  %v6778_v12 = vrot.slane %v6777_v49, 1 }
 0x550   :  { %v5891_v45 = vpop.f32.mrb[95].mxu1  ;;  %v7278_v23 = vrot.slane %v15055_v36, 4  ;;  %v7287_v15 = vrot.slane %v7286_v20, 4  ;;  %v6789_v47 = vsel %vm3906_vm0, %v6134_v52, -inf  ;;  %v7622_v62 = vsel %vm7575_vm3, %v15015_v9, %v14975_v58 }
 0x551   :  { %v6785_v41 = vrot.slane %v6784_v38, 2  ;;  %v6791_v60 = vmax.f32 %v6789_v47, %v6790_v56  ;;  %v7294_v44 = vsel %vm3906_vm0, %v6247_v8, -inf  ;;  %v6246_v32 = vmax.f32 %v5872_v11, 0.0 }
 0x552   :  { %v7288_v54 = vmax.f32 %v7286_v20, %v7287_v15  ;;  %v6779_v61 = vmax.f32 %v6777_v49, %v6778_v12  ;;  %v7623_v53 = vsel %vm7577_vm4, %v6752_v63, %v7622_v62  ;;  %v5327_v3 = vadd.f32 %v14667_v42, %v15026_v22  ;;  %v8771_v14 = vpop.f32.mrb[120].mxu0  ;;  %v15099_v42 = vld [vmem:[%s15426_s4] ss:$0 sm:$0xff] }
 0x553   :  { %v6786_v21 = vmax.f32 %v6784_v38, %v6785_v41  ;;  %v6792_v27 = vrot.slane %v6791_v60, 4  ;;  %v7293_v0 = vsel %vm3906_vm0, %v6246_v32, -inf  ;;  %v7624_v25 = vsel %vm7579_vm5, %v6761_v13, %v7623_v53  ;;  %v5341_v58 = vpop.f32.mrb[121].mxu0 }
 0x554   :  { %v7289_v9 = vrot.slane %v7288_v54, 2  ;;  %v7295_v7 = vmax.f32 %v7293_v0, %v7294_v44  ;;  %v7625_v31 = vsel %vm7581_vm6, %v6770_v24, %v7624_v25  ;;  %v6137_v50 = vmax.f32 %v5327_v3, 0.0 }
 0x555   :  { %v6787_v35 = vrot.slane %v6786_v21, 1  ;;  %v6793_v49 = vmax.f32 %v6791_v60, %v6792_v27  ;;  %v7626_v63 = vsel %vm7583_vm7, %v6779_v61, %v7625_v31  ;;  %v5322_v22 = vadd.f32 %v15099_v42, %v15030_v30 }
 0x556   :  { %v7290_v59 = vmax.f32 %v7288_v54, %v7289_v9  ;;  %v7296_v13 = vrot.slane %v7295_v7, 4  ;;  %8998 = vmatprep.mubr.msk.f32.mxu1 %vm3906_vm0, %v7626_v63  ;;  %v6799_v48 = vsel %vm3906_vm0, %v6137_v50, -inf  ;;  %v5887_v39 = vadd.f32 %v15099_v42, %v15043_v57 }
 0x557   :  { %v6788_v24 = vmax.f32 %v6786_v21, %v6787_v35  ;;  %v6794_v20 = vrot.slane %v6793_v49, 2  ;;  %v6136_v56 = vmax.f32 %v5322_v22, 0.0  ;;  %v5882_v52 = vadd.f32 %v15099_v42, %v15046_v34 }
 0x558   :  { %v7291_v38 = vrot.slane %v7290_v59, 1  ;;  %v7297_v8 = vmax.f32 %v7295_v7, %v7296_v13  ;;  %v6249_v11 = vmax.f32 %v5887_v39, 0.0  ;;  %v5337_v30 = vadd.f32 %v15099_v42, %v15062_v19 }
 0x559   :  { %v6795_v12 = vmax.f32 %v6793_v49, %v6794_v20  ;;  %v6798_v15 = vsel %vm3906_vm0, %v6136_v56, -inf  ;;  %v6248_v47 = vmax.f32 %v5882_v52, 0.0  ;;  %v5332_v62 = vadd.f32 %v15099_v42, %v15067_v1 }
 0x55a   :  { %v8939_v57 = vpop.f32.mrb[96].mxu1  ;;  %v7292_v41 = vmax.f32 %v7290_v59, %v7291_v38  ;;  %v7298_v60 = vrot.slane %v7297_v8, 2  ;;  %v6800_v44 = vmax.f32 %v6798_v15, %v6799_v48  ;;  %v7303_v32 = vsel %vm3906_vm0, %v6249_v11, -inf }
 0x55b   :  { %v5901_v34 = vpop.f32.mrb[97].mxu1  ;;  %v6796_v54 = vrot.slane %v6795_v12, 1  ;;  %v7302_v61 = vsel %vm3906_vm0, %v6248_v47, -inf  ;;  %v6139_v53 = vmax.f32 %v5337_v30, 0.0  ;;  %v6138_v3 = vmax.f32 %v5332_v62, 0.0 }
 0x55c   :  { %v7299_v19 = vmax.f32 %v7297_v8, %v7298_v60  ;;  %v6801_v21 = vrot.slane %v6800_v44, 4  ;;  %v7304_v27 = vmax.f32 %v7302_v61, %v7303_v32  ;;  %v5897_v0 = vadd.f32 %v15099_v42, %v15079_v29 }
 0x55d   :  { %v6797_v25 = vmax.f32 %v6795_v12, %v6796_v54  ;;  %v6808_v1 = vsel %vm3906_vm0, %v6139_v53, -inf  ;;  %v6807_v9 = vsel %vm3906_vm0, %v6138_v3, -inf  ;;  %v5892_v7 = vadd.f32 %v15099_v42, %v5891_v45 }
 0x55e   :  { %v7300_v31 = vrot.slane %v7299_v19, 1  ;;  %v6802_v50 = vmax.f32 %v6800_v44, %v6801_v21  ;;  %v7305_v35 = vrot.slane %v7304_v27, 4  ;;  %v6809_v49 = vmax.f32 %v6807_v9, %v6808_v1 }
 0x55f   :  { %v8774_v63 = vpop.f32.mrb[122].mxu0  ;;  %v7627_v22 = vsel %vm7571_vm1, %v6797_v25, %v6788_v24  ;;  %v6251_v59 = vmax.f32 %v5897_v0, 0.0  ;;  %v6250_v13 = vmax.f32 %v5892_v7, 0.0  ;;  %v5347_v48 = vadd.f32 %v15099_v42, %v8771_v14 }
 0x560   :  { %v5351_v39 = vpop.f32.mrb[123].mxu0  ;;  %v7301_v29 = vmax.f32 %v7299_v19, %v7300_v31  ;;  %v6803_v20 = vrot.slane %v6802_v50, 2  ;;  %v7306_v56 = vmax.f32 %v7304_v27, %v7305_v35  ;;  %v6810_v52 = vrot.slane %v6809_v49, 4 }
 0x561   :  { %v7312_v38 = vsel %vm3906_vm0, %v6251_v59, -inf  ;;  %v7311_v45 = vsel %vm3906_vm0, %v6250_v13, -inf  ;;  %v6141_v8 = vmax.f32 %v5347_v48, 0.0  ;;  %v5342_v11 = vadd.f32 %v15099_v42, %v5341_v58 }
 0x562   :  { %v7676_v30 = vsel %vm7571_vm1, %v7301_v29, %v7292_v41  ;;  %v6804_v12 = vmax.f32 %v6802_v50, %v6803_v20  ;;  %v7307_v24 = vrot.slane %v7306_v56, 2  ;;  %v6811_v15 = vmax.f32 %v6809_v49, %v6810_v52 }
 0x563   :  { %v7313_v47 = vmax.f32 %v7311_v45, %v7312_v38  ;;  %v6817_v14 = vsel %vm3906_vm0, %v6141_v8, -inf  ;;  %v6140_v62 = vmax.f32 %v5342_v11, 0.0  ;;  %v5907_v60 = vadd.f32 %v15099_v42, %v8939_v57 }
 0x564   :  { %v6805_v44 = vrot.slane %v6804_v12, 1  ;;  %v7308_v32 = vmax.f32 %v7306_v56, %v7307_v24  ;;  %v6812_v54 = vrot.slane %v6811_v15, 2  ;;  %v5902_v61 = vadd.f32 %v15099_v42, %v5901_v34  ;;  %v8942_v53 = vpop.f32.mrb[98].mxu1 }
 0x565   :  { %v7314_v3 = vrot.slane %v7313_v47, 4  ;;  %v6816_v58 = vsel %vm3906_vm0, %v6140_v62, -inf  ;;  %v6253_v19 = vmax.f32 %v5907_v60, 0.0  ;;  %v5357_v41 = vadd.f32 %v15099_v42, %v8774_v63  ;;  %v5911_v21 = vpop.f32.mrb[99].mxu1 }
 0x566   :  { %v6806_v27 = vmax.f32 %v6804_v12, %v6805_v44  ;;  %v7309_v0 = vrot.slane %v7308_v32, 1  ;;  %v6813_v25 = vmax.f32 %v6811_v15, %v6812_v54  ;;  %v6818_v1 = vmax.f32 %v6816_v58, %v6817_v14 }
 0x567   :  { %v15135_v57 = vmax.f32 %v15052_v28, %v7264_v33  ;;  %v7321_v9 = vsel %vm3906_vm0, %v6253_v19, -inf  ;;  %v6252_v34 = vmax.f32 %v5902_v61, 0.0  ;;  %v6143_v7 = vmax.f32 %v5357_v41, 0.0 }
 0x568   :  { %v7273_v31 = vrot.slane %v15073_v17, 1  ;;  %v7628_v50 = vsel %vm7573_vm2, %v6806_v27, %v7627_v22  ;;  %v7310_v35 = vmax.f32 %v7308_v32, %v7309_v0  ;;  %v6819_v49 = vrot.slane %v6818_v1, 4 }
 0x569   :  { %v8777_v63 = vpop.f32.mrb[124].mxu0  ;;  %v15143_v59 = vmax.f32 %v15055_v36, %v7278_v23  ;;  %v7315_v13 = vmax.f32 %v7313_v47, %v7314_v3  ;;  %v7320_v28 = vsel %vm3906_vm0, %v6252_v34, -inf  ;;  %v5352_v33 = vadd.f32 %v15099_v42, %v5351_v39 }
 0x56a   :  { %v5361_v48 = vpop.f32.mrb[125].mxu0  ;;  %v15148_v29 = vsel %vm7573_vm2, %v7310_v35, %v7676_v30  ;;  %v6814_v20 = vrot.slane %v6813_v25, 1  ;;  %v6820_v56 = vmax.f32 %v6818_v1, %v6819_v49  ;;  %v7322_v22 = vmax.f32 %v7320_v28, %v7321_v9 }
 0x56b   :  { %v6826_v52 = vsel %vm3906_vm0, %v6143_v7, -inf  ;;  %v6142_v38 = vmax.f32 %v5352_v33, 0.0  ;;  %v5917_v45 = vadd.f32 %v15099_v42, %v8942_v53  ;;  %v5912_v36 = vadd.f32 %v15099_v42, %v5911_v21 }
 0x56c   :  { %v6821_v23 = vrot.slane %v6820_v56, 2  ;;  %v7323_v8 = vrot.slane %v7322_v22, 4  ;;  %v5367_v11 = vadd.f32 %v15099_v42, %v8777_v63  ;;  %v5362_v39 = vadd.f32 %v15099_v42, %v5361_v48 }
 0x56d   :  { %v7316_v12 = vrot.slane %v7315_v13, 2  ;;  %v6825_v30 = vsel %vm3906_vm0, %v6142_v38, -inf  ;;  %v6255_v24 = vmax.f32 %v5917_v45, 0.0  ;;  %v6254_v15 = vmax.f32 %v5912_v36, 0.0 }
 0x56e   :  { %v6822_v47 = vmax.f32 %v6820_v56, %v6821_v23  ;;  %v7324_v14 = vmax.f32 %v7322_v22, %v7323_v8  ;;  %v6827_v62 = vmax.f32 %v6825_v30, %v6826_v52  ;;  %v6145_v60 = vmax.f32 %v5367_v11, 0.0  ;;  %v8945_v44 = vpop.f32.mrb[100].mxu1 }
 0x56f   :  { %v6815_v32 = vmax.f32 %v6813_v25, %v6814_v20  ;;  %v7330_v54 = vsel %vm3906_vm0, %v6255_v24, -inf  ;;  %v7329_v61 = vsel %vm3906_vm0, %v6254_v15, -inf  ;;  %v6144_v53 = vmax.f32 %v5362_v39, 0.0  ;;  %v5921_v3 = vpop.f32.mrb[101].mxu1 }
 0x570   :  { %v6823_v58 = vrot.slane %v6822_v47, 1  ;;  %v7325_v19 = vrot.slane %v7324_v14, 2  ;;  %v6828_v41 = vrot.slane %v6827_v62, 4  ;;  %v7331_v21 = vmax.f32 %v7329_v61, %v7330_v54  ;;  %v16152_v61 = vld [vmem:[#allocation146_spill] sm:$0xff] }
 0x571   :  { %v6835_v27 = vsel %vm3906_vm0, %v6145_v60, -inf  ;;  %v6834_v0 = vsel %vm3906_vm0, %v6144_v53, -inf  ;;  %v5927_v1 = vadd.f32 %v15099_v42, %v8945_v44  ;;  %v5922_v9 = vadd.f32 %v15099_v42, %v5921_v3 }
 0x572   :  { %v7317_v34 = vmax.f32 %v7315_v13, %v7316_v12  ;;  %v6824_v25 = vmax.f32 %v6822_v47, %v6823_v58  ;;  %v7326_v7 = vmax.f32 %v7324_v14, %v7325_v19  ;;  %v6829_v35 = vmax.f32 %v6827_v62, %v6828_v41 }
 0x573   :  { %v6836_v49 = vmax.f32 %v6834_v0, %v6835_v27  ;;  %v6257_v63 = vmax.f32 %v5927_v1, 0.0  ;;  %v6256_v28 = vmax.f32 %v5922_v9, 0.0  ;;  %v8780_v33 = vpop.f32.mrb[126].mxu0  ;;  %v7629_v48 = vsel %vm7575_vm3, %v6815_v32, %v7628_v50 }
 0x574   :  { %v7280_v20 = vrot.slane %v15143_v59, 2  ;;  %v6830_v56 = vrot.slane %v6829_v35, 2  ;;  %v7332_v22 = vrot.slane %v7331_v21, 4  ;;  %v5377_v52 = vadd.f32 %v15099_v42, %v8780_v33  ;;  %v5371_v38 = vpop.f32.mrb[127].mxu0  ;;  %v16153_v33 = vld [vmem:[#allocation138_spill] sm:$0xff] }
 0x575   :  { %v6837_v45 = vrot.slane %v6836_v49, 4  ;;  %v7339_v36 = vsel %vm3906_vm0, %v6257_v63, -inf  ;;  %v7338_v13 = vsel %vm3906_vm0, %v6256_v28, -inf  ;;  %v5372_v23 = vadd.f32 %v15099_v42, %v5371_v38 }
 0x576   :  { %v7318_v8 = vrot.slane %v7317_v34, 1  ;;  %v7327_v11 = vrot.slane %v7326_v7, 1  ;;  %v6831_v39 = vmax.f32 %v6829_v35, %v6830_v56  ;;  %v7340_v12 = vmax.f32 %v7338_v13, %v7339_v36 }
 0x577   :  { %v6838_v30 = vmax.f32 %v6836_v49, %v6837_v45  ;;  %v6147_v50 = vmax.f32 %v5377_v52, 0.0  ;;  %v6146_v24 = vmax.f32 %v5372_v23, 0.0  ;;  %v7630_v15 = vsel %vm7577_vm4, %v6824_v25, %v7629_v48  ;;  %v16154_v48 = vld [vmem:[#allocation141_spill] sm:$0xff]  ;;  %v16155_v52 = vld [vmem:[#allocation142_spill] sm:$0xff] }
 0x578   :  { %v15172_v47 = vmax.f32 %v15073_v17, %v7273_v31  ;;  %v6832_v14 = vrot.slane %v6831_v39, 1  ;;  %v7333_v62 = vmax.f32 %v7331_v21, %v7332_v22  ;;  %v7341_v60 = vrot.slane %v7340_v12, 4 }
 0x579   :  { %v6839_v44 = vrot.slane %v6838_v30, 2  ;;  %v6844_v32 = vsel %vm3906_vm0, %v6147_v50, -inf  ;;  %v6843_v54 = vsel %vm3906_vm0, %v6146_v24, -inf  ;;  %v6994_v53 = vrot.slane %v16152_v61, 1  ;;  %v7915_v24 = vld [vmem:[%s15429_s7] sm:$0xff] }
 0x57a   :  { %v15178_v3 = vmax.f32 %v15143_v59, %v7280_v20  ;;  %v6833_v58 = vmax.f32 %v6831_v39, %v6832_v14  ;;  %v7342_v19 = vmax.f32 %v7340_v12, %v7341_v60  ;;  %v6845_v41 = vmax.f32 %v6843_v54, %v6844_v32  ;;  %v8948_v27 = vpop.f32.mrb[102].mxu1  ;;  %7925 = vperm.xlu0 %9060, %v7915_v24  }
 0x57b   :  { %v15180_v0 = vmax.f32 %v7317_v34, %v7318_v8  ;;  %v15182_v17 = vmax.f32 %v7326_v7, %v7327_v11  ;;  %v6840_v31 = vmax.f32 %v6838_v30, %v6839_v44  ;;  %v5937_v21 = vadd.f32 %v15099_v42, %v8948_v27  ;;  %v5931_v1 = vpop.f32.mrb[103].mxu1  ;;  %v16156_v8 = vld [vmem:[#allocation143_spill] sm:$0xff]  ;;  %v16157_v44 = vld [vmem:[#allocation145_spill] sm:$0xff] }
 0x57c   :  { %v7334_v9 = vrot.slane %v7333_v62, 2  ;;  %v6846_v25 = vrot.slane %v6845_v41, 4  ;;  %v5932_v35 = vadd.f32 %v15099_v42, %v5931_v1  ;;  %v6995_v49 = vmax.f32 %v16152_v61, %v6994_v53  ;;  %v16159_v1 = vld [vmem:[#allocation147_spill] sm:$0xff] }
 0x57d   :  { %v6841_v59 = vrot.slane %v6840_v31, 1  ;;  %v6259_v63 = vmax.f32 %v5937_v21, 0.0  ;;  %v7631_v28 = vsel %vm7579_vm5, %v6833_v58, %v7630_v15  ;;  %v7643_v34 = vsel %vm7575_vm3, %v16154_v48, %v16153_v33  ;;  %v7916_v58 = vld [vmem:[%s15429_s7 + $0x8] sm:$0xff]  ;;  %v16158_v21 = vld [vmem:[#allocation144_spill] sm:$0xff]  ;;  %v16160_v33 = vld [vmem:[#allocation149_spill] sm:$0xff] }
 0x57e   :  { %v7343_v7 = vrot.slane %v7342_v19, 2  ;;  %v6847_v20 = vmax.f32 %v6845_v41, %v6846_v25  ;;  %v6258_v56 = vmax.f32 %v5932_v35, 0.0  ;;  %v7644_v38 = vsel %vm7577_vm4, %v16155_v52, %v7643_v34  ;;  %7930 = vperm.xlu0 %9060, %v7916_v58   ;;  %v16162_v52 = vld [vmem:[#allocation148_spill] sm:$0xff] }
 0x57f   :  { %v8783_v22 = vpop.f32.mrb[128].mxu0  ;;  %v6842_v45 = vmax.f32 %v6840_v31, %v6841_v59  ;;  %v7348_v36 = vsel %vm3906_vm0, %v6259_v63, -inf  ;;  %v7645_v11 = vsel %vm7579_vm5, %v16156_v8, %v7644_v38  ;;  %v15197_v39 = vmax.f32 %v7333_v62, %v7334_v9  ;;  %v16163_v38 = vld [vmem:[#allocation151_spill] sm:$0xff] }
 0x580   :  { %v5387_v13 = vadd.f32 %v15099_v42, %v8783_v22  ;;  %v5381_v23 = vpop.f32.mrb[129].mxu0  ;;  %v6848_v12 = vrot.slane %v6847_v20, 2  ;;  %v7347_v30 = vsel %vm3906_vm0, %v6258_v56, -inf  ;;  %v7646_v32 = vsel %vm7581_vm6, %v16157_v44, %v7645_v11  ;;  %v16161_v56 = vld [vmem:[#allocation150_spill] sm:$0xff]  ;;  %v16164_v44 = vld [vmem:[#allocation152_spill] sm:$0xff] }
 0x581   :  { %v5382_v50 = vadd.f32 %v15099_v42, %v5381_v23  ;;  %v7349_v15 = vmax.f32 %v7347_v30, %v7348_v36  ;;  %v7632_v60 = vsel %vm7581_vm6, %v6842_v45, %v7631_v28  ;;  %v15207_v54 = vmax.f32 %v7342_v19, %v7343_v7  ;;  %v7917_v45 = vld [vmem:[%s15429_s7 + $0x10] sm:$0xff] }
 0x582   :  { %v6149_v14 = vmax.f32 %v5387_v13, 0.0  ;;  %v6849_v62 = vmax.f32 %v6847_v20, %v6848_v12  ;;  %v15210_v53 = vsel %vm7583_vm7, %v6995_v49, %v7646_v32  ;;  %v7066_v31 = vrot.slane %v14458_v6, 1  ;;  %7935 = vperm.xlu0 %9060, %v7917_v45  }
 0x583   :  { %v6148_v61 = vmax.f32 %v5382_v50, 0.0  ;;  %v7350_v41 = vrot.slane %v7349_v15, 4  ;;  %v7650_v9 = vsel %vm7575_vm3, %v16159_v1, %v16158_v21  ;;  %v7138_v49 = vrot.slane %v14800_v16, 1 }
 0x584   :  { %v6853_v27 = vsel %vm3906_vm0, %v6149_v14, -inf  ;;  %v6850_v25 = vrot.slane %v6849_v62, 1  ;;  %v7651_v35 = vsel %vm7577_vm4, %v14436_v40, %v7650_v9  ;;  %v7067_v28 = vmax.f32 %v14458_v6, %v7066_v31 }
 0x585   :  { %v6852_v19 = vsel %vm3906_vm0, %v6148_v61, -inf  ;;  %v7351_v59 = vmax.f32 %v7349_v15, %v7350_v41  ;;  %v7652_v48 = vsel %vm7579_vm5, %v16160_v33, %v7651_v35  ;;  %v7336_v34 = vrot.slane %v15197_v39, 1  ;;  %v7918_v61 = vld [vmem:[%s15429_s7 + $0x18] sm:$0xff] }
 0x586   :  { %v6854_v63 = vmax.f32 %v6852_v19, %v6853_v27  ;;  %v8951_v7 = vpop.f32.mrb[104].mxu1  ;;  %v6851_v20 = vmax.f32 %v6849_v62, %v6850_v25  ;;  %v7653_v22 = vsel %vm7581_vm6, %v16161_v56, %v7652_v48  ;;  %v7657_v40 = vsel %vm7575_vm3, %v16163_v38, %v16162_v52  ;;  %7940 = vperm.xlu0 %9060, %v7918_v61  }
 0x587   :  { %v7352_v6 = vrot.slane %v7351_v59, 2  ;;  %v5947_v36 = vadd.f32 %v15099_v42, %v8951_v7  ;;  %v5941_v13 = vpop.f32.mrb[105].mxu1  ;;  %v15238_v23 = vsel %vm7583_vm7, %v7067_v28, %v7653_v22  ;;  %v7139_v8 = vmax.f32 %v14800_v16, %v7138_v49 }
 0x588   :  { %v5942_v11 = vadd.f32 %v15099_v42, %v5941_v13  ;;  %v7633_v12 = vsel %vm7583_vm7, %v6851_v20, %v7632_v60  ;;  %v7658_v30 = vsel %vm7577_vm4, %v14542_v4, %v7657_v40  ;;  %v7210_v50 = vrot.slane %v15006_v51, 1 }
 0x589   :  { %v7345_v24 = vrot.slane %v15207_v54, 1  ;;  %v6855_v15 = vrot.slane %v6854_v63, 4  ;;  %v6261_v14 = vmax.f32 %v5947_v36, 0.0  ;;  %8999 = vmatmul.mubr.msk.f32.gmra.mrb[126].mxu1 %vm3906_vm0, %v7633_v12  ;;  %v7659_v32 = vsel %vm7579_vm5, %v16164_v44, %v7658_v30 }
 0x58a   :  { %v6260_v16 = vmax.f32 %v5942_v11, 0.0  ;;  %v7660_v62 = vsel %vm7581_vm6, %v14725_v55, %v7659_v32  ;;  %v7211_v60 = vmax.f32 %v15006_v51, %v7210_v50  ;;  %v7664_v4 = vsel %vm7575_vm3, %v14861_v43, %v14766_v2 }
 0x58b   :  { %v7353_v58 = vmax.f32 %v7351_v59, %v7352_v6  ;;  %v7357_v41 = vsel %vm3906_vm0, %v6261_v14, -inf  ;;  %v15261_v27 = vsel %vm7583_vm7, %v7139_v8, %v7660_v62  ;;  %v7665_v31 = vsel %vm7577_vm4, %v14876_v10, %v7664_v4 }
 0x58c   :  { %v7356_v55 = vsel %vm3906_vm0, %v6260_v16, -inf  ;;  %v7666_v21 = vsel %vm7579_vm5, %v14991_v5, %v7665_v31  ;;  %v7282_v2 = vrot.slane %v15178_v3, 1  ;;  %v7671_v43 = vsel %vm7575_vm3, %v15041_v46, %v15000_v37  ;;  %v7919_v37 = vld [vmem:[%s15429_s7 + $0x20] sm:$0xff] }
 0x58d   :  { %v8786_v51 = vpop.f32.mrb[130].mxu0  ;;  %v6856_v1 = vmax.f32 %v6854_v63, %v6855_v15  ;;  %v7358_v9 = vmax.f32 %v7356_v55, %v7357_v41  ;;  %v7667_v10 = vsel %vm7581_vm6, %v14997_v26, %v7666_v21  ;;  %v7672_v59 = vsel %vm7577_vm4, %v15064_v18, %v7671_v43  ;;  %7945 = vperm.xlu0 %9060, %v7919_v37   ;;  %v16165_v31 = vld [vmem:[#allocation129_spill] sm:$0xff] }
 0x58e   :  { %v5397_v19 = vadd.f32 %v15099_v42, %v8786_v51  ;;  %v5391_v25 = vpop.f32.mrb[131].mxu0  ;;  %v15277_v49 = vsel %vm7583_vm7, %v7211_v60, %v7667_v10  ;;  %v7283_v5 = vmax.f32 %v15178_v3, %v7282_v2  ;;  %v7337_v46 = vmax.f32 %v15197_v39, %v7336_v34  ;;  %v16166_v10 = vld [vmem:[#allocation130_spill] sm:$0xff] }
 0x58f   :  { %v5392_v35 = vadd.f32 %v15099_v42, %v5391_v25  ;;  %v7359_v63 = vrot.slane %v7358_v9, 4  ;;  %v7673_v33 = vsel %vm7579_vm5, %v15135_v57, %v7672_v59  ;;  %v7354_v18 = vrot.slane %v7353_v58, 1 }
 0x590   :  { %v6151_v28 = vmax.f32 %v5397_v19, 0.0  ;;  %v8954_v26 = vpop.f32.mrb[106].mxu1  ;;  %v7674_v3 = vsel %vm7581_vm6, %v15172_v47, %v7673_v33  ;;  %v7346_v56 = vmax.f32 %v15207_v54, %v7345_v24  ;;  %v6857_v34 = vrot.slane %v6856_v1, 2  ;;  %v7920_v47 = vld [vmem:[%s15429_s7 + $0x28] sm:$0xff] }
 0x591   :  { %v6150_v48 = vmax.f32 %v5392_v35, 0.0  ;;  %v5957_v7 = vadd.f32 %v15099_v42, %v8954_v26  ;;  %v5951_v20 = vpop.f32.mrb[107].mxu1  ;;  %v7360_v22 = vmax.f32 %v7358_v9, %v7359_v63  ;;  %v15296_v40 = vsel %vm7583_vm7, %v7283_v5, %v7674_v3  ;;  %7950 = vperm.xlu0 %9060, %v7920_v47   ;;  %v16168_v47 = vld [vmem:[#allocation134_spill] sm:$0xff] }
 0x592   :  { %v6862_v52 = vsel %vm3906_vm0, %v6151_v28, -inf  ;;  %v5952_v39 = vadd.f32 %v15099_v42, %v5951_v20  ;;  %v7355_v54 = vmax.f32 %v7353_v58, %v7354_v18  ;;  %v7678_v36 = vsel %vm7575_vm3, %v15180_v0, %v15148_v29  ;;  %v16167_v20 = vld [vmem:[#allocation131_spill] sm:$0xff] }
 0x593   :  { %v6861_v38 = vsel %vm3906_vm0, %v6150_v48, -inf  ;;  %v6263_v57 = vmax.f32 %v5957_v7, 0.0  ;;  %v7679_v8 = vsel %vm7577_vm4, %v15182_v17, %v7678_v36  ;;  %v7361_v11 = vrot.slane %v7360_v22, 2 }
 0x594   :  { %v6863_v45 = vmax.f32 %v6861_v38, %v6862_v52  ;;  %v6262_v6 = vmax.f32 %v5952_v39, 0.0  ;;  %v7680_v24 = vsel %vm7579_vm5, %v7337_v46, %v7679_v8  ;;  %v6858_v29 = vmax.f32 %v6856_v1, %v6857_v34 }
 0x595   :  { %v7366_v13 = vsel %vm3906_vm0, %v6263_v57, -inf  ;;  %v7681_v32 = vsel %vm7581_vm6, %v7346_v56, %v7680_v24  ;;  %v7362_v4 = vmax.f32 %v7360_v22, %v7361_v11  ;;  %v6891_v55 = vrot.slane %v16165_v31, 4 }
 0x596   :  { %v6864_v12 = vrot.slane %v6863_v45, 4  ;;  %v7365_v30 = vsel %vm3906_vm0, %v6262_v6, -inf  ;;  %v8789_v50 = vpop.f32.mrb[132].mxu0  ;;  %v15313_v17 = vsel %vm7583_vm7, %v7355_v54, %v7681_v32  ;;  %v6859_v1 = vrot.slane %v6858_v29, 1 }
 0x597   :  { %v7367_v15 = vmax.f32 %v7365_v30, %v7366_v13  ;;  %v5407_v14 = vadd.f32 %v15099_v42, %v8789_v50  ;;  %v5401_v44 = vpop.f32.mrb[133].mxu0  ;;  %v6900_v35 = vrot.slane %v16166_v10, 4  ;;  %v7363_v46 = vrot.slane %v7362_v4, 1 }
 0x598   :  { %v6865_v0 = vmax.f32 %v6863_v45, %v6864_v12  ;;  %v5402_v16 = vadd.f32 %v15099_v42, %v5401_v44  ;;  %v6892_v26 = vmax.f32 %v16165_v31, %v6891_v55  ;;  %v6909_v3 = vrot.slane %v16167_v20, 4 }
 0x599   :  { %v7368_v62 = vrot.slane %v7367_v15, 4  ;;  %v6153_v60 = vmax.f32 %v5407_v14, 0.0  ;;  %v6860_v18 = vmax.f32 %v6858_v29, %v6859_v1  ;;  %v6901_v52 = vmax.f32 %v16166_v10, %v6900_v35 }
 0x59a   :  { %v6866_v61 = vrot.slane %v6865_v0, 2  ;;  %v6152_v58 = vmax.f32 %v5402_v16, 0.0  ;;  %v8957_v41 = vpop.f32.mrb[108].mxu1  ;;  %v6918_v45 = vrot.slane %v16168_v47, 4  ;;  %v7364_v6 = vmax.f32 %v7362_v4, %v7363_v46 }
 0x59b   :  { %v7369_v51 = vmax.f32 %v7367_v15, %v7368_v62  ;;  %v6871_v21 = vsel %vm3906_vm0, %v6153_v60, -inf  ;;  %v5967_v2 = vadd.f32 %v15099_v42, %v8957_v41  ;;  %v5961_v43 = vpop.f32.mrb[109].mxu1  ;;  %v6910_v50 = vmax.f32 %v16167_v20, %v6909_v3 }
 0x59c   :  { %v6867_v9 = vmax.f32 %v6865_v0, %v6866_v61  ;;  %v6870_v19 = vsel %vm3906_vm0, %v6152_v58, -inf  ;;  %v5962_v25 = vadd.f32 %v15099_v42, %v5961_v43  ;;  %v6893_v29 = vrot.slane %v6892_v26, 2 }
 0x59d   :  { %v7370_v5 = vrot.slane %v7369_v51, 2  ;;  %v6872_v59 = vmax.f32 %v6870_v19, %v6871_v21  ;;  %v6265_v37 = vmax.f32 %v5967_v2, 0.0  ;;  %v6902_v0 = vrot.slane %v6901_v52, 2 }
 0x59e   :  { %v6868_v63 = vrot.slane %v6867_v9, 1  ;;  %v6264_v28 = vmax.f32 %v5962_v25, 0.0  ;;  %v6919_v16 = vmax.f32 %v16168_v47, %v6918_v45  ;;  %v6911_v21 = vrot.slane %v6910_v50, 2 }
 0x59f   :  { %v7371_v33 = vmax.f32 %v7369_v51, %v7370_v5  ;;  %v6873_v48 = vrot.slane %v6872_v59, 4  ;;  %v7375_v7 = vsel %vm3906_vm0, %v6265_v37, -inf  ;;  %v6903_v19 = vmax.f32 %v6901_v52, %v6902_v0 }
 0x5a0   :  { %v6869_v56 = vmax.f32 %v6867_v9, %v6868_v63  ;;  %v7374_v22 = vsel %vm3906_vm0, %v6264_v28, -inf  ;;  %v6894_v9 = vmax.f32 %v6892_v26, %v6893_v29  ;;  %v6920_v35 = vrot.slane %v6919_v16, 2 }
 0x5a1   :  { %v7372_v39 = vrot.slane %v7371_v33, 1  ;;  %v6874_v34 = vmax.f32 %v6872_v59, %v6873_v48  ;;  %v7376_v38 = vmax.f32 %v7374_v22, %v7375_v7  ;;  %v8792_v57 = vpop.f32.mrb[134].mxu0  ;;  %v6912_v7 = vmax.f32 %v6910_v50, %v6911_v21 }
 0x5a2   :  { %v7634_v54 = vsel %vm7571_vm1, %v6869_v56, %v6860_v18  ;;  %v5417_v36 = vadd.f32 %v15099_v42, %v8792_v57  ;;  %v5411_v13 = vpop.f32.mrb[135].mxu0  ;;  %v6895_v18 = vrot.slane %v6894_v9, 1  ;;  %v6904_v56 = vrot.slane %v6903_v19, 1 }
 0x5a3   :  { %v7373_v8 = vmax.f32 %v7371_v33, %v7372_v39  ;;  %v6875_v11 = vrot.slane %v6874_v34, 2  ;;  %v7377_v12 = vrot.slane %v7376_v38, 4  ;;  %v5412_v30 = vadd.f32 %v15099_v42, %v5411_v13 }
 0x5a4   :  { %v6155_v24 = vmax.f32 %v5417_v36, 0.0  ;;  %v6921_v39 = vmax.f32 %v6919_v16, %v6920_v35  ;;  %v6913_v13 = vrot.slane %v6912_v7, 1 }
 0x5a5   :  { %v7683_v15 = vsel %vm7571_vm1, %v7373_v8, %v7364_v6  ;;  %v6876_v14 = vmax.f32 %v6874_v34, %v6875_v11  ;;  %v7378_v44 = vmax.f32 %v7376_v38, %v7377_v12  ;;  %v6154_v32 = vmax.f32 %v5412_v30, 0.0 }
 0x5a6   :  { %v6880_v62 = vsel %vm3906_vm0, %v6155_v24, -inf  ;;  %v8960_v60 = vpop.f32.mrb[110].mxu1  ;;  %v6896_v30 = vmax.f32 %v6894_v9, %v6895_v18  ;;  %v6922_v0 = vrot.slane %v6921_v39, 1 }
 0x5a7   :  { %v6877_v4 = vrot.slane %v6876_v14, 1  ;;  %v7379_v61 = vrot.slane %v7378_v44, 2  ;;  %v6879_v58 = vsel %vm3906_vm0, %v6154_v32, -inf  ;;  %v5977_v41 = vadd.f32 %v15099_v42, %v8960_v60  ;;  %v5971_v31 = vpop.f32.mrb[111].mxu1 }
 0x5a8   :  { %v6881_v55 = vmax.f32 %v6879_v58, %v6880_v62  ;;  %v5972_v51 = vadd.f32 %v15099_v42, %v5971_v31  ;;  %v6914_v58 = vmax.f32 %v6912_v7, %v6913_v13 }
 0x5a9   :  { %v6878_v2 = vmax.f32 %v6876_v14, %v6877_v4  ;;  %v7380_v43 = vmax.f32 %v7378_v44, %v7379_v61  ;;  %v6267_v1 = vmax.f32 %v5977_v41, 0.0 }
 0x5aa   :  { %v6882_v25 = vrot.slane %v6881_v55, 4  ;;  %v6266_v10 = vmax.f32 %v5972_v51, 0.0 }
 0x5ab   :  { %v7635_v5 = vsel %vm7573_vm2, %v6878_v2, %v7634_v54  ;;  %v7381_v59 = vrot.slane %v7380_v43, 1  ;;  %v7384_v37 = vsel %vm3906_vm0, %v6267_v1, -inf  ;;  %v8963_v46 = vpop.f32.mrb[112].mxu1 }
 0x5ac   :  { %v6883_v63 = vmax.f32 %v6881_v55, %v6882_v25  ;;  %v7383_v28 = vsel %vm3906_vm0, %v6266_v10, -inf  ;;  %v5987_v33 = vadd.f32 %v15099_v42, %v8963_v46  ;;  %v5981_v48 = vpop.f32.mrb[113].mxu1 }
 0x5ad   :  { %v7382_v20 = vmax.f32 %v7380_v43, %v7381_v59  ;;  %v7385_v3 = vmax.f32 %v7383_v28, %v7384_v37  ;;  %v5982_v26 = vadd.f32 %v15099_v42, %v5981_v48 }
 0x5ae   :  { %v6884_v22 = vrot.slane %v6883_v63, 2  ;;  %v6269_v52 = vmax.f32 %v5987_v33, 0.0 }
 0x5af   :  { %v7684_v34 = vsel %vm7573_vm2, %v7382_v20, %v7683_v15  ;;  %v7386_v38 = vrot.slane %v7385_v3, 4  ;;  %v6268_v57 = vmax.f32 %v5982_v26, 0.0  ;;  %v8966_v47 = vpop.f32.mrb[114].mxu1  ;;  %v6905_v15 = vmax.f32 %v6903_v19, %v6904_v56 }
 0x5b0   :  { %v6885_v45 = vmax.f32 %v6883_v63, %v6884_v22  ;;  %v7393_v6 = vsel %vm3906_vm0, %v6269_v52, -inf  ;;  %v5997_v54 = vadd.f32 %v15099_v42, %v8966_v47  ;;  %v5991_v36 = vpop.f32.mrb[115].mxu1  ;;  %v6923_v19 = vmax.f32 %v6921_v39, %v6922_v0 }
 0x5b1   :  { %v7387_v8 = vmax.f32 %v7385_v3, %v7386_v38  ;;  %v7392_v11 = vsel %vm3906_vm0, %v6268_v57, -inf  ;;  %v5992_v12 = vadd.f32 %v15099_v42, %v5991_v36 }
 0x5b2   :  { %v6886_v50 = vrot.slane %v6885_v45, 1  ;;  %v7394_v24 = vmax.f32 %v7392_v11, %v7393_v6  ;;  %v6271_v14 = vmax.f32 %v5997_v54, 0.0 }
 0x5b3   :  { %v7388_v44 = vrot.slane %v7387_v8, 2  ;;  %v6270_v32 = vmax.f32 %v5992_v12, 0.0  ;;  %v8969_v29 = vpop.f32.mrb[116].mxu1 }
 0x5b4   :  { %v6887_v16 = vmax.f32 %v6885_v45, %v6886_v50  ;;  %v7395_v62 = vrot.slane %v7394_v24, 4  ;;  %v7402_v60 = vsel %vm3906_vm0, %v6271_v14, -inf  ;;  %v6007_v4 = vadd.f32 %v15099_v42, %v8969_v29  ;;  %v6001_v61 = vpop.f32.mrb[117].mxu1 }
 0x5b5   :  { %v7389_v41 = vmax.f32 %v7387_v8, %v7388_v44  ;;  %v7401_v31 = vsel %vm3906_vm0, %v6270_v32, -inf  ;;  %v6002_v55 = vadd.f32 %v15099_v42, %v6001_v61 }
 0x5b6   :  { %v7396_v51 = vmax.f32 %v7394_v24, %v7395_v62  ;;  %v7403_v21 = vmax.f32 %v7401_v31, %v7402_v60  ;;  %v6273_v2 = vmax.f32 %v6007_v4, 0.0  ;;  %v7636_v43 = vsel %vm7575_vm3, %v6887_v16, %v7635_v5  ;;  %v15381_v24 = vld [vmem:[%s15428_s6] ss:$0 sm:$0xff] }
 0x5b7   :  { %v7390_v1 = vrot.slane %v7389_v41, 1  ;;  %v6272_v9 = vmax.f32 %v6002_v55, 0.0  ;;  %v7637_v25 = vsel %vm7577_vm4, %v6896_v30, %v7636_v43 }
 0x5b8   :  { %v7397_v10 = vrot.slane %v7396_v51, 2  ;;  %v7404_v35 = vrot.slane %v7403_v21, 4  ;;  %v7411_v59 = vsel %vm3906_vm0, %v6273_v2, -inf  ;;  %v7638_v37 = vsel %vm7579_vm5, %v6905_v15, %v7637_v25  ;;  %v7984_v2 = vld [vmem:[#allocation2] sm:$0x1] }
 0x5b9   :  { %v7391_v46 = vmax.f32 %v7389_v41, %v7390_v1  ;;  %v7410_v63 = vsel %vm3906_vm0, %v6272_v9, -inf  ;;  %v7639_v28 = vsel %vm7581_vm6, %v6914_v58, %v7638_v37  ;;  %v8972_v5 = vpop.f32.mrb[118].mxu1 }
 0x5ba   :  { %v7398_v33 = vmax.f32 %v7396_v51, %v7397_v10  ;;  %v7405_v48 = vmax.f32 %v7403_v21, %v7404_v35  ;;  %v7412_v7 = vmax.f32 %v7410_v63, %v7411_v59  ;;  %v7640_v20 = vsel %vm7583_vm7, %v6923_v19, %v7639_v28  ;;  %v6011_v26 = vpop.f32.mrb[119].mxu1  ;;  %v7921_v51 = vld [vmem:[%s15429_s7 + $0x30] sm:$0xff]  ;;  %v7922_v21 = vld [vmem:[%s15429_s7 + $0x38] sm:$0xff]  ;;  %s9353_s7 = smov [#allocation3]  }
 0x5bb   :  { %v6017_v3 = vadd.f32 %v15099_v42, %v8972_v5  ;;  %9001 = vmatprep.mubr.msk.f32.mxu1 %vm3906_vm0, %v7640_v20  ;;  %v7685_v18 = vsel %vm7575_vm3, %v7391_v46, %v7684_v34  ;;  %v6012_v39 = vadd.f32 %v15099_v42, %v6011_v26  ;;  %7955 = vperm.xlu0 %9060, %v7921_v51   ;;  %s8002_s26 = sshll.u32 %s9353_s7, 4  ;;  %s8003_s26 = int_to_ptr.vmem [resolvable:$true] %s8002_s26 }
 0x5bc   :  { %v7399_v56 = vrot.slane %v7398_v33, 1  ;;  %v7406_v22 = vrot.slane %v7405_v48, 2  ;;  %v7413_v52 = vrot.slane %v7412_v7, 4  ;;  %9002 = vmatmul.mubr.msk.f32.gmra.mrb[128].mxu1 %vm3906_vm0, %v15210_v53  ;;  %s9327_s27 = scalar_lea.vmem %s8003_s26, 16  ;;  %s9331_s28 = scalar_lea.vmem %s8003_s26, 32 }
 0x5bd   :  { %v6275_v38 = vmax.f32 %v6017_v3, 0.0  ;;  %9004 = vmatprep.mubr.msk.f32.mxu1 %vm3906_vm0, %v15238_v23  ;;  %v6274_v6 = vmax.f32 %v6012_v39, 0.0  ;;  %p9328_p0 = scmp.ne.s32.totalorder %s8003_s26, %s9327_s27  ;;  %p9332_p1 = scmp.lt.s32.totalorder %s8003_s26, %s8003_s26 }
 0x5be   :  { %v7400_v57 = vmax.f32 %v7398_v33, %v7399_v56  ;;  %v7407_v47 = vmax.f32 %v7405_v48, %v7406_v22  ;;  %v7414_v45 = vmax.f32 %v7412_v7, %v7413_v52  ;;  %p9333_p2 = scmp.lt.s32.totalorder %s9331_s28, %s9327_s27 }
 0x5bf   :  { %v7420_v54 = vsel %vm3906_vm0, %v6275_v38, -inf  ;;  %v7419_v13 = vsel %vm3906_vm0, %v6274_v6, -inf  ;;  %7960 = vperm.xlu0 %9060, %v7922_v21  }
 0x5c0   :  { %v7408_v36 = vrot.slane %v7407_v47, 1  ;;  %v7415_v34 = vrot.slane %v7414_v45, 2  ;;  %9005 = vmatmul.mubr.msk.f32.gmra.mrb[130].mxu1 %vm3906_vm0, %v15261_v27  ;;  %v7686_v42 = vsel %vm7577_vm4, %v7400_v57, %v7685_v18  ;;  %v7421_v53 = vmax.f32 %v7419_v13, %v7420_v54  ;;  %p9334_p3 = por %p9333_p2, %p9332_p1 }
 0x5c1   :  { %9007 = vmatprep.mubr.msk.f32.mxu1 %vm3906_vm0, %v15277_v49 }
 0x5c2   :  { %v7409_v23 = vmax.f32 %v7407_v47, %v7408_v36  ;;  %v7416_v8 = vmax.f32 %v7414_v45, %v7415_v34  ;;  %v7422_v11 = vrot.slane %v7421_v53, 4  ;;  %p9335_p4 = pnand %p9334_p3, %p9328_p0 }
 0x5c3   :  { %7987 = vperm.xlu0 %9060, %v7984_v2  }
 0x5c4   :  { %v7417_v12 = vrot.slane %v7416_v8, 1  ;;  %9008 = vmatmul.mubr.msk.f32.gmra.mrb[132].mxu1 %vm3906_vm0, %v15296_v40  ;;  %v7687_v30 = vsel %vm7579_vm5, %v7409_v23, %v7686_v42  ;;  %v7423_v50 = vmax.f32 %v7421_v53, %v7422_v11 }
 0x5c5   :  { %9010 = vmatprep.mubr.msk.f32.mxu1 %vm3906_vm0, %v15313_v17 }
 0x5c6   :  { %v7418_v27 = vmax.f32 %v7416_v8, %v7417_v12  ;;  %v7424_v49 = vrot.slane %v7423_v50, 2  ;;  %v8991_v14 = vpop.f32.mrb[120].mxu1 }
 0x5c7   :  { %v7788_v15 = vpop.f32.mrb[121].mxu1  ;;  %v7794_v29 = vadd.f32 %v8991_v14, %v15381_v24 }
 0x5c8   :  { %v7688_v44 = vsel %vm7581_vm6, %v7418_v27, %v7687_v30  ;;  %v7425_v32 = vmax.f32 %v7423_v50, %v7424_v49  ;;  %v7789_v40 = vadd.f32 %v15381_v24, %v7788_v15 }
 0x5c9   :  { %v7868_v62 = vmax.f32 %v7794_v29, 0.0 }
 0x5ca   :  { %v7867_v0 = vmax.f32 %v7789_v40, 0.0  ;;  %v7426_v16 = vrot.slane %v7425_v32, 1 }
 0x5cc   :  { %7883 = vxpose.xlu1.b32.start [1/16] (narrow) %v7867_v0, 64  ;;  %v7427_v17 = vmax.f32 %v7425_v32, %v7426_v16 }
 0x5ce   :  { %v7689_v60 = vsel %vm7583_vm7, %v7427_v17, %v7688_v44 }
 0x5cf   :  { %9011 = vmatmul.mubr.msk.f32.gmra.mrb[134].mxu1 %vm3906_vm0, %v7689_v60 }
 0x5d0   :  { %v8994_v4 = vpop.f32.mrb[122].mxu1  ;;  %7884 = vxpose.xlu1.b32.cont [2/16] (narrow) %v7868_v62, 64 }
 0x5d1   :  { %v7798_v61 = vpop.f32.mrb[123].mxu1  ;;  %v7804_v41 = vadd.f32 %v8994_v4, %v15381_v24 }
 0x5d2   :  { %v7799_v58 = vadd.f32 %v15381_v24, %v7798_v61 }
 0x5d3   :  { %v7870_v55 = vmax.f32 %v7804_v41, 0.0 }
 0x5d4   :  { %v7869_v31 = vmax.f32 %v7799_v58, 0.0 }
 0x5d6   :  { %7885 = vxpose.xlu1.b32.cont [3/16] (narrow) %v7869_v31, 64 }
 0x5da   :  { %7886 = vxpose.xlu1.b32.cont [4/16] (narrow) %v7870_v55, 64 }
 0x5f6   :  { %v8997_v43 = vpop.f32.mrb[124].mxu1 }
 0x5f7   :  { %v7808_v1 = vpop.f32.mrb[125].mxu1  ;;  %v7814_v19 = vadd.f32 %v8997_v43, %v15381_v24 }
 0x5f8   :  { %v7809_v9 = vadd.f32 %v15381_v24, %v7808_v1 }
 0x5f9   :  { %v7872_v10 = vmax.f32 %v7814_v19, 0.0  ;;  %v7926_v8 = vpop.permute.xlu0 %7925 }
 0x5fa   :  { %v7871_v25 = vmax.f32 %v7809_v9, 0.0 }
 0x5fc   :  { %7887 = vxpose.xlu1.b32.cont [5/16] (narrow) %v7871_v25, 64 }
 0x5fd   :  { %v7931_v11 = vpop.permute.xlu0 %7930 }
 0x600   :  { %7888 = vxpose.xlu1.b32.cont [6/16] (narrow) %v7872_v10, 64 }
 0x601   :  { %v7936_v12 = vpop.permute.xlu0 %7935 }
 0x605   :  { %v7941_v50 = vpop.permute.xlu0 %7940 }
 0x60c   :  { %v7946_v14 = vpop.permute.xlu0 %7945 }
 0x610   :  { %v7951_v32 = vpop.permute.xlu0 %7950 }
 0x63a   :  { %v7956_v4 = vpop.permute.xlu0 %7955 }
 0x63e   :  { %v7961_v21 = vpop.permute.xlu0 %7960 }
 0x65c   :  { %v9000_v35 = vpop.f32.mrb[126].mxu1 }
 0x65d   :  { %v7818_v59 = vpop.f32.mrb[127].mxu1  ;;  %v7824_v46 = vadd.f32 %v9000_v35, %v15381_v24 }
 0x65e   :  { %v7819_v37 = vadd.f32 %v15381_v24, %v7818_v59  ;;  %v7988_v59 = vpop.permute.xlu0 %7987 }
 0x65f   :  { %v7874_v28 = vmax.f32 %v7824_v46, 0.0  ;;  %v16169_v46 = vld [vmem:[#allocation211_spill] sm:$0xff] }
 0x660   :  { %v7873_v63 = vmax.f32 %v7819_v37, 0.0 }
 0x662   :  { %7889 = vxpose.xlu1.b32.cont [7/16] (narrow) %v7873_v63, 64  ;;  %v16170_v63 = vsub.s32 0, %v16169_v46 }
 0x666   :  { %7890 = vxpose.xlu1.b32.cont [8/16] (narrow) %v7874_v28, 64  ;;  %v7993_v28 = vrot.slane %v7988_v59, %v16170_v63 }
 0x68f   :  { %v9003_v33 = vpop.f32.mrb[128].mxu1 }
 0x690   :  { %v7828_v48 = vpop.f32.mrb[129].mxu1  ;;  %v7834_v5 = vadd.f32 %v9003_v33, %v15381_v24 }
 0x691   :  { %v7829_v7 = vadd.f32 %v15381_v24, %v7828_v48 }
 0x692   :  { %v7876_v18 = vmax.f32 %v7834_v5, 0.0 }
 0x693   :  { %v7875_v20 = vmax.f32 %v7829_v7, 0.0  ;;  %v9006_v3 = vpop.f32.mrb[130].mxu1 }
 0x694   :  { %v7838_v26 = vpop.f32.mrb[131].mxu1  ;;  %v7844_v39 = vadd.f32 %v9006_v3, %v15381_v24 }
 0x695   :  { %7891 = vxpose.xlu1.b32.cont [9/16] (narrow) %v7875_v20, 64  ;;  %v7839_v56 = vadd.f32 %v15381_v24, %v7838_v26 }
 0x696   :  { %v7878_v57 = vmax.f32 %v7844_v39, 0.0 }
 0x697   :  { %v9009_v22 = vpop.f32.mrb[132].mxu1  ;;  %v7877_v38 = vmax.f32 %v7839_v56, 0.0 }
 0x698   :  { %v7848_v52 = vpop.f32.mrb[133].mxu1  ;;  %v7854_v45 = vadd.f32 %v9009_v22, %v15381_v24 }
 0x699   :  { %7892 = vxpose.xlu1.b32.cont [10/16] (narrow) %v7876_v18, 64  ;;  %v7849_v47 = vadd.f32 %v15381_v24, %v7848_v52 }
 0x69a   :  { %v7880_v34 = vmax.f32 %v7854_v45, 0.0 }
 0x69b   :  { %v7879_v6 = vmax.f32 %v7849_v47, 0.0 }
 0x69d   :  { %7893 = vxpose.xlu1.b32.cont [11/16] (narrow) %v7877_v38, 64 }
 0x6a1   :  { %7894 = vxpose.xlu1.b32.cont [12/16] (narrow) %v7878_v57, 64 }
 0x6a2   :  { %v9012_v54 = vpop.f32.mrb[134].mxu1 }
 0x6a3   :  { %v7858_v36 = vpop.f32.mrb[135].mxu1  ;;  %v7864_v42 = vadd.f32 %v9012_v54, %v15381_v24 }
 0x6a4   :  { %v7859_v13 = vadd.f32 %v15381_v24, %v7858_v36 }
 0x6a5   :  { %7895 = vxpose.xlu1.b32.cont [13/16] (narrow) %v7879_v6, 64  ;;  %v7882_v23 = vmax.f32 %v7864_v42, 0.0 }
 0x6a6   :  { %v7881_v53 = vmax.f32 %v7859_v13, 0.0 }
 0x6a9   :  { %7896 = vxpose.xlu1.b32.cont [14/16] (narrow) %v7880_v34, 64 }
 0x6ad   :  { %7897 = vxpose.xlu1.b32.cont [15/16] (narrow) %v7881_v53, 64 }
 0x6b1   :  { %7898 = vxpose.xlu1.b32.end [16/16] (narrow) %v7882_v23, 64 }
 0x6f5   :  { %v7899_v30 = vpop.trf.xlu1 }
 0x6f6   :  { %v7963_v29 = vmul.f32 %v7926_v8, %v7899_v30 }
 0x6f9   :  { %v7900_v27 = vpop.trf.xlu1 }
 0x6fa   :  { %v7964_v44 = vmul.f32 %v7931_v11, %v7900_v27 }
 0x6fc   :  { %v7971_v16 = vadd.f32 %v7964_v44, %v7963_v29 }
 0x6fd   :  { %v7901_v49 = vpop.trf.xlu1 }
 0x6fe   :  { %v7965_v0 = vmul.f32 %v7936_v12, %v7901_v49 }
 0x700   :  { %v7972_v62 = vadd.f32 %v7971_v16, %v7965_v0 }
 0x701   :  { %v7902_v15 = vpop.trf.xlu1 }
 0x702   :  { %v7966_v24 = vmul.f32 %v7941_v50, %v7902_v15 }
 0x704   :  { %v7973_v61 = vadd.f32 %v7972_v62, %v7966_v24 }
 0x705   :  { %v7903_v40 = vpop.trf.xlu1 }
 0x706   :  { %v7967_v60 = vmul.f32 %v7946_v14, %v7903_v40 }
 0x708   :  { %v7974_v31 = vadd.f32 %v7973_v61, %v7967_v60 }
 0x709   :  { %v7904_v17 = vpop.trf.xlu1 }
 0x70a   :  { %v7968_v58 = vmul.f32 %v7951_v32, %v7904_v17 }
 0x70c   :  { %v7975_v51 = vadd.f32 %v7974_v31, %v7968_v58 }
 0x70d   :  { %v7905_v41 = vpop.trf.xlu1 }
 0x70e   :  { %v7969_v55 = vmul.f32 %v7956_v4, %v7905_v41 }
 0x710   :  { %v7976_v43 = vadd.f32 %v7975_v51, %v7969_v55 }
 0x711   :  { %v7906_v2 = vpop.trf.xlu1 }
 0x712   :  { %v7970_v1 = vmul.f32 %v7961_v21, %v7906_v2 }
 0x714   :  { %v7977_v9 = vadd.f32 %v7976_v43, %v7970_v1 }
 0x716   :  { %v7978_v19 = vrot.slane %v7977_v9, 4 }
 0x718   :  { %v7979_v25 = vadd.f32 %v7978_v19, %v7977_v9 }
 0x71a   :  { %v7980_v10 = vrot.slane %v7979_v25, 2 }
 0x71c   :  { %v7981_v35 = vadd.f32 %v7980_v10, %v7979_v25 }
 0x71e   :  { %v7982_v37 = vrot.slane %v7981_v35, 1 }
 0x720   :  { %v7983_v33 = vadd.f32 %v7982_v37, %v7981_v35 }
 0x722   :  { %v7994_v48 = vadd.f32 %v7993_v28, %v7983_v33 }
 0x724   :  { %7995 = vst [vmem:[#allocation3] sm:$0x1] %v7994_v48 }
 0x725   :  { %9338 = shalt.err (!%p9335_p4)
}
 0x726   :  { %s9339_s10 = scalar_lea.hbm %s15431_s9, 16 }
 0x727   :  { %p9340_p5 = scmp.ne.s32.totalorder %s15431_s9, %s9339_s10  ;;  %p9343_p6 = scmp.lt.u32.totalorder %s9339_s10, %s15431_s9 }
 0x729   :  { %p9345_p7 = pnand %p9343_p6, %p9340_p5 }
 0x72b   :  { %9348 = shalt.err (!%p9345_p7)
}
 0x72c   :  { %8005 = dma.vmem_to_hbm [thread:$0]  %s8003_s26, 16, %s15431_s9, [#allocation4]  }
 0x72d   :  { %9349 = dma.done.wait [#allocation4], 16  }
 0x72e   :  { %9350 = vsyncadd [#allocation4], 4294967280 }
 0x72f   :  { %8009 = vsyncpa [#allocation4], 1 }

</bundles_post_ra>
